<compile_context>
chip_gen: v7x
topology: tpu7x:2x2x1
jax: 0.10.0
libtpu: 0.0.40
codegen_flags: <defaults>
</compile_context>

<pallas_src>
import jax
import jax.numpy as jnp
from jax.experimental import pallas as pl
from jax.experimental.pallas import tpu as pltpu

EPS = 1e-5
LANES = 128


# ------------------------------ small helpers ------------------------------ #

def _round_up(x, m):
    return ((x + m - 1) // m) * m


def _pad_last(a, target):
    pad = target - a.shape[-1]
    if pad == 0:
        return a
    cfg = [(0, 0)] * (a.ndim - 1) + [(0, pad)]
    return jnp.pad(a, cfg)


def _vmem_limit_bytes():
    # Generation-aware scoped-VMEM limit: ~75% of physical, capped at 96 MiB
    # (128-MiB v5e/v6e -> 96 MiB, 64-MiB v7x -> 48 MiB). Fallback is safe on all.
    try:
        phys = int(pltpu.get_tpu_info().vmem_capacity_bytes)
    except Exception:
        phys = 64 * 1024 * 1024
    return min(phys * 3 // 4, 96 * 1024 * 1024)


def _pick_tile(m, cap):
    """Largest power-of-two divisor of m that is <= cap (and >= 8), else None."""
    t = cap
    while t >= 8:
        if m % t == 0:
            return t
        t //= 2
    return None


def _weight_to_gemm(w_oihw, cp):
    """torch (Cout, Cin, 3, 3) -> (9*Cp, Cp) bf16: taps K-concatenated, zero-padded."""
    cout, cin, kh, kw = w_oihw.shape
    w = jnp.transpose(w_oihw, (2, 3, 1, 0)).reshape(kh * kw, cin, cout)
    w = jnp.pad(w, ((0, 0), (0, cp - cin), (0, cp - cout)))
    return w.reshape(kh * kw * cp, cp).astype(jnp.bfloat16)


def _fold_bn(sums, ssqs, gamma, beta, count, cp):
    """Per-image partial (sum, sumsq) -> folded per-channel scale/shift, (1, Cp) f32."""
    s = jnp.sum(sums, axis=(0, 1))
    q = jnp.sum(ssqs, axis=(0, 1))
    mean = s / count
    var = q / count - mean * mean            # biased batch variance (train-mode BN)
    g = _pad_last(gamma, cp)
    b = _pad_last(beta, cp)
    scale = g * jax.lax.rsqrt(var + EPS)     # padded channels: gamma==0 -> scale 0
    shift = b - mean * scale
    return scale.reshape(1, cp), shift.reshape(1, cp)


# --------------- pass A/B: (optional BN+ReLU) + conv3x3 + BN stats ----------- #

def _make_conv_kernel(H, W, Cp, fuse_bn_relu):
    HW = H * W

    def kernel(*refs):
        if fuse_bn_relu:
            (x_ref, scale_ref, shift_ref, w_ref,
             z_ref, sum_ref, ssq_ref, xpad_ref, patch_ref) = refs
        else:
            (x_ref, w_ref,
             z_ref, sum_ref, ssq_ref, xpad_ref, patch_ref) = refs

        # 1) in-VMEM halo: zero the padded scratch, write the activation interior.
        #    (Optionally apply the fused BN1 scale/shift + ReLU prologue first.)
        xpad_ref[...] = jnp.zeros((H + 2, W + 2, Cp), jnp.bfloat16)
        x = x_ref[0]                                        # (H, W, Cp) bf16
        if fuse_bn_relu:
            xf = x.astype(jnp.float32)
            scale = scale_ref[...].reshape(1, 1, Cp)
            shift = shift_ref[...].reshape(1, 1, Cp)
            x = jnp.maximum(xf * scale + shift, 0.0).astype(jnp.bfloat16)
        xpad_ref[1:H + 1, 1:W + 1, :] = x

        # 2) im2col into a lane-dense (HW, 9*Cp) VMEM buffer (built once per block).
        for tap in range(9):
            ky, kx = tap // 3, tap % 3
            patch_ref[:, tap * Cp:(tap + 1) * Cp] = (
                xpad_ref[ky:ky + H, kx:kx + W, :].reshape(HW, Cp))

        # 3) single deep-K MXU GEMM: (HW, 9*Cp) x (9*Cp, Cp) -> f32.
        acc = jnp.dot(patch_ref[...], w_ref[...],
                      preferred_element_type=jnp.float32)

        # 4) bf16 conv output + per-image BN partial statistics (f32).
        z_ref[...] = acc.reshape(1, H, W, Cp).astype(jnp.bfloat16)
        sum_ref[...] = jnp.sum(acc, axis=0).reshape(1, 1, Cp)
        ssq_ref[...] = jnp.sum(acc * acc, axis=0).reshape(1, 1, Cp)

    return kernel


def conv3x3_pass(x, w_gemm, *, H, W, Cp, vmem, bn_scale=None, bn_shift=None):
    """x: (N,H,W,Cp) bf16 -> (z (N,H,W,Cp) bf16, sums (N,1,Cp) f32, ssqs (N,1,Cp) f32)."""
    N = x.shape[0]
    fuse = bn_scale is not None
    kernel = _make_conv_kernel(H, W, Cp, fuse)

    act_spec = pl.BlockSpec((1, H, W, Cp), lambda n: (n, 0, 0, 0))
    w_spec = pl.BlockSpec((9 * Cp, Cp), lambda n: (0, 0))
    vec_spec = pl.BlockSpec((1, Cp), lambda n: (0, 0))
    stat_spec = pl.BlockSpec((1, 1, Cp), lambda n: (n, 0, 0))

    in_specs = [act_spec]
    args = [x]
    if fuse:
        in_specs += [vec_spec, vec_spec]
        args += [bn_scale, bn_shift]
    in_specs.append(w_spec)
    args.append(w_gemm)

    return pl.pallas_call(
        kernel,
        out_shape=(jax.ShapeDtypeStruct((N, H, W, Cp), jnp.bfloat16),
                   jax.ShapeDtypeStruct((N, 1, Cp), jnp.float32),
                   jax.ShapeDtypeStruct((N, 1, Cp), jnp.float32)),
        grid=(N,),
        in_specs=in_specs,
        out_specs=(act_spec, stat_spec, stat_spec),
        scratch_shapes=[pltpu.VMEM((H + 2, W + 2, Cp), jnp.bfloat16),   # halo pad
                        pltpu.VMEM((H * W, 9 * Cp), jnp.bfloat16)],     # im2col
        compiler_params=pltpu.CompilerParams(
            dimension_semantics=("parallel",),      # per-image partial stats
            vmem_limit_bytes=vmem),
    )(*args)


# -------------- pass C: BN2 + identity residual + ReLU, M-tiled -------------- #

def _bn_residual_relu_kernel(z_ref, scale_ref, shift_ref, r_ref, o_ref):
    z = z_ref[...].astype(jnp.float32)                       # (tile, Cp)
    y = z * scale_ref[...] + shift_ref[...]                  # folded BN (one FMA)
    y = y + r_ref[...].astype(jnp.float32)                   # bf16 residual
    o_ref[...] = jnp.maximum(y, 0.0)


def bn_residual_relu(z2d, scale, shift, resid2d, *, vmem):
    M, Cp = z2d.shape
    cap = 8192 if vmem >= (80 << 20) else 4096
    tile = _pick_tile(M, cap)
    pad_rows = 0
    if tile is None:                       # no clean divisor: pad rows, slice after
        tile = min(cap, 1024)
        pad_rows = _round_up(M, tile) - M
        z2d = jnp.pad(z2d, ((0, pad_rows), (0, 0)))
        resid2d = jnp.pad(resid2d, ((0, pad_rows), (0, 0)))
    Mp = z2d.shape[0]

    row_spec = pl.BlockSpec((tile, Cp), lambda i: (i, 0))
    vec_spec = pl.BlockSpec((1, Cp), lambda i: (0, 0))
    out = pl.pallas_call(
        _bn_residual_relu_kernel,
        out_shape=jax.ShapeDtypeStruct((Mp, Cp), jnp.float32),
        grid=(Mp // tile,),
        in_specs=[row_spec, vec_spec, vec_spec, row_spec],
        out_specs=row_spec,
        compiler_params=pltpu.CompilerParams(
            dimension_semantics=("parallel",),
            vmem_limit_bytes=vmem),
    )(z2d, scale, shift, resid2d)
    if pad_rows:
        out = out[:M]
    return out


# --------------------------------- forward ---------------------------------- #

def resblock2_forward(x_nchw, params):
    # b1 / b2 (conv biases) are intentionally unused: training-mode BatchNorm
    # subtracts them back out exactly, so they are dead work.
    (w1, b1, g1, bt1, w2, b2, g2, bt2) = params
    N, Cin, H, W = x_nchw.shape
    Cout = w1.shape[0]
    Cp = _round_up(max(Cin, Cout, LANES), LANES)
    M = N * H * W
    vmem = _vmem_limit_bytes()

    # NCHW -> NHWC, channel-pad to lane width, bf16 (also reused as the residual).
    x_nhwc = jnp.transpose(x_nchw, (0, 2, 3, 1))
    xb = _pad_last(x_nhwc, Cp).astype(jnp.bfloat16)          # (N,H,W,Cp) bf16

    w1t = _weight_to_gemm(w1, Cp)
    w2t = _weight_to_gemm(w2, Cp)

    # ---- pass A: conv1 + BN1 partial stats (halo built in VMEM) ----
    z1, s1, q1 = conv3x3_pass(xb, w1t, H=H, W=W, Cp=Cp, vmem=vmem)
    scale1, shift1 = _fold_bn(s1, q1, g1, bt1, M, Cp)        # tiny (Cp,) XLA ops

    # ---- pass B: fused BN1+ReLU prologue + conv2 + BN2 partial stats ----
    z2, s2, q2 = conv3x3_pass(z1, w2t, H=H, W=W, Cp=Cp, vmem=vmem,
                              bn_scale=scale1, bn_shift=shift1)
    scale2, shift2 = _fold_bn(s2, q2, g2, bt2, M, Cp)

    # ---- pass C: BN2 + identity residual + ReLU ----
    out = bn_residual_relu(z2.reshape(M, Cp), scale2, shift2,
                           xb.reshape(M, Cp), vmem=vmem)

    out = out.reshape(N, H, W, Cp)[..., :Cout]
    return jnp.transpose(out, (0, 3, 1, 2))                  # back to NCHW


# ------------------------- pure-JAX reference (f32) ------------------------- #

def resblock2_reference(x, params):
    (w1, b1, g1, bt1, w2, b2, g2, bt2) = params

    def conv(x, w, b):
        y = jax.lax.conv_general_dilated(
            x, w, window_strides=(1, 1), padding=((1, 1), (1, 1)),
            dimension_numbers=('NCHW', 'OIHW', 'NCHW'))
        return y + b[None, :, None, None]

    def bn(x, g, bt):
        mean = jnp.mean(x, axis=(0, 2, 3), keepdims=True)
        var = jnp.mean((x - mean) ** 2, axis=(0, 2, 3), keepdims=True)
        return (x - mean) * jax.lax.rsqrt(var + EPS) * g[None, :, None, None] \
            + bt[None, :, None, None]

    F = jnp.maximum(bn(conv(x, w1, b1), g1, bt1), 0.0)
    F = bn(conv(F, w2, b2), g2, bt2)
    return jnp.maximum(F + x, 0.0)


# ----------------------------------- main ------------------------------------ #

if __name__ == "__main__":
    key = jax.random.PRNGKey(0)
    N, C, H, W = 2, 4, 16, 16          # in_channel == out_channel (identity shortcut)
    ks = jax.random.split(key, 9)

    x = jax.random.normal(ks[0], (N, C, H, W), jnp.float32)

    # deterministic synthetic parameters (PyTorch layouts: conv OIHW, BN per-channel)
    w1 = 0.1 * jax.random.normal(ks[1], (C, C, 3, 3), jnp.float32)
    b1 = 0.1 * jax.random.normal(ks[2], (C,), jnp.float32)
    g1 = 1.0 + 0.1 * jax.random.normal(ks[3], (C,), jnp.float32)
    bt1 = 0.1 * jax.random.normal(ks[4], (C,), jnp.float32)
    w2 = 0.1 * jax.random.normal(ks[5], (C, C, 3, 3), jnp.float32)
    b2 = 0.1 * jax.random.normal(ks[6], (C,), jnp.float32)
    g2 = 1.0 + 0.1 * jax.random.normal(ks[7], (C,), jnp.float32)
    bt2 = 0.1 * jax.random.normal(ks[8], (C,), jnp.float32)
    params = (w1, b1, g1, bt1, w2, b2, g2, bt2)

    out = jax.jit(resblock2_forward)(x, params)
    out = jax.block_until_ready(out)

    ref = jax.block_until_ready(resblock2_reference(x, params))
    assert out.shape == (N, C, H, W)
    # bf16 MXU inputs / bf16 intermediates -> loosened tolerance vs the f32 reference
    assert jnp.allclose(out, ref, atol=6e-2, rtol=6e-2), \
        f"max abs err {jnp.max(jnp.abs(out - ref))}"

    print("KERNEL_OK")
</pallas_src>

<mosaic_0001>
module attributes {stable_mosaic.version = 11 : i64} {
  func.func @kernel(%arg0: i32, %arg1: memref<1x16x16x128xbf16, #tpu.memory_space<vmem>>, %arg2: memref<1152x128xbf16, #tpu.memory_space<vmem>>, %arg3: memref<1x16x16x128xbf16, #tpu.memory_space<vmem>>, %arg4: memref<1x1x128xf32, #tpu.memory_space<vmem>>, %arg5: memref<1x1x128xf32, #tpu.memory_space<vmem>>, %arg6: memref<18x18x128xbf16, #tpu.memory_space<vmem>>, %arg7: memref<256x1152xbf16, #tpu.memory_space<vmem>>) attributes {dimension_semantics = [#tpu.dimension_semantics<parallel>], iteration_bounds = array<i64: 2>, scalar_prefetch = 0 : i64, scratch_operands = 2 : i64, tpu.core_type = #tpu.core_type<tc>, window_params = [{transform_indices = @transform_0, window_bounds = array<i64: 1, 16, 16, 128>}, {pipeline_mode = #tpu.pipeline_mode<synchronous>, transform_indices = @transform_1, window_bounds = array<i64: 1152, 128>}, {transform_indices = @transform_2, window_bounds = array<i64: 1, 16, 16, 128>}, {transform_indices = @transform_3, window_bounds = array<i64: 1, 1, 128>}, {transform_indices = @transform_4, window_bounds = array<i64: 1, 1, 128>}]} {
    %cst = arith.constant 0.000000e+00 : bf16
    %0 = vector.broadcast %cst : bf16 to vector<18x18x128xbf16>
    %c0 = arith.constant 0 : index
    %c0_0 = arith.constant 0 : index
    %c0_1 = arith.constant 0 : index
    %1 = vector.load %arg6[%c0, %c0_0, %c0_1] : memref<18x18x128xbf16, #tpu.memory_space<vmem>>, vector<18x18x128xbf16>
    tpu.vector_store %arg6[%c0, %c0_0, %c0_1], %0 {strides = array<i32>} : memref<18x18x128xbf16, #tpu.memory_space<vmem>>, vector<18x18x128xbf16>,
    %c0_2 = arith.constant 0 : index
    %c0_3 = arith.constant 0 : index
    %c0_4 = arith.constant 0 : index
    %c0_5 = arith.constant 0 : index
    %2 = vector.load %arg1[%c0_2, %c0_3, %c0_4, %c0_5] : memref<1x16x16x128xbf16, #tpu.memory_space<vmem>>, vector<1x16x16x128xbf16>
    %3 = vector.shape_cast %2 : vector<1x16x16x128xbf16> to vector<16x16x128xbf16>
    %c1 = arith.constant 1 : index
    %c1_6 = arith.constant 1 : index
    %c0_7 = arith.constant 0 : index
    %4 = vector.load %arg6[%c1, %c1_6, %c0_7] : memref<18x18x128xbf16, #tpu.memory_space<vmem>>, vector<16x16x128xbf16>
    tpu.vector_store %arg6[%c1, %c1_6, %c0_7], %3 {strides = array<i32>} : memref<18x18x128xbf16, #tpu.memory_space<vmem>>, vector<16x16x128xbf16>,
    %c0_8 = arith.constant 0 : index
    %c0_9 = arith.constant 0 : index
    %c0_10 = arith.constant 0 : index
    %5 = vector.load %arg6[%c0_8, %c0_9, %c0_10] : memref<18x18x128xbf16, #tpu.memory_space<vmem>>, vector<16x16x128xbf16>
    %6 = vector.shape_cast %5 : vector<16x16x128xbf16> to vector<256x128xbf16>
    %c0_11 = arith.constant 0 : index
    %c0_12 = arith.constant 0 : index
    %7 = vector.load %arg7[%c0_11, %c0_12] : memref<256x1152xbf16, #tpu.memory_space<vmem>>, vector<256x128xbf16>
    tpu.vector_store %arg7[%c0_11, %c0_12], %6 {strides = array<i32>} : memref<256x1152xbf16, #tpu.memory_space<vmem>>, vector<256x128xbf16>,
    %c0_13 = arith.constant 0 : index
    %c1_14 = arith.constant 1 : index
    %c0_15 = arith.constant 0 : index
    %8 = vector.load %arg6[%c0_13, %c1_14, %c0_15] : memref<18x18x128xbf16, #tpu.memory_space<vmem>>, vector<16x16x128xbf16>
    %9 = vector.shape_cast %8 : vector<16x16x128xbf16> to vector<256x128xbf16>
    %c0_16 = arith.constant 0 : index
    %c128 = arith.constant 128 : index
    %10 = vector.load %arg7[%c0_16, %c128] : memref<256x1152xbf16, #tpu.memory_space<vmem>>, vector<256x128xbf16>
    tpu.vector_store %arg7[%c0_16, %c128], %9 {strides = array<i32>} : memref<256x1152xbf16, #tpu.memory_space<vmem>>, vector<256x128xbf16>,
    %c0_17 = arith.constant 0 : index
    %c2 = arith.constant 2 : index
    %c0_18 = arith.constant 0 : index
    %11 = vector.load %arg6[%c0_17, %c2, %c0_18] : memref<18x18x128xbf16, #tpu.memory_space<vmem>>, vector<16x16x128xbf16>
    %12 = vector.shape_cast %11 : vector<16x16x128xbf16> to vector<256x128xbf16>
    %c0_19 = arith.constant 0 : index
    %c256 = arith.constant 256 : index
    %13 = vector.load %arg7[%c0_19, %c256] : memref<256x1152xbf16, #tpu.memory_space<vmem>>, vector<256x128xbf16>
    tpu.vector_store %arg7[%c0_19, %c256], %12 {strides = array<i32>} : memref<256x1152xbf16, #tpu.memory_space<vmem>>, vector<256x128xbf16>,
    %c1_20 = arith.constant 1 : index
    %c0_21 = arith.constant 0 : index
    %c0_22 = arith.constant 0 : index
    %14 = vector.load %arg6[%c1_20, %c0_21, %c0_22] : memref<18x18x128xbf16, #tpu.memory_space<vmem>>, vector<16x16x128xbf16>
    %15 = vector.shape_cast %14 : vector<16x16x128xbf16> to vector<256x128xbf16>
    %c0_23 = arith.constant 0 : index
    %c384 = arith.constant 384 : index
    %16 = vector.load %arg7[%c0_23, %c384] : memref<256x1152xbf16, #tpu.memory_space<vmem>>, vector<256x128xbf16>
    tpu.vector_store %arg7[%c0_23, %c384], %15 {strides = array<i32>} : memref<256x1152xbf16, #tpu.memory_space<vmem>>, vector<256x128xbf16>,
    %c1_24 = arith.constant 1 : index
    %c1_25 = arith.constant 1 : index
    %c0_26 = arith.constant 0 : index
    %17 = vector.load %arg6[%c1_24, %c1_25, %c0_26] : memref<18x18x128xbf16, #tpu.memory_space<vmem>>, vector<16x16x128xbf16>
    %18 = vector.shape_cast %17 : vector<16x16x128xbf16> to vector<256x128xbf16>
    %c0_27 = arith.constant 0 : index
    %c512 = arith.constant 512 : index
    %19 = vector.load %arg7[%c0_27, %c512] : memref<256x1152xbf16, #tpu.memory_space<vmem>>, vector<256x128xbf16>
    tpu.vector_store %arg7[%c0_27, %c512], %18 {strides = array<i32>} : memref<256x1152xbf16, #tpu.memory_space<vmem>>, vector<256x128xbf16>,
    %c1_28 = arith.constant 1 : index
    %c2_29 = arith.constant 2 : index
    %c0_30 = arith.constant 0 : index
    %20 = vector.load %arg6[%c1_28, %c2_29, %c0_30] : memref<18x18x128xbf16, #tpu.memory_space<vmem>>, vector<16x16x128xbf16>
    %21 = vector.shape_cast %20 : vector<16x16x128xbf16> to vector<256x128xbf16>
    %c0_31 = arith.constant 0 : index
    %c640 = arith.constant 640 : index
    %22 = vector.load %arg7[%c0_31, %c640] : memref<256x1152xbf16, #tpu.memory_space<vmem>>, vector<256x128xbf16>
    tpu.vector_store %arg7[%c0_31, %c640], %21 {strides = array<i32>} : memref<256x1152xbf16, #tpu.memory_space<vmem>>, vector<256x128xbf16>,
    %c2_32 = arith.constant 2 : index
    %c0_33 = arith.constant 0 : index
    %c0_34 = arith.constant 0 : index
    %23 = vector.load %arg6[%c2_32, %c0_33, %c0_34] : memref<18x18x128xbf16, #tpu.memory_space<vmem>>, vector<16x16x128xbf16>
    %24 = vector.shape_cast %23 : vector<16x16x128xbf16> to vector<256x128xbf16>
    %c0_35 = arith.constant 0 : index
    %c768 = arith.constant 768 : index
    %25 = vector.load %arg7[%c0_35, %c768] : memref<256x1152xbf16, #tpu.memory_space<vmem>>, vector<256x128xbf16>
    tpu.vector_store %arg7[%c0_35, %c768], %24 {strides = array<i32>} : memref<256x1152xbf16, #tpu.memory_space<vmem>>, vector<256x128xbf16>,
    %c2_36 = arith.constant 2 : index
    %c1_37 = arith.constant 1 : index
    %c0_38 = arith.constant 0 : index
    %26 = vector.load %arg6[%c2_36, %c1_37, %c0_38] : memref<18x18x128xbf16, #tpu.memory_space<vmem>>, vector<16x16x128xbf16>
    %27 = vector.shape_cast %26 : vector<16x16x128xbf16> to vector<256x128xbf16>
    %c0_39 = arith.constant 0 : index
    %c896 = arith.constant 896 : index
    %28 = vector.load %arg7[%c0_39, %c896] : memref<256x1152xbf16, #tpu.memory_space<vmem>>, vector<256x128xbf16>
    tpu.vector_store %arg7[%c0_39, %c896], %27 {strides = array<i32>} : memref<256x1152xbf16, #tpu.memory_space<vmem>>, vector<256x128xbf16>,
    %c2_40 = arith.constant 2 : index
    %c2_41 = arith.constant 2 : index
    %c0_42 = arith.constant 0 : index
    %29 = vector.load %arg6[%c2_40, %c2_41, %c0_42] : memref<18x18x128xbf16, #tpu.memory_space<vmem>>, vector<16x16x128xbf16>
    %30 = vector.shape_cast %29 : vector<16x16x128xbf16> to vector<256x128xbf16>
    %c0_43 = arith.constant 0 : index
    %c1024 = arith.constant 1024 : index
    %31 = vector.load %arg7[%c0_43, %c1024] : memref<256x1152xbf16, #tpu.memory_space<vmem>>, vector<256x128xbf16>
    tpu.vector_store %arg7[%c0_43, %c1024], %30 {strides = array<i32>} : memref<256x1152xbf16, #tpu.memory_space<vmem>>, vector<256x128xbf16>,
    %c0_44 = arith.constant 0 : index
    %c0_45 = arith.constant 0 : index
    %32 = vector.load %arg7[%c0_44, %c0_45] : memref<256x1152xbf16, #tpu.memory_space<vmem>>, vector<256x1152xbf16>
    %c0_46 = arith.constant 0 : index
    %c0_47 = arith.constant 0 : index
    %33 = vector.load %arg2[%c0_46, %c0_47] : memref<1152x128xbf16, #tpu.memory_space<vmem>>, vector<1152x128xbf16>
    %cst_48 = arith.constant dense<0.000000e+00> : vector<256x128xf32>
    %34 = tpu.matmul %32, %33, %cst_48 {dimension_numbers = #tpu.dot_dimension_numbers<[1], [0], [0], [1], [0, 0, 1, 1], [], []>} : vector<256x1152xbf16>, vector<1152x128xbf16>, vector<256x128xf32> -> vector<256x128xf32>
    %35 = vector.shape_cast %34 : vector<256x128xf32> to vector<1x16x16x128xf32>
    %36 = arith.truncf %35 : vector<1x16x16x128xf32> to vector<1x16x16x128xbf16>
    %c0_49 = arith.constant 0 : index
    %c0_50 = arith.constant 0 : index
    %c0_51 = arith.constant 0 : index
    %c0_52 = arith.constant 0 : index
    %37 = vector.load %arg3[%c0_49, %c0_50, %c0_51, %c0_52] : memref<1x16x16x128xbf16, #tpu.memory_space<vmem>>, vector<1x16x16x128xbf16>
    tpu.vector_store %arg3[%c0_49, %c0_50, %c0_51, %c0_52], %36 {strides = array<i32>} : memref<1x16x16x128xbf16, #tpu.memory_space<vmem>>, vector<1x16x16x128xbf16>,
    %cst_53 = arith.constant dense<0.000000e+00> : vector<128xf32>
    %38 = vector.multi_reduction <add>, %34, %cst_53 [0] : vector<256x128xf32> to vector<128xf32>
    %39 = vector.shape_cast %38 : vector<128xf32> to vector<1x1x128xf32>
    %c0_54 = arith.constant 0 : index
    %c0_55 = arith.constant 0 : index
    %c0_56 = arith.constant 0 : index
    %40 = vector.load %arg4[%c0_54, %c0_55, %c0_56] : memref<1x1x128xf32, #tpu.memory_space<vmem>>, vector<1x1x128xf32>
    tpu.vector_store %arg4[%c0_54, %c0_55, %c0_56], %39 {strides = array<i32>} : memref<1x1x128xf32, #tpu.memory_space<vmem>>, vector<1x1x128xf32>,
    %41 = arith.mulf %34, %34 : vector<256x128xf32>
    %cst_57 = arith.constant dense<0.000000e+00> : vector<128xf32>
    %42 = vector.multi_reduction <add>, %41, %cst_57 [0] : vector<256x128xf32> to vector<128xf32>
    %43 = vector.shape_cast %42 : vector<128xf32> to vector<1x1x128xf32>
    %c0_58 = arith.constant 0 : index
    %c0_59 = arith.constant 0 : index
    %c0_60 = arith.constant 0 : index
    %44 = vector.load %arg5[%c0_58, %c0_59, %c0_60] : memref<1x1x128xf32, #tpu.memory_space<vmem>>, vector<1x1x128xf32>
    tpu.vector_store %arg5[%c0_58, %c0_59, %c0_60], %43 {strides = array<i32>} : memref<1x1x128xf32, #tpu.memory_space<vmem>>, vector<1x1x128xf32>,
    return
  }
  func.func @transform_0(%arg0: i32) -> (i32, i32, i32, i32) {
    %c0_i32 = arith.constant 0 : i32
    %c0_i32_0 = arith.constant 0 : i32
    %c0_i32_1 = arith.constant 0 : i32
    %c0_i32_2 = arith.constant 0 : i32
    return %arg0, %c0_i32, %c0_i32_0, %c0_i32_1 : i32, i32, i32, i32
  }
  func.func @transform_1(%arg0: i32) -> (i32, i32) {
    %c0_i32 = arith.constant 0 : i32
    %c0_i32_0 = arith.constant 0 : i32
    %c0_i32_1 = arith.constant 0 : i32
    return %c0_i32, %c0_i32_0 : i32, i32
  }
  func.func @transform_2(%arg0: i32) -> (i32, i32, i32, i32) {
    %c0_i32 = arith.constant 0 : i32
    %c0_i32_0 = arith.constant 0 : i32
    %c0_i32_1 = arith.constant 0 : i32
    %c0_i32_2 = arith.constant 0 : i32
    return %arg0, %c0_i32, %c0_i32_0, %c0_i32_1 : i32, i32, i32, i32
  }
  func.func @transform_3(%arg0: i32) -> (i32, i32, i32) {
    %c0_i32 = arith.constant 0 : i32
    %c0_i32_0 = arith.constant 0 : i32
    %c0_i32_1 = arith.constant 0 : i32
    return %arg0, %c0_i32, %c0_i32_0 : i32, i32, i32
  }
  func.func @transform_4(%arg0: i32) -> (i32, i32, i32) {
    %c0_i32 = arith.constant 0 : i32
    %c0_i32_0 = arith.constant 0 : i32
    %c0_i32_1 = arith.constant 0 : i32
    return %arg0, %c0_i32, %c0_i32_0 : i32, i32, i32
  }
}

module attributes {stable_mosaic.version = 11 : i64} {
  func.func @kernel(%arg0: i32, %arg1: memref<1x16x16x128xbf16, #tpu.memory_space<vmem>>, %arg2: memref<1x128xf32, #tpu.memory_space<vmem>>, %arg3: memref<1x128xf32, #tpu.memory_space<vmem>>, %arg4: memref<1152x128xbf16, #tpu.memory_space<vmem>>, %arg5: memref<1x16x16x128xbf16, #tpu.memory_space<vmem>>, %arg6: memref<1x1x128xf32, #tpu.memory_space<vmem>>, %arg7: memref<1x1x128xf32, #tpu.memory_space<vmem>>, %arg8: memref<18x18x128xbf16, #tpu.memory_space<vmem>>, %arg9: memref<256x1152xbf16, #tpu.memory_space<vmem>>) attributes {dimension_semantics = [#tpu.dimension_semantics<parallel>], iteration_bounds = array<i64: 2>, scalar_prefetch = 0 : i64, scratch_operands = 2 : i64, tpu.core_type = #tpu.core_type<tc>, window_params = [{transform_indices = @transform_0, window_bounds = array<i64: 1, 16, 16, 128>}, {pipeline_mode = #tpu.pipeline_mode<synchronous>, transform_indices = @transform_1, window_bounds = array<i64: 1, 128>}, {pipeline_mode = #tpu.pipeline_mode<synchronous>, transform_indices = @transform_2, window_bounds = array<i64: 1, 128>}, {pipeline_mode = #tpu.pipeline_mode<synchronous>, transform_indices = @transform_3, window_bounds = array<i64: 1152, 128>}, {transform_indices = @transform_4, window_bounds = array<i64: 1, 16, 16, 128>}, {transform_indices = @transform_5, window_bounds = array<i64: 1, 1, 128>}, {transform_indices = @transform_6, window_bounds = array<i64: 1, 1, 128>}]} {
    %cst = arith.constant 0.000000e+00 : bf16
    %0 = vector.broadcast %cst : bf16 to vector<18x18x128xbf16>
    %c0 = arith.constant 0 : index
    %c0_0 = arith.constant 0 : index
    %c0_1 = arith.constant 0 : index
    %1 = vector.load %arg8[%c0, %c0_0, %c0_1] : memref<18x18x128xbf16, #tpu.memory_space<vmem>>, vector<18x18x128xbf16>
    tpu.vector_store %arg8[%c0, %c0_0, %c0_1], %0 {strides = array<i32>} : memref<18x18x128xbf16, #tpu.memory_space<vmem>>, vector<18x18x128xbf16>,
    %c0_2 = arith.constant 0 : index
    %c0_3 = arith.constant 0 : index
    %c0_4 = arith.constant 0 : index
    %c0_5 = arith.constant 0 : index
    %2 = vector.load %arg1[%c0_2, %c0_3, %c0_4, %c0_5] : memref<1x16x16x128xbf16, #tpu.memory_space<vmem>>, vector<1x16x16x128xbf16>
    %3 = vector.shape_cast %2 : vector<1x16x16x128xbf16> to vector<16x16x128xbf16>
    %4 = arith.extf %3 : vector<16x16x128xbf16> to vector<16x16x128xf32>
    %c0_6 = arith.constant 0 : index
    %c0_7 = arith.constant 0 : index
    %5 = vector.load %arg2[%c0_6, %c0_7] : memref<1x128xf32, #tpu.memory_space<vmem>>, vector<1x128xf32>
    %6 = vector.shape_cast %5 : vector<1x128xf32> to vector<1x1x128xf32>
    %c0_8 = arith.constant 0 : index
    %c0_9 = arith.constant 0 : index
    %7 = vector.load %arg3[%c0_8, %c0_9] : memref<1x128xf32, #tpu.memory_space<vmem>>, vector<1x128xf32>
    %8 = vector.shape_cast %7 : vector<1x128xf32> to vector<1x1x128xf32>
    %9 = vector.broadcast %6 : vector<1x1x128xf32> to vector<16x16x128xf32>
    %10 = arith.mulf %4, %9 : vector<16x16x128xf32>
    %11 = vector.broadcast %8 : vector<1x1x128xf32> to vector<16x16x128xf32>
    %12 = arith.addf %10, %11 : vector<16x16x128xf32>
    %cst_10 = arith.constant 0.000000e+00 : f32
    %13 = vector.broadcast %cst_10 : f32 to vector<16x16x128xf32>
    %14 = arith.maximumf %12, %13 : vector<16x16x128xf32>
    %15 = arith.truncf %14 : vector<16x16x128xf32> to vector<16x16x128xbf16>
    %c1 = arith.constant 1 : index
    %c1_11 = arith.constant 1 : index
    %c0_12 = arith.constant 0 : index
    %16 = vector.load %arg8[%c1, %c1_11, %c0_12] : memref<18x18x128xbf16, #tpu.memory_space<vmem>>, vector<16x16x128xbf16>
    tpu.vector_store %arg8[%c1, %c1_11, %c0_12], %15 {strides = array<i32>} : memref<18x18x128xbf16, #tpu.memory_space<vmem>>, vector<16x16x128xbf16>,
    %c0_13 = arith.constant 0 : index
    %c0_14 = arith.constant 0 : index
    %c0_15 = arith.constant 0 : index
    %17 = vector.load %arg8[%c0_13, %c0_14, %c0_15] : memref<18x18x128xbf16, #tpu.memory_space<vmem>>, vector<16x16x128xbf16>
    %18 = vector.shape_cast %17 : vector<16x16x128xbf16> to vector<256x128xbf16>
    %c0_16 = arith.constant 0 : index
    %c0_17 = arith.constant 0 : index
    %19 = vector.load %arg9[%c0_16, %c0_17] : memref<256x1152xbf16, #tpu.memory_space<vmem>>, vector<256x128xbf16>
    tpu.vector_store %arg9[%c0_16, %c0_17], %18 {strides = array<i32>} : memref<256x1152xbf16, #tpu.memory_space<vmem>>, vector<256x128xbf16>,
    %c0_18 = arith.constant 0 : index
    %c1_19 = arith.constant 1 : index
    %c0_20 = arith.constant 0 : index
    %20 = vector.load %arg8[%c0_18, %c1_19, %c0_20] : memref<18x18x128xbf16, #tpu.memory_space<vmem>>, vector<16x16x128xbf16>
    %21 = vector.shape_cast %20 : vector<16x16x128xbf16> to vector<256x128xbf16>
    %c0_21 = arith.constant 0 : index
    %c128 = arith.constant 128 : index
    %22 = vector.load %arg9[%c0_21, %c128] : memref<256x1152xbf16, #tpu.memory_space<vmem>>, vector<256x128xbf16>
    tpu.vector_store %arg9[%c0_21, %c128], %21 {strides = array<i32>} : memref<256x1152xbf16, #tpu.memory_space<vmem>>, vector<256x128xbf16>,
    %c0_22 = arith.constant 0 : index
    %c2 = arith.constant 2 : index
    %c0_23 = arith.constant 0 : index
    %23 = vector.load %arg8[%c0_22, %c2, %c0_23] : memref<18x18x128xbf16, #tpu.memory_space<vmem>>, vector<16x16x128xbf16>
    %24 = vector.shape_cast %23 : vector<16x16x128xbf16> to vector<256x128xbf16>
    %c0_24 = arith.constant 0 : index
    %c256 = arith.constant 256 : index
    %25 = vector.load %arg9[%c0_24, %c256] : memref<256x1152xbf16, #tpu.memory_space<vmem>>, vector<256x128xbf16>
    tpu.vector_store %arg9[%c0_24, %c256], %24 {strides = array<i32>} : memref<256x1152xbf16, #tpu.memory_space<vmem>>, vector<256x128xbf16>,
    %c1_25 = arith.constant 1 : index
    %c0_26 = arith.constant 0 : index
    %c0_27 = arith.constant 0 : index
    %26 = vector.load %arg8[%c1_25, %c0_26, %c0_27] : memref<18x18x128xbf16, #tpu.memory_space<vmem>>, vector<16x16x128xbf16>
    %27 = vector.shape_cast %26 : vector<16x16x128xbf16> to vector<256x128xbf16>
    %c0_28 = arith.constant 0 : index
    %c384 = arith.constant 384 : index
    %28 = vector.load %arg9[%c0_28, %c384] : memref<256x1152xbf16, #tpu.memory_space<vmem>>, vector<256x128xbf16>
    tpu.vector_store %arg9[%c0_28, %c384], %27 {strides = array<i32>} : memref<256x1152xbf16, #tpu.memory_space<vmem>>, vector<256x128xbf16>,
    %c1_29 = arith.constant 1 : index
    %c1_30 = arith.constant 1 : index
    %c0_31 = arith.constant 0 : index
    %29 = vector.load %arg8[%c1_29, %c1_30, %c0_31] : memref<18x18x128xbf16, #tpu.memory_space<vmem>>, vector<16x16x128xbf16>
    %30 = vector.shape_cast %29 : vector<16x16x128xbf16> to vector<256x128xbf16>
    %c0_32 = arith.constant 0 : index
    %c512 = arith.constant 512 : index
    %31 = vector.load %arg9[%c0_32, %c512] : memref<256x1152xbf16, #tpu.memory_space<vmem>>, vector<256x128xbf16>
    tpu.vector_store %arg9[%c0_32, %c512], %30 {strides = array<i32>} : memref<256x1152xbf16, #tpu.memory_space<vmem>>, vector<256x128xbf16>,
    %c1_33 = arith.constant 1 : index
    %c2_34 = arith.constant 2 : index
    %c0_35 = arith.constant 0 : index
    %32 = vector.load %arg8[%c1_33, %c2_34, %c0_35] : memref<18x18x128xbf16, #tpu.memory_space<vmem>>, vector<16x16x128xbf16>
    %33 = vector.shape_cast %32 : vector<16x16x128xbf16> to vector<256x128xbf16>
    %c0_36 = arith.constant 0 : index
    %c640 = arith.constant 640 : index
    %34 = vector.load %arg9[%c0_36, %c640] : memref<256x1152xbf16, #tpu.memory_space<vmem>>, vector<256x128xbf16>
    tpu.vector_store %arg9[%c0_36, %c640], %33 {strides = array<i32>} : memref<256x1152xbf16, #tpu.memory_space<vmem>>, vector<256x128xbf16>,
    %c2_37 = arith.constant 2 : index
    %c0_38 = arith.constant 0 : index
    %c0_39 = arith.constant 0 : index
    %35 = vector.load %arg8[%c2_37, %c0_38, %c0_39] : memref<18x18x128xbf16, #tpu.memory_space<vmem>>, vector<16x16x128xbf16>
    %36 = vector.shape_cast %35 : vector<16x16x128xbf16> to vector<256x128xbf16>
    %c0_40 = arith.constant 0 : index
    %c768 = arith.constant 768 : index
    %37 = vector.load %arg9[%c0_40, %c768] : memref<256x1152xbf16, #tpu.memory_space<vmem>>, vector<256x128xbf16>
    tpu.vector_store %arg9[%c0_40, %c768], %36 {strides = array<i32>} : memref<256x1152xbf16, #tpu.memory_space<vmem>>, vector<256x128xbf16>,
    %c2_41 = arith.constant 2 : index
    %c1_42 = arith.constant 1 : index
    %c0_43 = arith.constant 0 : index
    %38 = vector.load %arg8[%c2_41, %c1_42, %c0_43] : memref<18x18x128xbf16, #tpu.memory_space<vmem>>, vector<16x16x128xbf16>
    %39 = vector.shape_cast %38 : vector<16x16x128xbf16> to vector<256x128xbf16>
    %c0_44 = arith.constant 0 : index
    %c896 = arith.constant 896 : index
    %40 = vector.load %arg9[%c0_44, %c896] : memref<256x1152xbf16, #tpu.memory_space<vmem>>, vector<256x128xbf16>
    tpu.vector_store %arg9[%c0_44, %c896], %39 {strides = array<i32>} : memref<256x1152xbf16, #tpu.memory_space<vmem>>, vector<256x128xbf16>,
    %c2_45 = arith.constant 2 : index
    %c2_46 = arith.constant 2 : index
    %c0_47 = arith.constant 0 : index
    %41 = vector.load %arg8[%c2_45, %c2_46, %c0_47] : memref<18x18x128xbf16, #tpu.memory_space<vmem>>, vector<16x16x128xbf16>
    %42 = vector.shape_cast %41 : vector<16x16x128xbf16> to vector<256x128xbf16>
    %c0_48 = arith.constant 0 : index
    %c1024 = arith.constant 1024 : index
    %43 = vector.load %arg9[%c0_48, %c1024] : memref<256x1152xbf16, #tpu.memory_space<vmem>>, vector<256x128xbf16>
    tpu.vector_store %arg9[%c0_48, %c1024], %42 {strides = array<i32>} : memref<256x1152xbf16, #tpu.memory_space<vmem>>, vector<256x128xbf16>,
    %c0_49 = arith.constant 0 : index
    %c0_50 = arith.constant 0 : index
    %44 = vector.load %arg9[%c0_49, %c0_50] : memref<256x1152xbf16, #tpu.memory_space<vmem>>, vector<256x1152xbf16>
    %c0_51 = arith.constant 0 : index
    %c0_52 = arith.constant 0 : index
    %45 = vector.load %arg4[%c0_51, %c0_52] : memref<1152x128xbf16, #tpu.memory_space<vmem>>, vector<1152x128xbf16>
    %cst_53 = arith.constant dense<0.000000e+00> : vector<256x128xf32>
    %46 = tpu.matmul %44, %45, %cst_53 {dimension_numbers = #tpu.dot_dimension_numbers<[1], [0], [0], [1], [0, 0, 1, 1], [], []>} : vector<256x1152xbf16>, vector<1152x128xbf16>, vector<256x128xf32> -> vector<256x128xf32>
    %47 = vector.shape_cast %46 : vector<256x128xf32> to vector<1x16x16x128xf32>
    %48 = arith.truncf %47 : vector<1x16x16x128xf32> to vector<1x16x16x128xbf16>
    %c0_54 = arith.constant 0 : index
    %c0_55 = arith.constant 0 : index
    %c0_56 = arith.constant 0 : index
    %c0_57 = arith.constant 0 : index
    %49 = vector.load %arg5[%c0_54, %c0_55, %c0_56, %c0_57] : memref<1x16x16x128xbf16, #tpu.memory_space<vmem>>, vector<1x16x16x128xbf16>
    tpu.vector_store %arg5[%c0_54, %c0_55, %c0_56, %c0_57], %48 {strides = array<i32>} : memref<1x16x16x128xbf16, #tpu.memory_space<vmem>>, vector<1x16x16x128xbf16>,
    %cst_58 = arith.constant dense<0.000000e+00> : vector<128xf32>
    %50 = vector.multi_reduction <add>, %46, %cst_58 [0] : vector<256x128xf32> to vector<128xf32>
    %51 = vector.shape_cast %50 : vector<128xf32> to vector<1x1x128xf32>
    %c0_59 = arith.constant 0 : index
    %c0_60 = arith.constant 0 : index
    %c0_61 = arith.constant 0 : index
    %52 = vector.load %arg6[%c0_59, %c0_60, %c0_61] : memref<1x1x128xf32, #tpu.memory_space<vmem>>, vector<1x1x128xf32>
    tpu.vector_store %arg6[%c0_59, %c0_60, %c0_61], %51 {strides = array<i32>} : memref<1x1x128xf32, #tpu.memory_space<vmem>>, vector<1x1x128xf32>,
    %53 = arith.mulf %46, %46 : vector<256x128xf32>
    %cst_62 = arith.constant dense<0.000000e+00> : vector<128xf32>
    %54 = vector.multi_reduction <add>, %53, %cst_62 [0] : vector<256x128xf32> to vector<128xf32>
    %55 = vector.shape_cast %54 : vector<128xf32> to vector<1x1x128xf32>
    %c0_63 = arith.constant 0 : index
    %c0_64 = arith.constant 0 : index
    %c0_65 = arith.constant 0 : index
    %56 = vector.load %arg7[%c0_63, %c0_64, %c0_65] : memref<1x1x128xf32, #tpu.memory_space<vmem>>, vector<1x1x128xf32>
    tpu.vector_store %arg7[%c0_63, %c0_64, %c0_65], %55 {strides = array<i32>} : memref<1x1x128xf32, #tpu.memory_space<vmem>>, vector<1x1x128xf32>,
    return
  }
  func.func @transform_0(%arg0: i32) -> (i32, i32, i32, i32) {
    %c0_i32 = arith.constant 0 : i32
    %c0_i32_0 = arith.constant 0 : i32
    %c0_i32_1 = arith.constant 0 : i32
    %c0_i32_2 = arith.constant 0 : i32
    return %arg0, %c0_i32, %c0_i32_0, %c0_i32_1 : i32, i32, i32, i32
  }
  func.func @transform_1(%arg0: i32) -> (i32, i32) {
    %c0_i32 = arith.constant 0 : i32
    %c0_i32_0 = arith.constant 0 : i32
    %c0_i32_1 = arith.constant 0 : i32
    return %c0_i32, %c0_i32_0 : i32, i32
  }
  func.func @transform_2(%arg0: i32) -> (i32, i32) {
    %c0_i32 = arith.constant 0 : i32
    %c0_i32_0 = arith.constant 0 : i32
    %c0_i32_1 = arith.constant 0 : i32
    return %c0_i32, %c0_i32_0 : i32, i32
  }
  func.func @transform_3(%arg0: i32) -> (i32, i32) {
    %c0_i32 = arith.constant 0 : i32
    %c0_i32_0 = arith.constant 0 : i32
    %c0_i32_1 = arith.constant 0 : i32
    return %c0_i32, %c0_i32_0 : i32, i32
  }
  func.func @transform_4(%arg0: i32) -> (i32, i32, i32, i32) {
    %c0_i32 = arith.constant 0 : i32
    %c0_i32_0 = arith.constant 0 : i32
    %c0_i32_1 = arith.constant 0 : i32
    %c0_i32_2 = arith.constant 0 : i32
    return %arg0, %c0_i32, %c0_i32_0, %c0_i32_1 : i32, i32, i32, i32
  }
  func.func @transform_5(%arg0: i32) -> (i32, i32, i32) {
    %c0_i32 = arith.constant 0 : i32
    %c0_i32_0 = arith.constant 0 : i32
    %c0_i32_1 = arith.constant 0 : i32
    return %arg0, %c0_i32, %c0_i32_0 : i32, i32, i32
  }
  func.func @transform_6(%arg0: i32) -> (i32, i32, i32) {
    %c0_i32 = arith.constant 0 : i32
    %c0_i32_0 = arith.constant 0 : i32
    %c0_i32_1 = arith.constant 0 : i32
    return %arg0, %c0_i32, %c0_i32_0 : i32, i32, i32
  }
}

module attributes {stable_mosaic.version = 11 : i64} {
  func.func @_bn_residual_relu_kernel(%arg0: i32, %arg1: memref<512x128xbf16, #tpu.memory_space<vmem>>, %arg2: memref<1x128xf32, #tpu.memory_space<vmem>>, %arg3: memref<1x128xf32, #tpu.memory_space<vmem>>, %arg4: memref<512x128xbf16, #tpu.memory_space<vmem>>, %arg5: memref<512x128xf32, #tpu.memory_space<vmem>>) attributes {dimension_semantics = [#tpu.dimension_semantics<parallel>], iteration_bounds = array<i64: 1>, scalar_prefetch = 0 : i64, scratch_operands = 0 : i64, tpu.core_type = #tpu.core_type<tc>, window_params = [{transform_indices = @transform_0, window_bounds = array<i64: 512, 128>}, {pipeline_mode = #tpu.pipeline_mode<synchronous>, transform_indices = @transform_1, window_bounds = array<i64: 1, 128>}, {pipeline_mode = #tpu.pipeline_mode<synchronous>, transform_indices = @transform_2, window_bounds = array<i64: 1, 128>}, {transform_indices = @transform_3, window_bounds = array<i64: 512, 128>}, {transform_indices = @transform_4, window_bounds = array<i64: 512, 128>}]} {
    %c0 = arith.constant 0 : index
    %c0_0 = arith.constant 0 : index
    %0 = vector.load %arg1[%c0, %c0_0] : memref<512x128xbf16, #tpu.memory_space<vmem>>, vector<512x128xbf16>
    %1 = arith.extf %0 : vector<512x128xbf16> to vector<512x128xf32>
    %c0_1 = arith.constant 0 : index
    %c0_2 = arith.constant 0 : index
    %2 = vector.load %arg2[%c0_1, %c0_2] : memref<1x128xf32, #tpu.memory_space<vmem>>, vector<1x128xf32>
    %3 = vector.broadcast %2 : vector<1x128xf32> to vector<512x128xf32>
    %4 = arith.mulf %1, %3 : vector<512x128xf32>
    %c0_3 = arith.constant 0 : index
    %c0_4 = arith.constant 0 : index
    %5 = vector.load %arg3[%c0_3, %c0_4] : memref<1x128xf32, #tpu.memory_space<vmem>>, vector<1x128xf32>
    %6 = vector.broadcast %5 : vector<1x128xf32> to vector<512x128xf32>
    %7 = arith.addf %4, %6 : vector<512x128xf32>
    %c0_5 = arith.constant 0 : index
    %c0_6 = arith.constant 0 : index
    %8 = vector.load %arg4[%c0_5, %c0_6] : memref<512x128xbf16, #tpu.memory_space<vmem>>, vector<512x128xbf16>
    %9 = arith.extf %8 : vector<512x128xbf16> to vector<512x128xf32>
    %10 = arith.addf %7, %9 : vector<512x128xf32>
    %cst = arith.constant 0.000000e+00 : f32
    %11 = vector.broadcast %cst : f32 to vector<512x128xf32>
    %12 = arith.maximumf %10, %11 : vector<512x128xf32>
    %c0_7 = arith.constant 0 : index
    %c0_8 = arith.constant 0 : index
    %13 = vector.load %arg5[%c0_7, %c0_8] : memref<512x128xf32, #tpu.memory_space<vmem>>, vector<512x128xf32>
    tpu.vector_store %arg5[%c0_7, %c0_8], %12 {strides = array<i32>} : memref<512x128xf32, #tpu.memory_space<vmem>>, vector<512x128xf32>,
    return
  }
  func.func @transform_0(%arg0: i32) -> (i32, i32) {
    %c0_i32 = arith.constant 0 : i32
    %c0_i32_0 = arith.constant 0 : i32
    return %arg0, %c0_i32 : i32, i32
  }
  func.func @transform_1(%arg0: i32) -> (i32, i32) {
    %c0_i32 = arith.constant 0 : i32
    %c0_i32_0 = arith.constant 0 : i32
    %c0_i32_1 = arith.constant 0 : i32
    return %c0_i32, %c0_i32_0 : i32, i32
  }
  func.func @transform_2(%arg0: i32) -> (i32, i32) {
    %c0_i32 = arith.constant 0 : i32
    %c0_i32_0 = arith.constant 0 : i32
    %c0_i32_1 = arith.constant 0 : i32
    return %c0_i32, %c0_i32_0 : i32, i32
  }
  func.func @transform_3(%arg0: i32) -> (i32, i32) {
    %c0_i32 = arith.constant 0 : i32
    %c0_i32_0 = arith.constant 0 : i32
    return %arg0, %c0_i32 : i32, i32
  }
  func.func @transform_4(%arg0: i32) -> (i32, i32) {
    %c0_i32 = arith.constant 0 : i32
    %c0_i32_0 = arith.constant 0 : i32
    return %arg0, %c0_i32 : i32, i32
  }
}

</mosaic_0001>

<bundles_post_ra>
// kernel: resblock2_forward.5
= control target key start
LH: loop header
LB: loop body
LE: loop exit
PB: predicated region body
PF: predicated region fallthrough
CT: control target
= control target key end

     0   :  { %s1478_s0 = inlined_call_operand.vmem [shape: bf16[512,128], index: 0, kind: input, shape index: {}]   ;;  %s1479_s1 = inlined_call_operand.vmem [shape: f32[1,128], index: 1, kind: input, shape index: {}]   ;;  %s1480_s2 = inlined_call_operand.vmem [shape: f32[1,128], index: 2, kind: input, shape index: {}]   ;;  %s1481_s3 = inlined_call_operand.vmem [shape: bf16[512,128], index: 3, kind: input, shape index: {}]   ;;  %s1482_s4 = inlined_call_operand.vmem [shape: f32[512,128], index: 4, kind: output, shape index: {}]  }
   0x1   :  { %v614_v0 = vld [vmem:[%s1478_s0] sm:$0xff]   ;;  %v869_v5 = vld [vmem:[%s1478_s0 + $0x8] sm:$0xff]   ;;  %v870_v12 = vld [vmem:[%s1478_s0 + $0x10] sm:$0xff]  }
   0x2   :  { %v962_v1 = vld [vmem:[%s1479_s1] ss:$0 sm:$0xff]  ;;  %v615_v2 = vunpack.c.l.bf16 %v614_v0  ;;  %v616_v4 = vunpack.c.h.bf16 %v614_v0  ;;  %v900_v6 = vld [vmem:[%s1481_s3 + $0x8] sm:$0xff]   ;;  %v619_v10 = vunpack.c.l.bf16 %v869_v5  ;;  %v901_v13 = vld [vmem:[%s1481_s3 + $0x10] sm:$0xff]   ;;  %v620_v16 = vunpack.c.h.bf16 %v869_v5 }
   0x3   :  { %v742_v3 = vld [vmem:[%s1481_s3] sm:$0xff]   ;;  %v747_v11 = vunpack.c.l.bf16 %v900_v6  ;;  %v748_v17 = vunpack.c.h.bf16 %v900_v6  ;;  %v871_v18 = vld [vmem:[%s1478_s0 + $0x18] sm:$0xff]   ;;  %v623_v20 = vunpack.c.l.bf16 %v870_v12  ;;  %v751_v21 = vunpack.c.l.bf16 %v901_v13  ;;  %v873_v54 = vld [vmem:[%s1478_s0 + $0x28] sm:$0xff]  }
   0x4   :  { %v976_v7 = vld [vmem:[%s1480_s2] ss:$0 sm:$0xff]  ;;  %v743_v8 = vunpack.c.l.bf16 %v742_v3  ;;  %v744_v9 = vunpack.c.h.bf16 %v742_v3  ;;  %v152_v14 = vmul.f32 %v615_v2, %v962_v1  ;;  %v153_v15 = vmul.f32 %v616_v4, %v962_v1  ;;  %v902_v23 = vld [vmem:[%s1481_s3 + $0x18] sm:$0xff]   ;;  %v904_v55 = vld [vmem:[%s1481_s3 + $0x28] sm:$0xff]  }
   0x5   :  { %v154_v19 = vmul.f32 %v619_v10, %v962_v1  ;;  %v624_v22 = vunpack.c.h.bf16 %v870_v12  ;;  %v155_v26 = vmul.f32 %v620_v16, %v962_v1  ;;  %v752_v27 = vunpack.c.h.bf16 %v901_v13  ;;  %v872_v40 = vld [vmem:[%s1478_s0 + $0x20] sm:$0xff]   ;;  %v874_v0 = vld [vmem:[%s1478_s0 + $0x30] sm:$0xff]   ;;  %v875_v16 = vld [vmem:[%s1478_s0 + $0x38] sm:$0xff]  }
   0x6   :  { %v223_v24 = vadd.f32 %v976_v7, %v152_v14  ;;  %v224_v25 = vadd.f32 %v976_v7, %v153_v15  ;;  %v156_v29 = vmul.f32 %v623_v20, %v962_v1  ;;  %v627_v31 = vunpack.c.l.bf16 %v871_v18  ;;  %v903_v45 = vld [vmem:[%s1481_s3 + $0x20] sm:$0xff]   ;;  %v905_v2 = vld [vmem:[%s1481_s3 + $0x30] sm:$0xff]  }
   0x7   :  { %v225_v28 = vadd.f32 %v976_v7, %v154_v19  ;;  %v157_v30 = vmul.f32 %v624_v22, %v962_v1  ;;  %v226_v34 = vadd.f32 %v976_v7, %v155_v26  ;;  %v755_v35 = vunpack.c.l.bf16 %v902_v23 }
   0x8   :  { %v415_v32 = vadd.f32 %v743_v8, %v223_v24  ;;  %v416_v33 = vadd.f32 %v744_v9, %v224_v25  ;;  %v227_v37 = vadd.f32 %v976_v7, %v156_v29  ;;  %v158_v39 = vmul.f32 %v627_v31, %v962_v1 }
   0x9   :  { %v417_v36 = vadd.f32 %v747_v11, %v225_v28  ;;  %v228_v38 = vadd.f32 %v976_v7, %v157_v30  ;;  %v418_v43 = vadd.f32 %v748_v17, %v226_v34  ;;  %v628_v44 = vunpack.c.h.bf16 %v871_v18  ;;  %v876_v34 = vld [vmem:[%s1478_s0 + $0x40] sm:$0xff]  }
   0xa   :  { %v479_v41 = vmax.f32 %v415_v32, 0.0  ;;  %v480_v42 = vmax.f32 %v416_v33, 0.0  ;;  %v419_v47 = vadd.f32 %v751_v21, %v227_v37  ;;  %v229_v49 = vadd.f32 %v976_v7, %v158_v39  ;;  %v906_v21 = vld [vmem:[%s1481_s3 + $0x38] sm:$0xff]   ;;  %v907_v39 = vld [vmem:[%s1481_s3 + $0x40] sm:$0xff]  }
   0xb   :  { %v481_v46 = vmax.f32 %v417_v36, 0.0  ;;  %v420_v48 = vadd.f32 %v752_v27, %v228_v38  ;;  %v482_v50 = vmax.f32 %v418_v43, 0.0  ;;  %v159_v51 = vmul.f32 %v628_v44, %v962_v1 }
   0xc   :  { %543 = vst [vmem:[%s1482_s4] sm:$0xff] %v479_v41  ;;  %544 = vst [vmem:[%s1482_s4 + $0x8] sm:$0xff] %v480_v42  ;;  %v756_v52 = vunpack.c.h.bf16 %v902_v23  ;;  %v631_v53 = vunpack.c.l.bf16 %v872_v40  ;;  %v483_v56 = vmax.f32 %v419_v47, 0.0  ;;  %v421_v58 = vadd.f32 %v755_v35, %v229_v49  ;;  %v908_v49 = vld [vmem:[%s1481_s3 + $0x48] sm:$0xff]  }
   0xd   :  { %545 = vst [vmem:[%s1482_s4 + $0x10] sm:$0xff] %v481_v46  ;;  %v484_v57 = vmax.f32 %v420_v48, 0.0  ;;  %v759_v59 = vunpack.c.l.bf16 %v903_v45  ;;  %546 = vst [vmem:[%s1482_s4 + $0x18] sm:$0xff] %v482_v50  ;;  %v230_v60 = vadd.f32 %v976_v7, %v159_v51  ;;  %v632_v62 = vunpack.c.h.bf16 %v872_v40  ;;  %v877_v48 = vld [vmem:[%s1478_s0 + $0x48] sm:$0xff]  }
   0xe   :  { %v160_v61 = vmul.f32 %v631_v53, %v962_v1  ;;  %v760_v63 = vunpack.c.h.bf16 %v903_v45  ;;  %547 = vst [vmem:[%s1482_s4 + $0x20] sm:$0xff] %v483_v56  ;;  %v485_v3 = vmax.f32 %v421_v58, 0.0  ;;  %v635_v4 = vunpack.c.l.bf16 %v873_v54  ;;  %v878_v58 = vld [vmem:[%s1478_s0 + $0x50] sm:$0xff]  }
   0xf   :  { %548 = vst [vmem:[%s1482_s4 + $0x28] sm:$0xff] %v484_v57  ;;  %v763_v5 = vunpack.c.l.bf16 %v904_v55  ;;  %v636_v6 = vunpack.c.h.bf16 %v873_v54  ;;  %v422_v8 = vadd.f32 %v756_v52, %v230_v60  ;;  %v161_v10 = vmul.f32 %v632_v62, %v962_v1 }
  0x10   :  { %v231_v9 = vadd.f32 %v976_v7, %v160_v61  ;;  %v764_v11 = vunpack.c.h.bf16 %v904_v55  ;;  %549 = vst [vmem:[%s1482_s4 + $0x30] sm:$0xff] %v485_v3  ;;  %v162_v12 = vmul.f32 %v635_v4, %v962_v1  ;;  %v639_v14 = vunpack.c.l.bf16 %v874_v0 }
  0x11   :  { %v163_v13 = vmul.f32 %v636_v6, %v962_v1  ;;  %v767_v15 = vunpack.c.l.bf16 %v905_v2  ;;  %v486_v17 = vmax.f32 %v422_v8, 0.0  ;;  %v232_v19 = vadd.f32 %v976_v7, %v161_v10  ;;  %v879_v10 = vld [vmem:[%s1478_s0 + $0x58] sm:$0xff]  }
  0x12   :  { %v423_v18 = vadd.f32 %v759_v59, %v231_v9  ;;  %v640_v20 = vunpack.c.h.bf16 %v874_v0  ;;  %v233_v22 = vadd.f32 %v976_v7, %v162_v12  ;;  %v164_v24 = vmul.f32 %v639_v14, %v962_v1 }
  0x13   :  { %v234_v23 = vadd.f32 %v976_v7, %v163_v13  ;;  %v768_v25 = vunpack.c.h.bf16 %v905_v2  ;;  %550 = vst [vmem:[%s1482_s4 + $0x38] sm:$0xff] %v486_v17  ;;  %v424_v27 = vadd.f32 %v760_v63, %v232_v19  ;;  %v643_v29 = vunpack.c.l.bf16 %v875_v16  ;;  %v909_v63 = vld [vmem:[%s1481_s3 + $0x50] sm:$0xff]   ;;  %v910_v19 = vld [vmem:[%s1481_s3 + $0x58] sm:$0xff]  }
  0x14   :  { %v487_v26 = vmax.f32 %v423_v18, 0.0  ;;  %v165_v28 = vmul.f32 %v640_v20, %v962_v1  ;;  %v425_v30 = vadd.f32 %v763_v5, %v233_v22  ;;  %v235_v32 = vadd.f32 %v976_v7, %v164_v24 }
  0x15   :  { %v426_v31 = vadd.f32 %v764_v11, %v234_v23  ;;  %v771_v33 = vunpack.c.l.bf16 %v906_v21  ;;  %v488_v35 = vmax.f32 %v424_v27, 0.0  ;;  %v166_v37 = vmul.f32 %v643_v29, %v962_v1 }
  0x16   :  { %551 = vst [vmem:[%s1482_s4 + $0x40] sm:$0xff] %v487_v26  ;;  %v236_v36 = vadd.f32 %v976_v7, %v165_v28  ;;  %v644_v38 = vunpack.c.h.bf16 %v875_v16  ;;  %v489_v40 = vmax.f32 %v425_v30, 0.0  ;;  %v427_v42 = vadd.f32 %v767_v15, %v235_v32  ;;  %v880_v28 = vld [vmem:[%s1478_s0 + $0x60] sm:$0xff]  }
  0x17   :  { %v490_v41 = vmax.f32 %v426_v31, 0.0  ;;  %v772_v43 = vunpack.c.h.bf16 %v906_v21  ;;  %552 = vst [vmem:[%s1482_s4 + $0x48] sm:$0xff] %v488_v35  ;;  %v237_v45 = vadd.f32 %v976_v7, %v166_v37  ;;  %v647_v47 = vunpack.c.l.bf16 %v876_v34 }
  0x18   :  { %v428_v44 = vadd.f32 %v768_v25, %v236_v36  ;;  %v167_v46 = vmul.f32 %v644_v38, %v962_v1  ;;  %553 = vst [vmem:[%s1482_s4 + $0x50] sm:$0xff] %v489_v40  ;;  %v491_v50 = vmax.f32 %v427_v42, 0.0  ;;  %v775_v51 = vunpack.c.l.bf16 %v907_v39  ;;  %v881_v42 = vld [vmem:[%s1478_s0 + $0x68] sm:$0xff]  }
  0x19   :  { %554 = vst [vmem:[%s1482_s4 + $0x58] sm:$0xff] %v490_v41  ;;  %v648_v52 = vunpack.c.h.bf16 %v876_v34  ;;  %v776_v53 = vunpack.c.h.bf16 %v907_v39  ;;  %v429_v55 = vadd.f32 %v771_v33, %v237_v45  ;;  %v168_v57 = vmul.f32 %v647_v47, %v962_v1  ;;  %v911_v33 = vld [vmem:[%s1481_s3 + $0x60] sm:$0xff]  }
  0x1a   :  { %v492_v54 = vmax.f32 %v428_v44, 0.0  ;;  %v238_v56 = vadd.f32 %v976_v7, %v167_v46  ;;  %555 = vst [vmem:[%s1482_s4 + $0x60] sm:$0xff] %v491_v50  ;;  %v651_v60 = vunpack.c.l.bf16 %v877_v48  ;;  %v779_v61 = vunpack.c.l.bf16 %v908_v49 }
  0x1b   :  { %v169_v59 = vmul.f32 %v648_v52, %v962_v1  ;;  %v652_v62 = vunpack.c.h.bf16 %v877_v48  ;;  %v493_v0 = vmax.f32 %v429_v55, 0.0  ;;  %v239_v3 = vadd.f32 %v976_v7, %v168_v57  ;;  %v882_v52 = vld [vmem:[%s1478_s0 + $0x70] sm:$0xff]  }
  0x1c   :  { %556 = vst [vmem:[%s1482_s4 + $0x68] sm:$0xff] %v492_v54  ;;  %v430_v2 = vadd.f32 %v772_v43, %v238_v56  ;;  %v780_v4 = vunpack.c.h.bf16 %v908_v49  ;;  %v170_v6 = vmul.f32 %v651_v60, %v962_v1  ;;  %v655_v9 = vunpack.c.l.bf16 %v878_v58  ;;  %v912_v43 = vld [vmem:[%s1481_s3 + $0x68] sm:$0xff]   ;;  %v913_v57 = vld [vmem:[%s1481_s3 + $0x70] sm:$0xff]  }
  0x1d   :  { %v240_v5 = vadd.f32 %v976_v7, %v169_v59  ;;  %v171_v8 = vmul.f32 %v652_v62, %v962_v1  ;;  %557 = vst [vmem:[%s1482_s4 + $0x70] sm:$0xff] %v493_v0  ;;  %v431_v12 = vadd.f32 %v775_v51, %v239_v3  ;;  %v783_v13 = vunpack.c.l.bf16 %v909_v63  ;;  %v883_v3 = vld [vmem:[%s1478_s0 + $0x78] sm:$0xff]  }
  0x1e   :  { %v494_v11 = vmax.f32 %v430_v2, 0.0  ;;  %v656_v14 = vunpack.c.h.bf16 %v878_v58  ;;  %v241_v16 = vadd.f32 %v976_v7, %v170_v6  ;;  %v172_v18 = vmul.f32 %v655_v9, %v962_v1 }
  0x1f   :  { %v432_v15 = vadd.f32 %v776_v53, %v240_v5  ;;  %v242_v17 = vadd.f32 %v976_v7, %v171_v8  ;;  %v495_v20 = vmax.f32 %v431_v12, 0.0  ;;  %v784_v22 = vunpack.c.h.bf16 %v909_v63 }
  0x20   :  { %558 = vst [vmem:[%s1482_s4 + $0x78] sm:$0xff] %v494_v11  ;;  %v173_v21 = vmul.f32 %v656_v14, %v962_v1  ;;  %v659_v23 = vunpack.c.l.bf16 %v879_v10  ;;  %v433_v25 = vadd.f32 %v779_v61, %v241_v16  ;;  %v243_v27 = vadd.f32 %v976_v7, %v172_v18 }
  0x21   :  { %v496_v24 = vmax.f32 %v432_v15, 0.0  ;;  %v434_v26 = vadd.f32 %v780_v4, %v242_v17  ;;  %559 = vst [vmem:[%s1482_s4 + $0x80] sm:$0xff] %v495_v20  ;;  %v787_v31 = vunpack.c.l.bf16 %v910_v19  ;;  %v660_v32 = vunpack.c.h.bf16 %v879_v10 }
  0x22   :  { %v244_v29 = vadd.f32 %v976_v7, %v173_v21  ;;  %v174_v30 = vmul.f32 %v659_v23, %v962_v1  ;;  %v497_v34 = vmax.f32 %v433_v25, 0.0  ;;  %v435_v36 = vadd.f32 %v783_v13, %v243_v27  ;;  %v914_v13 = vld [vmem:[%s1481_s3 + $0x78] sm:$0xff]   ;;  %v915_v27 = vld [vmem:[%s1481_s3 + $0x80] sm:$0xff]  }
  0x23   :  { %560 = vst [vmem:[%s1482_s4 + $0x88] sm:$0xff] %v496_v24  ;;  %v498_v35 = vmax.f32 %v434_v26, 0.0  ;;  %v788_v37 = vunpack.c.h.bf16 %v910_v19  ;;  %v175_v40 = vmul.f32 %v660_v32, %v962_v1  ;;  %v663_v41 = vunpack.c.l.bf16 %v880_v28 }
  0x24   :  { %v436_v38 = vadd.f32 %v784_v22, %v244_v29  ;;  %v245_v39 = vadd.f32 %v976_v7, %v174_v30  ;;  %561 = vst [vmem:[%s1482_s4 + $0x90] sm:$0xff] %v497_v34  ;;  %v499_v44 = vmax.f32 %v435_v36, 0.0  ;;  %v791_v45 = vunpack.c.l.bf16 %v911_v33  ;;  %v884_v22 = vld [vmem:[%s1478_s0 + $0x80] sm:$0xff]   ;;  %v885_v36 = vld [vmem:[%s1478_s0 + $0x88] sm:$0xff]  }
  0x25   :  { %562 = vst [vmem:[%s1482_s4 + $0x98] sm:$0xff] %v498_v35  ;;  %v664_v46 = vunpack.c.h.bf16 %v880_v28  ;;  %v792_v47 = vunpack.c.h.bf16 %v911_v33  ;;  %v246_v50 = vadd.f32 %v976_v7, %v175_v40  ;;  %v176_v51 = vmul.f32 %v663_v41, %v962_v1 }
  0x26   :  { %v500_v48 = vmax.f32 %v436_v38, 0.0  ;;  %v437_v49 = vadd.f32 %v787_v31, %v245_v39  ;;  %563 = vst [vmem:[%s1482_s4 + $0xa0] sm:$0xff] %v499_v44  ;;  %v667_v54 = vunpack.c.l.bf16 %v881_v42  ;;  %v795_v55 = vunpack.c.l.bf16 %v912_v43 }
  0x27   :  { %v177_v53 = vmul.f32 %v664_v46, %v962_v1  ;;  %v668_v56 = vunpack.c.h.bf16 %v881_v42  ;;  %v438_v59 = vadd.f32 %v788_v37, %v246_v50  ;;  %v247_v60 = vadd.f32 %v976_v7, %v176_v51  ;;  %v916_v37 = vld [vmem:[%s1481_s3 + $0x88] sm:$0xff]   ;;  %v886_v46 = vld [vmem:[%s1478_s0 + $0x90] sm:$0xff]  }
  0x28   :  { %564 = vst [vmem:[%s1482_s4 + $0xa8] sm:$0xff] %v500_v48  ;;  %v501_v58 = vmax.f32 %v437_v49, 0.0  ;;  %v796_v61 = vunpack.c.h.bf16 %v912_v43  ;;  %v178_v63 = vmul.f32 %v667_v54, %v962_v1  ;;  %v671_v2 = vunpack.c.l.bf16 %v882_v52  ;;  %v917_v51 = vld [vmem:[%s1481_s3 + $0x90] sm:$0xff]  }
  0x29   :  { %v248_v62 = vadd.f32 %v976_v7, %v177_v53  ;;  %v179_v0 = vmul.f32 %v668_v56, %v962_v1  ;;  %v502_v4 = vmax.f32 %v438_v59, 0.0  ;;  %v439_v5 = vadd.f32 %v791_v45, %v247_v60  ;;  %v887_v60 = vld [vmem:[%s1478_s0 + $0x98] sm:$0xff]  }
  0x2a   :  { %565 = vst [vmem:[%s1482_s4 + $0xb0] sm:$0xff] %v501_v58  ;;  %v799_v6 = vunpack.c.l.bf16 %v913_v57  ;;  %v672_v8 = vunpack.c.h.bf16 %v882_v52  ;;  %v249_v10 = vadd.f32 %v976_v7, %v178_v63  ;;  %v180_v12 = vmul.f32 %v671_v2, %v962_v1 }
  0x2b   :  { %v440_v9 = vadd.f32 %v792_v47, %v248_v62  ;;  %v250_v11 = vadd.f32 %v976_v7, %v179_v0  ;;  %566 = vst [vmem:[%s1482_s4 + $0xb8] sm:$0xff] %v502_v4  ;;  %v503_v14 = vmax.f32 %v439_v5, 0.0  ;;  %v800_v16 = vunpack.c.h.bf16 %v913_v57 }
  0x2c   :  { %v181_v15 = vmul.f32 %v672_v8, %v962_v1  ;;  %v675_v17 = vunpack.c.l.bf16 %v883_v3  ;;  %v441_v19 = vadd.f32 %v795_v55, %v249_v10  ;;  %v251_v21 = vadd.f32 %v976_v7, %v180_v12 }
  0x2d   :  { %v504_v18 = vmax.f32 %v440_v9, 0.0  ;;  %v442_v20 = vadd.f32 %v796_v61, %v250_v11  ;;  %567 = vst [vmem:[%s1482_s4 + $0xc0] sm:$0xff] %v503_v14  ;;  %v803_v25 = vunpack.c.l.bf16 %v914_v13  ;;  %v676_v26 = vunpack.c.h.bf16 %v883_v3 }
  0x2e   :  { %v252_v23 = vadd.f32 %v976_v7, %v181_v15  ;;  %v182_v24 = vmul.f32 %v675_v17, %v962_v1  ;;  %v505_v28 = vmax.f32 %v441_v19, 0.0  ;;  %v443_v30 = vadd.f32 %v799_v6, %v251_v21  ;;  %v918_v6 = vld [vmem:[%s1481_s3 + $0x98] sm:$0xff]   ;;  %v919_v21 = vld [vmem:[%s1481_s3 + $0xa0] sm:$0xff]  }
  0x2f   :  { %568 = vst [vmem:[%s1482_s4 + $0xc8] sm:$0xff] %v504_v18  ;;  %v506_v29 = vmax.f32 %v442_v20, 0.0  ;;  %v804_v31 = vunpack.c.h.bf16 %v914_v13  ;;  %v183_v34 = vmul.f32 %v676_v26, %v962_v1  ;;  %v679_v35 = vunpack.c.l.bf16 %v884_v22 }
  0x30   :  { %v444_v32 = vadd.f32 %v800_v16, %v252_v23  ;;  %v253_v33 = vadd.f32 %v976_v7, %v182_v24  ;;  %569 = vst [vmem:[%s1482_s4 + $0xd0] sm:$0xff] %v505_v28  ;;  %v507_v38 = vmax.f32 %v443_v30, 0.0  ;;  %v807_v39 = vunpack.c.l.bf16 %v915_v27  ;;  %v888_v16 = vld [vmem:[%s1478_s0 + $0xa0] sm:$0xff]   ;;  %v889_v30 = vld [vmem:[%s1478_s0 + $0xa8] sm:$0xff]  }
  0x31   :  { %570 = vst [vmem:[%s1482_s4 + $0xd8] sm:$0xff] %v506_v29  ;;  %v680_v40 = vunpack.c.h.bf16 %v884_v22  ;;  %v808_v41 = vunpack.c.h.bf16 %v915_v27  ;;  %v254_v44 = vadd.f32 %v976_v7, %v183_v34  ;;  %v184_v45 = vmul.f32 %v679_v35, %v962_v1 }
  0x32   :  { %v508_v42 = vmax.f32 %v444_v32, 0.0  ;;  %v445_v43 = vadd.f32 %v803_v25, %v253_v33  ;;  %571 = vst [vmem:[%s1482_s4 + $0xe0] sm:$0xff] %v507_v38  ;;  %v683_v48 = vunpack.c.l.bf16 %v885_v36  ;;  %v811_v49 = vunpack.c.l.bf16 %v916_v37 }
  0x33   :  { %v185_v47 = vmul.f32 %v680_v40, %v962_v1  ;;  %v684_v50 = vunpack.c.h.bf16 %v885_v36  ;;  %v446_v53 = vadd.f32 %v804_v31, %v254_v44  ;;  %v255_v54 = vadd.f32 %v976_v7, %v184_v45  ;;  %v920_v31 = vld [vmem:[%s1481_s3 + $0xa8] sm:$0xff]   ;;  %v890_v40 = vld [vmem:[%s1478_s0 + $0xb0] sm:$0xff]  }
  0x34   :  { %572 = vst [vmem:[%s1482_s4 + $0xe8] sm:$0xff] %v508_v42  ;;  %v509_v52 = vmax.f32 %v445_v43, 0.0  ;;  %v812_v55 = vunpack.c.h.bf16 %v916_v37  ;;  %v186_v57 = vmul.f32 %v683_v48, %v962_v1  ;;  %v687_v59 = vunpack.c.l.bf16 %v886_v46  ;;  %v921_v45 = vld [vmem:[%s1481_s3 + $0xb0] sm:$0xff]  }
  0x35   :  { %v256_v56 = vadd.f32 %v976_v7, %v185_v47  ;;  %v187_v58 = vmul.f32 %v684_v50, %v962_v1  ;;  %v510_v61 = vmax.f32 %v446_v53, 0.0  ;;  %v447_v62 = vadd.f32 %v807_v39, %v255_v54  ;;  %v891_v54 = vld [vmem:[%s1478_s0 + $0xb8] sm:$0xff]  }
  0x36   :  { %573 = vst [vmem:[%s1482_s4 + $0xf0] sm:$0xff] %v509_v52  ;;  %v815_v63 = vunpack.c.l.bf16 %v917_v51  ;;  %v688_v0 = vunpack.c.h.bf16 %v886_v46  ;;  %v257_v3 = vadd.f32 %v976_v7, %v186_v57  ;;  %v188_v5 = vmul.f32 %v687_v59, %v962_v1 }
  0x37   :  { %v448_v2 = vadd.f32 %v808_v41, %v256_v56  ;;  %v258_v4 = vadd.f32 %v976_v7, %v187_v58  ;;  %574 = vst [vmem:[%s1482_s4 + $0xf8] sm:$0xff] %v510_v61  ;;  %v511_v8 = vmax.f32 %v447_v62, 0.0  ;;  %v816_v10 = vunpack.c.h.bf16 %v917_v51 }
  0x38   :  { %v189_v9 = vmul.f32 %v688_v0, %v962_v1  ;;  %v691_v11 = vunpack.c.l.bf16 %v887_v60  ;;  %v449_v13 = vadd.f32 %v811_v49, %v257_v3  ;;  %v259_v15 = vadd.f32 %v976_v7, %v188_v5 }
  0x39   :  { %v512_v12 = vmax.f32 %v448_v2, 0.0  ;;  %v450_v14 = vadd.f32 %v812_v55, %v258_v4  ;;  %575 = vst [vmem:[%s1482_s4 + $0x100] sm:$0xff] %v511_v8  ;;  %v819_v19 = vunpack.c.l.bf16 %v918_v6  ;;  %v692_v20 = vunpack.c.h.bf16 %v887_v60 }
  0x3a   :  { %v260_v17 = vadd.f32 %v976_v7, %v189_v9  ;;  %v190_v18 = vmul.f32 %v691_v11, %v962_v1  ;;  %v513_v22 = vmax.f32 %v449_v13, 0.0  ;;  %v451_v24 = vadd.f32 %v815_v63, %v259_v15  ;;  %v922_v63 = vld [vmem:[%s1481_s3 + $0xb8] sm:$0xff]   ;;  %v923_v15 = vld [vmem:[%s1481_s3 + $0xc0] sm:$0xff]  }
  0x3b   :  { %576 = vst [vmem:[%s1482_s4 + $0x108] sm:$0xff] %v512_v12  ;;  %v514_v23 = vmax.f32 %v450_v14, 0.0  ;;  %v820_v25 = vunpack.c.h.bf16 %v918_v6  ;;  %v191_v28 = vmul.f32 %v692_v20, %v962_v1  ;;  %v695_v29 = vunpack.c.l.bf16 %v888_v16 }
  0x3c   :  { %v452_v26 = vadd.f32 %v816_v10, %v260_v17  ;;  %v261_v27 = vadd.f32 %v976_v7, %v190_v18  ;;  %577 = vst [vmem:[%s1482_s4 + $0x110] sm:$0xff] %v513_v22  ;;  %v515_v32 = vmax.f32 %v451_v24, 0.0  ;;  %v823_v33 = vunpack.c.l.bf16 %v919_v21  ;;  %v892_v10 = vld [vmem:[%s1478_s0 + $0xc0] sm:$0xff]   ;;  %v893_v24 = vld [vmem:[%s1478_s0 + $0xc8] sm:$0xff]  }
  0x3d   :  { %578 = vst [vmem:[%s1482_s4 + $0x118] sm:$0xff] %v514_v23  ;;  %v696_v34 = vunpack.c.h.bf16 %v888_v16  ;;  %v824_v35 = vunpack.c.h.bf16 %v919_v21  ;;  %v262_v38 = vadd.f32 %v976_v7, %v191_v28  ;;  %v192_v39 = vmul.f32 %v695_v29, %v962_v1 }
  0x3e   :  { %v516_v36 = vmax.f32 %v452_v26, 0.0  ;;  %v453_v37 = vadd.f32 %v819_v19, %v261_v27  ;;  %579 = vst [vmem:[%s1482_s4 + $0x120] sm:$0xff] %v515_v32  ;;  %v699_v42 = vunpack.c.l.bf16 %v889_v30  ;;  %v827_v43 = vunpack.c.l.bf16 %v920_v31 }
  0x3f   :  { %v193_v41 = vmul.f32 %v696_v34, %v962_v1  ;;  %v700_v44 = vunpack.c.h.bf16 %v889_v30  ;;  %v454_v47 = vadd.f32 %v820_v25, %v262_v38  ;;  %v263_v48 = vadd.f32 %v976_v7, %v192_v39  ;;  %v924_v25 = vld [vmem:[%s1481_s3 + $0xc8] sm:$0xff]   ;;  %v894_v34 = vld [vmem:[%s1478_s0 + $0xd0] sm:$0xff]  }
  0x40   :  { %580 = vst [vmem:[%s1482_s4 + $0x128] sm:$0xff] %v516_v36  ;;  %v517_v46 = vmax.f32 %v453_v37, 0.0  ;;  %v828_v49 = vunpack.c.h.bf16 %v920_v31  ;;  %v194_v51 = vmul.f32 %v699_v42, %v962_v1  ;;  %v703_v53 = vunpack.c.l.bf16 %v890_v40  ;;  %v925_v39 = vld [vmem:[%s1481_s3 + $0xd0] sm:$0xff]  }
  0x41   :  { %v264_v50 = vadd.f32 %v976_v7, %v193_v41  ;;  %v195_v52 = vmul.f32 %v700_v44, %v962_v1  ;;  %v518_v55 = vmax.f32 %v454_v47, 0.0  ;;  %v455_v56 = vadd.f32 %v823_v33, %v263_v48  ;;  %v895_v48 = vld [vmem:[%s1478_s0 + $0xd8] sm:$0xff]  }
  0x42   :  { %581 = vst [vmem:[%s1482_s4 + $0x130] sm:$0xff] %v517_v46  ;;  %v831_v57 = vunpack.c.l.bf16 %v921_v45  ;;  %v704_v58 = vunpack.c.h.bf16 %v890_v40  ;;  %v265_v60 = vadd.f32 %v976_v7, %v194_v51  ;;  %v196_v62 = vmul.f32 %v703_v53, %v962_v1 }
  0x43   :  { %v456_v59 = vadd.f32 %v824_v35, %v264_v50  ;;  %v266_v61 = vadd.f32 %v976_v7, %v195_v52  ;;  %582 = vst [vmem:[%s1482_s4 + $0x138] sm:$0xff] %v518_v55  ;;  %v519_v0 = vmax.f32 %v455_v56, 0.0  ;;  %v832_v3 = vunpack.c.h.bf16 %v921_v45 }
  0x44   :  { %v197_v2 = vmul.f32 %v704_v58, %v962_v1  ;;  %v707_v4 = vunpack.c.l.bf16 %v891_v54  ;;  %v457_v6 = vadd.f32 %v827_v43, %v265_v60  ;;  %v267_v9 = vadd.f32 %v976_v7, %v196_v62 }
  0x45   :  { %v520_v5 = vmax.f32 %v456_v59, 0.0  ;;  %v458_v8 = vadd.f32 %v828_v49, %v266_v61  ;;  %583 = vst [vmem:[%s1482_s4 + $0x140] sm:$0xff] %v519_v0  ;;  %v835_v13 = vunpack.c.l.bf16 %v922_v63  ;;  %v708_v14 = vunpack.c.h.bf16 %v891_v54 }
  0x46   :  { %v268_v11 = vadd.f32 %v976_v7, %v197_v2  ;;  %v198_v12 = vmul.f32 %v707_v4, %v962_v1  ;;  %v521_v16 = vmax.f32 %v457_v6, 0.0  ;;  %v459_v18 = vadd.f32 %v831_v57, %v267_v9  ;;  %v926_v57 = vld [vmem:[%s1481_s3 + $0xd8] sm:$0xff]   ;;  %v927_v9 = vld [vmem:[%s1481_s3 + $0xe0] sm:$0xff]  }
  0x47   :  { %584 = vst [vmem:[%s1482_s4 + $0x148] sm:$0xff] %v520_v5  ;;  %v522_v17 = vmax.f32 %v458_v8, 0.0  ;;  %v836_v19 = vunpack.c.h.bf16 %v922_v63  ;;  %v199_v22 = vmul.f32 %v708_v14, %v962_v1  ;;  %v711_v23 = vunpack.c.l.bf16 %v892_v10 }
  0x48   :  { %v460_v20 = vadd.f32 %v832_v3, %v268_v11  ;;  %v269_v21 = vadd.f32 %v976_v7, %v198_v12  ;;  %585 = vst [vmem:[%s1482_s4 + $0x150] sm:$0xff] %v521_v16  ;;  %v523_v26 = vmax.f32 %v459_v18, 0.0  ;;  %v839_v27 = vunpack.c.l.bf16 %v923_v15  ;;  %v896_v3 = vld [vmem:[%s1478_s0 + $0xe0] sm:$0xff]   ;;  %v897_v18 = vld [vmem:[%s1478_s0 + $0xe8] sm:$0xff]  }
  0x49   :  { %586 = vst [vmem:[%s1482_s4 + $0x158] sm:$0xff] %v522_v17  ;;  %v712_v28 = vunpack.c.h.bf16 %v892_v10  ;;  %v840_v29 = vunpack.c.h.bf16 %v923_v15  ;;  %v270_v32 = vadd.f32 %v976_v7, %v199_v22  ;;  %v200_v33 = vmul.f32 %v711_v23, %v962_v1 }
  0x4a   :  { %v524_v30 = vmax.f32 %v460_v20, 0.0  ;;  %v461_v31 = vadd.f32 %v835_v13, %v269_v21  ;;  %587 = vst [vmem:[%s1482_s4 + $0x160] sm:$0xff] %v523_v26  ;;  %v715_v36 = vunpack.c.l.bf16 %v893_v24  ;;  %v843_v37 = vunpack.c.l.bf16 %v924_v25 }
  0x4b   :  { %v201_v35 = vmul.f32 %v712_v28, %v962_v1  ;;  %v716_v38 = vunpack.c.h.bf16 %v893_v24  ;;  %v462_v41 = vadd.f32 %v836_v19, %v270_v32  ;;  %v271_v42 = vadd.f32 %v976_v7, %v200_v33  ;;  %v928_v19 = vld [vmem:[%s1481_s3 + $0xe8] sm:$0xff]   ;;  %v898_v28 = vld [vmem:[%s1478_s0 + $0xf0] sm:$0xff]  }
  0x4c   :  { %588 = vst [vmem:[%s1482_s4 + $0x168] sm:$0xff] %v524_v30  ;;  %v525_v40 = vmax.f32 %v461_v31, 0.0  ;;  %v844_v43 = vunpack.c.h.bf16 %v924_v25  ;;  %v202_v45 = vmul.f32 %v715_v36, %v962_v1  ;;  %v719_v47 = vunpack.c.l.bf16 %v894_v34  ;;  %v929_v33 = vld [vmem:[%s1481_s3 + $0xf0] sm:$0xff]  }
  0x4d   :  { %v272_v44 = vadd.f32 %v976_v7, %v201_v35  ;;  %v203_v46 = vmul.f32 %v716_v38, %v962_v1  ;;  %v526_v49 = vmax.f32 %v462_v41, 0.0  ;;  %v463_v50 = vadd.f32 %v839_v27, %v271_v42  ;;  %v899_v42 = vld [vmem:[%s1478_s0 + $0xf8] sm:$0xff]  }
  0x4e   :  { %589 = vst [vmem:[%s1482_s4 + $0x170] sm:$0xff] %v525_v40  ;;  %v847_v51 = vunpack.c.l.bf16 %v925_v39  ;;  %v720_v52 = vunpack.c.h.bf16 %v894_v34  ;;  %v273_v54 = vadd.f32 %v976_v7, %v202_v45  ;;  %v204_v56 = vmul.f32 %v719_v47, %v962_v1 }
  0x4f   :  { %v464_v53 = vadd.f32 %v840_v29, %v272_v44  ;;  %v274_v55 = vadd.f32 %v976_v7, %v203_v46  ;;  %590 = vst [vmem:[%s1482_s4 + $0x178] sm:$0xff] %v526_v49  ;;  %v527_v58 = vmax.f32 %v463_v50, 0.0  ;;  %v848_v60 = vunpack.c.h.bf16 %v925_v39 }
  0x50   :  { %v205_v59 = vmul.f32 %v720_v52, %v962_v1  ;;  %v723_v61 = vunpack.c.l.bf16 %v895_v48  ;;  %v465_v63 = vadd.f32 %v843_v37, %v273_v54  ;;  %v275_v2 = vadd.f32 %v976_v7, %v204_v56 }
  0x51   :  { %v528_v62 = vmax.f32 %v464_v53, 0.0  ;;  %v466_v0 = vadd.f32 %v844_v43, %v274_v55  ;;  %591 = vst [vmem:[%s1482_s4 + $0x180] sm:$0xff] %v527_v58  ;;  %v851_v6 = vunpack.c.l.bf16 %v926_v57  ;;  %v724_v8 = vunpack.c.h.bf16 %v895_v48 }
  0x52   :  { %v276_v4 = vadd.f32 %v976_v7, %v205_v59  ;;  %v206_v5 = vmul.f32 %v723_v61, %v962_v1  ;;  %v529_v10 = vmax.f32 %v465_v63, 0.0  ;;  %v467_v12 = vadd.f32 %v847_v51, %v275_v2  ;;  %v930_v51 = vld [vmem:[%s1481_s3 + $0xf8] sm:$0xff]  }
  0x53   :  { %592 = vst [vmem:[%s1482_s4 + $0x188] sm:$0xff] %v528_v62  ;;  %v530_v11 = vmax.f32 %v466_v0, 0.0  ;;  %v852_v13 = vunpack.c.h.bf16 %v926_v57  ;;  %v207_v16 = vmul.f32 %v724_v8, %v962_v1  ;;  %v727_v17 = vunpack.c.l.bf16 %v896_v3 }
  0x54   :  { %v468_v14 = vadd.f32 %v848_v60, %v276_v4  ;;  %v277_v15 = vadd.f32 %v976_v7, %v206_v5  ;;  %593 = vst [vmem:[%s1482_s4 + $0x190] sm:$0xff] %v529_v10  ;;  %v531_v20 = vmax.f32 %v467_v12, 0.0  ;;  %v855_v21 = vunpack.c.l.bf16 %v927_v9 }
  0x55   :  { %594 = vst [vmem:[%s1482_s4 + $0x198] sm:$0xff] %v530_v11  ;;  %v728_v22 = vunpack.c.h.bf16 %v896_v3  ;;  %v856_v23 = vunpack.c.h.bf16 %v927_v9  ;;  %v278_v26 = vadd.f32 %v976_v7, %v207_v16  ;;  %v208_v27 = vmul.f32 %v727_v17, %v962_v1 }
  0x56   :  { %v532_v24 = vmax.f32 %v468_v14, 0.0  ;;  %v469_v25 = vadd.f32 %v851_v6, %v277_v15  ;;  %595 = vst [vmem:[%s1482_s4 + $0x1a0] sm:$0xff] %v531_v20  ;;  %v731_v30 = vunpack.c.l.bf16 %v897_v18  ;;  %v859_v31 = vunpack.c.l.bf16 %v928_v19 }
  0x57   :  { %v209_v29 = vmul.f32 %v728_v22, %v962_v1  ;;  %v732_v32 = vunpack.c.h.bf16 %v897_v18  ;;  %v470_v35 = vadd.f32 %v852_v13, %v278_v26  ;;  %v279_v36 = vadd.f32 %v976_v7, %v208_v27 }
  0x58   :  { %596 = vst [vmem:[%s1482_s4 + $0x1a8] sm:$0xff] %v532_v24  ;;  %v533_v34 = vmax.f32 %v469_v25, 0.0  ;;  %v860_v37 = vunpack.c.h.bf16 %v928_v19  ;;  %v210_v39 = vmul.f32 %v731_v30, %v962_v1  ;;  %v735_v41 = vunpack.c.l.bf16 %v898_v28 }
  0x59   :  { %v280_v38 = vadd.f32 %v976_v7, %v209_v29  ;;  %v211_v40 = vmul.f32 %v732_v32, %v962_v1  ;;  %v534_v43 = vmax.f32 %v470_v35, 0.0  ;;  %v471_v44 = vadd.f32 %v855_v21, %v279_v36 }
  0x5a   :  { %597 = vst [vmem:[%s1482_s4 + $0x1b0] sm:$0xff] %v533_v34  ;;  %v863_v45 = vunpack.c.l.bf16 %v929_v33  ;;  %v736_v46 = vunpack.c.h.bf16 %v898_v28  ;;  %v281_v48 = vadd.f32 %v976_v7, %v210_v39  ;;  %v212_v50 = vmul.f32 %v735_v41, %v962_v1 }
  0x5b   :  { %v472_v47 = vadd.f32 %v856_v23, %v280_v38  ;;  %v282_v49 = vadd.f32 %v976_v7, %v211_v40  ;;  %598 = vst [vmem:[%s1482_s4 + $0x1b8] sm:$0xff] %v534_v43  ;;  %v535_v52 = vmax.f32 %v471_v44, 0.0  ;;  %v864_v54 = vunpack.c.h.bf16 %v929_v33 }
  0x5c   :  { %v213_v53 = vmul.f32 %v736_v46, %v962_v1  ;;  %v739_v55 = vunpack.c.l.bf16 %v899_v42  ;;  %v473_v57 = vadd.f32 %v859_v31, %v281_v48  ;;  %v283_v59 = vadd.f32 %v976_v7, %v212_v50 }
  0x5d   :  { %v536_v56 = vmax.f32 %v472_v47, 0.0  ;;  %v474_v58 = vadd.f32 %v860_v37, %v282_v49  ;;  %599 = vst [vmem:[%s1482_s4 + $0x1c0] sm:$0xff] %v535_v52  ;;  %v867_v62 = vunpack.c.l.bf16 %v930_v51  ;;  %v740_v63 = vunpack.c.h.bf16 %v899_v42 }
  0x5e   :  { %v284_v60 = vadd.f32 %v976_v7, %v213_v53  ;;  %v214_v61 = vmul.f32 %v739_v55, %v962_v1  ;;  %v537_v0 = vmax.f32 %v473_v57, 0.0  ;;  %v475_v3 = vadd.f32 %v863_v45, %v283_v59 }
  0x5f   :  { %600 = vst [vmem:[%s1482_s4 + $0x1c8] sm:$0xff] %v536_v56  ;;  %v538_v2 = vmax.f32 %v474_v58, 0.0  ;;  %v215_v6 = vmul.f32 %v740_v63, %v962_v1  ;;  %v868_v8 = vunpack.c.h.bf16 %v930_v51 }
  0x60   :  { %v476_v4 = vadd.f32 %v864_v54, %v284_v60  ;;  %v285_v5 = vadd.f32 %v976_v7, %v214_v61  ;;  %601 = vst [vmem:[%s1482_s4 + $0x1d0] sm:$0xff] %v537_v0  ;;  %v539_v9 = vmax.f32 %v475_v3, 0.0 }
  0x61   :  { %602 = vst [vmem:[%s1482_s4 + $0x1d8] sm:$0xff] %v538_v2  ;;  %v286_v12 = vadd.f32 %v976_v7, %v215_v6 }
  0x62   :  { %v540_v10 = vmax.f32 %v476_v4, 0.0  ;;  %v477_v11 = vadd.f32 %v867_v62, %v285_v5  ;;  %603 = vst [vmem:[%s1482_s4 + $0x1e0] sm:$0xff] %v539_v9 }
  0x63   :  { %v478_v13 = vadd.f32 %v868_v8, %v286_v12 }
  0x64   :  { %604 = vst [vmem:[%s1482_s4 + $0x1e8] sm:$0xff] %v540_v10  ;;  %v541_v1 = vmax.f32 %v477_v11, 0.0 }
  0x65   :  { %v542_v14 = vmax.f32 %v478_v13, 0.0 }
  0x66   :  { %605 = vst [vmem:[%s1482_s4 + $0x1f0] sm:$0xff] %v541_v1 }
  0x67   :  { %606 = vst [vmem:[%s1482_s4 + $0x1f8] sm:$0xff] %v542_v14 }

// kernel: resblock2_forward.4
= control target key start
LH: loop header
LB: loop body
LE: loop exit
PB: predicated region body
PF: predicated region fallthrough
CT: control target
= control target key end

     0   :  { %s7067_s21 = smov 0   ;;  %s8810_s0 = inlined_call_operand.vmem [shape: bf16[2,16,16,128], index: 0, kind: input, shape index: {}]   ;;  %s8811_s1 = inlined_call_operand.vmem [shape: f32[1,128], index: 1, kind: input, shape index: {}]   ;;  %s8812_s2 = inlined_call_operand.vmem [shape: f32[1,128], index: 2, kind: input, shape index: {}]   ;;  %s8813_s3 = inlined_call_operand.vmem [shape: bf16[1152,128], index: 3, kind: input, shape index: {}]   ;;  %s8814_s4 = inlined_call_operand.vmem [shape: bf16[2,16,16,128], index: 4, kind: output, shape index: {0}]   ;;  %s8815_s5 = inlined_call_operand.vmem [shape: f32[2,1,128], index: 5, kind: output, shape index: {1}]   ;;  %s8816_s6 = inlined_call_operand.vmem [shape: f32[2,1,128], index: 6, kind: output, shape index: {2}]  }
   0x1 LB: > { %s5772_s22 = sadd.s32 4294967295, %s7029_s21   ;;  %p5776_p0 = scmp.ge.s32.totalorder %s7029_s21, 1  ;;  %s7029_s21 = sphi %s7067_s21, %s17_s21  }
   0x2   : > { %p217_p1 = scmp.lt.s32.totalorder %s7029_s21, 3 }
   0x4   : > { %p218_p2 = pnand %p5776_p0, %p217_p1 }
   0x6   : > { %221 = sbr.rel (%p218_p2) target bundleno = 672 (0x2a0), region = 36 }
   0xd   : > { %v6898_v0 = vld [vmem:[%s8813_s3 + $0x40] sm:$0xff]   ;;  %v7031_v2 = vmov 0   ;;  %v6900_v3 = vld [vmem:[%s8813_s3 + $0x48] sm:$0xff]   ;;  %v6902_v5 = vld [vmem:[%s8813_s3 + $0x50] sm:$0xff]   ;;  %p253_p3 = scmp.lt.s32.totalorder %s5772_s22, 1  ;;  %vm918_vm3 = vcmask 1043456  }
   0xe   : > { %v6899_v1 = vld [vmem:[%s8813_s3] sm:$0xff]   ;;  %270 = vst [vmem:[#allocation2] sm:$0xf] %v7031_v2  ;;  %271 = vst [vmem:[#allocation2 + $0x4] sm:$0xf] %v7031_v2  ;;  %6353 = vmatprep.subr.bf16.mxu0 %v6898_v0  ;;  %6873 = vmatprep.subr.bf16.mxu1 %v6898_v0  ;;  %v6901_v4 = vld [vmem:[%s8813_s3 + $0x8] sm:$0xff]  }
   0xf   : > { %272 = vst [vmem:[#allocation2 + $0x8] sm:$0x1] %v7031_v2  ;;  %273 = vst [vmem:[#allocation2 + $0xc] sm:$0xf] %v7031_v2  ;;  %6354 = vmatpush3.bf16.msra.mxu0 %v6899_v1  ;;  %6881 = vmatpush3.bf16.msra.mxu1 %v6899_v1  ;;  %v6903_v6 = vld [vmem:[%s8813_s3 + $0x10] sm:$0xff]   ;;  %v6904_v7 = vld [vmem:[%s8813_s3 + $0x58] sm:$0xff]  }
  0x10   : > { %274 = vst [vmem:[#allocation2 + $0x10] sm:$0xf] %v7031_v2  ;;  %275 = vst [vmem:[#allocation2 + $0x14] sm:$0x1] %v7031_v2  ;;  %6355 = vmatprep.subr.bf16.mxu0 %v6900_v3  ;;  %6874 = vmatprep.subr.bf16.mxu1 %v6900_v3  ;;  %s8852_s22 = smov (!%p253_p3, %s5772_s22), 1  ;;  %v6905_v8 = vld [vmem:[%s8813_s3 + $0x18] sm:$0xff]  }
  0x11   : > { %276 = vst [vmem:[#allocation2 + $0x18] sm:$0xf] %v7031_v2  ;;  %277 = vst [vmem:[#allocation2 + $0x1c] sm:$0xf] %v7031_v2  ;;  %v6906_v9 = vld [vmem:[%s8813_s3 + $0x60] sm:$0xff]   ;;  %s6113_s17 = sshll.u32 %s8852_s22, 7  ;;  %s265_s24 = scalar_lea.vmem %s8815_s5, %s8852_s22 }
  0x12   : > { %278 = vst [vmem:[#allocation2 + $0x20] sm:$0x1] %v7031_v2  ;;  %279 = vst [vmem:[#allocation2 + $0x24] sm:$0xf] %v7031_v2  ;;  %v6907_v10 = vld [vmem:[%s8813_s3 + $0x20] sm:$0xff]   ;;  %v6908_v11 = vld [vmem:[%s8813_s3 + $0x68] sm:$0xff]   ;;  %s7120_s26 = scalar_lea.vmem %s8810_s0, %s6113_s17  ;;  %s8740_s23 = scalar_lea.vmem %s8814_s4, %s6113_s17 }
  0x13   : > { %280 = vst [vmem:[#allocation2 + $0x28] sm:$0xf] %v7031_v2  ;;  %281 = vst [vmem:[#allocation2 + $0x2c] sm:$0x1] %v7031_v2  ;;  %6356 = vmatpush3.bf16.msra.mxu0 %v6901_v4  ;;  %6882 = vmatpush3.bf16.msra.mxu1 %v6901_v4  ;;  %vm1227_vm0 = vsmask.f32 3328  ;;  %s268_s28 = scalar_lea.vmem %s8816_s6, %s8852_s22 }
  0x14   : > { %282 = vst [vmem:[#allocation2 + $0x30] sm:$0xf] %v7031_v2  ;;  %283 = vst [vmem:[#allocation2 + $0x34] sm:$0xf] %v7031_v2  ;;  %6357 = vmatprep.subr.bf16.mxu0 %v6902_v5  ;;  %6875 = vmatprep.subr.bf16.mxu1 %v6902_v5  ;;  %vm1228_vm1 = vsmask.f32 7440 }
  0x15   : > { %284 = vst [vmem:[#allocation2 + $0x38] sm:$0x1] %v7031_v2  ;;  %285 = vst [vmem:[#allocation2 + $0x3c] sm:$0xf] %v7031_v2  ;;  %v1179_v12 = vld [vmem:[#allocation2] sm:$0xf] }
  0x16   : > { %286 = vst [vmem:[#allocation2 + $0x40] sm:$0xf] %v7031_v2  ;;  %287 = vst [vmem:[#allocation2 + $0x44] sm:$0x1] %v7031_v2  ;;  %v1180_v13 = vld [vmem:[#allocation2 + $0x4] sm:$0xf] }
  0x17   : > { %288 = vst [vmem:[#allocation2 + $0x48] sm:$0xf] %v7031_v2  ;;  %289 = vst [vmem:[#allocation2 + $0x4c] sm:$0xf] %v7031_v2  ;;  %6358 = vmatpush3.bf16.msra.mxu0 %v6903_v6  ;;  %6883 = vmatpush3.bf16.msra.mxu1 %v6903_v6  ;;  %v1181_v14 = vld [vmem:[#allocation2 + $0x8] sm:$0x1] }
  0x18   : > { %290 = vst [vmem:[#allocation2 + $0x50] sm:$0x1] %v7031_v2  ;;  %291 = vst [vmem:[#allocation2 + $0x54] sm:$0xf] %v7031_v2  ;;  %6359 = vmatprep.subr.bf16.mxu0 %v6904_v7  ;;  %6876 = vmatprep.subr.bf16.mxu1 %v6904_v7  ;;  %v1231_v15 = vshrl.u32 %v1179_v12, 16  ;;  %v1234_v16 = vshll.u32 %v1179_v12, 16 }
  0x19   : > { %292 = vst [vmem:[#allocation2 + $0x58] sm:$0xf] %v7031_v2  ;;  %293 = vst [vmem:[#allocation2 + $0x5c] sm:$0x1] %v7031_v2  ;;  %v6909_v17 = vld [vmem:[%s8813_s3 + $0x28] sm:$0xff]   ;;  %v1240_v18 = vshll.u32 %v1180_v13, 16 }
  0x1a   : > { %294 = vst [vmem:[#allocation2 + $0x60] sm:$0xf] %v7031_v2  ;;  %295 = vst [vmem:[#allocation2 + $0x64] sm:$0xf] %v7031_v2  ;;  %v1244_v19 = vshrl.u32 %v1180_v13, 16  ;;  %v1250_v20 = vshll.u32 %v1181_v14, 16 }
  0x1b   : > { %296 = vst [vmem:[#allocation2 + $0x68] sm:$0x1] %v7031_v2  ;;  %297 = vst [vmem:[#allocation2 + $0x6c] sm:$0xf] %v7031_v2  ;;  %6360 = vmatpush3.bf16.msra.mxu0 %v6905_v8  ;;  %6884 = vmatpush3.bf16.msra.mxu1 %v6905_v8  ;;  %v1233_v21 = vrot.slane %v1231_v15, 4  ;;  %v1236_v22 = vrot.slane %v1234_v16, 5 }
  0x1c   : > { %298 = vst [vmem:[#allocation2 + $0x70] sm:$0xf] %v7031_v2  ;;  %299 = vst [vmem:[#allocation2 + $0x74] sm:$0x1] %v7031_v2  ;;  %6361 = vmatprep.subr.bf16.mxu0 %v6906_v9  ;;  %6877 = vmatprep.subr.bf16.mxu1 %v6906_v9  ;;  %v6180_v23 = vld [vmem:[%s7120_s26] sm:$0xff]   ;;  %v6333_v24 = vld [vmem:[%s7120_s26 + $0x58] sm:$0xff]  }
  0x1d   : > { %300 = vst [vmem:[#allocation2 + $0x78] sm:$0xf] %v7031_v2  ;;  %301 = vst [vmem:[#allocation2 + $0x7c] sm:$0xf] %v7031_v2  ;;  %v6910_v25 = vld [vmem:[%s8813_s3 + $0x70] sm:$0xff]   ;;  %v1242_v26 = vrot.slane %v1240_v18, 5  ;;  %v6181_v28 = vunpack.c.l.bf16 %v6180_v23  ;;  %v1237_v30 = vor.u32 %v1236_v22, %v1233_v21  ;;  %v6182_v31 = vunpack.c.h.bf16 %v6180_v23 }
  0x1e   : > { %302 = vst [vmem:[#allocation2 + $0x80] sm:$0x1] %v7031_v2  ;;  %303 = vst [vmem:[#allocation2 + $0x84] sm:$0xf] %v7031_v2  ;;  %v1246_v27 = vrot.slane %v1244_v19, 4  ;;  %v1252_v35 = vrot.slane %v1250_v20, 5  ;;  %v6225_v37 = vunpack.c.l.bf16 %v6333_v24  ;;  %v6226_v41 = vunpack.c.h.bf16 %v6333_v24 }
  0x1f   : > { %304 = vst [vmem:[#allocation2 + $0x88] sm:$0xf] %v7031_v2  ;;  %305 = vst [vmem:[#allocation2 + $0x8c] sm:$0x1] %v7031_v2  ;;  %6362 = vmatpush3.bf16.msra.mxu0 %v6907_v10  ;;  %6885 = vmatpush3.bf16.msra.mxu1 %v6907_v10  ;;  %v7133_v29 = vld [vmem:[%s8811_s1] ss:$0 sm:$0xff] }
  0x20   : > { %306 = vst [vmem:[#allocation2 + $0x90] sm:$0xf] %v7031_v2  ;;  %307 = vst [vmem:[#allocation2 + $0x94] sm:$0xf] %v7031_v2  ;;  %6363 = vmatprep.subr.bf16.mxu0 %v6908_v11  ;;  %6878 = vmatprep.subr.bf16.mxu1 %v6908_v11  ;;  %v7138_v32 = vld [vmem:[%s8812_s2] ss:$0 sm:$0xff]  ;;  %v1247_v34 = vor.u32 %v1246_v27, %v1242_v26  ;;  %v396_v36 = vmul.f32 %v6181_v28, %v7133_v29 }
  0x21   : > { %308 = vst [vmem:[#allocation2 + $0x98] sm:$0x1] %v7031_v2  ;;  %309 = vst [vmem:[#allocation2 + $0x9c] sm:$0xf] %v7031_v2  ;;  %v6911_v38 = vld [vmem:[%s8813_s3 + $0x30] sm:$0xff]   ;;  %v1238_v39 = vrot.slane %v1237_v30, 4  ;;  %v397_v40 = vmul.f32 %v6182_v31, %v7133_v29  ;;  %v418_v45 = vmul.f32 %v6225_v37, %v7133_v29  ;;  %v419_v48 = vmul.f32 %v6226_v41, %v7133_v29 }
  0x22   : > { %310 = vst [vmem:[#allocation2 + $0xa0] sm:$0xf] %v7031_v2  ;;  %311 = vst [vmem:[#allocation2 + $0xa4] sm:$0x1] %v7031_v2  ;;  %vm594_vm4 = vsmask.f32 256  ;;  %v434_v44 = vadd.f32 %v7138_v32, %v396_v36 }
  0x23   : > { %312 = vst [vmem:[#allocation2 + $0xa8] sm:$0xf] %v7031_v2  ;;  %313 = vst [vmem:[#allocation2 + $0xac] sm:$0xf] %v7031_v2  ;;  %6364 = vmatpush3.bf16.msra.mxu0 %v6909_v17  ;;  %6886 = vmatpush3.bf16.msra.mxu1 %v6909_v17  ;;  %v6912_v42 = vld [vmem:[%s8813_s3 + $0x78] sm:$0xff]   ;;  %v1248_v43 = vrot.slane %v1247_v34, 4  ;;  %v435_v47 = vadd.f32 %v7138_v32, %v397_v40  ;;  %v456_v52 = vadd.f32 %v7138_v32, %v418_v45 }
  0x24   : > { %314 = vst [vmem:[#allocation2 + $0xb0] sm:$0x1] %v7031_v2  ;;  %315 = vst [vmem:[#allocation2 + $0xb4] sm:$0xf] %v7031_v2  ;;  %6365 = vmatprep.subr.bf16.mxu0 %v6910_v25  ;;  %6879 = vmatprep.subr.bf16.mxu1 %v6910_v25  ;;  %vm595_vm5 = vsmask.f32 4368  ;;  %v457_v55 = vadd.f32 %v7138_v32, %v419_v48 }
  0x25   : > { %316 = vst [vmem:[#allocation2 + $0xb8] sm:$0xf] %v7031_v2  ;;  %317 = vst [vmem:[#allocation2 + $0xbc] sm:$0x1] %v7031_v2  ;;  %v6913_v49 = vld [vmem:[%s8813_s3 + $0x38] sm:$0xff]   ;;  %v466_v51 = vmax.f32 %v434_v44, 0.0 }
  0x26   : > { %318 = vst [vmem:[#allocation2 + $0xc0] sm:$0xf] %v7031_v2  ;;  %319 = vst [vmem:[#allocation2 + $0xc4] sm:$0xf] %v7031_v2  ;;  %v467_v54 = vmax.f32 %v435_v47, 0.0  ;;  %v6915_v56 = vld [vmem:[%s8813_s3 + $0xc0] sm:$0xff]  }
  0x27   : > { %320 = vst [vmem:[#allocation2 + $0xc8] sm:$0x1] %v7031_v2  ;;  %321 = vst [vmem:[#allocation2 + $0xcc] sm:$0xf] %v7031_v2  ;;  %6366 = vmatpush3.bf16.msra.mxu0 %v6911_v38  ;;  %6887 = vmatpush3.bf16.msra.mxu1 %v6911_v38  ;;  %v6115_v57 = vpack.c.bf16 %v466_v51, %v466_v51  ;;  %v488_v58 = vmax.f32 %v456_v52, 0.0  ;;  %v6916_v59 = vld [vmem:[%s8813_s3 + $0x140] sm:$0xff]  }
  0x28   : > { %322 = vst [vmem:[#allocation2 + $0xd0] sm:$0xf] %v7031_v2  ;;  %323 = vst [vmem:[#allocation2 + $0xd4] sm:$0x1] %v7031_v2  ;;  %6367 = vmatprep.subr.bf16.mxu0 %v6912_v42  ;;  %6880 = vmatprep.subr.bf16.mxu1 %v6912_v42  ;;  %v6116_v60 = vpack.c.bf16 %v467_v54, %v467_v54  ;;  %vm925_vm6 = vcmask 1040384   ;;  %v489_v61 = vmax.f32 %v457_v55, 0.0 }
  0x29   : > { %vm7142_vm2 = vmor %vm1227_vm0, %vm1228_vm1  ;;  %v6914_v62 = vld [vmem:[#allocation2] sm:$0xff]   ;;  %v598_v63 = vshrl.u32 %v6115_v57, 16  ;;  %v601_v0 = vshll.u32 %v6115_v57, 16  ;;  %vm919_vm7 = vsmask.f32 7938  ;;  %v6137_v1 = vpack.c.bf16 %v488_v58, %v488_v58  ;;  %v6323_v2 = vld [vmem:[%s7120_s26 + $0x8] sm:$0xff]  }
  0x2a   : > { %v1243_v46 = vsel %vm7142_vm2, %v1238_v39, %v1242_v26  ;;  %v1253_v50 = vsel %vm7142_vm2, %v1248_v43, %v1252_v35  ;;  %v606_v3 = vshrl.u32 %v6116_v60, 16  ;;  %v609_v4 = vshll.u32 %v6116_v60, 16  ;;  %v921_v5 = vld [vmem:[#allocation2 + $0xc] sm:$0xf]  ;;  %v6920_v7 = vld [vmem:[%s8813_s3 + $0x100] sm:$0xff]   ;;  %vm7179_vm8 = vmor %vm594_vm4, %vm595_vm5 }
  0x2b   : > { %v5831_v53 = vcombine.low %v1243_v46, %v1253_v50  ;;  %6368 = vmatpush3.bf16.msra.mxu0 %v6913_v49  ;;  %6888 = vmatpush3.bf16.msra.mxu1 %v6913_v49  ;;  %v6138_v6 = vpack.c.bf16 %v489_v61, %v489_v61  ;;  %v6185_v8 = vunpack.c.l.bf16 %v6323_v2  ;;  %v600_v10 = vrot.slane %v598_v63, 7  ;;  %v927_v11 = vld [vmem:[#allocation2 + $0x14] sm:$0x1]  ;;  %vm7185_vm9 = vmand %vm918_vm3, %vm919_vm7  ;;  %v1000_v19 = vld [vmem:[#allocation2 + $0x90] sm:$0xf] }
  0x2c   : > { %v785_v12 = vshrl.u32 %v6137_v1, 16  ;;  %v788_v13 = vshll.u32 %v6137_v1, 16  ;;  %6465 = vmatprep.subr.bf16.mxu1 %v6915_v56  ;;  %6577 = vmatprep.subr.bf16.mxu0 %v6916_v59  ;;  %v6186_v14 = vunpack.c.h.bf16 %v6323_v2  ;;  %v608_v15 = vrot.slane %v606_v3, 7  ;;  %v6334_v21 = vld [vmem:[%s7120_s26 + $0x60] sm:$0xff]   ;;  %vm7193_vm10 = vmand %vm925_vm6, %vm594_vm4  ;;  %v1004_v26 = vld [vmem:[#allocation2 + $0x98] sm:$0x1] }
  0x2d   : > { %4626 = vmatprep.mubr.bf16.mxu0 %v5831_v53  ;;  %v793_v17 = vshrl.u32 %v6138_v6, 16  ;;  %v796_v18 = vshll.u32 %v6138_v6, 16  ;;  %v398_v20 = vmul.f32 %v6185_v8, %v7133_v29  ;;  %v603_v22 = vor.u32 %v601_v0, %v600_v10  ;;  %v6928_v43 = vld [vmem:[%s8813_s3 + $0x148] sm:$0xff]   ;;  %v6324_v52 = vld [vmem:[%s7120_s26 + $0x10] sm:$0xff]  }
  0x2e   : > { %4627 = vmatmul.mubr.bf16.vlgmr.msra.gmra.mrb[0].mxu0 %v6914_v62  ;;  %v604_v23 = vrot.slane %v600_v10, 4  ;;  %v787_v25 = vrot.slane %v785_v12, 7  ;;  %v399_v27 = vmul.f32 %v6186_v14, %v7133_v29  ;;  %v611_v28 = vor.u32 %v609_v4, %v608_v15  ;;  %v6930_v48 = vld [vmem:[%s8813_s3 + $0x108] sm:$0xff]  }
  0x2f   : > { %v613_v30 = vrot.slane %v608_v15, 4  ;;  %v795_v31 = vrot.slane %v793_v17, 7  ;;  %6578 = vmatpush3.bf16.msra.mxu0 %v6920_v7  ;;  %v436_v34 = vadd.f32 %v7138_v32, %v398_v20  ;;  %v922_v35 = vsel %vm7185_vm9, %v603_v22, %v921_v5  ;;  %v6335_v57 = vld [vmem:[%s7120_s26 + $0x68] sm:$0xff]  }
  0x30   : > { %v790_v36 = vor.u32 %v788_v13, %v787_v25  ;;  %v791_v37 = vrot.slane %v787_v25, 4  ;;  %v437_v38 = vadd.f32 %v7138_v32, %v399_v27  ;;  %v612_v39 = vsel %vm7179_vm8, %v604_v23, %v611_v28  ;;  %923 = vst [vmem:[#allocation2 + $0xc] sm:$0xf] %v922_v35  ;;  %6579 = vmatprep.subr.bf16.mxu0 %v6928_v43  ;;  %v934_v43 = vld [vmem:[#allocation2 + $0x20] sm:$0x1] }
  0x31   : > { %v928_v40 = vsel %vm7193_vm10, %v613_v30, %v927_v11  ;;  %v798_v41 = vor.u32 %v796_v18, %v795_v31  ;;  %v800_v42 = vrot.slane %v795_v31, 4  ;;  %924 = vst [vmem:[#allocation2 + $0x10] sm:$0xf] %v612_v39  ;;  %v468_v45 = vmax.f32 %v436_v34, 0.0 }
  0x32   : > { %929 = vst [vmem:[#allocation2 + $0x14] sm:$0x1] %v928_v40  ;;  %v1001_v44 = vsel %vm7185_vm9, %v790_v36, %v1000_v19  ;;  %v469_v46 = vmax.f32 %v437_v38, 0.0  ;;  %v6229_v47 = vunpack.c.l.bf16 %v6334_v21  ;;  %v6230_v51 = vunpack.c.h.bf16 %v6334_v21  ;;  %v930_v38 = vld [vmem:[#allocation2 + $0x18] sm:$0xf] }
  0x33   : > { %v799_v49 = vsel %vm7179_vm8, %v791_v37, %v798_v41  ;;  %1002 = vst [vmem:[#allocation2 + $0x90] sm:$0xf] %v1001_v44  ;;  %v1005_v50 = vsel %vm7193_vm10, %v800_v42, %v1004_v26  ;;  %v6117_v53 = vpack.c.bf16 %v468_v45, %v468_v45  ;;  %6580 = vmatpush3.bf16.msra.mxu0 %v6930_v48  ;;  %v6189_v56 = vunpack.c.l.bf16 %v6324_v52 }
  0x34   : > { %1003 = vst [vmem:[#allocation2 + $0x94] sm:$0xf] %v799_v49  ;;  %1006 = vst [vmem:[#allocation2 + $0x98] sm:$0x1] %v1005_v50  ;;  %v6118_v54 = vpack.c.bf16 %v469_v46, %v469_v46  ;;  %v420_v55 = vmul.f32 %v6229_v47, %v7133_v29  ;;  %v421_v58 = vmul.f32 %v6230_v51, %v7133_v29  ;;  %v6190_v59 = vunpack.c.h.bf16 %v6324_v52 }
  0x35   : > { %v6233_v60 = vunpack.c.l.bf16 %v6335_v57  ;;  %v6234_v61 = vunpack.c.h.bf16 %v6335_v57  ;;  %v615_v62 = vshrl.u32 %v6117_v53, 16  ;;  %v618_v63 = vshll.u32 %v6117_v53, 16 }
  0x36   : > { %v623_v0 = vshrl.u32 %v6118_v54, 16  ;;  %v626_v1 = vshll.u32 %v6118_v54, 16  ;;  %v7223_v2 = vadd.f32 %v7138_v32, %v420_v55  ;;  %v7226_v3 = vadd.f32 %v7138_v32, %v421_v58 }
  0x37   : > { %v400_v4 = vmul.f32 %v6189_v56, %v7133_v29  ;;  %v401_v5 = vmul.f32 %v6190_v59, %v7133_v29  ;;  %v1182_v6 = vld [vmem:[#allocation2 + $0xc] sm:$0xf]  ;;  %v617_v7 = vrot.slane %v615_v62, 7  ;;  %v422_v10 = vmul.f32 %v6233_v60, %v7133_v29 }
  0x38   : > { %v625_v8 = vrot.slane %v623_v0, 7  ;;  %v423_v11 = vmul.f32 %v6234_v61, %v7133_v29  ;;  %v1183_v12 = vld [vmem:[#allocation2 + $0x10] sm:$0xf]  ;;  %v1255_v14 = vshrl.u32 %v1182_v6, 16  ;;  %v1258_v15 = vshll.u32 %v1182_v6, 16 }
  0x39   : > { %v1184_v13 = vld [vmem:[#allocation2 + $0x14] sm:$0x1]  ;;  %v7233_v17 = vadd.f32 %v7138_v32, %v400_v4  ;;  %v7236_v18 = vadd.f32 %v7138_v32, %v401_v5  ;;  %v1264_v19 = vshll.u32 %v1183_v12, 16  ;;  %v1268_v20 = vshrl.u32 %v1183_v12, 16  ;;  %v6917_v61 = vld [vmem:[#allocation2 + $0xc] sm:$0xff]  }
  0x3a   : > { %v1274_v21 = vshll.u32 %v1184_v13, 16  ;;  %v1215_v22 = vld [vmem:[#allocation2 + $0x90] sm:$0xf]  ;;  %v620_v23 = vor.u32 %v618_v63, %v617_v7  ;;  %v1257_v25 = vrot.slane %v1255_v14, 4  ;;  %v1260_v26 = vrot.slane %v1258_v15, 5 }
  0x3b   : > { %v1216_v27 = vld [vmem:[#allocation2 + $0x94] sm:$0xf]  ;;  %v1217_v28 = vld [vmem:[#allocation2 + $0x98] sm:$0x1]  ;;  %v628_v30 = vor.u32 %v626_v1, %v625_v8  ;;  %v7239_v31 = vadd.f32 %v7138_v32, %v422_v10  ;;  %v1266_v34 = vrot.slane %v1264_v19, 5  ;;  %v1270_v35 = vrot.slane %v1268_v20, 4 }
  0x3c   : > { %v1276_v36 = vrot.slane %v1274_v21, 5  ;;  %v1519_v37 = vshrl.u32 %v1215_v22, 16  ;;  %v1261_v39 = vor.u32 %v1260_v26, %v1257_v25  ;;  %v1522_v40 = vshll.u32 %v1215_v22, 16  ;;  %v6938_v14 = vld [vmem:[%s8813_s3 + $0x150] sm:$0xff]   ;;  %v6921_v26 = vld [vmem:[%s8813_s3 + $0xc8] sm:$0xff]  }
  0x3d   : > { %v1528_v41 = vshll.u32 %v1216_v27, 16  ;;  %v1532_v42 = vshrl.u32 %v1216_v27, 16  ;;  %v1271_v44 = vor.u32 %v1270_v35, %v1266_v34  ;;  %v1538_v46 = vshll.u32 %v1217_v28, 16  ;;  %v7275_v20 = vld [vmem:[%s7120_s26 + $0x70] sm:$0xff]   ;;  %6581 = vmatprep.subr.bf16.mxu0 %v6938_v14  ;;  %v1007_v28 = vld [vmem:[#allocation2 + $0x9c] sm:$0xf] }
  0x3e   : > { %v1521_v45 = vrot.slane %v1519_v37, 4  ;;  %v621_v47 = vrot.slane %v617_v7, 4  ;;  %v1262_v48 = vrot.slane %v1261_v39, 4  ;;  %v1524_v49 = vrot.slane %v1522_v40, 5  ;;  %v6918_v7 = vld [vmem:[#allocation2 + $0x90] sm:$0xff]  }
  0x3f   : > { %v1530_v50 = vrot.slane %v1528_v41, 5  ;;  %v1534_v51 = vrot.slane %v1532_v42, 4  ;;  %v1272_v52 = vrot.slane %v1271_v44, 4  ;;  %v1540_v53 = vrot.slane %v1538_v46, 5  ;;  %v6942_v25 = vld [vmem:[%s8813_s3 + $0x110] sm:$0xff]   ;;  %v6922_v46 = vld [vmem:[%s8813_s3 + $0x88] sm:$0xff]  }
  0x40   : > { %v629_v54 = vsel %vm7179_vm8, %v621_v47, %v628_v30  ;;  %v630_v55 = vrot.slane %v625_v8, 4  ;;  %v1267_v56 = vsel %vm7142_vm2, %v1262_v48, %v1266_v34  ;;  %v1525_v57 = vor.u32 %v1524_v49, %v1521_v45  ;;  %v6919_v8 = vld [vmem:[%s8813_s3 + $0x80] sm:$0xff]   ;;  %6582 = vmatpush3.bf16.msra.mxu0 %v6942_v25  ;;  %v941_v14 = vld [vmem:[#allocation2 + $0x2c] sm:$0x1] }
  0x41   : > { %v1535_v58 = vor.u32 %v1534_v51, %v1530_v50  ;;  %v931_v59 = vsel %vm7185_vm9, %v620_v23, %v930_v38  ;;  %933 = vst [vmem:[#allocation2 + $0x1c] sm:$0xf] %v629_v54  ;;  %v1277_v60 = vsel %vm7142_vm2, %v1272_v52, %v1276_v36  ;;  %v490_v63 = vmax.f32 %v7223_v2, 0.0 }
  0x42   : > { %932 = vst [vmem:[#allocation2 + $0x18] sm:$0xf] %v931_v59  ;;  %v935_v62 = vsel %vm7193_vm10, %v630_v55, %v934_v43  ;;  %v491_v0 = vmax.f32 %v7226_v3, 0.0  ;;  %v5832_v1 = vcombine.low %v1267_v56, %v1277_v60  ;;  %v1526_v4 = vrot.slane %v1525_v57, 4  ;;  %v7262_v3 = vld [vmem:[%s7120_s26 + $0x18] sm:$0xff]   ;;  %v6923_v56 = vld [vmem:[%s8813_s3 + $0xd0] sm:$0xff]  }
  0x43   : > { %v1536_v5 = vrot.slane %v1535_v58, 4  ;;  %936 = vst [vmem:[#allocation2 + $0x20] sm:$0x1] %v935_v62  ;;  %v470_v6 = vmax.f32 %v7233_v17, 0.0  ;;  %v6139_v10 = vpack.c.bf16 %v490_v63, %v490_v63  ;;  %v471_v13 = vmax.f32 %v7236_v18, 0.0 }
  0x44   : > { %v6140_v12 = vpack.c.bf16 %v491_v0, %v491_v0  ;;  %v7259_v2 = vadd.f32 %v7138_v32, %v423_v11  ;;  %4634 = vmatprep.mubr.bf16.mxu0 %v5832_v1  ;;  %v1531_v15 = vsel %vm7142_vm2, %v1526_v4, %v1530_v50  ;;  %v492_v18 = vmax.f32 %v7239_v31, 0.0  ;;  %v1011_v43 = vld [vmem:[#allocation2 + $0xa4] sm:$0x1] }
  0x45   : > { %v1541_v17 = vsel %vm7142_vm2, %v1536_v5, %v1540_v53  ;;  %v7271_v19 = vpack.c.bf16 %v470_v6, %v470_v6  ;;  %4635 = vmatmul.mubr.bf16.gmra.mrb[4].mxu0 %v6917_v61  ;;  %v802_v21 = vshrl.u32 %v6139_v10, 16  ;;  %v805_v22 = vshll.u32 %v6139_v10, 16  ;;  %v6926_v61 = vld [vmem:[%s8813_s3 + $0x90] sm:$0xff]   ;;  %v937_v62 = vld [vmem:[#allocation2 + $0x24] sm:$0xf] }
  0x46   : > { %v5843_v11 = vcombine.low %v1531_v15, %v1541_v17  ;;  %v810_v23 = vshrl.u32 %v6140_v12, 16  ;;  %v813_v27 = vshll.u32 %v6140_v12, 16  ;;  %v7283_v30 = vpack.c.bf16 %v471_v13, %v471_v13  ;;  %v6927_v12 = vld [vmem:[%s8813_s3 + $0xd8] sm:$0xff]  }
  0x47   : > { %v632_v31 = vshrl.u32 %v7271_v19, 16  ;;  %v635_v34 = vshll.u32 %v7271_v19, 16  ;;  %v804_v36 = vrot.slane %v802_v21, 7  ;;  %v7287_v38 = vpack.c.bf16 %v492_v18, %v492_v18  ;;  %v6929_v19 = vld [vmem:[%s8813_s3 + $0x98] sm:$0xff]  }
  0x48   : > { %4722 = vmatprep.mubr.bf16.mxu1 %v5843_v11  ;;  %v1186_v35 = vld [vmem:[#allocation2 + $0x1c] sm:$0xf]  ;;  %v812_v37 = vrot.slane %v810_v23, 7  ;;  %v6193_v39 = vunpack.c.l.bf16 %v7262_v3  ;;  %v6194_v44 = vunpack.c.h.bf16 %v7262_v3  ;;  %v6237_v45 = vunpack.c.l.bf16 %v7275_v20 }
  0x49   : > { %4723 = vmatmul.mubr.bf16.vlgmr.msra.gmra.mrb[0].mxu1 %v6918_v7  ;;  %v1185_v40 = vld [vmem:[#allocation2 + $0x18] sm:$0xf]  ;;  %v1288_v41 = vshll.u32 %v1186_v35, 16  ;;  %v1292_v42 = vshrl.u32 %v1186_v35, 16  ;;  %v807_v50 = vor.u32 %v805_v22, %v804_v36  ;;  %v808_v51 = vrot.slane %v804_v36, 4 }
  0x4a   : > { %6466 = vmatpush3.bf16.msra.mxu1 %v6919_v8  ;;  %v1187_v47 = vld [vmem:[#allocation2 + $0x20] sm:$0x1]  ;;  %v1279_v48 = vshrl.u32 %v1185_v40, 16  ;;  %v1282_v49 = vshll.u32 %v1185_v40, 16  ;;  %v815_v55 = vor.u32 %v813_v27, %v812_v37  ;;  %v817_v59 = vrot.slane %v812_v37, 4  ;;  %v6924_v23 = vld [vmem:[#allocation2 + $0x18] sm:$0xff]  }
  0x4b   : > { %6467 = vmatprep.subr.bf16.mxu1 %v6921_v26  ;;  %v1290_v52 = vrot.slane %v1288_v41, 5  ;;  %v1294_v53 = vrot.slane %v1292_v42, 4  ;;  %v1298_v54 = vshll.u32 %v1187_v47, 16  ;;  %v1008_v60 = vsel %vm7185_vm9, %v807_v50, %v1007_v28  ;;  %v1014_v27 = vld [vmem:[#allocation2 + $0xa8] sm:$0xf]  ;;  %v6949_v47 = vld [vmem:[%s8813_s3 + $0x158] sm:$0xff]  }
  0x4c   : > { %v1281_v57 = vrot.slane %v1279_v48, 4  ;;  %v1284_v58 = vrot.slane %v1282_v49, 5  ;;  %v816_v1 = vsel %vm7179_vm8, %v808_v51, %v815_v55  ;;  %1009 = vst [vmem:[#allocation2 + $0x9c] sm:$0xf] %v1008_v60  ;;  %v634_v4 = vrot.slane %v632_v31, 7  ;;  %6583 = vmatprep.subr.bf16.mxu0 %v6949_v47 }
  0x4d   : > { %v1295_v63 = vor.u32 %v1294_v53, %v1290_v52  ;;  %v1300_v0 = vrot.slane %v1298_v54, 5  ;;  %1010 = vst [vmem:[#allocation2 + $0xa0] sm:$0xf] %v816_v1  ;;  %v1012_v6 = vsel %vm7193_vm10, %v817_v59, %v1011_v43  ;;  %v640_v7 = vshrl.u32 %v7283_v30, 16 }
  0x4e   : > { %6468 = vmatpush3.bf16.msra.mxu1 %v6922_v46  ;;  %v1285_v5 = vor.u32 %v1284_v58, %v1281_v57  ;;  %v643_v8 = vshll.u32 %v7283_v30, 16  ;;  %1013 = vst [vmem:[#allocation2 + $0xa4] sm:$0x1] %v1012_v6  ;;  %v637_v13 = vor.u32 %v635_v34, %v634_v4  ;;  %v638_v3 = vrot.slane %v634_v4, 4  ;;  %v6934_v57 = vld [vmem:[%s8813_s3 + $0xa0] sm:$0xff]   ;;  %v6950_v6 = vld [vmem:[%s8813_s3 + $0x118] sm:$0xff]  }
  0x4f   : > { %v1296_v10 = vrot.slane %v1295_v63, 4  ;;  %6469 = vmatprep.subr.bf16.mxu1 %v6923_v56  ;;  %v493_v15 = vmax.f32 %v7259_v2, 0.0  ;;  %v642_v18 = vrot.slane %v640_v7, 7  ;;  %v819_v11 = vshrl.u32 %v7287_v38, 16  ;;  %6584 = vmatpush3.bf16.msra.mxu0 %v6950_v6 }
  0x50   : > { %v1286_v17 = vrot.slane %v1285_v5, 4  ;;  %v822_v21 = vshll.u32 %v7287_v38, 16  ;;  %v938_v25 = vsel %vm7185_vm9, %v637_v13, %v937_v62  ;;  %v402_v2 = vmul.f32 %v6193_v39, %v7133_v29  ;;  %v6931_v38 = vld [vmem:[%s8813_s3 + $0xe0] sm:$0xff]   ;;  %v1018_v5 = vld [vmem:[#allocation2 + $0xb0] sm:$0x1] }
  0x51   : > { %v1301_v22 = vsel %vm7142_vm2, %v1296_v10, %v1300_v0  ;;  %v6142_v26 = vpack.c.bf16 %v493_v15, %v493_v15  ;;  %v645_v30 = vor.u32 %v643_v8, %v642_v18  ;;  %v647_v31 = vrot.slane %v642_v18, 4  ;;  %939 = vst [vmem:[#allocation2 + $0x24] sm:$0xf] %v938_v25  ;;  %v6937_v18 = vld [vmem:[%s8813_s3 + $0xf0] sm:$0xff]  }
  0x52   : > { %v1291_v28 = vsel %vm7142_vm2, %v1286_v17, %v1290_v52  ;;  %6470 = vmatpush3.bf16.msra.mxu1 %v6926_v61  ;;  %v821_v34 = vrot.slane %v819_v11, 7  ;;  %v403_v40 = vmul.f32 %v6194_v44, %v7133_v29  ;;  %v440_v44 = vadd.f32 %v7138_v32, %v402_v2  ;;  %v6935_v61 = vld [vmem:[%s8813_s3 + $0xe8] sm:$0xff]  }
  0x53   : > { %v5833_v35 = vcombine.low %v1291_v28, %v1301_v22  ;;  %6471 = vmatprep.subr.bf16.mxu1 %v6927_v12  ;;  %v827_v36 = vshrl.u32 %v6142_v26, 16  ;;  %v830_v37 = vshll.u32 %v6142_v26, 16  ;;  %v1218_v41 = vld [vmem:[#allocation2 + $0x9c] sm:$0xf]  ;;  %v646_v39 = vsel %vm7179_vm8, %v638_v3, %v645_v30 }
  0x54   : > { %v942_v42 = vsel %vm7193_vm10, %v647_v31, %v941_v14  ;;  %v824_v43 = vor.u32 %v822_v21, %v821_v34  ;;  %v825_v46 = vrot.slane %v821_v34, 4  ;;  %v1219_v48 = vld [vmem:[#allocation2 + $0xa0] sm:$0xf]  ;;  %v1543_v49 = vshrl.u32 %v1218_v41, 16  ;;  %940 = vst [vmem:[#allocation2 + $0x28] sm:$0xf] %v646_v39 }
  0x55   : > { %4642 = vmatprep.mubr.bf16.mxu0 %v5833_v35  ;;  %v1546_v50 = vshll.u32 %v1218_v41, 16  ;;  %943 = vst [vmem:[#allocation2 + $0x2c] sm:$0x1] %v942_v42  ;;  %v441_v51 = vadd.f32 %v7138_v32, %v403_v40  ;;  %v1220_v52 = vld [vmem:[#allocation2 + $0xa4] sm:$0x1]  ;;  %v1552_v53 = vshll.u32 %v1219_v48, 16  ;;  %v6238_v28 = vunpack.c.h.bf16 %v7275_v20 }
  0x56   : > { %v1556_v54 = vshrl.u32 %v1219_v48, 16  ;;  %4643 = vmatmul.mubr.bf16.gmra.mrb[8].mxu0 %v6924_v23  ;;  %6472 = vmatpush3.bf16.msra.mxu1 %v6929_v19  ;;  %v829_v55 = vrot.slane %v827_v36, 7  ;;  %v1015_v56 = vsel %vm7185_vm9, %v824_v43, %v1014_v27  ;;  %v1545_v58 = vrot.slane %v1543_v49, 4  ;;  %v6936_v19 = vld [vmem:[%s8813_s3 + $0xa8] sm:$0xff]   ;;  %v6925_v34 = vld [vmem:[#allocation2 + $0x9c] sm:$0xff]  }
  0x57   : > { %v1548_v59 = vrot.slane %v1546_v50, 5  ;;  %v1562_v60 = vshll.u32 %v1220_v52, 16  ;;  %1016 = vst [vmem:[#allocation2 + $0xa8] sm:$0xf] %v1015_v56  ;;  %6473 = vmatprep.subr.bf16.mxu1 %v6931_v38  ;;  %v472_v62 = vmax.f32 %v440_v44, 0.0  ;;  %v1554_v63 = vrot.slane %v1552_v53, 5 }
  0x58   : > { %v1558_v0 = vrot.slane %v1556_v54, 4  ;;  %v832_v1 = vor.u32 %v830_v37, %v829_v55  ;;  %v834_v4 = vrot.slane %v829_v55, 4  ;;  %v1188_v10 = vld [vmem:[#allocation2 + $0x24] sm:$0xf]  ;;  %v473_v12 = vmax.f32 %v441_v51, 0.0  ;;  %v6941_v38 = vld [vmem:[%s8813_s3 + $0xb0] sm:$0xff]  }
  0x59   : > { %v1549_v7 = vor.u32 %v1548_v59, %v1545_v58  ;;  %v1564_v8 = vrot.slane %v1562_v60, 5  ;;  %v6121_v13 = vpack.c.bf16 %v472_v62, %v472_v62  ;;  %v1303_v14 = vshrl.u32 %v1188_v10, 16  ;;  %v944_v56 = vld [vmem:[#allocation2 + $0x30] sm:$0xf] }
  0x5a   : > { %v1559_v3 = vor.u32 %v1558_v0, %v1554_v63  ;;  %v1306_v15 = vshll.u32 %v1188_v10, 16  ;;  %v833_v17 = vsel %vm7179_vm8, %v825_v46, %v832_v1  ;;  %6474 = vmatpush3.bf16.msra.mxu1 %v6934_v57  ;;  %v1019_v21 = vsel %vm7193_vm10, %v834_v4, %v1018_v5  ;;  %v6944_v5 = vld [vmem:[%s8813_s3 + $0xb8] sm:$0xff]  }
  0x5b   : > { %v1550_v11 = vrot.slane %v1549_v7, 4  ;;  %1017 = vst [vmem:[#allocation2 + $0xac] sm:$0xf] %v833_v17  ;;  %6475 = vmatprep.subr.bf16.mxu1 %v6935_v61  ;;  %v7359_v22 = vpack.c.bf16 %v473_v12, %v473_v12  ;;  %v649_v23 = vshrl.u32 %v6121_v13, 16  ;;  %v1189_v26 = vld [vmem:[#allocation2 + $0x28] sm:$0xf]  ;;  %v424_v30 = vmul.f32 %v6237_v45, %v7133_v29 }
  0x5c   : > { %v1560_v25 = vrot.slane %v1559_v3, 4  ;;  %v1190_v27 = vld [vmem:[#allocation2 + $0x2c] sm:$0x1]  ;;  %v1305_v2 = vrot.slane %v1303_v14, 4  ;;  %1020 = vst [vmem:[#allocation2 + $0xb0] sm:$0x1] %v1019_v21  ;;  %v425_v20 = vmul.f32 %v6238_v28, %v7133_v29 }
  0x5d   : > { %v1555_v31 = vsel %vm7142_vm2, %v1550_v11, %v1554_v63  ;;  %v1308_v35 = vrot.slane %v1306_v15, 5  ;;  %v1312_v36 = vshll.u32 %v1189_v26, 16  ;;  %v1316_v37 = vshrl.u32 %v1189_v26, 16  ;;  %v6943_v45 = vld [vmem:[%s8813_s3 + $0xf8] sm:$0xff]   ;;  %v6946_v3 = vld [vmem:[%s8813_s3 + $0x1c0] sm:$0xff]  }
  0x5e   : > { %v1565_v40 = vsel %vm7142_vm2, %v1560_v25, %v1564_v8  ;;  %v1322_v41 = vshll.u32 %v1190_v27, 16  ;;  %v1221_v39 = vld [vmem:[#allocation2 + $0xa8] sm:$0xf]  ;;  %6476 = vmatpush3.bf16.msra.mxu1 %v6936_v19  ;;  %v651_v42 = vrot.slane %v649_v23, 7  ;;  %vm1790_vm11 = vcmask 1042432  }
  0x5f   : > { %vm1791_vm12 = vcmask 1046532   ;;  %v5844_v43 = vcombine.low %v1555_v31, %v1565_v40  ;;  %v1309_v46 = vor.u32 %v1308_v35, %v1305_v2  ;;  %v1314_v47 = vrot.slane %v1312_v36, 5  ;;  %6477 = vmatprep.subr.bf16.mxu1 %v6937_v18  ;;  %v6932_v8 = vld [vmem:[#allocation2 + $0x24] sm:$0xff]   ;;  %v1694_v28 = vld [vmem:[#allocation2] sm:$0xe] }
  0x60   : > { %v1318_v48 = vrot.slane %v1316_v37, 4  ;;  %v1324_v49 = vrot.slane %v1322_v41, 5  ;;  %v1567_v50 = vshrl.u32 %v1221_v39, 16  ;;  %v1570_v44 = vshll.u32 %v1221_v39, 16  ;;  %vm7401_vm13 = vmor %vm1790_vm11, %vm1791_vm12 }
  0x61   : > { %v652_v51 = vshll.u32 %v6121_v13, 16  ;;  %4730 = vmatprep.mubr.bf16.mxu1 %v5844_v43  ;;  %v1310_v52 = vrot.slane %v1309_v46, 4  ;;  %v655_v54 = vrot.slane %v651_v42, 4  ;;  %v657_v55 = vshrl.u32 %v7359_v22, 16  ;;  %v6326_v13 = vld [vmem:[%s7120_s26 + $0x20] sm:$0xff]  }
  0x62   : > { %v1319_v53 = vor.u32 %v1318_v48, %v1314_v47  ;;  %4731 = vmatmul.mubr.bf16.gmra.mrb[4].mxu1 %v6925_v34  ;;  %v1222_v57 = vld [vmem:[#allocation2 + $0xac] sm:$0xf]  ;;  %v1569_v58 = vrot.slane %v1567_v50, 4  ;;  %v1572_v59 = vrot.slane %v1570_v44, 5  ;;  %v462_v61 = vadd.f32 %v7138_v32, %v424_v30  ;;  %v1695_v30 = vld [vmem:[#allocation2 + $0x4] sm:$0xf] }
  0x63   : > { %v654_v60 = vor.u32 %v652_v51, %v651_v42  ;;  %v1315_v62 = vsel %vm7142_vm2, %v1310_v52, %v1314_v47  ;;  %v1223_v0 = vld [vmem:[#allocation2 + $0xb0] sm:$0x1]  ;;  %v1576_v1 = vshll.u32 %v1222_v57, 16  ;;  %v1580_v4 = vshrl.u32 %v1222_v57, 16  ;;  %6478 = vmatpush3.bf16.msra.mxu1 %v6941_v38  ;;  %v6933_v39 = vld [vmem:[#allocation2 + $0xa8] sm:$0xff]   ;;  %v6954_v46 = vld [vmem:[%s8813_s3 + $0x160] sm:$0xff]  }
  0x64   : > { %v1320_v63 = vrot.slane %v1319_v53, 4  ;;  %v1573_v6 = vor.u32 %v1572_v59, %v1569_v58  ;;  %v1586_v7 = vshll.u32 %v1223_v0, 16  ;;  %v659_v10 = vrot.slane %v657_v55, 7  ;;  %6479 = vmatprep.subr.bf16.mxu1 %v6943_v45  ;;  %v7415_v51 = vld [vmem:[%s8812_s2] ss:$0 sm:$0xff]  ;;  %6585 = vmatprep.subr.bf16.mxu0 %v6954_v46 }
  0x65   : > { %v660_v12 = vshll.u32 %v7359_v22, 16  ;;  %v1578_v15 = vrot.slane %v1576_v1, 5  ;;  %v1582_v17 = vrot.slane %v1580_v4, 4  ;;  %v945_v19 = vsel %vm7185_vm9, %v654_v60, %v944_v56  ;;  %v948_v22 = vld [vmem:[#allocation2 + $0x38] sm:$0x1] }
  0x66   : > { %v1325_v14 = vsel %vm7142_vm2, %v1320_v63, %v1324_v49  ;;  %v1574_v11 = vrot.slane %v1573_v6, 4  ;;  %v1588_v21 = vrot.slane %v1586_v7, 5  ;;  %946 = vst [vmem:[#allocation2 + $0x30] sm:$0xf] %v945_v19  ;;  %v664_v26 = vrot.slane %v659_v10, 4 }
  0x67   : > { %v5834_v18 = vcombine.low %v1315_v62, %v1325_v14  ;;  %v662_v23 = vor.u32 %v660_v12, %v659_v10  ;;  %v1583_v25 = vor.u32 %v1582_v17, %v1578_v15  ;;  %v463_v27 = vadd.f32 %v7138_v32, %v425_v20  ;;  %6480 = vmatpush3.bf16.msra.mxu1 %v6944_v5  ;;  %v1696_v53 = vld [vmem:[#allocation2 + $0x8] sm:$0x1]  ;;  %v1021_v59 = vld [vmem:[#allocation2 + $0xb4] sm:$0xf]  ;;  %v1025_v63 = vld [vmem:[#allocation2 + $0xbc] sm:$0x1] }
  0x68   : > { %v494_v2 = vmax.f32 %v462_v61, 0.0  ;;  %v1579_v31 = vsel %vm7142_vm2, %v1574_v11, %v1578_v15  ;;  %v6197_v35 = vunpack.c.l.bf16 %v6326_v13  ;;  %v6198_v36 = vunpack.c.h.bf16 %v6326_v13  ;;  %6689 = vmatprep.subr.bf16.mxu1 %v6946_v3 }
  0x69   : > { %4650 = vmatprep.mubr.bf16.mxu0 %v5834_v18  ;;  %v663_v34 = vsel %vm7179_vm8, %v655_v54, %v662_v23  ;;  %v1584_v37 = vrot.slane %v1583_v25, 4  ;;  %v949_v32 = vsel %vm7193_vm10, %v664_v26, %v948_v22  ;;  %v495_v38 = vmax.f32 %v463_v27, 0.0  ;;  %v6327_v26 = vld [vmem:[%s7120_s26 + $0x28] sm:$0xff]  }
  0x6a   : > { %4651 = vmatmul.mubr.bf16.gmra.mrb[12].mxu0 %v6932_v8  ;;  %947 = vst [vmem:[#allocation2 + $0x34] sm:$0xf] %v663_v34  ;;  %v6143_v40 = vpack.c.bf16 %v494_v2, %v494_v2  ;;  %950 = vst [vmem:[#allocation2 + $0x38] sm:$0x1] %v949_v32  ;;  %v404_v42 = vmul.f32 %v6197_v35, %v7133_v29  ;;  %v405_v20 = vmul.f32 %v6198_v36, %v7133_v29  ;;  %v6957_v8 = vld [vmem:[%s8813_s3 + $0x120] sm:$0xff]  }
  0x6b   : > { %v5847_v45 = vrot.slane %v1694_v28, 9  ;;  %v1795_v43 = vrot.slane %v1695_v30, 5  ;;  %v1589_v47 = vsel %vm7142_vm2, %v1584_v37, %v1588_v21  ;;  %v6144_v48 = vpack.c.bf16 %v495_v38, %v495_v38  ;;  %6586 = vmatpush3.bf16.msra.mxu0 %v6957_v8  ;;  %v1697_v34 = vld [vmem:[#allocation2 + $0xc] sm:$0xe]  ;;  %v1698_v38 = vld [vmem:[#allocation2 + $0x10] sm:$0xf] }
  0x6c   : > { %v836_v49 = vshrl.u32 %v6143_v40, 16  ;;  %v839_v50 = vshll.u32 %v6143_v40, 16  ;;  %v5845_v44 = vcombine.low %v1579_v31, %v1589_v47  ;;  %v442_v29 = vadd.f32 %v7415_v51, %v404_v42  ;;  %v951_v31 = vld [vmem:[#allocation2 + $0x3c] sm:$0xf] }
  0x6d   : > { %v443_v52 = vadd.f32 %v7415_v51, %v405_v20  ;;  %v7421_v54 = vsel %vm7401_vm13, %v5847_v45, %v1795_v43  ;;  %v1191_v55 = vld [vmem:[#allocation2 + $0x30] sm:$0xf]  ;;  %v844_v57 = vshrl.u32 %v6144_v48, 16  ;;  %v847_v58 = vshll.u32 %v6144_v48, 16  ;;  %v1699_v45 = vld [vmem:[#allocation2 + $0x14] sm:$0x1] }
  0x6e   : > { %v838_v56 = vrot.slane %v836_v49, 7  ;;  %v1797_v60 = vrot.slane %v1795_v43, 4  ;;  %4738 = vmatprep.mubr.bf16.mxu1 %v5845_v44  ;;  %v1327_v61 = vshrl.u32 %v1191_v55, 16  ;;  %v1330_v62 = vshll.u32 %v1191_v55, 16 }
  0x6f   : > { %v474_v0 = vmax.f32 %v442_v29, 0.0  ;;  %v475_v1 = vmax.f32 %v443_v52, 0.0  ;;  %4739 = vmatmul.mubr.bf16.gmra.mrb[8].mxu1 %v6933_v39  ;;  %v846_v6 = vrot.slane %v844_v57, 7  ;;  %v1798_v7 = vrot.slane %v1696_v53, 5  ;;  %v955_v29 = vld [vmem:[#allocation2 + $0x44] sm:$0x1] }
  0x70   : > { %v841_v4 = vor.u32 %v839_v50, %v838_v56  ;;  %v842_v5 = vrot.slane %v838_v56, 4  ;;  %v1329_v12 = vrot.slane %v1327_v61, 4  ;;  %v1332_v13 = vrot.slane %v1330_v62, 5 }
  0x71   : > { %v1192_v10 = vld [vmem:[#allocation2 + $0x34] sm:$0xf]  ;;  %v6123_v3 = vpack.c.bf16 %v474_v0, %v474_v0  ;;  %v6124_v14 = vpack.c.bf16 %v475_v1, %v475_v1  ;;  %v1193_v15 = vld [vmem:[#allocation2 + $0x38] sm:$0x1]  ;;  %v849_v18 = vor.u32 %v847_v58, %v846_v6  ;;  %v851_v11 = vrot.slane %v846_v6, 4  ;;  %v6962_v1 = vld [vmem:[%s8813_s3 + $0x128] sm:$0xff]  }
  0x72   : > { %v1336_v17 = vshll.u32 %v1192_v10, 16  ;;  %v1340_v19 = vshrl.u32 %v1192_v10, 16  ;;  %v1333_v21 = vor.u32 %v1332_v13, %v1329_v12  ;;  %v1346_v23 = vshll.u32 %v1193_v15, 16  ;;  %v6939_v50 = vld [vmem:[#allocation2 + $0x30] sm:$0xff]  }
  0x73   : > { %v1022_v22 = vsel %vm7185_vm9, %v841_v4, %v1021_v59  ;;  %v666_v25 = vshrl.u32 %v6123_v3, 16  ;;  %v850_v28 = vsel %vm7179_vm8, %v842_v5, %v849_v18  ;;  %v1026_v30 = vsel %vm7193_vm10, %v851_v11, %v1025_v63  ;;  %v6961_v59 = vld [vmem:[%s8813_s3 + $0x168] sm:$0xff]   ;;  %v7451_v63 = vld [vmem:[%s8811_s1] ss:$0 sm:$0xff] }
  0x74   : > { %v1338_v27 = vrot.slane %v1336_v17, 5  ;;  %v1342_v2 = vrot.slane %v1340_v19, 4  ;;  %1023 = vst [vmem:[#allocation2 + $0xb4] sm:$0xf] %v1022_v22  ;;  %v1334_v35 = vrot.slane %v1333_v21, 4  ;;  %v1348_v36 = vrot.slane %v1346_v23, 5  ;;  %6587 = vmatprep.subr.bf16.mxu0 %v6961_v59 }
  0x75   : > { %1024 = vst [vmem:[#allocation2 + $0xb8] sm:$0xf] %v850_v28  ;;  %1027 = vst [vmem:[#allocation2 + $0xbc] sm:$0x1] %v1026_v30  ;;  %v668_v37 = vrot.slane %v666_v25, 7  ;;  %v669_v32 = vshll.u32 %v6123_v3, 16  ;;  %v7435_v20 = vsel %vm7401_vm13, %v1797_v60, %v1798_v7  ;;  %v6201_v52 = vunpack.c.l.bf16 %v6327_v26  ;;  %6588 = vmatpush3.bf16.msra.mxu0 %v6962_v1 }
  0x76   : > { %v1343_v40 = vor.u32 %v1342_v2, %v1338_v27  ;;  %v674_v39 = vshrl.u32 %v6124_v14, 16  ;;  %v677_v42 = vshll.u32 %v6124_v14, 16  ;;  %v1339_v43 = vsel %vm7142_vm2, %v1334_v35, %v1338_v27  ;;  %v6328_v21 = vld [vmem:[%s7120_s26 + $0x30] sm:$0xff]   ;;  %v7473_v27 = vld [vmem:[#allocation2 + $0x18] sm:$0xe] }
  0x77   : > { %v671_v46 = vor.u32 %v669_v32, %v668_v37  ;;  %v672_v47 = vrot.slane %v668_v37, 4  ;;  %v5863_v48 = vcombine.low %v7421_v54, %v7435_v20  ;;  %v6202_v53 = vunpack.c.h.bf16 %v6327_v26 }
  0x78   : > { %v1344_v49 = vrot.slane %v1343_v40, 4  ;;  %v676_v44 = vrot.slane %v674_v39, 7  ;;  %v5848_v56 = vrot.slane %v1697_v34, 9  ;;  %v1802_v57 = vrot.slane %v1698_v38, 5 }
  0x79   : > { %v952_v55 = vsel %vm7185_vm9, %v671_v46, %v951_v31  ;;  %v1805_v58 = vrot.slane %v1699_v45, 5  ;;  %v406_v0 = vmul.f32 %v7451_v63, %v6201_v52  ;;  %v407_v6 = vmul.f32 %v7451_v63, %v6202_v53  ;;  %v6968_v52 = vld [vmem:[%s8813_s3 + $0x170] sm:$0xff]  }
  0x7a   : > { %v1349_v60 = vsel %vm7142_vm2, %v1344_v49, %v1348_v36  ;;  %v679_v61 = vor.u32 %v677_v42, %v676_v44  ;;  %v681_v62 = vrot.slane %v676_v44, 4  ;;  %953 = vst [vmem:[#allocation2 + $0x3c] sm:$0xf] %v952_v55  ;;  %v7460_v7 = vsel %vm7401_vm13, %v5848_v56, %v1802_v57  ;;  %6589 = vmatprep.subr.bf16.mxu0 %v6968_v52 }
  0x7b   : > { %v5835_v4 = vcombine.low %v1339_v43, %v1349_v60  ;;  %v1224_v5 = vld [vmem:[#allocation2 + $0xb4] sm:$0xf]  ;;  %v1804_v8 = vrot.slane %v1802_v57, 4  ;;  %v444_v11 = vadd.f32 %v7415_v51, %v406_v0  ;;  %v445_v25 = vadd.f32 %v7415_v51, %v407_v6  ;;  %v1701_v60 = vld [vmem:[#allocation2 + $0x1c] sm:$0xf] }
  0x7c   : > { %v1225_v10 = vld [vmem:[#allocation2 + $0xb8] sm:$0xf]  ;;  %v1226_v12 = vld [vmem:[#allocation2 + $0xbc] sm:$0x1]  ;;  %v1591_v13 = vshrl.u32 %v1224_v5, 16  ;;  %v1594_v3 = vshll.u32 %v1224_v5, 16  ;;  %v680_v14 = vsel %vm7179_vm8, %v672_v47, %v679_v61  ;;  %v956_v15 = vsel %vm7193_vm10, %v681_v62, %v955_v29 }
  0x7d   : > { %4658 = vmatprep.mubr.bf16.mxu0 %v5835_v4  ;;  %v1600_v17 = vshll.u32 %v1225_v10, 16  ;;  %v1604_v19 = vshrl.u32 %v1225_v10, 16  ;;  %v1610_v18 = vshll.u32 %v1226_v12, 16  ;;  %954 = vst [vmem:[#allocation2 + $0x40] sm:$0xf] %v680_v14  ;;  %v7471_v26 = vsel %vm7401_vm13, %v1804_v8, %v1805_v58  ;;  %v6940_v62 = vld [vmem:[#allocation2 + $0xb4] sm:$0xff]  }
  0x7e   : > { %957 = vst [vmem:[#allocation2 + $0x44] sm:$0x1] %v956_v15  ;;  %v1593_v23 = vrot.slane %v1591_v13, 4  ;;  %v1596_v22 = vrot.slane %v1594_v3, 5  ;;  %4659 = vmatmul.mubr.bf16.gmra.mrb[16].mxu0 %v6939_v50  ;;  %v476_v31 = vmax.f32 %v444_v11, 0.0  ;;  %v477_v35 = vmax.f32 %v445_v25, 0.0 }
  0x7f   : > { %v1602_v2 = vrot.slane %v1600_v17, 5  ;;  %v1606_v28 = vrot.slane %v1604_v19, 4  ;;  %v1612_v30 = vrot.slane %v1610_v18, 5  ;;  %v5864_v36 = vcombine.low %v7460_v7, %v7471_v26  ;;  %v958_v5 = vld [vmem:[#allocation2 + $0x48] sm:$0xf]  ;;  %v6945_v10 = vld [vmem:[#allocation2 + $0xc] sm:$0xff]  }
  0x80   : > { %v1597_v34 = vor.u32 %v1596_v22, %v1593_v23  ;;  %v6205_v37 = vunpack.c.l.bf16 %v6328_v21  ;;  %v6125_v40 = vpack.c.bf16 %v476_v31, %v476_v31  ;;  %v6206_v39 = vunpack.c.h.bf16 %v6328_v21  ;;  %v6970_v3 = vld [vmem:[%s8813_s3 + $0x130] sm:$0xff]   ;;  %v1702_v25 = vld [vmem:[#allocation2 + $0x20] sm:$0x1] }
  0x81   : > { %v1607_v32 = vor.u32 %v1606_v28, %v1602_v2  ;;  %v1194_v38 = vld [vmem:[#allocation2 + $0x3c] sm:$0xf]  ;;  %v5849_v42 = vrot.slane %v7473_v27, 9  ;;  %v6126_v47 = vpack.c.bf16 %v477_v35, %v477_v35  ;;  %v962_v18 = vld [vmem:[#allocation2 + $0x50] sm:$0x1]  ;;  %6590 = vmatpush3.bf16.msra.mxu0 %v6970_v3  ;;  %v1812_v52 = vrot.slane %v1702_v25, 5 }
  0x82   : > { %v1598_v45 = vrot.slane %v1597_v34, 4  ;;  %v1351_v43 = vshrl.u32 %v1194_v38, 16  ;;  %v1354_v46 = vshll.u32 %v1194_v38, 16  ;;  %v683_v50 = vshrl.u32 %v6125_v40, 16  ;;  %v1703_v38 = vld [vmem:[#allocation2 + $0x24] sm:$0xe] }
  0x83   : > { %v1608_v49 = vrot.slane %v1607_v32, 4  ;;  %v686_v44 = vshll.u32 %v6125_v40, 16  ;;  %v408_v29 = vmul.f32 %v7451_v63, %v6205_v37  ;;  %v409_v59 = vmul.f32 %v7451_v63, %v6206_v39  ;;  %v6329_v32 = vld [vmem:[%s7120_s26 + $0x38] sm:$0xff]   ;;  %v6958_v25 = vld [vmem:[%s8813_s3 + $0x188] sm:$0xff]  }
  0x84   : > { %v1603_v53 = vsel %vm7142_vm2, %v1598_v45, %v1602_v2  ;;  %v1195_v55 = vld [vmem:[#allocation2 + $0x40] sm:$0xf]  ;;  %v1353_v57 = vrot.slane %v1351_v43, 4  ;;  %v1356_v58 = vrot.slane %v1354_v46, 5  ;;  %v685_v12 = vrot.slane %v683_v50, 7  ;;  %v6975_v46 = vld [vmem:[%s8813_s3 + $0x178] sm:$0xff]  }
  0x85   : > { %v1196_v56 = vld [vmem:[#allocation2 + $0x44] sm:$0x1]  ;;  %v1613_v61 = vsel %vm7142_vm2, %v1608_v49, %v1612_v30  ;;  %v1360_v0 = vshll.u32 %v1195_v55, 16  ;;  %v1364_v1 = vshrl.u32 %v1195_v55, 16  ;;  %v691_v13 = vshrl.u32 %v6126_v47, 16  ;;  %v6947_v55 = vld [vmem:[#allocation2 + $0x3c] sm:$0xff]   ;;  %6591 = vmatprep.subr.bf16.mxu0 %v6975_v46 }
  0x86   : > { %v1370_v4 = vshll.u32 %v1196_v56, 16  ;;  %v5846_v6 = vcombine.low %v1603_v53, %v1613_v61  ;;  %v1357_v8 = vor.u32 %v1356_v58, %v1353_v57  ;;  %v694_v19 = vshll.u32 %v6126_v47, 16  ;;  %v6948_v47 = vld [vmem:[%s8813_s3 + $0x180] sm:$0xff]  }
  0x87   : > { %v1362_v14 = vrot.slane %v1360_v0, 5  ;;  %v1366_v15 = vrot.slane %v1364_v1, 4  ;;  %v688_v21 = vor.u32 %v686_v44, %v685_v12  ;;  %v689_v23 = vrot.slane %v685_v12, 4  ;;  %v6951_v44 = vld [vmem:[#allocation2 + $0x18] sm:$0xff]   ;;  %v7518_v1 = vld [vmem:[%s7120_s26 + $0x40] sm:$0xff]   ;;  %v6955_v12 = vld [vmem:[%s8813_s3 + $0x1c8] sm:$0xff]  }
  0x88   : > { %v1372_v17 = vrot.slane %v1370_v4, 5  ;;  %4746 = vmatprep.mubr.bf16.mxu1 %v5846_v6  ;;  %v1358_v11 = vrot.slane %v1357_v8, 4  ;;  %v693_v22 = vrot.slane %v691_v13, 7  ;;  %v446_v2 = vadd.f32 %v7415_v51, %v408_v29  ;;  %v6976_v4 = vld [vmem:[%s8813_s3 + $0x138] sm:$0xff]  }
  0x89   : > { %4747 = vmatmul.mubr.bf16.gmra.mrb[12].mxu1 %v6940_v62  ;;  %v1367_v27 = vor.u32 %v1366_v15, %v1362_v14  ;;  %v447_v28 = vadd.f32 %v7415_v51, %v409_v59  ;;  %v1809_v30 = vrot.slane %v1701_v60, 5  ;;  %v959_v37 = vsel %vm7185_vm9, %v688_v21, %v958_v5  ;;  %v1705_v59 = vld [vmem:[#allocation2 + $0x2c] sm:$0x1]  ;;  %6592 = vmatpush3.bf16.msra.mxu0 %v6976_v4 }
  0x8a   : > { %v1363_v31 = vsel %vm7142_vm2, %v1358_v11, %v1362_v14  ;;  %4787 = vmatprep.mubr.bf16.mxu1 %v6945_v10  ;;  %v696_v34 = vor.u32 %v694_v19, %v693_v22  ;;  %v698_v35 = vrot.slane %v693_v22, 4  ;;  %960 = vst [vmem:[#allocation2 + $0x48] sm:$0xf] %v959_v37  ;;  %v478_v39 = vmax.f32 %v446_v2, 0.0 }
  0x8b   : > { %v1368_v40 = vrot.slane %v1367_v27, 4  ;;  %v479_v45 = vmax.f32 %v447_v28, 0.0  ;;  %v7499_v43 = vsel %vm7401_vm13, %v5849_v42, %v1809_v30  ;;  %v1811_v29 = vrot.slane %v1809_v30, 4  ;;  %v1704_v42 = vld [vmem:[#allocation2 + $0x28] sm:$0xf] }
  0x8c   : > { %v697_v49 = vsel %vm7179_vm8, %v689_v23, %v696_v34  ;;  %v963_v50 = vsel %vm7193_vm10, %v698_v35, %v962_v18  ;;  %v6127_v56 = vpack.c.bf16 %v478_v39, %v478_v39  ;;  %v6209_v58 = vunpack.c.l.bf16 %v6329_v32  ;;  %v965_v18 = vld [vmem:[#allocation2 + $0x54] sm:$0xf]  ;;  %v6980_v23 = vld [vmem:[%s8813_s3 + $0x200] sm:$0xff]   ;;  %v969_v34 = vld [vmem:[#allocation2 + $0x5c] sm:$0x1] }
  0x8d   : > { %v1373_v53 = vsel %vm7142_vm2, %v1368_v40, %v1372_v17  ;;  %961 = vst [vmem:[#allocation2 + $0x4c] sm:$0xf] %v697_v49  ;;  %964 = vst [vmem:[#allocation2 + $0x50] sm:$0x1] %v963_v50  ;;  %v6128_v57 = vpack.c.bf16 %v479_v45, %v479_v45  ;;  %v7515_v61 = vsel %vm7401_vm13, %v1811_v29, %v1812_v52  ;;  %v6210_v62 = vunpack.c.h.bf16 %v6329_v32  ;;  %v6964_v35 = vld [vmem:[%s8813_s3 + $0x1d0] sm:$0xff]  }
  0x8e   : > { %v5836_v60 = vcombine.low %v1363_v31, %v1373_v53  ;;  %v5850_v0 = vrot.slane %v1703_v38, 9  ;;  %v700_v5 = vshrl.u32 %v6127_v56, 16  ;;  %v703_v6 = vshll.u32 %v6127_v56, 16  ;;  %6825 = vmatprep.subr.bf16.mxu0 %v6980_v23  ;;  %v6966_v29 = vld [vmem:[%s8813_s3 + $0x190] sm:$0xff]   ;;  %v6979_v23 = vld [vmem:[%s8813_s3 + $0x1e0] sm:$0xff]  }
  0x8f   : > { %v708_v8 = vshrl.u32 %v6128_v57, 16  ;;  %v711_v10 = vshll.u32 %v6128_v57, 16  ;;  %v5865_v13 = vcombine.low %v7499_v43, %v7515_v61  ;;  %v410_v3 = vmul.f32 %v7451_v63, %v6209_v58  ;;  %v1706_v56 = vld [vmem:[#allocation2 + $0x30] sm:$0xe]  ;;  %v1708_v43 = vld [vmem:[#allocation2 + $0x38] sm:$0x1] }
  0x90   : > { %4666 = vmatprep.mubr.bf16.mxu0 %v5836_v60  ;;  %v411_v14 = vmul.f32 %v7451_v63, %v6210_v62  ;;  %v1816_v15 = vrot.slane %v1704_v42, 5  ;;  %v702_v17 = vrot.slane %v700_v5, 7  ;;  %v1819_v11 = vrot.slane %v1705_v59, 5  ;;  %v1707_v62 = vld [vmem:[#allocation2 + $0x34] sm:$0xf] }
  0x91   : > { %4667 = vmatmul.mubr.bf16.gmra.mrb[20].mxu0 %v6947_v55  ;;  %4788 = vmatmul.mubr.bf16.vlgmr.msra.gmra.mrb[16].mxu1 %v5863_v48  ;;  %v710_v19 = vrot.slane %v708_v8, 7  ;;  %v6213_v21 = vunpack.c.l.bf16 %v7518_v1  ;;  %v1197_v22 = vld [vmem:[#allocation2 + $0x48] sm:$0xf]  ;;  %v448_v54 = vadd.f32 %v7415_v51, %v410_v3  ;;  %v6214_v39 = vunpack.c.h.bf16 %v7518_v1  ;;  %v6989_v61 = vld [vmem:[%s8813_s3 + $0x1f0] sm:$0xff]  }
  0x92   : > { %6690 = vmatpush3.bf16.msra.mxu1 %v6948_v47  ;;  %4795 = vmatprep.mubr.bf16.mxu1 %v6951_v44  ;;  %v449_v20 = vadd.f32 %v7415_v51, %v411_v14  ;;  %v7544_v48 = vsel %vm7401_vm13, %v5850_v0, %v1816_v15  ;;  %v1818_v27 = vrot.slane %v1816_v15, 4  ;;  %v1375_v2 = vshrl.u32 %v1197_v22, 16  ;;  %v6953_v44 = vld [vmem:[#allocation2 + $0x24] sm:$0xff]   ;;  %v6972_v0 = vld [vmem:[%s8813_s3 + $0x1d8] sm:$0xff]  }
  0x93   : > { %v1378_v28 = vshll.u32 %v1197_v22, 16  ;;  %v705_v30 = vor.u32 %v703_v6, %v702_v17  ;;  %v706_v31 = vrot.slane %v702_v17, 4  ;;  %6691 = vmatprep.subr.bf16.mxu1 %v6955_v12  ;;  %v713_v38 = vor.u32 %v711_v10, %v710_v19  ;;  %v6974_v14 = vld [vmem:[%s8813_s3 + $0x198] sm:$0xff]  }
  0x94   : > { %v1198_v37 = vld [vmem:[#allocation2 + $0x4c] sm:$0xf]  ;;  %v1199_v32 = vld [vmem:[#allocation2 + $0x50] sm:$0x1]  ;;  %v7551_v40 = vsel %vm7401_vm13, %v1818_v27, %v1819_v11  ;;  %v412_v45 = vmul.f32 %v7451_v63, %v6213_v21  ;;  %v1377_v46 = vrot.slane %v1375_v2, 4  ;;  %v715_v53 = vrot.slane %v710_v19, 4 }
  0x95   : > { %v1380_v47 = vrot.slane %v1378_v28, 5  ;;  %v1384_v49 = vshll.u32 %v1198_v37, 16  ;;  %v1388_v50 = vshrl.u32 %v1198_v37, 16  ;;  %v1394_v52 = vshll.u32 %v1199_v32, 16  ;;  %v7580_v21 = vld [vmem:[%s7120_s26 + $0x48] sm:$0xff]   ;;  %v6981_v37 = vld [vmem:[%s8813_s3 + $0x1a0] sm:$0xff]  }
  0x96   : > { %v714_v42 = vsel %vm7179_vm8, %v706_v31, %v713_v38  ;;  %v966_v55 = vsel %vm7185_vm9, %v705_v30, %v965_v18  ;;  %6692 = vmatpush3.bf16.msra.mxu1 %v6958_v25  ;;  %v480_v60 = vmax.f32 %v448_v54, 0.0  ;;  %v970_v4 = vsel %vm7193_vm10, %v715_v53, %v969_v34  ;;  %v6959_v54 = vld [vmem:[#allocation2 + $0x30] sm:$0xff]   ;;  %v6952_v28 = vld [vmem:[#allocation2 + $0x48] sm:$0xff]   ;;  %v972_v31 = vld [vmem:[#allocation2 + $0x60] sm:$0xf] }
  0x97   : > { %v1381_v57 = vor.u32 %v1380_v47, %v1377_v46  ;;  %v1386_v58 = vrot.slane %v1384_v49, 5  ;;  %v1390_v59 = vrot.slane %v1388_v50, 4  ;;  %967 = vst [vmem:[#allocation2 + $0x54] sm:$0xf] %v966_v55  ;;  %968 = vst [vmem:[#allocation2 + $0x58] sm:$0xf] %v714_v42  ;;  %6693 = vmatprep.subr.bf16.mxu1 %v6964_v35  ;;  %v5866_v6 = vcombine.low %v7544_v48, %v7551_v40 }
  0x98   : > { %v1396_v1 = vrot.slane %v1394_v52, 5  ;;  %v481_v5 = vmax.f32 %v449_v20, 0.0  ;;  %971 = vst [vmem:[#allocation2 + $0x5c] sm:$0x1] %v970_v4  ;;  %v6129_v12 = vpack.c.bf16 %v480_v60, %v480_v60  ;;  %v413_v3 = vmul.f32 %v7451_v63, %v6214_v39  ;;  %v6984_v32 = vld [vmem:[%s8813_s3 + $0x1e8] sm:$0xff]  }
  0x99   : > { %v1382_v8 = vrot.slane %v1381_v57, 4  ;;  %v1391_v10 = vor.u32 %v1390_v59, %v1386_v58  ;;  %4796 = vmatmul.mubr.bf16.gmra.mrb[20].mxu1 %v5864_v36  ;;  %v450_v17 = vadd.f32 %v7415_v51, %v412_v45  ;;  %v5851_v19 = vrot.slane %v1706_v56, 9  ;;  %v976_v42 = vld [vmem:[#allocation2 + $0x68] sm:$0x1] }
  0x9a   : > { %4803 = vmatprep.mubr.bf16.mxu1 %v6953_v44  ;;  %v6130_v15 = vpack.c.bf16 %v481_v5, %v481_v5  ;;  %v1823_v18 = vrot.slane %v1707_v62, 5  ;;  %6694 = vmatpush3.bf16.msra.mxu1 %v6966_v29  ;;  %v717_v36 = vshrl.u32 %v6129_v12, 16  ;;  %v720_v11 = vshll.u32 %v6129_v12, 16 }
  0x9b   : > { %v1387_v7 = vsel %vm7142_vm2, %v1382_v8, %v1386_v58  ;;  %v1392_v26 = vrot.slane %v1391_v10, 4  ;;  %6695 = vmatprep.subr.bf16.mxu1 %v6972_v0  ;;  %v451_v20 = vadd.f32 %v7415_v51, %v413_v3  ;;  %v482_v27 = vmax.f32 %v450_v17, 0.0  ;;  %v6986_v10 = vld [vmem:[%s8813_s3 + $0x1a8] sm:$0xff]  }
  0x9c   : > { %v725_v22 = vshrl.u32 %v6130_v15, 16  ;;  %v728_v25 = vshll.u32 %v6130_v15, 16  ;;  %v719_v30 = vrot.slane %v717_v36, 7  ;;  %v7590_v34 = vsel %vm7401_vm13, %v5851_v19, %v1823_v18 }
  0x9d   : > { %v1397_v2 = vsel %vm7142_vm2, %v1392_v26, %v1396_v1  ;;  %v7592_v35 = vrot.slane %v1823_v18, 4  ;;  %v6131_v46 = vpack.c.bf16 %v482_v27, %v482_v27  ;;  %v6217_v47 = vunpack.c.l.bf16 %v7580_v21 }
  0x9e   : > { %v5837_v38 = vcombine.low %v1387_v7, %v1397_v2  ;;  %v1200_v39 = vld [vmem:[#allocation2 + $0x54] sm:$0xf]  ;;  %v1201_v45 = vld [vmem:[#allocation2 + $0x58] sm:$0xf]  ;;  %v6218_v49 = vunpack.c.h.bf16 %v7580_v21  ;;  %6696 = vmatpush3.bf16.msra.mxu1 %v6974_v14  ;;  %v722_v55 = vor.u32 %v720_v11, %v719_v30  ;;  %v723_v56 = vrot.slane %v719_v30, 4 }
  0x9f   : > { %v1399_v50 = vshrl.u32 %v1200_v39, 16  ;;  %v1402_v44 = vshll.u32 %v1200_v39, 16  ;;  %v1408_v29 = vshll.u32 %v1201_v45, 16  ;;  %v1412_v52 = vshrl.u32 %v1201_v45, 16  ;;  %6697 = vmatprep.subr.bf16.mxu1 %v6979_v23  ;;  %v1202_v53 = vld [vmem:[#allocation2 + $0x5c] sm:$0x1] }
  0xa0   : > { %4674 = vmatprep.mubr.bf16.mxu0 %v5837_v38  ;;  %v727_v57 = vrot.slane %v725_v22, 7  ;;  %v483_v58 = vmax.f32 %v451_v20, 0.0  ;;  %v1418_v1 = vshll.u32 %v1202_v53, 16  ;;  %v973_v8 = vsel %vm7185_vm9, %v722_v55, %v972_v31  ;;  %v979_v7 = vld [vmem:[#allocation2 + $0x6c] sm:$0xf]  ;;  %v6963_v23 = vld [vmem:[#allocation2 + $0x3c] sm:$0xff]  }
  0xa1   : > { %4675 = vmatmul.mubr.bf16.gmra.mrb[24].mxu0 %v6952_v28  ;;  %v1401_v59 = vrot.slane %v1399_v50, 4  ;;  %v1404_v60 = vrot.slane %v1402_v44, 5  ;;  %v1410_v62 = vrot.slane %v1408_v29, 5  ;;  %v1414_v0 = vrot.slane %v1412_v52, 4  ;;  %4804 = vmatmul.mubr.bf16.gmra.mrb[24].mxu1 %v5865_v13  ;;  %974 = vst [vmem:[#allocation2 + $0x60] sm:$0xf] %v973_v8 }
  0xa2   : > { %v730_v4 = vor.u32 %v728_v25, %v727_v57  ;;  %v732_v5 = vrot.slane %v727_v57, 4  ;;  %4811 = vmatprep.mubr.bf16.mxu1 %v6959_v54  ;;  %6698 = vmatpush3.bf16.msra.mxu1 %v6981_v37  ;;  %v6132_v14 = vpack.c.bf16 %v483_v58, %v483_v58  ;;  %v734_v15 = vshrl.u32 %v6131_v46, 16  ;;  %v7618_v22 = vld [vmem:[%s7120_s26 + $0x50] sm:$0xff]   ;;  %v1709_v2 = vld [vmem:[#allocation2 + $0x3c] sm:$0xe] }
  0xa3   : > { %v1405_v12 = vor.u32 %v1404_v60, %v1401_v59  ;;  %v1415_v3 = vor.u32 %v1414_v0, %v1410_v62  ;;  %6699 = vmatprep.subr.bf16.mxu1 %v6984_v32  ;;  %v1420_v13 = vrot.slane %v1418_v1, 5  ;;  %v737_v18 = vshll.u32 %v6131_v46, 16  ;;  %v7622_v28 = vld [vmem:[#allocation2 + $0x40] sm:$0xf]  ;;  %v6956_v37 = vld [vmem:[#allocation2 + $0x54] sm:$0xff]  }
  0xa4   : > { %v731_v17 = vsel %vm7179_vm8, %v723_v56, %v730_v4  ;;  %v977_v19 = vsel %vm7193_vm10, %v732_v5, %v976_v42  ;;  %v736_v11 = vrot.slane %v734_v15, 7  ;;  %v742_v21 = vshrl.u32 %v6132_v14, 16  ;;  %v6991_v39 = vld [vmem:[%s8813_s3 + $0x1b0] sm:$0xff]  }
  0xa5   : > { %v1406_v26 = vrot.slane %v1405_v12, 4  ;;  %v1416_v36 = vrot.slane %v1415_v3, 4  ;;  %975 = vst [vmem:[#allocation2 + $0x64] sm:$0xf] %v731_v17  ;;  %978 = vst [vmem:[#allocation2 + $0x68] sm:$0x1] %v977_v19  ;;  %v414_v20 = vmul.f32 %v7451_v63, %v6217_v47  ;;  %v415_v27 = vmul.f32 %v7451_v63, %v6218_v49 }
  0xa6   : > { %v745_v25 = vshll.u32 %v6132_v14, 16  ;;  %v1826_v54 = vrot.slane %v1708_v43, 5  ;;  %6700 = vmatpush3.bf16.msra.mxu1 %v6986_v10  ;;  %v739_v32 = vor.u32 %v737_v18, %v736_v11  ;;  %v740_v38 = vrot.slane %v736_v11, 4  ;;  %v983_v44 = vld [vmem:[#allocation2 + $0x74] sm:$0x1]  ;;  %v6967_v10 = vld [vmem:[#allocation2 + $0x48] sm:$0xff]  }
  0xa7   : > { %v1411_v30 = vsel %vm7142_vm2, %v1406_v26, %v1410_v62  ;;  %v1421_v31 = vsel %vm7142_vm2, %v1416_v36, %v1420_v13  ;;  %6701 = vmatprep.subr.bf16.mxu1 %v6989_v61  ;;  %v744_v46 = vrot.slane %v742_v21, 7  ;;  %v452_v49 = vadd.f32 %v7415_v51, %v414_v20  ;;  %v6994_v43 = vld [vmem:[%s8813_s3 + $0x1f8] sm:$0xff]   ;;  %v1711_v21 = vld [vmem:[#allocation2 + $0x44] sm:$0x1] }
  0xa8   : > { %v5838_v45 = vcombine.low %v1411_v30, %v1421_v31  ;;  %v1827_v47 = vsel %vm7401_vm13, %v7592_v35, %v1826_v54  ;;  %v980_v50 = vsel %vm7185_vm9, %v739_v32, %v979_v7  ;;  %v453_v52 = vadd.f32 %v7415_v51, %v415_v27  ;;  %v1203_v53 = vld [vmem:[#allocation2 + $0x60] sm:$0xf]  ;;  %v986_v19 = vld [vmem:[#allocation2 + $0x78] sm:$0xf] }
  0xa9   : > { %4812 = vmatmul.mubr.bf16.gmra.mrb[28].mxu1 %v5866_v6  ;;  %v5867_v29 = vcombine.low %v7590_v34, %v1827_v47  ;;  %v5852_v42 = vrot.slane %v1709_v2, 9  ;;  %v747_v55 = vor.u32 %v745_v25, %v744_v46  ;;  %v749_v56 = vrot.slane %v744_v46, 4  ;;  %981 = vst [vmem:[#allocation2 + $0x6c] sm:$0xf] %v980_v50 }
  0xaa   : > { %4682 = vmatprep.mubr.bf16.mxu0 %v5838_v45  ;;  %4819 = vmatprep.mubr.bf16.mxu1 %v6963_v23  ;;  %v484_v35 = vmax.f32 %v452_v49, 0.0  ;;  %v6221_v57 = vunpack.c.l.bf16 %v7618_v22  ;;  %v1423_v48 = vshrl.u32 %v1203_v53, 16  ;;  %v1426_v40 = vshll.u32 %v1203_v53, 16  ;;  %v6996_v45 = vld [vmem:[%s8813_s3 + $0x1b8] sm:$0xff]  }
  0xab   : > { %4683 = vmatmul.mubr.bf16.gmra.mrb[28].mxu0 %v6956_v37  ;;  %v485_v6 = vmax.f32 %v453_v52, 0.0  ;;  %v1830_v58 = vrot.slane %v7622_v28, 5  ;;  %6702 = vmatpush3.bf16.msra.mxu1 %v6991_v39  ;;  %v748_v51 = vsel %vm7179_vm8, %v740_v38, %v747_v55  ;;  %v984_v60 = vsel %vm7193_vm10, %v749_v56, %v983_v44  ;;  %v990_v38 = vld [vmem:[#allocation2 + $0x80] sm:$0x1]  ;;  %v1712_v52 = vld [vmem:[#allocation2 + $0x48] sm:$0xe] }
  0xac   : > { %v1204_v34 = vld [vmem:[#allocation2 + $0x64] sm:$0xf]  ;;  %v1205_v59 = vld [vmem:[#allocation2 + $0x68] sm:$0x1]  ;;  %v6133_v62 = vpack.c.bf16 %v484_v35, %v484_v35  ;;  %v6222_v0 = vunpack.c.h.bf16 %v7618_v22  ;;  %v1425_v1 = vrot.slane %v1423_v48, 4  ;;  %v1428_v4 = vrot.slane %v1426_v40, 5  ;;  %6703 = vmatprep.subr.bf16.mxu1 %v6994_v43 }
  0xad   : > { %v1432_v5 = vshll.u32 %v1204_v34, 16  ;;  %v1436_v8 = vshrl.u32 %v1204_v34, 16  ;;  %982 = vst [vmem:[#allocation2 + $0x70] sm:$0xf] %v748_v51  ;;  %985 = vst [vmem:[#allocation2 + $0x74] sm:$0x1] %v984_v60  ;;  %v6134_v3 = vpack.c.bf16 %v485_v6, %v485_v6  ;;  %v7654_v18 = vsel %vm7401_vm13, %v5852_v42, %v1830_v58 }
  0xae   : > { %v1442_v12 = vshll.u32 %v1205_v59, 16  ;;  %v751_v14 = vshrl.u32 %v6133_v62, 16  ;;  %v754_v15 = vshll.u32 %v6133_v62, 16  ;;  %v1429_v61 = vor.u32 %v1428_v4, %v1425_v1  ;;  %v6960_v53 = vld [vmem:[#allocation2 + $0x60] sm:$0xff]   ;;  %v1714_v48 = vld [vmem:[#allocation2 + $0x50] sm:$0x1] }
  0xaf   : > { %v1434_v13 = vrot.slane %v1432_v5, 5  ;;  %v1438_v17 = vrot.slane %v1436_v8, 4  ;;  %v759_v36 = vshrl.u32 %v6134_v3, 16  ;;  %v762_v11 = vshll.u32 %v6134_v3, 16  ;;  %6704 = vmatpush3.bf16.msra.mxu1 %v6996_v45  ;;  %v2641_v59 = vld [vmem:[#allocation2 + $0xc] sm:$0xe] }
  0xb0   : > { %v1444_v7 = vrot.slane %v1442_v12, 5  ;;  %v753_v26 = vrot.slane %v751_v14, 7  ;;  %v1430_v23 = vrot.slane %v1429_v61, 4  ;;  %v1206_v25 = vld [vmem:[#allocation2 + $0x6c] sm:$0xf]  ;;  %v1832_v54 = vrot.slane %v1830_v58, 4 }
  0xb1   : > { %v1439_v22 = vor.u32 %v1438_v17, %v1434_v13  ;;  %4820 = vmatmul.mubr.bf16.gmra.mrb[32].mxu1 %v5867_v29  ;;  %v416_v20 = vmul.f32 %v7451_v63, %v6221_v57  ;;  %v1447_v27 = vshrl.u32 %v1206_v25, 16  ;;  %v1450_v2 = vshll.u32 %v1206_v25, 16  ;;  %v1713_v57 = vld [vmem:[#allocation2 + $0x4c] sm:$0xf]  ;;  %v6971_v1 = vld [vmem:[#allocation2 + $0x54] sm:$0xff]  }
  0xb2   : > { %v756_v28 = vor.u32 %v754_v15, %v753_v26  ;;  %v757_v30 = vrot.slane %v753_v26, 4  ;;  %4827 = vmatprep.mubr.bf16.mxu1 %v6967_v10  ;;  %v1435_v31 = vsel %vm7142_vm2, %v1430_v23, %v1434_v13  ;;  %v761_v32 = vrot.slane %v759_v36, 7  ;;  %v2642_v12 = vld [vmem:[#allocation2 + $0x10] sm:$0xf]  ;;  %v7677_v14 = vld [vmem:[%s8812_s2] ss:$0 sm:$0xff] }
  0xb3   : > { %v1440_v37 = vrot.slane %v1439_v22, 4  ;;  %v1833_v39 = vrot.slane %v1711_v21, 5  ;;  %v1449_v49 = vrot.slane %v1447_v27, 4  ;;  %v1452_v50 = vrot.slane %v1450_v2, 5  ;;  %v7681_v13 = vld [vmem:[#allocation2 + $0x14] sm:$0x1] }
  0xb4   : > { %v1207_v46 = vld [vmem:[#allocation2 + $0x70] sm:$0xf]  ;;  %v1208_v47 = vld [vmem:[#allocation2 + $0x74] sm:$0x1]  ;;  %v987_v44 = vsel %vm7185_vm9, %v756_v28, %v986_v19  ;;  %v417_v29 = vmul.f32 %v7451_v63, %v6222_v0  ;;  %v764_v58 = vor.u32 %v762_v11, %v761_v32  ;;  %v766_v34 = vrot.slane %v761_v32, 4  ;;  %v7686_v23 = vld [vmem:[%s7120_s26 + $0x78] sm:$0xff]  }
  0xb5   : > { %v1445_v42 = vsel %vm7142_vm2, %v1440_v37, %v1444_v7  ;;  %v1456_v55 = vshll.u32 %v1207_v46, 16  ;;  %v1460_v56 = vshrl.u32 %v1207_v46, 16  ;;  %v1466_v35 = vshll.u32 %v1208_v47, 16  ;;  %988 = vst [vmem:[#allocation2 + $0x78] sm:$0xf] %v987_v44  ;;  %v6965_v2 = vld [vmem:[#allocation2 + $0x6c] sm:$0xff]  }
  0xb6   : > { %v5839_v40 = vcombine.low %v1435_v31, %v1445_v42  ;;  %v1453_v6 = vor.u32 %v1452_v50, %v1449_v49  ;;  %v1834_v0 = vsel %vm7401_vm13, %v1832_v54, %v1833_v39  ;;  %v765_v5 = vsel %vm7179_vm8, %v757_v30, %v764_v58  ;;  %v6977_v50 = vld [vmem:[#allocation2 + $0x60] sm:$0xff]  }
  0xb7   : > { %v1458_v51 = vrot.slane %v1456_v55, 5  ;;  %v1462_v60 = vrot.slane %v1460_v56, 4  ;;  %v1468_v62 = vrot.slane %v1466_v35, 5  ;;  %v991_v8 = vsel %vm7193_vm10, %v766_v34, %v990_v38  ;;  %989 = vst [vmem:[#allocation2 + $0x7c] sm:$0xf] %v765_v5 }
  0xb8   : > { %4690 = vmatprep.mubr.bf16.mxu0 %v5839_v40  ;;  %v1454_v4 = vrot.slane %v1453_v6, 4  ;;  %v5868_v10 = vcombine.low %v7654_v18, %v1834_v0  ;;  %992 = vst [vmem:[#allocation2 + $0x80] sm:$0x1] %v991_v8  ;;  %v454_v15 = vadd.f32 %v7677_v14, %v416_v20  ;;  %v455_v43 = vadd.f32 %v7677_v14, %v417_v29  ;;  %v993_v40 = vld [vmem:[#allocation2 + $0x84] sm:$0xf] }
  0xb9   : > { %4691 = vmatmul.mubr.bf16.gmra.mrb[32].mxu0 %v6960_v53  ;;  %v1463_v3 = vor.u32 %v1462_v60, %v1458_v51  ;;  %v5853_v61 = vrot.slane %v1712_v52, 9  ;;  %v1837_v19 = vrot.slane %v1713_v57, 5  ;;  %v1840_v18 = vrot.slane %v1714_v48, 5  ;;  %v1715_v53 = vld [vmem:[#allocation2 + $0x54] sm:$0xe] }
  0xba   : > { %v1459_v17 = vsel %vm7142_vm2, %v1454_v4, %v1458_v51  ;;  %4828 = vmatmul.mubr.bf16.gmra.mrb[36].mxu1 %v5868_v10  ;;  %v5911_v7 = vrot.slane %v2641_v59, 9  ;;  %v486_v36 = vmax.f32 %v454_v15, 0.0  ;;  %v487_v11 = vmax.f32 %v455_v43, 0.0  ;;  %v1716_v51 = vld [vmem:[#allocation2 + $0x58] sm:$0xf] }
  0xbb   : > { %v1464_v26 = vrot.slane %v1463_v3, 4  ;;  %4835 = vmatprep.mubr.bf16.mxu1 %v6971_v1  ;;  %v2739_v21 = vrot.slane %v2642_v12, 5  ;;  %v1838_v25 = vsel %vm7401_vm13, %v5853_v61, %v1837_v19  ;;  %v1839_v54 = vrot.slane %v1837_v19, 4  ;;  %v2129_v60 = vld [vmem:[#allocation2 + $0xc] sm:$0xf] }
  0xbc   : > { %v1209_v22 = vld [vmem:[#allocation2 + $0x78] sm:$0xf]  ;;  %v2742_v20 = vrot.slane %v7681_v13, 5  ;;  %v6135_v31 = vpack.c.bf16 %v486_v36, %v486_v36  ;;  %v6136_v32 = vpack.c.bf16 %v487_v11, %v487_v11  ;;  %v6241_v39 = vunpack.c.l.bf16 %v7686_v23  ;;  %v997_v4 = vld [vmem:[#allocation2 + $0x8c] sm:$0x1] }
  0xbd   : > { %v1469_v27 = vsel %vm7142_vm2, %v1464_v26, %v1468_v62  ;;  %v1471_v28 = vshrl.u32 %v1209_v22, 16  ;;  %v1474_v30 = vshll.u32 %v1209_v22, 16  ;;  %v1841_v38 = vsel %vm7401_vm13, %v1839_v54, %v1840_v18  ;;  %v1717_v5 = vld [vmem:[#allocation2 + $0x5c] sm:$0x1]  ;;  %v2130_v43 = vld [vmem:[#allocation2 + $0x10] sm:$0xf] }
  0xbe   : > { %v5840_v37 = vcombine.low %v1459_v17, %v1469_v27  ;;  %v768_v47 = vshrl.u32 %v6135_v31, 16  ;;  %v771_v49 = vshll.u32 %v6135_v31, 16  ;;  %v1210_v44 = vld [vmem:[#allocation2 + $0x7c] sm:$0xf]  ;;  %v5869_v52 = vcombine.low %v1838_v25, %v1841_v38  ;;  %v2131_v18 = vld [vmem:[#allocation2 + $0x14] sm:$0x1] }
  0xbf   : > { %v1473_v45 = vrot.slane %v1471_v28, 4  ;;  %v1476_v46 = vrot.slane %v1474_v30, 5  ;;  %v1211_v29 = vld [vmem:[#allocation2 + $0x80] sm:$0x1]  ;;  %v7698_v42 = vsel %vm7401_vm13, %v5911_v7, %v2739_v21  ;;  %v6242_v55 = vunpack.c.h.bf16 %v7686_v23  ;;  %v2644_v11 = vld [vmem:[#allocation2 + $0x18] sm:$0xe] }
  0xc0   : > { %4698 = vmatprep.mubr.bf16.mxu0 %v5840_v37  ;;  %v1480_v35 = vshll.u32 %v1210_v44, 16  ;;  %v1484_v57 = vshrl.u32 %v1210_v44, 16  ;;  %v1490_v48 = vshll.u32 %v1211_v29, 16  ;;  %v770_v6 = vrot.slane %v768_v47, 7  ;;  %v2645_v27 = vld [vmem:[#allocation2 + $0x1c] sm:$0xf] }
  0xc1   : > { %4699 = vmatmul.mubr.bf16.gmra.mrb[36].mxu0 %v6965_v2  ;;  %v1477_v56 = vor.u32 %v1476_v46, %v1473_v45  ;;  %v776_v58 = vshrl.u32 %v6136_v32, 16  ;;  %v779_v34 = vshll.u32 %v6136_v32, 16  ;;  %v2741_v59 = vrot.slane %v2739_v21, 4  ;;  %v2646_v2 = vld [vmem:[#allocation2 + $0x20] sm:$0x1] }
  0xc2   : > { %4836 = vmatmul.mubr.bf16.gmra.mrb[40].mxu1 %v5869_v52  ;;  %v1482_v0 = vrot.slane %v1480_v35, 5  ;;  %v1486_v1 = vrot.slane %v1484_v57, 4  ;;  %v7702_v8 = vmul.f32 %v7451_v63, %v6241_v39  ;;  %v1492_v10 = vrot.slane %v1490_v48, 5  ;;  %v1718_v37 = vld [vmem:[#allocation2 + $0x60] sm:$0xe]  ;;  %v6969_v39 = vld [vmem:[#allocation2 + $0x78] sm:$0xff]  }
  0xc3   : > { %v1478_v62 = vrot.slane %v1477_v56, 4  ;;  %4843 = vmatprep.mubr.bf16.mxu1 %v6977_v50  ;;  %v773_v12 = vor.u32 %v771_v49, %v770_v6  ;;  %v774_v3 = vrot.slane %v770_v6, 4  ;;  %v778_v15 = vrot.slane %v776_v58, 7  ;;  %v1719_v32 = vld [vmem:[#allocation2 + $0x64] sm:$0xf] }
  0xc4   : > { %v1487_v13 = vor.u32 %v1486_v1, %v1482_v0  ;;  %v7708_v17 = vsel %vm7401_vm13, %v2741_v59, %v2742_v20  ;;  %v5854_v19 = vrot.slane %v1715_v53, 9  ;;  %v1844_v36 = vrot.slane %v1716_v51, 5  ;;  %v1720_v49 = vld [vmem:[#allocation2 + $0x68] sm:$0x1]  ;;  %v6978_v53 = vld [vmem:[#allocation2 + $0x6c] sm:$0xff]  }
  0xc5   : > { %v1483_v61 = vsel %vm7142_vm2, %v1478_v62, %v1482_v0  ;;  %v781_v7 = vor.u32 %v779_v34, %v778_v15  ;;  %v783_v26 = vrot.slane %v778_v15, 4  ;;  %v994_v63 = vsel %vm7185_vm9, %v773_v12, %v993_v40  ;;  %v2132_v56 = vld [vmem:[#allocation2 + $0x18] sm:$0xf] }
  0xc6   : > { %v1488_v21 = vrot.slane %v1487_v13, 4  ;;  %995 = vst [vmem:[#allocation2 + $0x84] sm:$0xf] %v994_v63  ;;  %v1847_v22 = vrot.slane %v1717_v5, 5  ;;  %v2178_v25 = vshrl.u32 %v2129_v60, 16  ;;  %v2181_v54 = vshll.u32 %v2129_v60, 16 }
  0xc7   : > { %v782_v20 = vsel %vm7179_vm8, %v774_v3, %v781_v7  ;;  %v998_v28 = vsel %vm7193_vm10, %v783_v26, %v997_v4  ;;  %v1845_v30 = vsel %vm7401_vm13, %v5854_v19, %v1844_v36  ;;  %v1846_v31 = vrot.slane %v1844_v36, 4  ;;  %v7021_v26 = vld [vmem:[%s8811_s1] ss:$0 sm:$0xff]  ;;  %v2156_v9 = vld [vmem:[#allocation2 + $0x78] sm:$0xf] }
  0xc8   : > { %v1493_v38 = vsel %vm7142_vm2, %v1488_v21, %v1492_v10  ;;  %996 = vst [vmem:[#allocation2 + $0x88] sm:$0xf] %v782_v20  ;;  %999 = vst [vmem:[#allocation2 + $0x8c] sm:$0x1] %v998_v28  ;;  %v2180_v45 = vrot.slane %v2178_v25, 4  ;;  %v2183_v46 = vrot.slane %v2181_v54, 5  ;;  %v5927_v6 = vcombine.low %v7698_v42, %v7708_v17 }
  0xc9   : > { %v2187_v47 = vshll.u32 %v2130_v43, 16  ;;  %v5841_v50 = vcombine.low %v1483_v61, %v1493_v38  ;;  %v1848_v44 = vsel %vm7401_vm13, %v1846_v31, %v1847_v22  ;;  %v2191_v29 = vshrl.u32 %v2130_v43, 16  ;;  %v2133_v54 = vld [vmem:[#allocation2 + $0x1c] sm:$0xf] }
  0xca   : > { %v2197_v52 = vshll.u32 %v2131_v18, 16  ;;  %v5870_v35 = vcombine.low %v1845_v30, %v1848_v44  ;;  %v2184_v57 = vor.u32 %v2183_v46, %v2180_v45  ;;  %v5912_v40 = vrot.slane %v2644_v11, 9  ;;  %v6982_v46 = vld [vmem:[#allocation2 + $0x78] sm:$0xff]  }
  0xcb   : > { %v2189_v48 = vrot.slane %v2187_v47, 5  ;;  %4706 = vmatprep.mubr.bf16.mxu0 %v5841_v50  ;;  %v2193_v58 = vrot.slane %v2191_v29, 4  ;;  %v2746_v34 = vrot.slane %v2645_v27, 5  ;;  %v2749_v59 = vrot.slane %v2646_v2, 5  ;;  %v2134_v27 = vld [vmem:[#allocation2 + $0x20] sm:$0x1] }
  0xcc   : > { %4707 = vmatmul.mubr.bf16.gmra.mrb[40].mxu0 %v6969_v39  ;;  %4844 = vmatmul.mubr.bf16.gmra.mrb[44].mxu1 %v5870_v35  ;;  %v2185_v51 = vrot.slane %v2184_v57, 4  ;;  %v2199_v60 = vrot.slane %v2197_v52, 5  ;;  %v5855_v62 = vrot.slane %v1718_v37, 9  ;;  %v1851_v0 = vrot.slane %v1719_v32, 5  ;;  %v2647_v32 = vld [vmem:[#allocation2 + $0x24] sm:$0xe] }
  0xcd   : > { %v1212_v1 = vld [vmem:[#allocation2 + $0x84] sm:$0xf]  ;;  %v2194_v4 = vor.u32 %v2193_v58, %v2189_v48  ;;  %4851 = vmatprep.mubr.bf16.mxu1 %v6978_v53  ;;  %v7726_v5 = vsel %vm7401_vm13, %v5912_v40, %v2746_v34  ;;  %v2748_v10 = vrot.slane %v2746_v34, 4  ;;  %v1854_v12 = vrot.slane %v1720_v49, 5  ;;  %v2648_v47 = vld [vmem:[#allocation2 + $0x28] sm:$0xf] }
  0xce   : > { %v1495_v3 = vshrl.u32 %v1212_v1, 16  ;;  %v1498_v15 = vshll.u32 %v1212_v1, 16  ;;  %v2190_v43 = vsel %vm7142_vm2, %v2185_v51, %v2189_v48  ;;  %v2202_v61 = vshrl.u32 %v2132_v56, 16  ;;  %v2649_v52 = vld [vmem:[#allocation2 + $0x2c] sm:$0x1] }
  0xcf   : > { %v1213_v13 = vld [vmem:[#allocation2 + $0x88] sm:$0xf]  ;;  %v1214_v19 = vld [vmem:[#allocation2 + $0x8c] sm:$0x1]  ;;  %v7732_v18 = vsel %vm7401_vm13, %v2748_v10, %v2749_v59  ;;  %v1852_v7 = vsel %vm7401_vm13, %v5855_v62, %v1851_v0  ;;  %v7741_v63 = vmul.f32 %v7021_v26, %v6242_v55  ;;  %v7745_v36 = vadd.f32 %v7677_v14, %v7702_v8  ;;  %v1721_v53 = vld [vmem:[#allocation2 + $0x6c] sm:$0xe] }
  0xd0   : > { %v1497_v11 = vrot.slane %v1495_v3, 4  ;;  %v1500_v21 = vrot.slane %v1498_v15, 5  ;;  %v1504_v22 = vshll.u32 %v1213_v13, 16  ;;  %v1508_v25 = vshrl.u32 %v1213_v13, 16  ;;  %v1722_v58 = vld [vmem:[#allocation2 + $0x70] sm:$0xf] }
  0xd1   : > { %v1514_v2 = vshll.u32 %v1214_v19, 16  ;;  %v2195_v20 = vrot.slane %v2194_v4, 4  ;;  %v5928_v28 = vcombine.low %v7726_v5, %v7732_v18  ;;  %v1853_v30 = vrot.slane %v1851_v0, 4  ;;  %v1723_v34 = vld [vmem:[#allocation2 + $0x74] sm:$0x1]  ;;  %v6973_v15 = vld [vmem:[#allocation2 + $0x84] sm:$0xff]  }
  0xd2   : > { %v1501_v31 = vor.u32 %v1500_v21, %v1497_v11  ;;  %v1506_v23 = vrot.slane %v1504_v22, 5  ;;  %v1510_v55 = vrot.slane %v1508_v25, 4  ;;  %v2204_v37 = vrot.slane %v2202_v61, 4  ;;  %v2135_v62 = vld [vmem:[#allocation2 + $0x24] sm:$0xf] }
  0xd3   : > { %v1516_v38 = vrot.slane %v1514_v2, 5  ;;  %v2200_v8 = vsel %vm7142_vm2, %v2195_v20, %v2199_v60  ;;  %v1855_v39 = vsel %vm7401_vm13, %v1853_v30, %v1854_v12  ;;  %v2205_v45 = vshll.u32 %v2132_v56, 16  ;;  %v2136_v12 = vld [vmem:[#allocation2 + $0x28] sm:$0xf]  ;;  %v2137_v21 = vld [vmem:[#allocation2 + $0x2c] sm:$0x1] }
  0xd4   : > { %v1502_v49 = vrot.slane %v1501_v31, 4  ;;  %v1511_v50 = vor.u32 %v1510_v55, %v1506_v23  ;;  %v7753_v44 = vcombine.low %v2190_v43, %v2200_v8  ;;  %v5871_v29 = vcombine.low %v1852_v7, %v1855_v39  ;;  %v2650_v22 = vld [vmem:[#allocation2 + $0x30] sm:$0xe]  ;;  %v2651_v55 = vld [vmem:[#allocation2 + $0x34] sm:$0xf] }
  0xd5   : > { %v2207_v35 = vrot.slane %v2205_v45, 5  ;;  %v2211_v57 = vshll.u32 %v2133_v54, 16  ;;  %v2215_v48 = vshrl.u32 %v2133_v54, 16  ;;  %v2221_v40 = vshll.u32 %v2134_v27, 16 }
  0xd6   : > { %v1507_v59 = vsel %vm7142_vm2, %v1502_v49, %v1506_v23  ;;  %v1512_v51 = vrot.slane %v1511_v50, 4  ;;  %4852 = vmatmul.mubr.bf16.gmra.mrb[48].mxu1 %v5871_v29  ;;  %v5913_v56 = vrot.slane %v2647_v32, 9  ;;  %v2753_v60 = vrot.slane %v2648_v47, 5  ;;  %v1724_v32 = vld [vmem:[#allocation2 + $0x78] sm:$0xe] }
  0xd7   : > { %v2208_v0 = vor.u32 %v2207_v35, %v2204_v37  ;;  %v2213_v1 = vrot.slane %v2211_v57, 5  ;;  %v2217_v4 = vrot.slane %v2215_v48, 4  ;;  %v2223_v10 = vrot.slane %v2221_v40, 5  ;;  %4859 = vmatprep.mubr.bf16.mxu1 %v6982_v46  ;;  %v2652_v37 = vld [vmem:[#allocation2 + $0x38] sm:$0x1]  ;;  %v6983_v48 = vld [vmem:[#allocation2 + $0x84] sm:$0xff]  }
  0xd8   : > { %v1517_v3 = vsel %vm7142_vm2, %v1512_v51, %v1516_v38  ;;  %v7761_v43 = vsel %vm7401_vm13, %v5913_v56, %v2753_v60  ;;  %v2755_v61 = vrot.slane %v2753_v60, 4  ;;  %v2756_v13 = vrot.slane %v2649_v52, 5  ;;  %v1725_v38 = vld [vmem:[#allocation2 + $0x7c] sm:$0xf]  ;;  %v1726_v52 = vld [vmem:[#allocation2 + $0x80] sm:$0x1] }
  0xd9   : > { %v5842_v19 = vcombine.low %v1507_v59, %v1517_v3  ;;  %v2209_v7 = vrot.slane %v2208_v0, 4  ;;  %v2218_v26 = vor.u32 %v2217_v4, %v2213_v1  ;;  %v5856_v11 = vrot.slane %v1721_v53, 9  ;;  %v6985_v4 = vld [vmem:[%s8813_s3 + $0x208] sm:$0xff]  }
  0xda   : > { %v7765_v25 = vsel %vm7401_vm13, %v2755_v61, %v2756_v13  ;;  %v1858_v54 = vrot.slane %v1722_v58, 5  ;;  %v1861_v27 = vrot.slane %v1723_v34, 5  ;;  %v2226_v2 = vshrl.u32 %v2135_v62, 16  ;;  %v2138_v58 = vld [vmem:[#allocation2 + $0x30] sm:$0xf] }
  0xdb   : > { %4714 = vmatprep.mubr.bf16.mxu0 %v5842_v19  ;;  %v2214_v20 = vsel %vm7142_vm2, %v2209_v7, %v2213_v1  ;;  %v2219_v30 = vrot.slane %v2218_v26, 4  ;;  %v5929_v31 = vcombine.low %v7761_v43, %v7765_v25  ;;  %v2229_v23 = vshll.u32 %v2135_v62, 16  ;;  %v2139_v62 = vld [vmem:[#allocation2 + $0x34] sm:$0xf]  ;;  %v2653_v7 = vld [vmem:[#allocation2 + $0x3c] sm:$0xe] }
  0xdc   : > { %4715 = vmatmul.mubr.bf16.gmra.mrb[44].mxu0 %v6973_v15  ;;  %v1859_v8 = vsel %vm7401_vm13, %v5856_v11, %v1858_v54  ;;  %v1860_v39 = vrot.slane %v1858_v54, 4  ;;  %v2228_v45 = vrot.slane %v2226_v2, 4  ;;  %v2235_v46 = vshll.u32 %v2136_v12, 16 }
  0xdd   : > { %4948 = vmatprep.mubr.bf16.mxu0 %v5927_v6  ;;  %v2224_v47 = vsel %vm7142_vm2, %v2219_v30, %v2223_v10  ;;  %v2231_v49 = vrot.slane %v2229_v23, 5  ;;  %v2239_v50 = vshrl.u32 %v2136_v12, 16  ;;  %v2245_v29 = vshll.u32 %v2137_v21, 16  ;;  %v2140_v12 = vld [vmem:[#allocation2 + $0x38] sm:$0x1] }
  0xde   : > { %v7778_v53 = vcombine.low %v2214_v20, %v2224_v47  ;;  %v1862_v35 = vsel %vm7401_vm13, %v1860_v39, %v1861_v27  ;;  %v2237_v57 = vrot.slane %v2235_v46, 5  ;;  %v5914_v40 = vrot.slane %v2650_v22, 9  ;;  %v2654_v30 = vld [vmem:[#allocation2 + $0x40] sm:$0xf]  ;;  %v2655_v23 = vld [vmem:[#allocation2 + $0x44] sm:$0x1] }
  0xdf   : > { %v5872_v34 = vcombine.low %v1859_v8, %v1862_v35  ;;  %v2232_v59 = vor.u32 %v2231_v49, %v2228_v45  ;;  %v2241_v42 = vrot.slane %v2239_v50, 4  ;;  %v2247_v17 = vrot.slane %v2245_v29, 5  ;;  %v6987_v8 = vld [vmem:[#allocation2 + $0x90] sm:$0xff]   ;;  %v1727_v39 = vld [vmem:[#allocation2 + $0x84] sm:$0xe] }
  0xe0   : > { %v2760_v6 = vrot.slane %v2651_v55, 5  ;;  %v2763_v51 = vrot.slane %v2652_v37, 5  ;;  %v5857_v56 = vrot.slane %v1724_v32, 9  ;;  %v1865_v60 = vrot.slane %v1725_v38, 5  ;;  %v7022_v55 = vld [vmem:[%s8813_s3 + $0x200] sm:$0xff]   ;;  %v6990_v49 = vld [vmem:[%s8813_s3 + $0x210] sm:$0xff]  }
  0xe1   : > { %4860 = vmatmul.mubr.bf16.gmra.mrb[52].mxu1 %v5872_v34  ;;  %v2233_v0 = vrot.slane %v2232_v59, 4  ;;  %v2242_v1 = vor.u32 %v2241_v42, %v2237_v57  ;;  %v1868_v10 = vrot.slane %v1726_v52, 5  ;;  %v2250_v3 = vshrl.u32 %v2138_v58, 16  ;;  %v1728_v45 = vld [vmem:[#allocation2 + $0x88] sm:$0xf] }
  0xe2   : > { %4867 = vmatprep.mubr.bf16.mxu1 %v6983_v48  ;;  %v7787_v15 = vsel %vm7401_vm13, %v5914_v40, %v2760_v6  ;;  %v2762_v61 = vrot.slane %v2760_v6, 4  ;;  %v1866_v13 = vsel %vm7401_vm13, %v5857_v56, %v1865_v60  ;;  %v1867_v19 = vrot.slane %v1865_v60, 4  ;;  %v1729_v47 = vld [vmem:[#allocation2 + $0x8c] sm:$0x1]  ;;  %v2142_v59 = vld [vmem:[#allocation2 + $0x40] sm:$0xf] }
  0xe3   : > { %v2238_v26 = vsel %vm7142_vm2, %v2233_v0, %v2237_v57  ;;  %v2243_v11 = vrot.slane %v2242_v1, 4  ;;  %v2252_v21 = vrot.slane %v2250_v3, 4  ;;  %v2253_v22 = vshll.u32 %v2138_v58, 16  ;;  %v2141_v57 = vld [vmem:[#allocation2 + $0x3c] sm:$0xf] }
  0xe4   : > { %4949 = vmatmul.mubr.bf16.vlgmr.msra.gmra.mrb[48].mxu0 %v7753_v44  ;;  %v7796_v54 = vsel %vm7401_vm13, %v2762_v61, %v2763_v51  ;;  %v1869_v27 = vsel %vm7401_vm13, %v1867_v19, %v1868_v10  ;;  %v2259_v2 = vshll.u32 %v2139_v62, 16  ;;  %v2263_v20 = vshrl.u32 %v2139_v62, 16  ;;  %v2143_v56 = vld [vmem:[#allocation2 + $0x44] sm:$0x1]  ;;  %v2656_v60 = vld [vmem:[#allocation2 + $0x48] sm:$0xe] }
  0xe5   : > { %4956 = vmatprep.mubr.bf16.mxu0 %v5928_v28  ;;  %6826 = vmatpush3.bf16.msra.mxu0 %v7022_v55  ;;  %v2248_v44 = vsel %vm7142_vm2, %v2243_v11, %v2247_v17  ;;  %v5930_v37 = vcombine.low %v7787_v15, %v7796_v54  ;;  %v5873_v32 = vcombine.low %v1866_v13, %v1869_v27  ;;  %v2255_v38 = vrot.slane %v2253_v22, 5  ;;  %v2657_v62 = vld [vmem:[#allocation2 + $0x4c] sm:$0xf]  ;;  %v2658_v3 = vld [vmem:[#allocation2 + $0x50] sm:$0x1] }
  0xe6   : > { %v7810_v46 = vcombine.low %v2238_v26, %v2248_v44  ;;  %6827 = vmatprep.subr.bf16.mxu0 %v6985_v4  ;;  %v2261_v5 = vrot.slane %v2259_v2, 5  ;;  %v2265_v18 = vrot.slane %v2263_v20, 4  ;;  %v2269_v28 = vshll.u32 %v2140_v12, 16  ;;  %v1730_v61 = vld [vmem:[#allocation2 + $0x90] sm:$0xe]  ;;  %v6988_v2 = vld [vmem:[#allocation2 + $0x9c] sm:$0xff]  }
  0xe7   : > { %v2256_v50 = vor.u32 %v2255_v38, %v2252_v21  ;;  %v5915_v29 = vrot.slane %v2653_v7, 9  ;;  %v2767_v52 = vrot.slane %v2654_v30, 5  ;;  %v2770_v35 = vrot.slane %v2655_v23, 5  ;;  %v1731_v20 = vld [vmem:[#allocation2 + $0x94] sm:$0xf]  ;;  %v6998_v23 = vld [vmem:[%s8813_s3 + $0x220] sm:$0xff]  }
  0xe8   : > { %v2266_v48 = vor.u32 %v2265_v18, %v2261_v5  ;;  %v2271_v40 = vrot.slane %v2269_v28, 5  ;;  %v5858_v58 = vrot.slane %v1727_v39, 9  ;;  %v1872_v34 = vrot.slane %v1728_v45, 5  ;;  %v1732_v30 = vld [vmem:[#allocation2 + $0x98] sm:$0x1] }
  0xe9   : > { %4868 = vmatmul.mubr.bf16.gmra.mrb[56].mxu1 %v5873_v32  ;;  %v2257_v42 = vrot.slane %v2256_v50, 4  ;;  %6828 = vmatpush3.bf16.msra.mxu0 %v6985_v4  ;;  %v7817_v17 = vsel %vm7401_vm13, %v5915_v29, %v2767_v52  ;;  %v2769_v6 = vrot.slane %v2767_v52, 4  ;;  %v1875_v51 = vrot.slane %v1729_v47, 5  ;;  %v6995_v4 = vld [vmem:[%s8813_s3 + $0x218] sm:$0xff]   ;;  %v2144_v38 = vld [vmem:[#allocation2 + $0x48] sm:$0xf] }
  0xea   : > { %v2267_v0 = vrot.slane %v2266_v48, 4  ;;  %4875 = vmatprep.mubr.bf16.mxu1 %v6987_v8  ;;  %v1873_v1 = vsel %vm7401_vm13, %v5858_v58, %v1872_v34  ;;  %v1874_v10 = vrot.slane %v1872_v34, 4  ;;  %v2274_v12 = vshrl.u32 %v2141_v57, 16  ;;  %6829 = vmatprep.subr.bf16.mxu0 %v6990_v49  ;;  %v2145_v18 = vld [vmem:[#allocation2 + $0x4c] sm:$0xf] }
  0xeb   : > { %v2262_v13 = vsel %vm7142_vm2, %v2257_v42, %v2261_v5  ;;  %v7828_v19 = vsel %vm7401_vm13, %v2769_v6, %v2770_v35  ;;  %v2277_v7 = vshll.u32 %v2141_v57, 16  ;;  %v2283_v26 = vshll.u32 %v2142_v59, 16  ;;  %v2146_v35 = vld [vmem:[#allocation2 + $0x50] sm:$0x1]  ;;  %v2659_v58 = vld [vmem:[#allocation2 + $0x54] sm:$0xe] }
  0xec   : > { %4957 = vmatmul.mubr.bf16.gmra.mrb[52].mxu0 %v7778_v53  ;;  %v2272_v11 = vsel %vm7142_vm2, %v2267_v0, %v2271_v40  ;;  %v5931_v21 = vcombine.low %v7817_v17, %v7828_v19  ;;  %v1876_v22 = vsel %vm7401_vm13, %v1874_v10, %v1875_v51  ;;  %v2276_v27 = vrot.slane %v2274_v12, 4  ;;  %v7001_v34 = vld [vmem:[%s8813_s3 + $0x228] sm:$0xff]   ;;  %v1733_v12 = vld [vmem:[#allocation2 + $0x9c] sm:$0xe]  ;;  %v2148_v15 = vld [vmem:[#allocation2 + $0x58] sm:$0xf] }
  0xed   : > { %4964 = vmatprep.mubr.bf16.mxu0 %v5929_v31  ;;  %v7843_v53 = vcombine.low %v2262_v13, %v2272_v11  ;;  %v5874_v55 = vcombine.low %v1873_v1, %v1876_v22  ;;  %v2279_v44 = vrot.slane %v2277_v7, 5  ;;  %v2285_v32 = vrot.slane %v2283_v26, 5  ;;  %6830 = vmatpush3.bf16.msra.mxu0 %v6990_v49  ;;  %v6992_v26 = vld [vmem:[#allocation2 + $0xa8] sm:$0xff]   ;;  %v1735_v11 = vld [vmem:[#allocation2 + $0xa4] sm:$0x1]  ;;  %v7004_v22 = vld [vmem:[%s8813_s3 + $0x230] sm:$0xff]  }
  0xee   : > { %v2287_v8 = vshrl.u32 %v2142_v59, 16  ;;  %v2293_v39 = vshll.u32 %v2143_v56, 16  ;;  %v5916_v45 = vrot.slane %v2656_v60, 9  ;;  %v2774_v5 = vrot.slane %v2657_v62, 5  ;;  %6831 = vmatprep.subr.bf16.mxu0 %v6995_v4  ;;  %v2660_v56 = vld [vmem:[#allocation2 + $0x58] sm:$0xf] }
  0xef   : > { %v2280_v28 = vor.u32 %v2279_v44, %v2276_v27  ;;  %v2777_v47 = vrot.slane %v2658_v3, 5  ;;  %v5859_v50 = vrot.slane %v1730_v61, 9  ;;  %v1879_v29 = vrot.slane %v1731_v20, 5  ;;  %v2661_v60 = vld [vmem:[#allocation2 + $0x5c] sm:$0x1] }
  0xf0   : > { %v2289_v52 = vrot.slane %v2287_v8, 4  ;;  %v2295_v43 = vrot.slane %v2293_v39, 5  ;;  %v7847_v25 = vsel %vm7401_vm13, %v5916_v45, %v2774_v5  ;;  %v2776_v31 = vrot.slane %v2774_v5, 4  ;;  %v1734_v3 = vld [vmem:[#allocation2 + $0xa0] sm:$0xf] }
  0xf1   : > { %4876 = vmatmul.mubr.bf16.gmra.mrb[60].mxu1 %v5874_v55  ;;  %v2281_v49 = vrot.slane %v2280_v28, 4  ;;  %v1880_v57 = vsel %vm7401_vm13, %v5859_v50, %v1879_v29  ;;  %v1881_v48 = vrot.slane %v1879_v29, 4  ;;  %v1882_v40 = vrot.slane %v1732_v30, 5  ;;  %6832 = vmatpush3.bf16.msra.mxu0 %v6995_v4  ;;  %v2149_v28 = vld [vmem:[#allocation2 + $0x5c] sm:$0x1] }
  0xf2   : > { %v2290_v59 = vor.u32 %v2289_v52, %v2285_v32  ;;  %4883 = vmatprep.mubr.bf16.mxu1 %v6988_v2  ;;  %v7856_v42 = vsel %vm7401_vm13, %v2776_v31, %v2777_v47  ;;  %v2298_v6 = vshrl.u32 %v2144_v38, 16  ;;  %v2301_v51 = vshll.u32 %v2144_v38, 16  ;;  %6833 = vmatprep.subr.bf16.mxu0 %v6998_v23  ;;  %v2147_v38 = vld [vmem:[#allocation2 + $0x54] sm:$0xf] }
  0xf3   : > { %v2286_v62 = vsel %vm7142_vm2, %v2281_v49, %v2285_v32  ;;  %v5932_v0 = vcombine.low %v7847_v25, %v7856_v42  ;;  %v1883_v1 = vsel %vm7401_vm13, %v1881_v48, %v1882_v40  ;;  %v2307_v10 = vshll.u32 %v2145_v18, 16  ;;  %v2663_v48 = vld [vmem:[#allocation2 + $0x64] sm:$0xf]  ;;  %v2664_v40 = vld [vmem:[#allocation2 + $0x68] sm:$0x1] }
  0xf4   : > { %4965 = vmatmul.mubr.bf16.gmra.mrb[56].mxu0 %v7810_v46  ;;  %v2291_v61 = vrot.slane %v2290_v59, 4  ;;  %v5875_v4 = vcombine.low %v1880_v57, %v1883_v1  ;;  %v2300_v13 = vrot.slane %v2298_v6, 4  ;;  %v2303_v7 = vrot.slane %v2301_v51, 5 }
  0xf5   : > { %4972 = vmatprep.mubr.bf16.mxu0 %v5930_v37  ;;  %v2309_v27 = vrot.slane %v2307_v10, 5  ;;  %v2311_v2 = vshrl.u32 %v2145_v18, 16  ;;  %v2317_v20 = vshll.u32 %v2146_v35, 16  ;;  %v5917_v30 = vrot.slane %v2659_v58, 9  ;;  %6834 = vmatpush3.bf16.msra.mxu0 %v6998_v23  ;;  %v7007_v58 = vld [vmem:[%s8813_s3 + $0x238] sm:$0xff]  }
  0xf6   : > { %v2296_v46 = vsel %vm7142_vm2, %v2291_v61, %v2295_v43  ;;  %v2304_v55 = vor.u32 %v2303_v7, %v2300_v13  ;;  %v2781_v44 = vrot.slane %v2660_v56, 5  ;;  %v2784_v32 = vrot.slane %v2661_v60, 5  ;;  %6835 = vmatprep.subr.bf16.mxu0 %v7001_v34  ;;  %v2662_v43 = vld [vmem:[#allocation2 + $0x60] sm:$0xe]  ;;  %v1736_v56 = vld [vmem:[#allocation2 + $0xa8] sm:$0xe] }
  0xf7   : > { %v7873_v8 = vcombine.low %v2286_v62, %v2296_v46  ;;  %v2313_v39 = vrot.slane %v2311_v2, 4  ;;  %v2319_v45 = vrot.slane %v2317_v20, 5  ;;  %v5860_v5 = vrot.slane %v1733_v12, 9  ;;  %v1737_v12 = vld [vmem:[#allocation2 + $0xac] sm:$0xf]  ;;  %v6993_v20 = vld [vmem:[#allocation2 + $0xb4] sm:$0xff]  }
  0xf8   : > { %v2305_v54 = vrot.slane %v2304_v55, 4  ;;  %v7877_v37 = vsel %vm7401_vm13, %v5917_v30, %v2781_v44  ;;  %v2783_v23 = vrot.slane %v2781_v44, 4  ;;  %v1886_v18 = vrot.slane %v1734_v3, 5  ;;  %v1738_v7 = vld [vmem:[#allocation2 + $0xb0] sm:$0x1] }
  0xf9   : > { %4884 = vmatmul.mubr.bf16.gmra.mrb[64].mxu1 %v5875_v4  ;;  %v2314_v47 = vor.u32 %v2313_v39, %v2309_v27  ;;  %v1889_v50 = vrot.slane %v1735_v11, 5  ;;  %v2322_v29 = vshrl.u32 %v2147_v38, 16  ;;  %v2325_v52 = vshll.u32 %v2147_v38, 16  ;;  %6836 = vmatpush3.bf16.msra.mxu0 %v7001_v34 }
  0xfa   : > { %v2310_v31 = vsel %vm7142_vm2, %v2305_v54, %v2309_v27  ;;  %4891 = vmatprep.mubr.bf16.mxu1 %v6992_v26  ;;  %v7883_v35 = vsel %vm7401_vm13, %v2783_v23, %v2784_v32  ;;  %v1887_v49 = vsel %vm7401_vm13, %v5860_v5, %v1886_v18  ;;  %v1888_v57 = vrot.slane %v1886_v18, 4  ;;  %6837 = vmatprep.subr.bf16.mxu0 %v7004_v22  ;;  %v2150_v26 = vld [vmem:[#allocation2 + $0x60] sm:$0xf]  ;;  %v2151_v32 = vld [vmem:[#allocation2 + $0x64] sm:$0xf] }
  0xfb   : > { %v2315_v34 = vrot.slane %v2314_v47, 4  ;;  %v5933_v59 = vcombine.low %v7877_v37, %v7883_v35  ;;  %v2324_v6 = vrot.slane %v2322_v29, 4  ;;  %v2327_v51 = vrot.slane %v2325_v52, 5  ;;  %v2152_v5 = vld [vmem:[#allocation2 + $0x68] sm:$0x1] }
  0xfc   : > { %4973 = vmatmul.mubr.bf16.gmra.mrb[60].mxu0 %v7843_v53  ;;  %v1890_v60 = vsel %vm7401_vm13, %v1888_v57, %v1889_v50  ;;  %v2331_v62 = vshll.u32 %v2148_v15, 16  ;;  %v2335_v1 = vshrl.u32 %v2148_v15, 16  ;;  %v2341_v10 = vshll.u32 %v2149_v28, 16  ;;  %v2665_v47 = vld [vmem:[#allocation2 + $0x6c] sm:$0xe] }
  0xfd   : > { %4980 = vmatprep.mubr.bf16.mxu0 %v5931_v21  ;;  %v2320_v3 = vsel %vm7142_vm2, %v2315_v34, %v2319_v45  ;;  %v5876_v61 = vcombine.low %v1887_v49, %v1890_v60  ;;  %v2328_v4 = vor.u32 %v2327_v51, %v2324_v6  ;;  %v5918_v13 = vrot.slane %v2662_v43, 9  ;;  %6838 = vmatpush3.bf16.msra.mxu0 %v7004_v22  ;;  %v2666_v50 = vld [vmem:[#allocation2 + $0x70] sm:$0xf]  ;;  %v2667_v6 = vld [vmem:[#allocation2 + $0x74] sm:$0x1] }
  0xfe   : > { %v7900_v53 = vcombine.low %v2310_v31, %v2320_v3  ;;  %v2333_v11 = vrot.slane %v2331_v62, 5  ;;  %v2337_v27 = vrot.slane %v2335_v1, 4  ;;  %v2343_v2 = vrot.slane %v2341_v10, 5  ;;  %6839 = vmatprep.subr.bf16.mxu0 %v7007_v58  ;;  %v1739_v1 = vld [vmem:[#allocation2 + $0xb4] sm:$0xe] }
  0xff   : > { %v2329_v30 = vrot.slane %v2328_v4, 4  ;;  %v2788_v46 = vrot.slane %v2663_v48, 5  ;;  %v2791_v17 = vrot.slane %v2664_v40, 5  ;;  %v5861_v19 = vrot.slane %v1736_v56, 9  ;;  %v1740_v10 = vld [vmem:[#allocation2 + $0xb8] sm:$0xf] }
 0x100   : > { %v2338_v21 = vor.u32 %v2337_v27, %v2333_v11  ;;  %v1893_v55 = vrot.slane %v1737_v12, 5  ;;  %v1896_v44 = vrot.slane %v1738_v7, 5  ;;  %v2346_v38 = vshrl.u32 %v2150_v26, 16  ;;  %v2669_v37 = vld [vmem:[#allocation2 + $0x7c] sm:$0xf] }
 0x101   : > { %4892 = vmatmul.mubr.bf16.gmra.mrb[68].mxu1 %v5876_v61  ;;  %v2334_v22 = vsel %vm7142_vm2, %v2329_v30, %v2333_v11  ;;  %v7906_v39 = vsel %vm7401_vm13, %v5918_v13, %v2788_v46  ;;  %v2790_v45 = vrot.slane %v2788_v46, 4  ;;  %v2349_v15 = vshll.u32 %v2150_v26, 16  ;;  %6840 = vmatpush3.bf16.msra.mxu0 %v7007_v58  ;;  %v7910_v29 = vpop.f32.mrb[0].mxu0 }
 0x102   : > { %v2339_v54 = vrot.slane %v2338_v21, 4  ;;  %4899 = vmatprep.mubr.bf16.mxu1 %v6993_v20  ;;  %v1894_v23 = vsel %vm7401_vm13, %v5861_v19, %v1893_v55  ;;  %v1895_v18 = vrot.slane %v1893_v55, 4  ;;  %v2348_v28 = vrot.slane %v2346_v38, 4  ;;  %v7916_v57 = vpop.f32.mrb[1].mxu0  ;;  %v2153_v55 = vld [vmem:[#allocation2 + $0x6c] sm:$0xf] }
 0x103   : > { %v7914_v52 = vsel %vm7401_vm13, %v2790_v45, %v2791_v17  ;;  %v2351_v43 = vrot.slane %v2349_v15, 5  ;;  %v2355_v31 = vshll.u32 %v2151_v32, 16  ;;  %v2359_v49 = vshrl.u32 %v2151_v32, 16  ;;  %v7925_v51 = vpop.f32.mrb[2].mxu0 }
 0x104   : > { %4981 = vmatmul.mubr.bf16.gmra.mrb[64].mxu0 %v7873_v8  ;;  %v2344_v48 = vsel %vm7142_vm2, %v2339_v54, %v2343_v2  ;;  %v5934_v40 = vcombine.low %v7906_v39, %v7914_v52  ;;  %v1897_v58 = vsel %vm7401_vm13, %v1895_v18, %v1896_v44  ;;  %v2365_v34 = vshll.u32 %v2152_v5, 16  ;;  %v7932_v12 = vpop.f32.mrb[3].mxu0  ;;  %v1741_v2 = vld [vmem:[#allocation2 + $0xbc] sm:$0x1]  ;;  %v1028_v44 = vld [vmem:[#allocation2 + $0xc0] sm:$0xf] }
 0x105   : > { %4988 = vmatprep.mubr.bf16.mxu0 %v5932_v0  ;;  %v7930_v56 = vcombine.low %v2334_v22, %v2344_v48  ;;  %v5877_v8 = vcombine.low %v1894_v23, %v1897_v58  ;;  %v2352_v60 = vor.u32 %v2351_v43, %v2348_v28  ;;  %v2357_v62 = vrot.slane %v2355_v31, 5  ;;  %v2154_v5 = vld [vmem:[#allocation2 + $0x70] sm:$0xf]  ;;  %v2155_v28 = vld [vmem:[#allocation2 + $0x74] sm:$0x1] }
 0x106   : > { %v2361_v3 = vrot.slane %v2359_v49, 4  ;;  %v2367_v61 = vrot.slane %v2365_v34, 5  ;;  %v465_v4 = vadd.f32 %v7677_v14, %v7741_v63  ;;  %v496_v13 = vmax.f32 %v7745_v36, 0.0  ;;  %v2668_v31 = vld [vmem:[#allocation2 + $0x78] sm:$0xe] }
 0x107   : > { %v2353_v7 = vrot.slane %v2352_v60, 4  ;;  %v5919_v26 = vrot.slane %v2665_v47, 9  ;;  %v2795_v25 = vrot.slane %v2666_v50, 5  ;;  %v2798_v42 = vrot.slane %v2667_v6, 5  ;;  %v2670_v60 = vld [vmem:[#allocation2 + $0x80] sm:$0x1] }
 0x108   : > { %v2362_v0 = vor.u32 %v2361_v3, %v2357_v62  ;;  %v497_v11 = vmax.f32 %v465_v4, 0.0  ;;  %v6145_v27 = vpack.c.bf16 %v496_v13, %v496_v13  ;;  %v5862_v20 = vrot.slane %v1739_v1, 9 }
 0x109   : > { %4900 = vmatmul.mubr.bf16.gmra.mrb[72].mxu1 %v5877_v8  ;;  %v2358_v30 = vsel %vm7142_vm2, %v2353_v7, %v2357_v62  ;;  %v7941_v46 = vsel %vm7401_vm13, %v5919_v26, %v2795_v25  ;;  %v2797_v14 = vrot.slane %v2795_v25, 4  ;;  %v1900_v63 = vrot.slane %v1740_v10, 5  ;;  %v3075_v25 = vld [vmem:[#allocation2 + $0x1c] sm:$0xf] }
 0x10a   : > { %v2363_v36 = vrot.slane %v2362_v0, 4  ;;  %v6146_v17 = vpack.c.bf16 %v497_v11, %v497_v11  ;;  %v853_v19 = vshrl.u32 %v6145_v27, 16  ;;  %v856_v21 = vshll.u32 %v6145_v27, 16 }
 0x10b   : > { %v7945_v32 = vsel %vm7401_vm13, %v2797_v14, %v2798_v42  ;;  %v7949_v38 = vsel %vm7401_vm13, %v5862_v20, %v1900_v63  ;;  %v1902_v22 = vrot.slane %v1900_v63, 4  ;;  %v1903_v45 = vrot.slane %v1741_v2, 5  ;;  %v3076_v2 = vld [vmem:[#allocation2 + $0x20] sm:$0x1] }
 0x10c   : > { %4989 = vmatmul.mubr.bf16.gmra.mrb[68].mxu0 %v7900_v53  ;;  %v2368_v15 = vsel %vm7142_vm2, %v2363_v36, %v2367_v61  ;;  %v855_v54 = vrot.slane %v853_v19, 7  ;;  %v861_v23 = vshrl.u32 %v6146_v17, 16  ;;  %v864_v18 = vshll.u32 %v6146_v17, 16  ;;  %v3074_v61 = vld [vmem:[#allocation2 + $0x18] sm:$0xf] }
 0x10d   : > { %4996 = vmatprep.mubr.bf16.mxu0 %v5933_v59  ;;  %v7957_v47 = vcombine.low %v2358_v30, %v2368_v15  ;;  %v5935_v50 = vcombine.low %v7941_v46, %v7945_v32  ;;  %v7963_v43 = vsel %vm7401_vm13, %v1902_v22, %v1903_v45  ;;  %v2370_v53 = vshrl.u32 %v2153_v55, 16  ;;  %v2157_v45 = vld [vmem:[#allocation2 + $0x7c] sm:$0xf]  ;;  %v2159_v46 = vld [vmem:[#allocation2 + $0x84] sm:$0xf] }
 0x10e   : > { %v858_v49 = vor.u32 %v856_v21, %v855_v54  ;;  %v859_v48 = vrot.slane %v855_v54, 4  ;;  %v7965_v58 = vrot.slane %v861_v23, 7  ;;  %v5878_v34 = vcombine.low %v7949_v38, %v7963_v43  ;;  %v2158_v23 = vld [vmem:[#allocation2 + $0x80] sm:$0x1]  ;;  %v2160_v32 = vld [vmem:[#allocation2 + $0x88] sm:$0xf] }
 0x10f   : > { %v2372_v35 = vrot.slane %v2370_v53, 4  ;;  %v2373_v59 = vshll.u32 %v2153_v55, 16  ;;  %v2379_v6 = vshll.u32 %v2154_v5, 16  ;;  %v2383_v8 = vshrl.u32 %v2154_v5, 16 }
 0x110   : > { %v866_v62 = vor.u32 %v864_v18, %v7965_v58  ;;  %v868_v1 = vrot.slane %v7965_v58, 4  ;;  %v1029_v10 = vsel %vm7185_vm9, %v858_v49, %v1028_v44  ;;  %v2389_v3 = vshll.u32 %v2155_v28, 16  ;;  %v2671_v28 = vld [vmem:[#allocation2 + $0x84] sm:$0xe] }
 0x111   : > { %1030 = vst [vmem:[#allocation2 + $0xc0] sm:$0xf] %v1029_v10  ;;  %v2375_v4 = vrot.slane %v2373_v59, 5  ;;  %v2381_v13 = vrot.slane %v2379_v6, 5  ;;  %v2385_v7 = vrot.slane %v2383_v8, 4  ;;  %v5920_v26 = vrot.slane %v2668_v31, 9 }
 0x112   : > { %v867_v42 = vsel %vm7179_vm8, %v859_v48, %v866_v62  ;;  %v2391_v0 = vrot.slane %v2389_v3, 5  ;;  %v2802_v11 = vrot.slane %v2669_v37, 5  ;;  %v2805_v27 = vrot.slane %v2670_v60, 5  ;;  %v2672_v37 = vld [vmem:[#allocation2 + $0x88] sm:$0xf] }
 0x113   : > { %1031 = vst [vmem:[#allocation2 + $0xc4] sm:$0xf] %v867_v42  ;;  %v2376_v20 = vor.u32 %v2375_v4, %v2372_v35  ;;  %v2386_v30 = vor.u32 %v2385_v7, %v2381_v13  ;;  %v3123_v16 = vshrl.u32 %v3074_v61, 16  ;;  %v3126_v14 = vshll.u32 %v3074_v61, 16  ;;  %v2673_v60 = vld [vmem:[#allocation2 + $0x8c] sm:$0x1] }
 0x114   : > { %4997 = vmatmul.mubr.bf16.gmra.mrb[72].mxu0 %v7930_v56  ;;  %v7978_v63 = vsel %vm7401_vm13, %v5920_v26, %v2802_v11  ;;  %v2804_v36 = vrot.slane %v2802_v11, 4  ;;  %v3132_v17 = vshll.u32 %v3075_v25, 16  ;;  %v3136_v19 = vshrl.u32 %v3075_v25, 16  ;;  %v3077_v42 = vld [vmem:[#allocation2 + $0x24] sm:$0xf] }
 0x115   : > { %5004 = vmatprep.mubr.bf16.mxu0 %v5934_v40  ;;  %v2377_v21 = vrot.slane %v2376_v20, 4  ;;  %v2387_v55 = vrot.slane %v2386_v30, 4  ;;  %v3125_v44 = vrot.slane %v3123_v16, 4  ;;  %v3128_v22 = vrot.slane %v3126_v14, 5 }
 0x116   : > { %v7985_v56 = vsel %vm7401_vm13, %v2804_v36, %v2805_v27  ;;  %v3134_v5 = vrot.slane %v3132_v17, 5  ;;  %v3138_v15 = vrot.slane %v3136_v19, 4  ;;  %v3142_v54 = vshll.u32 %v3076_v2, 16  ;;  %v3079_v36 = vld [vmem:[#allocation2 + $0x2c] sm:$0x1] }
 0x117   : > { %v2382_v18 = vsel %vm7142_vm2, %v2377_v21, %v2381_v13  ;;  %v2392_v39 = vsel %vm7142_vm2, %v2387_v55, %v2391_v0  ;;  %v5936_v52 = vcombine.low %v7978_v63, %v7985_v56  ;;  %v3129_v40 = vor.u32 %v3128_v22, %v3125_v44  ;;  %v3082_v63 = vld [vmem:[#allocation2 + $0x38] sm:$0x1] }
 0x118   : > { %v7993_v53 = vcombine.low %v2382_v18, %v2392_v39  ;;  %v3139_v31 = vor.u32 %v3138_v15, %v3134_v5  ;;  %v3144_v49 = vrot.slane %v3142_v54, 5  ;;  %v2394_v48 = vshrl.u32 %v2156_v9, 16  ;;  %v8001_v0 = vpop.f32.mrb[4].mxu0  ;;  %v2174_v24 = vld [vmem:[#allocation2 + $0xc0] sm:$0xf] }
 0x119   : > { %v3130_v35 = vrot.slane %v3129_v40, 4  ;;  %v2397_v59 = vshll.u32 %v2156_v9, 16  ;;  %v2403_v6 = vshll.u32 %v2157_v45, 16  ;;  %v2407_v8 = vshrl.u32 %v2157_v45, 16  ;;  %v2161_v45 = vld [vmem:[#allocation2 + $0x8c] sm:$0x1] }
 0x11a   : > { %v6997_v62 = vld [vmem:[#allocation2 + $0xc0] sm:$0xff]   ;;  %v3140_v10 = vrot.slane %v3139_v31, 4  ;;  %v2396_v3 = vrot.slane %v2394_v48, 4  ;;  %v2413_v61 = vshll.u32 %v2158_v23, 16  ;;  %v7997_v4 = vadd.f32 %v7916_v57, %v7910_v29  ;;  %v3078_v29 = vld [vmem:[#allocation2 + $0x28] sm:$0xf] }
 0x11b   : > { %v3135_v13 = vsel %vm7142_vm2, %v3130_v35, %v3134_v5  ;;  %v2399_v7 = vrot.slane %v2397_v59, 5  ;;  %v2405_v26 = vrot.slane %v2403_v6, 5  ;;  %v2409_v25 = vrot.slane %v2407_v8, 4  ;;  %4907 = vmatprep.mubr.bf16.mxu1 %v6997_v62  ;;  %v8034_v48 = vpop.f32.mrb[5].mxu0  ;;  %v2675_v8 = vld [vmem:[#allocation2 + $0x94] sm:$0xf] }
 0x11c   : > { %5005 = vmatmul.mubr.bf16.gmra.mrb[76].mxu0 %v7957_v47  ;;  %v3145_v11 = vsel %vm7142_vm2, %v3140_v10, %v3144_v49  ;;  %v2415_v27 = vrot.slane %v2413_v61, 5  ;;  %v5921_v2 = vrot.slane %v2671_v28, 9  ;;  %v2809_v20 = vrot.slane %v2672_v37, 5  ;;  %v8006_v57 = vpop.f32.mrb[0].mxu1  ;;  %4908 = vmatmul.mubr.bf16.gmra.mrb[76].mxu1 %v5878_v34  ;;  %v6999_v34 = vld [vmem:[#allocation2 + $0x18] sm:$0xff]  }
 0x11d   : > { %5012 = vmatprep.mubr.bf16.mxu0 %v5935_v50  ;;  %v5959_v30 = vcombine.low %v3135_v13, %v3145_v11  ;;  %v2400_v47 = vor.u32 %v2399_v7, %v2396_v3  ;;  %v2410_v16 = vor.u32 %v2409_v25, %v2405_v26  ;;  %v2812_v14 = vrot.slane %v2673_v60, 5  ;;  %v8014_v17 = vpop.f32.mrb[1].mxu1  ;;  %v2674_v49 = vld [vmem:[#allocation2 + $0x90] sm:$0xe]  ;;  %v2676_v61 = vld [vmem:[#allocation2 + $0x98] sm:$0x1] }
 0x11e   : > { %v8018_v19 = vsel %vm7401_vm13, %v5921_v2, %v2809_v20  ;;  %v2811_v9 = vrot.slane %v2809_v20, 4  ;;  %v3147_v21 = vshrl.u32 %v3077_v42, 16  ;;  %v3150_v55 = vshll.u32 %v3077_v42, 16  ;;  %v8020_v50 = vpop.f32.mrb[2].mxu1  ;;  %v3080_v42 = vld [vmem:[#allocation2 + $0x30] sm:$0xf] }
 0x11f   : > { %5109 = vmatprep.mubr.bf16.mxu1 %v5959_v30  ;;  %v2401_v38 = vrot.slane %v2400_v47, 4  ;;  %v2411_v43 = vrot.slane %v2410_v16, 4  ;;  %v3156_v44 = vshll.u32 %v3078_v29, 16  ;;  %v3160_v22 = vshrl.u32 %v3078_v29, 16  ;;  %v8026_v18 = vpop.f32.mrb[3].mxu1  ;;  %v8037_v11 = vpop.f32.mrb[6].mxu0 }
 0x120   : > { %v8024_v5 = vsel %vm7401_vm13, %v2811_v9, %v2812_v14  ;;  %v3149_v15 = vrot.slane %v3147_v21, 4  ;;  %v3152_v54 = vrot.slane %v3150_v55, 5  ;;  %v3166_v23 = vshll.u32 %v3079_v36, 16  ;;  %v3081_v30 = vld [vmem:[#allocation2 + $0x34] sm:$0xf]  ;;  %v8044_v36 = vpop.f32.mrb[7].mxu0 }
 0x121   : > { %v2406_v39 = vsel %vm7142_vm2, %v2401_v38, %v2405_v26  ;;  %v2416_v40 = vsel %vm7142_vm2, %v2411_v43, %v2415_v27  ;;  %v5937_v28 = vcombine.low %v8018_v19, %v8024_v5  ;;  %v3158_v31 = vrot.slane %v3156_v44, 5  ;;  %v7000_v55 = vld [vmem:[#allocation2 + $0x24] sm:$0xff]   ;;  %v2163_v44 = vld [vmem:[#allocation2 + $0x94] sm:$0xf] }
 0x122   : > { %v5904_v37 = vcombine.low %v2406_v39, %v2416_v40  ;;  %v3153_v35 = vor.u32 %v3152_v54, %v3149_v15  ;;  %v3162_v59 = vrot.slane %v3160_v22, 4  ;;  %v3168_v6 = vrot.slane %v3166_v23, 5 }
 0x123   : > { %v2418_v60 = vshrl.u32 %v2159_v46, 16  ;;  %v2421_v62 = vshll.u32 %v2159_v46, 16  ;;  %v2427_v10 = vshll.u32 %v2160_v32, 16  ;;  %v2431_v3 = vshrl.u32 %v2160_v32, 16 }
 0x124   : > { %5013 = vmatmul.mubr.bf16.gmra.mrb[80].mxu0 %v7993_v53  ;;  %v3154_v13 = vrot.slane %v3153_v35, 4  ;;  %v3163_v7 = vor.u32 %v3162_v59, %v3158_v31  ;;  %v2437_v26 = vshll.u32 %v2161_v45, 16  ;;  %v5922_v25 = vrot.slane %v2674_v49, 9  ;;  %5110 = vmatmul.mubr.bf16.vlgmr.msra.gmra.mrb[80].mxu1 %v6999_v34  ;;  %v2162_v34 = vld [vmem:[#allocation2 + $0x90] sm:$0xf] }
 0x125   : > { %5020 = vmatprep.mubr.bf16.mxu0 %v5936_v52  ;;  %v2420_v27 = vrot.slane %v2418_v60, 4  ;;  %v2423_v2 = vrot.slane %v2421_v62, 5  ;;  %v2429_v20 = vrot.slane %v2427_v10, 5  ;;  %v2433_v29 = vrot.slane %v2431_v3, 4  ;;  %v2164_v62 = vld [vmem:[#allocation2 + $0x98] sm:$0x1] }
 0x126   : > { %v3159_v53 = vsel %vm7142_vm2, %v3154_v13, %v3158_v31  ;;  %v3164_v47 = vrot.slane %v3163_v7, 4  ;;  %v2439_v16 = vrot.slane %v2437_v26, 5  ;;  %v2816_v14 = vrot.slane %v2675_v8, 5  ;;  %v2677_v26 = vld [vmem:[#allocation2 + $0x9c] sm:$0xe] }
 0x127   : > { %v2424_v9 = vor.u32 %v2423_v2, %v2420_v27  ;;  %v2434_v21 = vor.u32 %v2433_v29, %v2429_v20  ;;  %v2819_v46 = vrot.slane %v2676_v61, 5  ;;  %v3171_v56 = vshrl.u32 %v3080_v42, 16  ;;  %v2679_v29 = vld [vmem:[#allocation2 + $0xa4] sm:$0x1] }
 0x128   : > { %v3169_v52 = vsel %vm7142_vm2, %v3164_v47, %v3168_v6  ;;  %v8050_v32 = vsel %vm7401_vm13, %v5922_v25, %v2816_v14  ;;  %v2818_v38 = vrot.slane %v2816_v14, 4  ;;  %v3174_v43 = vshll.u32 %v3080_v42, 16  ;;  %v2678_v25 = vld [vmem:[#allocation2 + $0xa0] sm:$0xf] }
 0x129   : > { %v5960_v22 = vcombine.low %v3159_v53, %v3169_v52  ;;  %v2425_v45 = vrot.slane %v2424_v9, 4  ;;  %v2435_v15 = vrot.slane %v2434_v21, 4  ;;  %v3173_v54 = vrot.slane %v3171_v56, 4  ;;  %v8052_v23 = vpop.f32.mrb[8].mxu0  ;;  %v3084_v56 = vld [vmem:[#allocation2 + $0x40] sm:$0xf] }
 0x12a   : > { %v8056_v39 = vsel %vm7401_vm13, %v2818_v38, %v2819_v46  ;;  %v3176_v40 = vrot.slane %v3174_v43, 5  ;;  %v3180_v31 = vshll.u32 %v3081_v30, 16  ;;  %v3184_v49 = vshrl.u32 %v3081_v30, 16  ;;  %v8058_v35 = vpop.f32.mrb[9].mxu0 }
 0x12b   : > { %5117 = vmatprep.mubr.bf16.mxu1 %v5960_v22  ;;  %v2430_v59 = vsel %vm7142_vm2, %v2425_v45, %v2429_v20  ;;  %v2440_v6 = vsel %vm7142_vm2, %v2435_v15, %v2439_v16  ;;  %v5938_v8 = vcombine.low %v8050_v32, %v8056_v39  ;;  %v3190_v60 = vshll.u32 %v3082_v63, 16  ;;  %v8066_v10 = vpop.f32.mrb[10].mxu0  ;;  %v3083_v16 = vld [vmem:[#allocation2 + $0x3c] sm:$0xf]  ;;  %v7002_v32 = vld [vmem:[#allocation2 + $0x30] sm:$0xff]  }
 0x12c   : > { %5021 = vmatmul.mubr.bf16.gmra.mrb[84].mxu0 %v5904_v37  ;;  %v5905_v3 = vcombine.low %v2430_v59, %v2440_v6  ;;  %v3177_v61 = vor.u32 %v3176_v40, %v3173_v54  ;;  %v3182_v13 = vrot.slane %v3180_v31, 5  ;;  %v3186_v7 = vrot.slane %v3184_v49, 4  ;;  %5118 = vmatmul.mubr.bf16.gmra.mrb[84].mxu1 %v7000_v55  ;;  %v8071_v14 = vpop.f32.mrb[11].mxu0  ;;  %v2165_v59 = vld [vmem:[#allocation2 + $0x9c] sm:$0xf] }
 0x12d   : > { %5028 = vmatprep.mubr.bf16.mxu0 %v5937_v28  ;;  %v3192_v42 = vrot.slane %v3190_v60, 5  ;;  %v2442_v27 = vshrl.u32 %v2162_v34, 16  ;;  %v2445_v2 = vshll.u32 %v2162_v34, 16  ;;  %v2451_v20 = vshll.u32 %v2163_v44, 16  ;;  %v3085_v34 = vld [vmem:[#allocation2 + $0x44] sm:$0x1] }
 0x12e   : > { %v3178_v30 = vrot.slane %v3177_v61, 4  ;;  %v3187_v53 = vor.u32 %v3186_v7, %v3182_v13  ;;  %v2455_v47 = vshrl.u32 %v2163_v44, 16  ;;  %v2461_v37 = vshll.u32 %v2164_v62, 16  ;;  %v2166_v6 = vld [vmem:[#allocation2 + $0xa0] sm:$0xf] }
 0x12f   : > { %v2444_v9 = vrot.slane %v2442_v27, 4  ;;  %v2447_v21 = vrot.slane %v2445_v2, 5  ;;  %v2453_v46 = vrot.slane %v2451_v20, 5  ;;  %v5923_v63 = vrot.slane %v2677_v26, 9  ;;  %v2167_v7 = vld [vmem:[#allocation2 + $0xa4] sm:$0x1] }
 0x130   : > { %v3183_v19 = vsel %vm7142_vm2, %v3178_v30, %v3182_v13  ;;  %v3188_v5 = vrot.slane %v3187_v53, 4  ;;  %v2457_v28 = vrot.slane %v2455_v47, 4  ;;  %v2463_v55 = vrot.slane %v2461_v37, 5  ;;  %v2680_v2 = vld [vmem:[#allocation2 + $0xa8] sm:$0xe] }
 0x131   : > { %v2448_v52 = vor.u32 %v2447_v21, %v2444_v9  ;;  %v2823_v38 = vrot.slane %v2678_v25, 5  ;;  %v2826_v43 = vrot.slane %v2679_v29, 5  ;;  %v3195_v44 = vshrl.u32 %v3083_v16, 16  ;;  %v2681_v20 = vld [vmem:[#allocation2 + $0xac] sm:$0xf] }
 0x132   : > { %v3193_v22 = vsel %vm7142_vm2, %v3188_v5, %v3192_v42  ;;  %v2458_v45 = vor.u32 %v2457_v28, %v2453_v46  ;;  %v3198_v15 = vshll.u32 %v3083_v16, 16  ;;  %v3204_v54 = vshll.u32 %v3084_v56, 16  ;;  %v2682_v47 = vld [vmem:[#allocation2 + $0xb0] sm:$0x1]  ;;  %v3086_v28 = vld [vmem:[#allocation2 + $0x48] sm:$0xf] }
 0x133   : > { %v5961_v39 = vcombine.low %v3183_v19, %v3193_v22  ;;  %v2449_v40 = vrot.slane %v2448_v52, 4  ;;  %v2824_v31 = vsel %vm7401_vm13, %v5923_v63, %v2823_v38  ;;  %v2825_v49 = vrot.slane %v2823_v38, 4 }
 0x134   : > { %5029 = vmatmul.mubr.bf16.gmra.mrb[88].mxu0 %v5905_v3  ;;  %v2459_v60 = vrot.slane %v2458_v45, 4  ;;  %v3197_v62 = vrot.slane %v3195_v44, 4  ;;  %v3200_v61 = vrot.slane %v3198_v15, 5  ;;  %v3206_v13 = vrot.slane %v3204_v54, 5 }
 0x135   : > { %5036 = vmatprep.mubr.bf16.mxu0 %v5938_v8  ;;  %5125 = vmatprep.mubr.bf16.mxu1 %v5961_v39  ;;  %v2454_v26 = vsel %vm7142_vm2, %v2449_v40, %v2453_v46  ;;  %v2827_v25 = vsel %vm7401_vm13, %v2825_v49, %v2826_v43  ;;  %v3208_v42 = vshrl.u32 %v3084_v56, 16  ;;  %v3214_v27 = vshll.u32 %v3085_v34, 16  ;;  %v8085_v8 = vpop.f32.mrb[4].mxu1  ;;  %v3087_v43 = vld [vmem:[#allocation2 + $0x4c] sm:$0xf] }
 0x136   : > { %v2464_v3 = vsel %vm7142_vm2, %v2459_v60, %v2463_v55  ;;  %5126 = vmatmul.mubr.bf16.gmra.mrb[88].mxu1 %v7002_v32  ;;  %v5939_v29 = vcombine.low %v2824_v31, %v2827_v25  ;;  %v3201_v30 = vor.u32 %v3200_v61, %v3197_v62  ;;  %v2466_v53 = vshrl.u32 %v2165_v59, 16  ;;  %v8087_v46 = vpop.f32.mrb[5].mxu1  ;;  %v3088_v61 = vld [vmem:[#allocation2 + $0x50] sm:$0x1] }
 0x137   : > { %v5906_v37 = vcombine.low %v2454_v26, %v2464_v3  ;;  %v3210_v16 = vrot.slane %v3208_v42, 4  ;;  %v3216_v9 = vrot.slane %v3214_v27, 5  ;;  %v2469_v21 = vshll.u32 %v2165_v59, 16  ;;  %v8089_v34 = vpop.f32.mrb[6].mxu1  ;;  %v2168_v27 = vld [vmem:[#allocation2 + $0xa8] sm:$0xf] }
 0x138   : > { %v3202_v63 = vrot.slane %v3201_v30, 4  ;;  %v2468_v56 = vrot.slane %v2466_v53, 4  ;;  %v2475_v19 = vshll.u32 %v2166_v6, 16  ;;  %v2479_v5 = vshrl.u32 %v2166_v6, 16  ;;  %v8093_v54 = vpop.f32.mrb[7].mxu1  ;;  %v7003_v6 = vld [vmem:[#allocation2 + $0x3c] sm:$0xff]  }
 0x139   : > { %v3211_v52 = vor.u32 %v3210_v16, %v3206_v13  ;;  %v2471_v55 = vrot.slane %v2469_v21, 5  ;;  %v2485_v32 = vshll.u32 %v2167_v7, 16  ;;  %v5924_v38 = vrot.slane %v2680_v2, 9 }
 0x13a   : > { %v3207_v44 = vsel %vm7142_vm2, %v3202_v63, %v3206_v13  ;;  %v2477_v22 = vrot.slane %v2475_v19, 5  ;;  %v2481_v45 = vrot.slane %v2479_v5, 4  ;;  %v2830_v15 = vrot.slane %v2681_v20, 5 }
 0x13b   : > { %v3212_v39 = vrot.slane %v3211_v52, 4  ;;  %v2472_v40 = vor.u32 %v2471_v55, %v2468_v56  ;;  %v2487_v31 = vrot.slane %v2485_v32, 5  ;;  %v2833_v49 = vrot.slane %v2682_v47, 5  ;;  %v2169_v47 = vld [vmem:[#allocation2 + $0xac] sm:$0xf] }
 0x13c   : > { %5037 = vmatmul.mubr.bf16.gmra.mrb[92].mxu0 %v5906_v37  ;;  %v2482_v59 = vor.u32 %v2481_v45, %v2477_v22  ;;  %v2831_v60 = vsel %vm7401_vm13, %v5924_v38, %v2830_v15  ;;  %v2832_v62 = vrot.slane %v2830_v15, 4  ;;  %v3219_v7 = vshrl.u32 %v3086_v28, 16 }
 0x13d   : > { %5044 = vmatprep.mubr.bf16.mxu0 %v5939_v29  ;;  %v3217_v13 = vsel %vm7142_vm2, %v3212_v39, %v3216_v9  ;;  %v2473_v26 = vrot.slane %v2472_v40, 4  ;;  %v3222_v25 = vshll.u32 %v3086_v28, 16  ;;  %v3228_v42 = vshll.u32 %v3087_v43, 16  ;;  %v8099_v2 = vpop.f32.mrb[12].mxu0  ;;  %v2170_v9 = vld [vmem:[#allocation2 + $0xb0] sm:$0x1] }
 0x13e   : > { %v5962_v20 = vcombine.low %v3207_v44, %v3217_v13  ;;  %v2483_v3 = vrot.slane %v2482_v59, 4  ;;  %v2834_v30 = vsel %vm7401_vm13, %v2832_v62, %v2833_v49  ;;  %v3221_v53 = vrot.slane %v3219_v7, 4  ;;  %v8107_v28 = vpop.f32.mrb[13].mxu0  ;;  %v2683_v44 = vld [vmem:[#allocation2 + $0xb4] sm:$0xe] }
 0x13f   : > { %v2478_v37 = vsel %vm7142_vm2, %v2473_v26, %v2477_v22  ;;  %v5940_v29 = vcombine.low %v2831_v60, %v2834_v30  ;;  %v3224_v16 = vrot.slane %v3222_v25, 5  ;;  %v3230_v21 = vrot.slane %v3228_v42, 5  ;;  %v2684_v22 = vld [vmem:[#allocation2 + $0xb8] sm:$0xf]  ;;  %v2685_v49 = vld [vmem:[#allocation2 + $0xbc] sm:$0x1] }
 0x140   : > { %5133 = vmatprep.mubr.bf16.mxu1 %v5962_v20  ;;  %v2488_v63 = vsel %vm7142_vm2, %v2483_v3, %v2487_v31  ;;  %v3232_v56 = vshrl.u32 %v3087_v43, 16  ;;  %v3238_v19 = vshll.u32 %v3088_v61, 16  ;;  %v2490_v5 = vshrl.u32 %v2168_v27, 16  ;;  %v3089_v62 = vld [vmem:[#allocation2 + $0x54] sm:$0xf] }
 0x141   : > { %v5907_v52 = vcombine.low %v2478_v37, %v2488_v63  ;;  %5134 = vmatmul.mubr.bf16.gmra.mrb[92].mxu1 %v7003_v6  ;;  %v3225_v55 = vor.u32 %v3224_v16, %v3221_v53  ;;  %v2493_v32 = vshll.u32 %v2168_v27, 16  ;;  %v2499_v38 = vshll.u32 %v2169_v47, 16  ;;  %v3090_v26 = vld [vmem:[#allocation2 + $0x58] sm:$0xf] }
 0x142   : > { %v3234_v45 = vrot.slane %v3232_v56, 4  ;;  %v3240_v15 = vrot.slane %v3238_v19, 5  ;;  %v2492_v39 = vrot.slane %v2490_v5, 4  ;;  %v2503_v40 = vshrl.u32 %v2169_v47, 16  ;;  %v8109_v25 = vpop.f32.mrb[8].mxu1  ;;  %v7005_v47 = vld [vmem:[#allocation2 + $0x48] sm:$0xff]  }
 0x143   : > { %v3226_v59 = vrot.slane %v3225_v55, 4  ;;  %v2495_v60 = vrot.slane %v2493_v32, 5  ;;  %v2501_v31 = vrot.slane %v2499_v38, 5  ;;  %v2509_v43 = vshll.u32 %v2170_v9, 16  ;;  %v3091_v9 = vld [vmem:[#allocation2 + $0x5c] sm:$0x1] }
 0x144   : > { %5045 = vmatmul.mubr.bf16.gmra.mrb[96].mxu0 %v5907_v52  ;;  %v3235_v61 = vor.u32 %v3234_v45, %v3230_v21  ;;  %v2505_v7 = vrot.slane %v2503_v40, 4  ;;  %v5925_v13 = vrot.slane %v2683_v44, 9  ;;  %v2837_v6 = vrot.slane %v2684_v22, 5  ;;  %v2171_v32 = vld [vmem:[#allocation2 + $0xb4] sm:$0xf]  ;;  %v8121_v40 = vpop.f32.mrb[9].mxu1 }
 0x145   : > { %5052 = vmatprep.mubr.bf16.mxu0 %v5940_v29  ;;  %v3231_v42 = vsel %vm7142_vm2, %v3226_v59, %v3230_v21  ;;  %v2496_v27 = vor.u32 %v2495_v60, %v2492_v39  ;;  %v2511_v20 = vrot.slane %v2509_v43, 5  ;;  %v2840_v3 = vrot.slane %v2685_v49, 5  ;;  %v2172_v39 = vld [vmem:[#allocation2 + $0xb8] sm:$0xf]  ;;  %v2173_v43 = vld [vmem:[#allocation2 + $0xbc] sm:$0x1] }
 0x146   : > { %v3236_v30 = vrot.slane %v3235_v61, 4  ;;  %v2506_v53 = vor.u32 %v2505_v7, %v2501_v31  ;;  %v2838_v37 = vsel %vm7401_vm13, %v5925_v13, %v2837_v6  ;;  %v2839_v16 = vrot.slane %v2837_v6, 4 }
 0x147   : > { %v2497_v63 = vrot.slane %v2496_v27, 4  ;;  %v3243_v56 = vshrl.u32 %v3089_v62, 16  ;;  %v3246_v19 = vshll.u32 %v3089_v62, 16  ;;  %v3252_v5 = vshll.u32 %v3090_v26, 16  ;;  %v8125_v62 = vpop.f32.mrb[10].mxu1 }
 0x148   : > { %v3241_v29 = vsel %vm7142_vm2, %v3236_v30, %v3240_v15  ;;  %v2507_v52 = vrot.slane %v2506_v53, 4  ;;  %v2841_v21 = vsel %vm7401_vm13, %v2839_v16, %v2840_v3  ;;  %v3256_v55 = vshrl.u32 %v3090_v26, 16  ;;  %v8127_v26 = vpop.f32.mrb[11].mxu1  ;;  %v2687_v53 = vld [vmem:[#allocation2 + $0xc4] sm:$0xf] }
 0x149   : > { %v5963_v38 = vcombine.low %v3231_v42, %v3241_v29  ;;  %v2502_v44 = vsel %vm7142_vm2, %v2497_v63, %v2501_v31  ;;  %v5941_v22 = vcombine.low %v2838_v37, %v2841_v21  ;;  %v3245_v45 = vrot.slane %v3243_v56, 4  ;;  %v1032_v31 = vld [vmem:[#allocation2 + $0xc8] sm:$0x1]  ;;  %v3093_v21 = vld [vmem:[#allocation2 + $0x64] sm:$0xf] }
 0x14a   : > { %v2512_v49 = vsel %vm7142_vm2, %v2507_v52, %v2511_v20  ;;  %v3248_v59 = vrot.slane %v3246_v19, 5  ;;  %v3254_v15 = vrot.slane %v3252_v5, 5  ;;  %v3258_v60 = vrot.slane %v3256_v55, 4  ;;  %v2686_v20 = vld [vmem:[#allocation2 + $0xc0] sm:$0xe] }
 0x14b   : > { %5141 = vmatprep.mubr.bf16.mxu1 %v5963_v38  ;;  %v5908_v61 = vcombine.low %v2502_v44, %v2512_v49  ;;  %v3262_v7 = vshll.u32 %v3091_v9, 16  ;;  %v2514_v13 = vshrl.u32 %v2171_v32, 16  ;;  %v2517_v6 = vshll.u32 %v2171_v32, 16  ;;  %v3092_v19 = vld [vmem:[#allocation2 + $0x60] sm:$0xf] }
 0x14c   : > { %5142 = vmatmul.mubr.bf16.gmra.mrb[96].mxu1 %v7005_v47  ;;  %v3249_v42 = vor.u32 %v3248_v59, %v3245_v45  ;;  %v3259_v27 = vor.u32 %v3258_v60, %v3254_v15  ;;  %v2523_v3 = vshll.u32 %v2172_v39, 16  ;;  %v2527_v30 = vshrl.u32 %v2172_v39, 16  ;;  %v7006_v39 = vld [vmem:[#allocation2 + $0x54] sm:$0xff]   ;;  %v3094_v59 = vld [vmem:[#allocation2 + $0x68] sm:$0x1]  ;;  %v8137_v60 = vpop.f32.mrb[14].mxu0 }
 0x14d   : > { %5053 = vmatmul.mubr.bf16.gmra.mrb[100].mxu0 %v5908_v61  ;;  %v3264_v37 = vrot.slane %v3262_v7, 5  ;;  %v2516_v16 = vrot.slane %v2514_v13, 4  ;;  %v2519_v63 = vrot.slane %v2517_v6, 5  ;;  %v2533_v56 = vshll.u32 %v2173_v43, 16 }
 0x14e   : > { %5060 = vmatprep.mubr.bf16.mxu0 %v5941_v22  ;;  %v3250_v9 = vrot.slane %v3249_v42, 4  ;;  %v3260_v5 = vrot.slane %v3259_v27, 4  ;;  %v2525_v29 = vrot.slane %v2523_v3, 5  ;;  %v2529_v52 = vrot.slane %v2527_v30, 4 }
 0x14f   : > { %v2520_v55 = vor.u32 %v2519_v63, %v2516_v16  ;;  %v2535_v47 = vrot.slane %v2533_v56, 5  ;;  %v1033_v32 = vsel %vm7193_vm10, %v868_v1, %v1032_v31  ;;  %v5926_v38 = vrot.slane %v2686_v20, 9  ;;  %v8139_v1 = vpop.f32.mrb[15].mxu0 }
 0x150   : > { %v3255_v44 = vsel %vm7142_vm2, %v3250_v9, %v3254_v15  ;;  %v3265_v45 = vsel %vm7142_vm2, %v3260_v5, %v3264_v37  ;;  %v2530_v22 = vor.u32 %v2529_v52, %v2525_v29  ;;  %1034 = vst [vmem:[#allocation2 + $0xc8] sm:$0x1] %v1033_v32  ;;  %v2844_v49 = vrot.slane %v2687_v53, 5  ;;  %v2175_v53 = vld [vmem:[#allocation2 + $0xc4] sm:$0xf] }
 0x151   : > { %v5964_v43 = vcombine.low %v3255_v44, %v3265_v45  ;;  %v2521_v61 = vrot.slane %v2520_v55, 4  ;;  %v3267_v58 = vshrl.u32 %v3092_v19, 16  ;;  %v3270_v7 = vshll.u32 %v3092_v19, 16  ;;  %v8145_v42 = vpop.f32.mrb[16].mxu0  ;;  %v3095_v45 = vld [vmem:[#allocation2 + $0x6c] sm:$0xf] }
 0x152   : > { %v2531_v13 = vrot.slane %v2530_v22, 4  ;;  %v8143_v15 = vsel %vm7401_vm13, %v5926_v38, %v2844_v49  ;;  %v2846_v6 = vrot.slane %v2844_v49, 4  ;;  %v3276_v31 = vshll.u32 %v3093_v21, 16  ;;  %v8149_v37 = vpop.f32.mrb[17].mxu0 }
 0x153   : > { %5149 = vmatprep.mubr.bf16.mxu1 %v5964_v43  ;;  %v2526_v27 = vsel %vm7142_vm2, %v2521_v61, %v2525_v29  ;;  %v3269_v3 = vrot.slane %v3267_v58, 4  ;;  %v3272_v30 = vrot.slane %v3270_v7, 5  ;;  %v3280_v20 = vshrl.u32 %v3093_v21, 16  ;;  %v8153_v9 = vpop.f32.mrb[18].mxu0  ;;  %v3096_v61 = vld [vmem:[#allocation2 + $0x70] sm:$0xf] }
 0x154   : > { %v2536_v16 = vsel %vm7142_vm2, %v2531_v13, %v2535_v47  ;;  %5150 = vmatmul.mubr.bf16.gmra.mrb[100].mxu1 %v7006_v39  ;;  %v3278_v63 = vrot.slane %v3276_v31, 5  ;;  %v3286_v56 = vshll.u32 %v3094_v59, 16  ;;  %v2538_v19 = vshrl.u32 %v2174_v24, 16 }
 0x155   : > { %v5909_v5 = vcombine.low %v2526_v27, %v2536_v16  ;;  %v3273_v52 = vor.u32 %v3272_v30, %v3269_v3  ;;  %v3282_v55 = vrot.slane %v3280_v20, 4  ;;  %v2541_v32 = vshll.u32 %v2174_v24, 16  ;;  %v3097_v20 = vld [vmem:[#allocation2 + $0x74] sm:$0x1] }
 0x156   : > { %v3288_v29 = vrot.slane %v3286_v56, 5  ;;  %v2540_v38 = vrot.slane %v2538_v19, 4  ;;  %v2547_v44 = vshll.u32 %v2175_v53, 16  ;;  %v2551_v21 = vshrl.u32 %v2175_v53, 16  ;;  %v8165_v53 = vpop.f32.mrb[19].mxu0 }
 0x157   : > { %5061 = vmatmul.mubr.bf16.gmra.mrb[104].mxu0 %v5909_v5  ;;  %v2688_v22 = vld [vmem:[#allocation2 + $0xc8] sm:$0x1]  ;;  %v3274_v49 = vrot.slane %v3273_v52, 4  ;;  %v3283_v43 = vor.u32 %v3282_v55, %v3278_v63  ;;  %v2543_v39 = vrot.slane %v2541_v32, 5  ;;  %v8157_v59 = vadd.f32 %v7932_v12, %v7925_v51  ;;  %v3586_v19 = vld [vmem:[#allocation2 + $0x18] sm:$0xe] }
 0x158   : > { %v2176_v47 = vld [vmem:[#allocation2 + $0xc8] sm:$0x1]  ;;  %v2847_v58 = vrot.slane %v2688_v22, 5  ;;  %v2549_v7 = vrot.slane %v2547_v44, 5  ;;  %v2553_v13 = vrot.slane %v2551_v21, 4  ;;  %v8163_v30 = vadd.f32 %v8014_v17, %v8006_v57  ;;  %v7008_v52 = vld [vmem:[#allocation2 + $0x60] sm:$0xff]  }
 0x159   : > { %v2557_v24 = vshll.u32 %v2176_v47, 16  ;;  %v3279_v31 = vsel %vm7142_vm2, %v3274_v49, %v3278_v63  ;;  %v3284_v27 = vrot.slane %v3283_v43, 4  ;;  %v2544_v3 = vor.u32 %v2543_v39, %v2540_v38  ;;  %v3587_v63 = vld [vmem:[#allocation2 + $0x1c] sm:$0xf]  ;;  %v3588_v32 = vld [vmem:[#allocation2 + $0x20] sm:$0x1] }
 0x15a   : > { %8827 = vst [vmem:[#allocation4_spill] sm:$0xff] %v8163_v30  ;;  %v2848_v51 = vsel %vm7401_vm13, %v2846_v6, %v2847_v58  ;;  %v2554_v12 = vor.u32 %v2553_v13, %v2549_v7  ;;  %v8171_v56 = vadd.f32 %v8026_v18, %v8020_v50  ;;  %v3291_v55 = vshrl.u32 %v3095_v45, 16  ;;  %v3589_v49 = vld [vmem:[#allocation2 + $0x24] sm:$0xe]  ;;  %v3590_v47 = vld [vmem:[#allocation2 + $0x28] sm:$0xf] }
 0x15b   : > { %v2559_v16 = vrot.slane %v2557_v24, 5  ;;  %v5942_v5 = vcombine.low %v8143_v15, %v2848_v51  ;;  %v3289_v57 = vsel %vm7142_vm2, %v3284_v27, %v3288_v29  ;;  %v2545_v17 = vrot.slane %v2544_v3, 4 }
 0x15c   : > { %8828 = vst [vmem:[#allocation5_spill] sm:$0xff] %v8171_v56  ;;  %v8176_v38 = vpop.f32.mrb[12].mxu1  ;;  %v5965_v6 = vcombine.low %v3279_v31, %v3289_v57  ;;  %v2555_v44 = vrot.slane %v2554_v12, 4  ;;  %v3294_v21 = vshll.u32 %v3095_v45, 16  ;;  %v3300_v22 = vshll.u32 %v3096_v61, 16 }
 0x15d   : > { %v8178_v50 = vpop.f32.mrb[13].mxu1  ;;  %5068 = vmatprep.mubr.bf16.mxu0 %v5942_v5  ;;  %v2550_v18 = vsel %vm7142_vm2, %v2545_v17, %v2549_v7  ;;  %v3293_v15 = vrot.slane %v3291_v55, 4  ;;  %v3304_v43 = vshrl.u32 %v3096_v61, 16  ;;  %v3310_v29 = vshll.u32 %v3097_v20, 16  ;;  %v3591_v31 = vld [vmem:[#allocation2 + $0x2c] sm:$0x1] }
 0x15e   : > { %v8182_v39 = vpop.f32.mrb[14].mxu1  ;;  %5157 = vmatprep.mubr.bf16.mxu1 %v5965_v6  ;;  %v2560_v58 = vsel %vm7142_vm2, %v2555_v44, %v2559_v16  ;;  %v3296_v13 = vrot.slane %v3294_v21, 5  ;;  %v3302_v45 = vrot.slane %v3300_v22, 5  ;;  %v5975_v24 = vrot.slane %v3586_v19, 9  ;;  %v3098_v17 = vld [vmem:[#allocation2 + $0x78] sm:$0xf] }
 0x15f   : > { %v8186_v27 = vpop.f32.mrb[15].mxu1  ;;  %v5910_v3 = vcombine.low %v2550_v18, %v2560_v58  ;;  %5158 = vmatmul.mubr.bf16.gmra.mrb[104].mxu1 %v7008_v52  ;;  %v3306_v51 = vrot.slane %v3304_v43, 4  ;;  %v3312_v7 = vrot.slane %v3310_v29, 5  ;;  %v3684_v12 = vrot.slane %v3587_v63, 5  ;;  %v3099_v44 = vld [vmem:[#allocation2 + $0x7c] sm:$0xf] }
 0x160   : > { %v3297_v61 = vor.u32 %v3296_v13, %v3293_v15  ;;  %v3687_v20 = vrot.slane %v3588_v32, 5  ;;  %v5976_v5 = vrot.slane %v3589_v49, 9  ;;  %v3691_v57 = vrot.slane %v3590_v47, 5  ;;  %v3100_v32 = vld [vmem:[#allocation2 + $0x80] sm:$0x1]  ;;  %v7009_v43 = vld [vmem:[#allocation2 + $0x6c] sm:$0xff]  }
 0x161   : > { %5069 = vmatmul.mubr.bf16.gmra.mrb[108].mxu0 %v5910_v3  ;;  %v3307_v55 = vor.u32 %v3306_v51, %v3302_v45  ;;  %v3685_v16 = vsel %vm7401_vm13, %v5975_v24, %v3684_v12  ;;  %v3686_v6 = vrot.slane %v3684_v12, 4  ;;  %v3694_v19 = vrot.slane %v3591_v31, 5  ;;  %v3592_v49 = vld [vmem:[#allocation2 + $0x30] sm:$0xe]  ;;  %v3593_v58 = vld [vmem:[#allocation2 + $0x34] sm:$0xf] }
 0x162   : > { %v3298_v21 = vrot.slane %v3297_v61, 4  ;;  %v3692_v52 = vsel %vm7401_vm13, %v5976_v5, %v3691_v57  ;;  %v3693_v22 = vrot.slane %v3691_v57, 4  ;;  %v8194_v63 = vadd.f32 %v8034_v48, %v8001_v0  ;;  %v3595_v3 = vld [vmem:[#allocation2 + $0x3c] sm:$0xe] }
 0x163   : > { %v3308_v18 = vrot.slane %v3307_v55, 4  ;;  %v3688_v15 = vsel %vm7401_vm13, %v3686_v6, %v3687_v20  ;;  %v8200_v29 = vadd.f32 %v8044_v36, %v8037_v11  ;;  %v8204_v47 = vadd.f32 %v8087_v46, %v8085_v8  ;;  %v3594_v36 = vld [vmem:[#allocation2 + $0x38] sm:$0x1]  ;;  %v3596_v20 = vld [vmem:[#allocation2 + $0x40] sm:$0xf] }
 0x164   : > { %v8206_v13 = vpop.f32.mrb[16].mxu1  ;;  %v8208_v0 = vpop.f32.mrb[20].mxu0  ;;  %v3303_v48 = vsel %vm7142_vm2, %v3298_v21, %v3302_v45  ;;  %v5991_v24 = vcombine.low %v3685_v16, %v3688_v15  ;;  %v3695_v31 = vsel %vm7401_vm13, %v3693_v22, %v3694_v19  ;;  %v8216_v11 = vadd.f32 %v8093_v54, %v8089_v34 }
 0x165   : > { %8829 = vst [vmem:[#allocation6_spill] sm:$0xff] %v8204_v47  ;;  %v8218_v8 = vpop.f32.mrb[17].mxu1  ;;  %v8220_v46 = vpop.f32.mrb[21].mxu0  ;;  %v3313_v51 = vsel %vm7142_vm2, %v3308_v18, %v3312_v7  ;;  %v5992_v12 = vcombine.low %v3692_v52, %v3695_v31  ;;  %v3315_v61 = vshrl.u32 %v3098_v17, 16  ;;  %v3318_v45 = vshll.u32 %v3098_v17, 16 }
 0x166   : > { %8830 = vst [vmem:[#allocation7_spill] sm:$0xff] %v8216_v11  ;;  %v8224_v5 = vpop.f32.mrb[18].mxu1  ;;  %v8226_v57 = vpop.f32.mrb[22].mxu0  ;;  %v5966_v55 = vcombine.low %v3303_v48, %v3313_v51  ;;  %6841 = vmatprep.mubr.bf16.mxu0 %v5991_v24  ;;  %v3324_v34 = vshll.u32 %v3099_v44, 16  ;;  %v3328_v54 = vshrl.u32 %v3099_v44, 16  ;;  %v3334_v16 = vshll.u32 %v3100_v32, 16 }
 0x167   : > { %v8228_v6 = vpop.f32.mrb[19].mxu1  ;;  %v8230_v19 = vpop.f32.mrb[23].mxu0  ;;  %v3317_v21 = vrot.slane %v3315_v61, 4  ;;  %v3320_v22 = vrot.slane %v3318_v45, 5  ;;  %v5977_v7 = vrot.slane %v3592_v49, 9  ;;  %v3698_v52 = vrot.slane %v3593_v58, 5 }
 0x168   : > { %v3597_v18 = vld [vmem:[#allocation2 + $0x44] sm:$0x1]  ;;  %5165 = vmatprep.mubr.bf16.mxu1 %v5966_v55  ;;  %v3326_v17 = vrot.slane %v3324_v34, 5  ;;  %v3330_v15 = vrot.slane %v3328_v54, 4  ;;  %v3336_v31 = vrot.slane %v3334_v16, 5  ;;  %v3701_v11 = vrot.slane %v3594_v36, 5 }
 0x169   : > { %5166 = vmatmul.mubr.bf16.gmra.mrb[108].mxu1 %v7009_v43  ;;  %6842 = vmatmul.mubr.bf16.vlgmr.msra.gmra.mrb[112].mxu0 %v5992_v12  ;;  %v3321_v48 = vor.u32 %v3320_v22, %v3317_v21  ;;  %v3699_v44 = vsel %vm7401_vm13, %v5977_v7, %v3698_v52  ;;  %v3700_v32 = vrot.slane %v3698_v52, 4  ;;  %v5978_v24 = vrot.slane %v3595_v3, 9  ;;  %v3101_v51 = vld [vmem:[#allocation2 + $0x84] sm:$0xf]  ;;  %v3102_v58 = vld [vmem:[#allocation2 + $0x88] sm:$0xf] }
 0x16a   : > { %v3331_v47 = vor.u32 %v3330_v15, %v3326_v17  ;;  %v3705_v61 = vrot.slane %v3596_v20, 5  ;;  %v3708_v45 = vrot.slane %v3597_v18, 5  ;;  %v8236_v49 = vadd.f32 %v8058_v35, %v8052_v23  ;;  %v3103_v12 = vld [vmem:[#allocation2 + $0x8c] sm:$0x1]  ;;  %v3598_v20 = vld [vmem:[#allocation2 + $0x48] sm:$0xe] }
 0x16b   : > { %v3322_v55 = vrot.slane %v3321_v48, 4  ;;  %v3702_v43 = vsel %vm7401_vm13, %v3700_v32, %v3701_v11  ;;  %v8242_v36 = vadd.f32 %v8071_v14, %v8066_v10  ;;  %v8246_v3 = vadd.f32 %v8121_v40, %v8109_v25  ;;  %v3599_v21 = vld [vmem:[#allocation2 + $0x4c] sm:$0xf]  ;;  %v3600_v22 = vld [vmem:[#allocation2 + $0x50] sm:$0x1]  ;;  %v7010_v52 = vld [vmem:[#allocation2 + $0x78] sm:$0xff]  }
 0x16c   : > { %v8248_v34 = vpop.f32.mrb[20].mxu1  ;;  %v3332_v54 = vrot.slane %v3331_v47, 4  ;;  %v5993_v23 = vcombine.low %v3699_v44, %v3702_v43  ;;  %v3706_v35 = vsel %vm7401_vm13, %v5978_v24, %v3705_v61  ;;  %v3707_v16 = vrot.slane %v3705_v61, 4  ;;  %v3603_v61 = vld [vmem:[#allocation2 + $0x5c] sm:$0x1] }
 0x16d   : > { %8831 = vst [vmem:[#allocation8_spill] sm:$0xff] %v8246_v3  ;;  %v8252_v11 = vpop.f32.mrb[21].mxu1  ;;  %v3327_v10 = vsel %vm7142_vm2, %v3322_v55, %v3326_v17  ;;  %v8258_v14 = vadd.f32 %v8127_v26, %v8125_v62  ;;  %v3339_v25 = vshrl.u32 %v3101_v51, 16  ;;  %v3342_v40 = vshll.u32 %v3101_v51, 16  ;;  %v3601_v17 = vld [vmem:[#allocation2 + $0x54] sm:$0xe] }
 0x16e   : > { %v8260_v7 = vpop.f32.mrb[22].mxu1  ;;  %v3337_v47 = vsel %vm7142_vm2, %v3332_v54, %v3336_v31  ;;  %6845 = vmatprep.mubr.bf16.mxu0 %v5993_v23  ;;  %v3709_v18 = vsel %vm7401_vm13, %v3707_v16, %v3708_v45  ;;  %v3348_v15 = vshll.u32 %v3102_v58, 16  ;;  %v3352_v48 = vshrl.u32 %v3102_v58, 16  ;;  %v3602_v51 = vld [vmem:[#allocation2 + $0x58] sm:$0xf] }
 0x16f   : > { %8832 = vst [vmem:[#allocation9_spill] sm:$0xff] %v8258_v14  ;;  %v8266_v44 = vpop.f32.mrb[23].mxu1  ;;  %v5967_v62 = vcombine.low %v3327_v10, %v3337_v47  ;;  %v5994_v26 = vcombine.low %v3706_v35, %v3709_v18  ;;  %v3341_v32 = vrot.slane %v3339_v25, 4  ;;  %v3344_v24 = vrot.slane %v3342_v40, 5  ;;  %v3104_v58 = vld [vmem:[#allocation2 + $0x90] sm:$0xf] }
 0x170   : > { %v3350_v55 = vrot.slane %v3348_v15, 5  ;;  %v3354_v43 = vrot.slane %v3352_v48, 4  ;;  %v3358_v14 = vshll.u32 %v3103_v12, 16  ;;  %v5979_v31 = vrot.slane %v3598_v20, 9  ;;  %v3105_v25 = vld [vmem:[#allocation2 + $0x94] sm:$0xf] }
 0x171   : > { %5173 = vmatprep.mubr.bf16.mxu1 %v5967_v62  ;;  %6846 = vmatmul.mubr.bf16.gmra.mrb[116].mxu0 %v5994_v26  ;;  %v3345_v54 = vor.u32 %v3344_v24, %v3341_v32  ;;  %v3712_v23 = vrot.slane %v3599_v21, 5  ;;  %v3715_v45 = vrot.slane %v3600_v22, 5  ;;  %v5980_v16 = vrot.slane %v3601_v17, 9  ;;  %v3106_v20 = vld [vmem:[#allocation2 + $0x98] sm:$0x1] }
 0x172   : > { %5174 = vmatmul.mubr.bf16.gmra.mrb[112].mxu1 %v7010_v52  ;;  %v3355_v3 = vor.u32 %v3354_v43, %v3350_v55  ;;  %v3360_v56 = vrot.slane %v3358_v14, 5  ;;  %v3719_v10 = vrot.slane %v3602_v51, 5  ;;  %v3722_v35 = vrot.slane %v3603_v61, 5  ;;  %v3604_v21 = vld [vmem:[#allocation2 + $0x60] sm:$0xe] }
 0x173   : > { %v3346_v40 = vrot.slane %v3345_v54, 4  ;;  %v3713_v47 = vsel %vm7401_vm13, %v5979_v31, %v3712_v23  ;;  %v3714_v18 = vrot.slane %v3712_v23, 4  ;;  %v8272_v12 = vadd.f32 %v8107_v28, %v8099_v2  ;;  %v3605_v62 = vld [vmem:[#allocation2 + $0x64] sm:$0xf] }
 0x174   : > { %v8274_v22 = vpop.f32.mrb[24].mxu0  ;;  %v8276_v15 = vpop.f32.mrb[24].mxu1  ;;  %v3356_v52 = vrot.slane %v3355_v3, 4  ;;  %v3720_v14 = vsel %vm7401_vm13, %v5980_v16, %v3719_v10  ;;  %v3721_v48 = vrot.slane %v3719_v10, 4  ;;  %v8282_v17 = vadd.f32 %v8139_v1, %v8137_v60  ;;  %v3606_v60 = vld [vmem:[#allocation2 + $0x68] sm:$0x1] }
 0x175   : > { %v8284_v26 = vpop.f32.mrb[25].mxu0  ;;  %v8286_v2 = vpop.f32.mrb[25].mxu1  ;;  %v3351_v28 = vsel %vm7142_vm2, %v3346_v40, %v3350_v55  ;;  %v3716_v32 = vsel %vm7401_vm13, %v3714_v18, %v3715_v45  ;;  %v8294_v3 = vadd.f32 %v8178_v50, %v8176_v38  ;;  %v8298_v24 = vadd.f32 %v8186_v27, %v8182_v39  ;;  %v3607_v1 = vld [vmem:[#allocation2 + $0x6c] sm:$0xe]  ;;  %v7011_v31 = vld [vmem:[#allocation2 + $0x84] sm:$0xff]  }
 0x176   : > { %8833 = vst [vmem:[#allocation10_spill] sm:$0xff] %v8282_v17  ;;  %v8300_v51 = vpop.f32.mrb[26].mxu0  ;;  %v8302_v61 = vpop.f32.mrb[26].mxu1  ;;  %v3361_v55 = vsel %vm7142_vm2, %v3356_v52, %v3360_v56  ;;  %v5995_v43 = vcombine.low %v3713_v47, %v3716_v32  ;;  %v3723_v54 = vsel %vm7401_vm13, %v3721_v48, %v3722_v35  ;;  %v3363_v38 = vshrl.u32 %v3104_v58, 16  ;;  %v3608_v50 = vld [vmem:[#allocation2 + $0x70] sm:$0xf] }
 0x177   : > { %8834 = vst [vmem:[#allocation11_spill] sm:$0xff] %v8294_v3  ;;  %8835 = vst [vmem:[#allocation12_spill] sm:$0xff] %v8298_v24  ;;  %v8308_v23 = vpop.f32.mrb[27].mxu0  ;;  %v8310_v39 = vpop.f32.mrb[27].mxu1  ;;  %v5968_v27 = vcombine.low %v3351_v28, %v3361_v55  ;;  %v5996_v45 = vcombine.low %v3720_v14, %v3723_v54  ;;  %v3366_v16 = vshll.u32 %v3104_v58, 16  ;;  %v3372_v10 = vshll.u32 %v3105_v25, 16 }
 0x178   : > { %v3609_v40 = vld [vmem:[#allocation2 + $0x74] sm:$0x1]  ;;  %6849 = vmatprep.mubr.bf16.mxu0 %v5995_v43  ;;  %v3365_v18 = vrot.slane %v3363_v38, 4  ;;  %v3376_v24 = vshrl.u32 %v3105_v25, 16  ;;  %v3382_v56 = vshll.u32 %v3106_v20, 16  ;;  %v5981_v47 = vrot.slane %v3604_v21, 9 }
 0x179   : > { %5181 = vmatprep.mubr.bf16.mxu1 %v5968_v27  ;;  %6850 = vmatmul.mubr.bf16.gmra.mrb[120].mxu0 %v5996_v45  ;;  %v3368_v52 = vrot.slane %v3366_v16, 5  ;;  %v3374_v35 = vrot.slane %v3372_v10, 5  ;;  %v3726_v48 = vrot.slane %v3605_v62, 5  ;;  %v3729_v32 = vrot.slane %v3606_v60, 5  ;;  %v3107_v25 = vld [vmem:[#allocation2 + $0x9c] sm:$0xf] }
 0x17a   : > { %5182 = vmatmul.mubr.bf16.gmra.mrb[116].mxu1 %v7011_v31  ;;  %v3378_v3 = vrot.slane %v3376_v24, 4  ;;  %v3384_v30 = vrot.slane %v3382_v56, 5  ;;  %v5982_v17 = vrot.slane %v3607_v1, 9  ;;  %v3733_v28 = vrot.slane %v3608_v50, 5  ;;  %v3108_v60 = vld [vmem:[#allocation2 + $0xa0] sm:$0xf] }
 0x17b   : > { %v3369_v14 = vor.u32 %v3368_v52, %v3365_v18  ;;  %v3727_v58 = vsel %vm7401_vm13, %v5981_v47, %v3726_v48  ;;  %v3728_v55 = vrot.slane %v3726_v48, 4  ;;  %v3736_v43 = vrot.slane %v3609_v40, 5  ;;  %v3109_v1 = vld [vmem:[#allocation2 + $0xa4] sm:$0x1]  ;;  %v3611_v45 = vld [vmem:[#allocation2 + $0x7c] sm:$0xf] }
 0x17c   : > { %v8314_v20 = vpop.f32.mrb[28].mxu1  ;;  %v3379_v21 = vor.u32 %v3378_v3, %v3374_v35  ;;  %v3734_v54 = vsel %vm7401_vm13, %v5982_v17, %v3733_v28  ;;  %v3735_v62 = vrot.slane %v3733_v28, 4  ;;  %v8320_v24 = vadd.f32 %v8149_v37, %v8145_v42  ;;  %v3610_v3 = vld [vmem:[#allocation2 + $0x78] sm:$0xe]  ;;  %v3612_v56 = vld [vmem:[#allocation2 + $0x80] sm:$0x1] }
 0x17d   : > { %v8322_v31 = vpop.f32.mrb[29].mxu1  ;;  %v3370_v38 = vrot.slane %v3369_v14, 4  ;;  %v3730_v50 = vsel %vm7401_vm13, %v3728_v55, %v3729_v32  ;;  %v8328_v27 = vadd.f32 %v8165_v53, %v8153_v9  ;;  %v6483_v17 = vadd.f32 %v8218_v8, %v8206_v13  ;;  %v3613_v48 = vld [vmem:[#allocation2 + $0x84] sm:$0xe]  ;;  %v3614_v32 = vld [vmem:[#allocation2 + $0x88] sm:$0xf] }
 0x17e   : > { %v8332_v16 = vpop.f32.mrb[28].mxu0  ;;  %v8334_v42 = vpop.f32.mrb[30].mxu1  ;;  %v3380_v37 = vrot.slane %v3379_v21, 4  ;;  %v5997_v10 = vcombine.low %v3727_v58, %v3730_v50  ;;  %v3737_v40 = vsel %vm7401_vm13, %v3735_v62, %v3736_v43  ;;  %v6486_v18 = vadd.f32 %v8228_v6, %v8224_v5  ;;  %v7012_v6 = vld [vmem:[#allocation2 + $0x90] sm:$0xff]  }
 0x17f   : > { %v8340_v9 = vpop.f32.mrb[29].mxu0  ;;  %v8342_v53 = vpop.f32.mrb[31].mxu1  ;;  %v3375_v13 = vsel %vm7142_vm2, %v3370_v38, %v3374_v35  ;;  %v5998_v8 = vcombine.low %v3734_v54, %v3737_v40  ;;  %v8347_v47 = vadd.f32 %v6483_v17, %v7997_v4  ;;  %v3387_v52 = vshrl.u32 %v3107_v25, 16  ;;  %v3615_v40 = vld [vmem:[#allocation2 + $0x8c] sm:$0x1] }
 0x180   : > { %v8349_v28 = vpop.f32.mrb[30].mxu0  ;;  %v3385_v5 = vsel %vm7142_vm2, %v3380_v37, %v3384_v30  ;;  %6853 = vmatprep.mubr.bf16.mxu0 %v5997_v10  ;;  %v8354_v14 = vadd.f32 %v6486_v18, %v8157_v59  ;;  %v3390_v58 = vshll.u32 %v3107_v25, 16  ;;  %v3396_v55 = vshll.u32 %v3108_v60, 16 }
 0x181   : > { %v8356_v35 = vpop.f32.mrb[31].mxu0  ;;  %v5969_v43 = vcombine.low %v3375_v13, %v3385_v5  ;;  %6854 = vmatmul.mubr.bf16.gmra.mrb[124].mxu0 %v5998_v8  ;;  %v3389_v4 = vrot.slane %v3387_v52, 4  ;;  %v3400_v21 = vshrl.u32 %v3108_v60, 16  ;;  %v3406_v54 = vshll.u32 %v3109_v1, 16 }
 0x182   : > { %v3392_v62 = vrot.slane %v3390_v58, 5  ;;  %v3398_v38 = vrot.slane %v3396_v55, 5  ;;  %v5983_v50 = vrot.slane %v3610_v3, 9  ;;  %v3740_v17 = vrot.slane %v3611_v45, 5 }
 0x183   : > { %5189 = vmatprep.mubr.bf16.mxu1 %v5969_v43  ;;  %v3402_v30 = vrot.slane %v3400_v21, 4  ;;  %v3408_v37 = vrot.slane %v3406_v54, 5  ;;  %v3743_v10 = vrot.slane %v3612_v56, 5  ;;  %v5984_v59 = vrot.slane %v3613_v48, 9  ;;  %v3110_v48 = vld [vmem:[#allocation2 + $0xa8] sm:$0xf] }
 0x184   : > { %v8358_v18 = vpop.f32.mrb[32].mxu1  ;;  %5190 = vmatmul.mubr.bf16.gmra.mrb[120].mxu1 %v7012_v6  ;;  %v3393_v25 = vor.u32 %v3392_v62, %v3389_v4  ;;  %v3741_v13 = vsel %vm7401_vm13, %v5983_v50, %v3740_v17  ;;  %v3742_v8 = vrot.slane %v3740_v17, 4  ;;  %v3747_v60 = vrot.slane %v3614_v32, 5  ;;  %v3111_v21 = vld [vmem:[#allocation2 + $0xac] sm:$0xf] }
 0x185   : > { %v8362_v1 = vpop.f32.mrb[33].mxu1  ;;  %v3403_v52 = vor.u32 %v3402_v30, %v3398_v38  ;;  %v3750_v3 = vrot.slane %v3615_v40, 5  ;;  %v8366_v45 = vadd.f32 %v8220_v46, %v8208_v0  ;;  %v8370_v56 = vadd.f32 %v8230_v19, %v8226_v57  ;;  %v7013_v46 = vld [vmem:[#allocation2 + $0x9c] sm:$0xff]   ;;  %v3112_v54 = vld [vmem:[#allocation2 + $0xb0] sm:$0x1] }
 0x186   : > { %v8372_v5 = vpop.f32.mrb[34].mxu1  ;;  %v3394_v6 = vrot.slane %v3393_v25, 4  ;;  %v3744_v58 = vsel %vm7401_vm13, %v3742_v8, %v3743_v10  ;;  %v3748_v32 = vsel %vm7401_vm13, %v5984_v59, %v3747_v60  ;;  %v3749_v55 = vrot.slane %v3747_v60, 4  ;;  %v3616_v30 = vld [vmem:[#allocation2 + $0x90] sm:$0xe] }
 0x187   : > { %v8378_v43 = vpop.f32.mrb[35].mxu1  ;;  %v3404_v4 = vrot.slane %v3403_v52, 4  ;;  %v5999_v0 = vcombine.low %v3741_v13, %v3744_v58  ;;  %v6489_v57 = vadd.f32 %v8252_v11, %v8248_v34  ;;  %v6492_v19 = vadd.f32 %v8266_v44, %v8260_v7  ;;  %v3617_v10 = vld [vmem:[#allocation2 + $0x94] sm:$0xf]  ;;  %v3618_v44 = vld [vmem:[#allocation2 + $0x98] sm:$0x1] }
 0x188   : > { %v3399_v62 = vsel %vm7142_vm2, %v3394_v6, %v3398_v38  ;;  %v3751_v50 = vsel %vm7401_vm13, %v3749_v55, %v3750_v3  ;;  %v3411_v17 = vshrl.u32 %v3110_v48, 16  ;;  %v3414_v40 = vshll.u32 %v3110_v48, 16  ;;  %v3619_v38 = vld [vmem:[#allocation2 + $0x9c] sm:$0xe]  ;;  %v3620_v25 = vld [vmem:[#allocation2 + $0xa0] sm:$0xf] }
 0x189   : > { %v3409_v59 = vsel %vm7142_vm2, %v3404_v4, %v3408_v37  ;;  %6857 = vmatprep.mubr.bf16.mxu0 %v5999_v0  ;;  %v6000_v34 = vcombine.low %v3748_v32, %v3751_v50  ;;  %v8391_v11 = vadd.f32 %v6489_v57, %v8194_v63  ;;  %v8394_v7 = vadd.f32 %v6492_v19, %v8200_v29  ;;  %v3621_v3 = vld [vmem:[#allocation2 + $0xa4] sm:$0x1]  ;;  %v3113_v0 = vld [vmem:[#allocation2 + $0xb4] sm:$0xf] }
 0x18a   : > { %v5970_v13 = vcombine.low %v3399_v62, %v3409_v59  ;;  %v3413_v8 = vrot.slane %v3411_v17, 4  ;;  %v3416_v60 = vrot.slane %v3414_v40, 5  ;;  %v3420_v52 = vshll.u32 %v3111_v21, 16 }
 0x18b   : > { %6858 = vmatmul.mubr.bf16.gmra.mrb[128].mxu0 %v6000_v34  ;;  %v3424_v48 = vshrl.u32 %v3111_v21, 16  ;;  %v3430_v6 = vshll.u32 %v3112_v54, 16  ;;  %v5985_v37 = vrot.slane %v3616_v30, 9  ;;  %v3754_v58 = vrot.slane %v3617_v10, 5 }
 0x18c   : > { %v8396_v32 = vpop.f32.mrb[32].mxu0  ;;  %5197 = vmatprep.mubr.bf16.mxu1 %v5970_v13  ;;  %v3417_v63 = vor.u32 %v3416_v60, %v3413_v8  ;;  %v3422_v55 = vrot.slane %v3420_v52, 5  ;;  %v3757_v29 = vrot.slane %v3618_v44, 5  ;;  %v5986_v4 = vrot.slane %v3619_v38, 9  ;;  %v3114_v60 = vld [vmem:[#allocation2 + $0xb8] sm:$0xf] }
 0x18d   : > { %v8398_v57 = vpop.f32.mrb[33].mxu0  ;;  %v8400_v19 = vpop.f32.mrb[36].mxu1  ;;  %5198 = vmatmul.mubr.bf16.gmra.mrb[124].mxu1 %v7013_v46  ;;  %v3426_v62 = vrot.slane %v3424_v48, 4  ;;  %v3432_v50 = vrot.slane %v3430_v6, 5  ;;  %v3755_v21 = vsel %vm7401_vm13, %v5985_v37, %v3754_v58  ;;  %v3756_v54 = vrot.slane %v3754_v58, 4 }
 0x18e   : > { %v8404_v17 = vpop.f32.mrb[34].mxu0  ;;  %v8406_v40 = vpop.f32.mrb[37].mxu1  ;;  %v3418_v30 = vrot.slane %v3417_v63, 4  ;;  %v3761_v10 = vrot.slane %v3620_v25, 5  ;;  %v3764_v59 = vrot.slane %v3621_v3, 5  ;;  %v8410_v34 = vadd.f32 %v8284_v26, %v8274_v22 }
 0x18f   : > { %v8412_v44 = vpop.f32.mrb[35].mxu0  ;;  %v8414_v46 = vpop.f32.mrb[38].mxu1  ;;  %v3427_v38 = vor.u32 %v3426_v62, %v3422_v55  ;;  %v3758_v13 = vsel %vm7401_vm13, %v3756_v54, %v3757_v29  ;;  %v8420_v8 = vadd.f32 %v8308_v23, %v8300_v51  ;;  %v6495_v25 = vadd.f32 %v8286_v2, %v8276_v15  ;;  %v3115_v6 = vld [vmem:[#allocation2 + $0xbc] sm:$0x1]  ;;  %v3622_v37 = vld [vmem:[#allocation2 + $0xa8] sm:$0xe] }
 0x190   : > { %v8424_v52 = vpop.f32.mrb[39].mxu1  ;;  %v3423_v22 = vsel %vm7142_vm2, %v3418_v30, %v3422_v55  ;;  %v6001_v26 = vcombine.low %v3755_v21, %v3758_v13  ;;  %v3762_v3 = vsel %vm7401_vm13, %v5986_v4, %v3761_v10  ;;  %v3763_v48 = vrot.slane %v3761_v10, 4  ;;  %v3623_v23 = vld [vmem:[#allocation2 + $0xac] sm:$0xf]  ;;  %v3624_v63 = vld [vmem:[#allocation2 + $0xb0] sm:$0x1] }
 0x191   : > { %v3428_v58 = vrot.slane %v3427_v38, 4  ;;  %v8431_v51 = vadd.f32 %v6495_v25, %v8236_v49  ;;  %v6498_v15 = vadd.f32 %v8310_v39, %v8302_v61  ;;  %v3435_v2 = vshrl.u32 %v3113_v0, 16  ;;  %v7014_v29 = vld [vmem:[#allocation2 + $0xa8] sm:$0xff]   ;;  %v3625_v54 = vld [vmem:[#allocation2 + $0xb4] sm:$0xe] }
 0x192   : > { %6861 = vmatprep.mubr.bf16.mxu0 %v6001_v26  ;;  %v3765_v55 = vsel %vm7401_vm13, %v3763_v48, %v3764_v59  ;;  %v3438_v62 = vshll.u32 %v3113_v0, 16  ;;  %v3444_v4 = vshll.u32 %v3114_v60, 16  ;;  %v3448_v21 = vshrl.u32 %v3114_v60, 16  ;;  %v3626_v39 = vld [vmem:[#allocation2 + $0xb8] sm:$0xf] }
 0x193   : > { %8836 = vst [vmem:[#allocation13_spill] sm:$0xff] %v8431_v51  ;;  %v3433_v30 = vsel %vm7142_vm2, %v3428_v58, %v3432_v50  ;;  %v6002_v49 = vcombine.low %v3762_v3, %v3765_v55  ;;  %v8440_v10 = vadd.f32 %v6498_v15, %v8242_v36  ;;  %v3437_v61 = vrot.slane %v3435_v2, 4  ;;  %v3627_v38 = vld [vmem:[#allocation2 + $0xbc] sm:$0x1] }
 0x194   : > { %v8442_v13 = vpop.f32.mrb[36].mxu0  ;;  %v5971_v25 = vcombine.low %v3423_v22, %v3433_v30  ;;  %v3440_v26 = vrot.slane %v3438_v62, 5  ;;  %v3446_v51 = vrot.slane %v3444_v4, 5  ;;  %v3450_v59 = vrot.slane %v3448_v21, 4 }
 0x195   : > { %8837 = vst [vmem:[#allocation14_spill] sm:$0xff] %v8440_v10  ;;  %v8444_v0 = vpop.f32.mrb[37].mxu0  ;;  %v8446_v60 = vpop.f32.mrb[40].mxu1  ;;  %6862 = vmatmul.mubr.bf16.gmra.mrb[132].mxu0 %v6002_v49  ;;  %v3454_v48 = vshll.u32 %v3115_v6, 16  ;;  %v5987_v50 = vrot.slane %v3622_v37, 9  ;;  %v3768_v3 = vrot.slane %v3623_v23, 5 }
 0x196   : > { %v3771_v58 = vrot.slane %v3624_v63, 5  ;;  %v8448_v36 = vpop.f32.mrb[38].mxu0  ;;  %v8450_v15 = vpop.f32.mrb[41].mxu1  ;;  %5205 = vmatprep.mubr.bf16.mxu1 %v5971_v25  ;;  %v3441_v2 = vor.u32 %v3440_v26, %v3437_v61  ;;  %v3451_v55 = vor.u32 %v3450_v59, %v3446_v51  ;;  %v5988_v22 = vrot.slane %v3625_v54, 9  ;;  %v3116_v26 = vld [vmem:[#allocation2 + $0xc0] sm:$0xf] }
 0x197   : > { %v3775_v62 = vrot.slane %v3626_v39, 5  ;;  %v8452_v4 = vpop.f32.mrb[39].mxu0  ;;  %v8454_v21 = vpop.f32.mrb[42].mxu1  ;;  %5206 = vmatmul.mubr.bf16.gmra.mrb[128].mxu1 %v7014_v29  ;;  %v3456_v30 = vrot.slane %v3454_v48, 5  ;;  %v3769_v6 = vsel %vm7401_vm13, %v5987_v50, %v3768_v3  ;;  %v3770_v37 = vrot.slane %v3768_v3, 4 }
 0x198   : > { %v3778_v23 = vrot.slane %v3627_v38, 5  ;;  %v8458_v63 = vpop.f32.mrb[43].mxu1  ;;  %v3442_v49 = vrot.slane %v3441_v2, 4  ;;  %v3452_v10 = vrot.slane %v3451_v55, 4  ;;  %v8466_v29 = vadd.f32 %v8340_v9, %v8332_v16  ;;  %v3117_v59 = vld [vmem:[#allocation2 + $0xc4] sm:$0xf] }
 0x199   : > { %v3776_v61 = vsel %vm7401_vm13, %v5988_v22, %v3775_v62  ;;  %v3777_v54 = vrot.slane %v3775_v62, 4  ;;  %v3772_v39 = vsel %vm7401_vm13, %v3770_v37, %v3771_v58  ;;  %v8470_v25 = vadd.f32 %v8356_v35, %v8349_v28  ;;  %v3118_v9 = vld [vmem:[#allocation2 + $0xc8] sm:$0x1]  ;;  %v7015_v2 = vld [vmem:[#allocation2 + $0xb4] sm:$0xff]   ;;  %v3629_v55 = vld [vmem:[#allocation2 + $0xc4] sm:$0xf] }
 0x19a   : > { %v6501_v38 = vadd.f32 %v8322_v31, %v8314_v20  ;;  %v3447_v48 = vsel %vm7142_vm2, %v3442_v49, %v3446_v51  ;;  %v3457_v50 = vsel %vm7142_vm2, %v3452_v10, %v3456_v30  ;;  %v6003_v3 = vcombine.low %v3769_v6, %v3772_v39  ;;  %v3628_v31 = vld [vmem:[#allocation2 + $0xc0] sm:$0xe]  ;;  %v3630_v30 = vld [vmem:[#allocation2 + $0xc8] sm:$0x1]  ;;  %v3632_v49 = vld [vmem:[#allocation2 + $0xd0] sm:$0xf] }
 0x19b   : > { %v3779_v16 = vsel %vm7401_vm13, %v3777_v54, %v3778_v23  ;;  %v5972_v58 = vcombine.low %v3447_v48, %v3457_v50  ;;  %v6504_v20 = vadd.f32 %v8342_v53, %v8334_v42  ;;  %v3459_v51 = vshrl.u32 %v3116_v26, 16  ;;  %v8838_v6 = vld [vmem:[#allocation10_spill] sm:$0xff] }
 0x19c   : > { %v6004_v28 = vcombine.low %v3776_v61, %v3779_v16  ;;  %v8481_v35 = vadd.f32 %v6501_v38, %v8272_v12  ;;  %6865 = vmatprep.mubr.bf16.mxu0 %v6003_v3  ;;  %v3462_v22 = vshll.u32 %v3116_v26, 16  ;;  %v3468_v10 = vshll.u32 %v3117_v59, 16  ;;  %v3631_v53 = vld [vmem:[#allocation2 + $0xcc] sm:$0xe]  ;;  %v3633_v26 = vld [vmem:[#allocation2 + $0xd4] sm:$0x1] }
 0x19d   : > { %v3472_v62 = vshrl.u32 %v3117_v59, 16  ;;  %5213 = vmatprep.mubr.bf16.mxu1 %v5972_v58  ;;  %v8486_v37 = vadd.f32 %v6504_v20, %v8838_v6  ;;  %v3478_v23 = vshll.u32 %v3118_v9, 16  ;;  %v8490_v12 = vadd.f32 %v8398_v57, %v8396_v32  ;;  %v3119_v58 = vld [vmem:[#allocation2 + $0xcc] sm:$0xf] }
 0x19e   : > { %6866 = vmatmul.mubr.bf16.gmra.mrb[136].mxu0 %v6004_v28  ;;  %v8494_v42 = vadd.f32 %v8412_v44, %v8404_v17  ;;  %v3461_v61 = vrot.slane %v3459_v51, 4  ;;  %v3464_v54 = vrot.slane %v3462_v22, 5  ;;  %v3470_v39 = vrot.slane %v3468_v10, 5 }
 0x19f   : > { %v3474_v38 = vrot.slane %v3472_v62, 4  ;;  %5214 = vmatmul.mubr.bf16.gmra.mrb[132].mxu1 %v7015_v2  ;;  %v3480_v59 = vrot.slane %v3478_v23, 5  ;;  %v5989_v48 = vrot.slane %v3628_v31, 9  ;;  %v3782_v50 = vrot.slane %v3629_v55, 5  ;;  %v6429_v16 = vpop.f32.mrb[40].mxu0  ;;  %v6523_v9 = vpop.f32.mrb[44].mxu1 }
 0x1a0   : > { %v3785_v3 = vrot.slane %v3630_v30, 5  ;;  %v3465_v32 = vor.u32 %v3464_v54, %v3461_v61  ;;  %v6507_v17 = vadd.f32 %v8362_v1, %v8358_v18  ;;  %v5990_v44 = vrot.slane %v3631_v53, 9  ;;  %v6430_v28 = vpop.f32.mrb[41].mxu0  ;;  %v6524_v20 = vpop.f32.mrb[45].mxu1  ;;  %v3120_v54 = vld [vmem:[#allocation2 + $0xd0] sm:$0xf] }
 0x1a1   : > { %v3475_v57 = vor.u32 %v3474_v38, %v3470_v39  ;;  %v3783_v51 = vsel %vm7401_vm13, %v5989_v48, %v3782_v50  ;;  %v3784_v22 = vrot.slane %v3782_v50, 4  ;;  %v3789_v2 = vrot.slane %v3632_v49, 5  ;;  %v6432_v31 = vpop.f32.mrb[42].mxu0  ;;  %v6526_v55 = vpop.f32.mrb[46].mxu1  ;;  %v3121_v38 = vld [vmem:[#allocation2 + $0xd4] sm:$0x1] }
 0x1a2   : > { %v3792_v10 = vrot.slane %v3633_v26, 5  ;;  %v3466_v62 = vrot.slane %v3465_v32, 4  ;;  %v8501_v6 = vadd.f32 %v6507_v17, %v8320_v24  ;;  %v6510_v18 = vadd.f32 %v8378_v43, %v8372_v5  ;;  %v6433_v1 = vpop.f32.mrb[43].mxu0  ;;  %v6527_v23 = vpop.f32.mrb[47].mxu1  ;;  %v7016_v50 = vld [vmem:[#allocation2 + $0xc0] sm:$0xff]  }
 0x1a3   : > { %v3476_v30 = vrot.slane %v3475_v57, 4  ;;  %v3786_v53 = vsel %vm7401_vm13, %v3784_v22, %v3785_v3  ;;  %v3790_v61 = vsel %vm7401_vm13, %v5990_v44, %v3789_v2  ;;  %v3791_v49 = vrot.slane %v3789_v2, 4 }
 0x1a4   : > { %8839 = vst [vmem:[#allocation10_spill] sm:$0xff] %v8501_v6  ;;  %v3483_v26 = vshrl.u32 %v3119_v58, 16  ;;  %v3471_v48 = vsel %vm7142_vm2, %v3466_v62, %v3470_v39  ;;  %v6005_v5 = vcombine.low %v3783_v51, %v3786_v53  ;;  %v8514_v43 = vadd.f32 %v6510_v18, %v8328_v27 }
 0x1a5   : > { %v3481_v24 = vsel %vm7142_vm2, %v3476_v30, %v3480_v59  ;;  %v3793_v3 = vsel %vm7401_vm13, %v3791_v49, %v3792_v10  ;;  %v3486_v17 = vshll.u32 %v3119_v58, 16  ;;  %v3492_v22 = vshll.u32 %v3120_v54, 16 }
 0x1a6   : > { %v5973_v32 = vcombine.low %v3471_v48, %v3481_v24  ;;  %v3485_v57 = vrot.slane %v3483_v26, 4  ;;  %6869 = vmatprep.mubr.bf16.mxu0 %v6005_v5  ;;  %v6006_v44 = vcombine.low %v3790_v61, %v3793_v3  ;;  %v3496_v2 = vshrl.u32 %v3120_v54, 16 }
 0x1a7   : > { %v3502_v6 = vshll.u32 %v3121_v38, 16  ;;  %v3488_v39 = vrot.slane %v3486_v17, 5  ;;  %v6425_v59 = vadd.f32 %v8444_v0, %v8442_v13  ;;  %v6428_v27 = vadd.f32 %v8452_v4, %v8448_v36 }
 0x1a8   : > { %5221 = vmatprep.mubr.bf16.mxu1 %v5973_v32  ;;  %v6513_v51 = vadd.f32 %v8406_v40, %v8400_v19  ;;  %6870 = vmatmul.mubr.bf16.gmra.mrb[140].mxu0 %v6006_v44  ;;  %v3494_v41 = vrot.slane %v3492_v22, 5  ;;  %v3498_v58 = vrot.slane %v3496_v2, 4  ;;  %v6516_v62 = vadd.f32 %v8424_v52, %v8414_v46 }
 0x1a9   : > { %5222 = vmatmul.mubr.bf16.gmra.mrb[136].mxu1 %v7016_v50  ;;  %v3504_v10 = vrot.slane %v3502_v6, 5  ;;  %v3489_v30 = vor.u32 %v3488_v39, %v3485_v57  ;;  %v6431_v53 = vadd.f32 %v6430_v28, %v6429_v16  ;;  %v6434_v13 = vadd.f32 %v6433_v1, %v6432_v31  ;;  %v6529_v0 = vpop.f32.mrb[48].mxu1 }
 0x1aa   : > { %v8527_v18 = vadd.f32 %v6513_v51, %v8366_v45  ;;  %v3499_v61 = vor.u32 %v3498_v58, %v3494_v41  ;;  %v8530_v36 = vadd.f32 %v6516_v62, %v8370_v56  ;;  %v6519_v19 = vadd.f32 %v8450_v15, %v8446_v60  ;;  %v6530_v4 = vpop.f32.mrb[49].mxu1 }
 0x1ab   : > { %v6522_v40 = vadd.f32 %v8458_v63, %v8454_v21  ;;  %v3490_v6 = vrot.slane %v3489_v30, 4  ;;  %v6525_v46 = vadd.f32 %v6524_v20, %v6523_v9  ;;  %v6528_v52 = vadd.f32 %v6527_v23, %v6526_v55  ;;  %v6532_v45 = vpop.f32.mrb[50].mxu1  ;;  %v7017_v9 = vld [vmem:[#allocation2 + $0xcc] sm:$0xff]  }
 0x1ac   : > { %v6531_v49 = vadd.f32 %v6530_v4, %v6529_v0  ;;  %v3500_v54 = vrot.slane %v3499_v61, 4  ;;  %v8537_v16 = vadd.f32 %v6519_v19, %v8410_v34  ;;  %v6533_v56 = vpop.f32.mrb[51].mxu1 }
 0x1ad   : > { %v8540_v28 = vadd.f32 %v6522_v40, %v8420_v8  ;;  %v3495_v60 = vsel %vm7142_vm2, %v3490_v6, %v3494_v41  ;;  %v8545_v15 = vadd.f32 %v6525_v46, %v8466_v29  ;;  %v8548_v21 = vadd.f32 %v6528_v52, %v8470_v25 }
 0x1ae   : > { %v8551_v63 = vadd.f32 %v6531_v49, %v8490_v12  ;;  %v3505_v34 = vsel %vm7142_vm2, %v3500_v54, %v3504_v10  ;;  %v6534_v20 = vadd.f32 %v6533_v56, %v6532_v45 }
 0x1af   : > { %v5974_v8 = vcombine.low %v3495_v60, %v3505_v34  ;;  %v6435_v31 = vpop.f32.mrb[44].mxu0 }
 0x1b0   : > { %v6436_v55 = vpop.f32.mrb[45].mxu0  ;;  %v8556_v1 = vadd.f32 %v6534_v20, %v8494_v42 }
 0x1b1   : > { %5229 = vmatprep.mubr.bf16.mxu1 %v5974_v8  ;;  %v6437_v29 = vadd.f32 %v6436_v55, %v6435_v31  ;;  %v6438_v23 = vpop.f32.mrb[46].mxu0 }
 0x1b2   : > { %5230 = vmatmul.mubr.bf16.gmra.mrb[140].mxu1 %v7017_v9  ;;  %v6439_v25 = vpop.f32.mrb[47].mxu0 }
 0x1b3   : > { %v6440_v38 = vadd.f32 %v6439_v25, %v6438_v23  ;;  %v8841_v23 = vld [vmem:[#allocation14_spill] sm:$0xff] }
 0x1b4   : > { %v6535_v26 = vpop.f32.mrb[52].mxu1 }
 0x1b5   : > { %v6536_v12 = vpop.f32.mrb[53].mxu1 }
 0x1b6   : > { %v6537_v48 = vadd.f32 %v6536_v12, %v6535_v26  ;;  %v6538_v24 = vpop.f32.mrb[54].mxu1 }
 0x1b7   : > { %v6593_v33 = vpop.f32.mrb[48].mxu0  ;;  %v6539_v50 = vpop.f32.mrb[55].mxu1 }
 0x1b8   : > { %v6594_v5 = vpop.f32.mrb[49].mxu0  ;;  %v8558_v32 = vadd.f32 %v6537_v48, %v6425_v59  ;;  %v6540_v3 = vadd.f32 %v6539_v50, %v6538_v24  ;;  %v8842_v50 = vld [vmem:[#allocation4_spill] sm:$0xff] }
 0x1b9   : > { %v6595_v57 = vadd.f32 %v6594_v5, %v6593_v33  ;;  %v6596_v17 = vpop.f32.mrb[50].mxu0 }
 0x1ba   : > { %v6597_v42 = vpop.f32.mrb[51].mxu0  ;;  %v8560_v44 = vadd.f32 %v6540_v3, %v6428_v27 }
 0x1bb   : > { %v8563_v22 = vadd.f32 %v6595_v57, %v8347_v47  ;;  %v6598_v2 = vadd.f32 %v6597_v42, %v6596_v17  ;;  %v8843_v42 = vld [vmem:[#allocation5_spill] sm:$0xff] }
 0x1bc   : > { %v6541_v39 = vpop.f32.mrb[56].mxu1 }
 0x1bd   : > { %v8566_v51 = vadd.f32 %v6598_v2, %v8354_v14  ;;  %v6542_v41 = vpop.f32.mrb[57].mxu1 }
 0x1be   : > { %v6543_v58 = vadd.f32 %v6542_v41, %v6541_v39  ;;  %v6544_v10 = vpop.f32.mrb[58].mxu1 }
 0x1bf   : > { %v6599_v62 = vpop.f32.mrb[52].mxu0  ;;  %v6545_v59 = vpop.f32.mrb[59].mxu1 }
 0x1c0   : > { %v6600_v30 = vpop.f32.mrb[53].mxu0  ;;  %v8568_v0 = vadd.f32 %v6543_v58, %v6431_v53  ;;  %v6546_v61 = vadd.f32 %v6545_v59, %v6544_v10 }
 0x1c1   : > { %v6601_v19 = vadd.f32 %v6600_v30, %v6599_v62  ;;  %v6602_v27 = vpop.f32.mrb[54].mxu0 }
 0x1c2   : > { %v6603_v40 = vpop.f32.mrb[55].mxu0  ;;  %v8570_v4 = vadd.f32 %v6546_v61, %v6434_v13 }
 0x1c3   : > { %v8573_v47 = vadd.f32 %v6601_v19, %v8391_v11  ;;  %v6604_v6 = vadd.f32 %v6603_v40, %v6602_v27  ;;  %v8840_v11 = vld [vmem:[#allocation13_spill] sm:$0xff]  ;;  %v8844_v40 = vld [vmem:[#allocation6_spill] sm:$0xff] }
 0x1c4   : > { %v6547_v14 = vpop.f32.mrb[60].mxu1 }
 0x1c5   : > { %v8576_v46 = vadd.f32 %v6604_v6, %v8394_v7  ;;  %v6548_v52 = vpop.f32.mrb[61].mxu1 }
 0x1c6   : > { %v6549_v49 = vadd.f32 %v6548_v52, %v6547_v14  ;;  %v6550_v45 = vpop.f32.mrb[62].mxu1 }
 0x1c7   : > { %v6605_v54 = vpop.f32.mrb[56].mxu0  ;;  %v6551_v53 = vpop.f32.mrb[63].mxu1 }
 0x1c8   : > { %v6606_v56 = vpop.f32.mrb[57].mxu0  ;;  %v8578_v60 = vadd.f32 %v6549_v49, %v6437_v29  ;;  %v6552_v34 = vadd.f32 %v6551_v53, %v6550_v45  ;;  %v8846_v53 = vld [vmem:[#allocation10_spill] sm:$0xff] }
 0x1c9   : > { %v6607_v9 = vadd.f32 %v6606_v56, %v6605_v54  ;;  %v6608_v13 = vpop.f32.mrb[58].mxu0 }
 0x1ca   : > { %v6609_v20 = vpop.f32.mrb[59].mxu0  ;;  %v8580_v8 = vadd.f32 %v6552_v34, %v6440_v38 }
 0x1cb   : > { %v8583_v31 = vadd.f32 %v6607_v9, %v8840_v11  ;;  %v6610_v55 = vadd.f32 %v6609_v20, %v6608_v13 }
 0x1cc   : > { %v6553_v7 = vpop.f32.mrb[64].mxu1 }
 0x1cd   : > { %v8586_v25 = vadd.f32 %v6610_v55, %v8841_v23  ;;  %v6554_v26 = vpop.f32.mrb[65].mxu1 }
 0x1ce   : > { %v6555_v12 = vadd.f32 %v6554_v26, %v6553_v7  ;;  %v6556_v48 = vpop.f32.mrb[66].mxu1  ;;  %v8847_v26 = vld [vmem:[#allocation8_spill] sm:$0xff] }
 0x1cf   : > { %v6611_v24 = vpop.f32.mrb[60].mxu0  ;;  %v6557_v29 = vpop.f32.mrb[67].mxu1 }
 0x1d0   : > { %v6612_v33 = vpop.f32.mrb[61].mxu0  ;;  %v8589_v5 = vadd.f32 %v6555_v12, %v8842_v50  ;;  %v6558_v3 = vadd.f32 %v6557_v29, %v6556_v48  ;;  %v8848_v50 = vld [vmem:[#allocation9_spill] sm:$0xff] }
 0x1d1   : > { %v6613_v38 = vadd.f32 %v6612_v33, %v6611_v24  ;;  %v6614_v57 = vpop.f32.mrb[62].mxu0 }
 0x1d2   : > { %v6615_v17 = vpop.f32.mrb[63].mxu0  ;;  %v8592_v2 = vadd.f32 %v6558_v3, %v8843_v42 }
 0x1d3   : > { %v8595_v39 = vadd.f32 %v6613_v38, %v8481_v35  ;;  %v6616_v41 = vadd.f32 %v6615_v17, %v6614_v57  ;;  %v8845_v35 = vld [vmem:[#allocation7_spill] sm:$0xff] }
 0x1d4   : > { %v6559_v58 = vpop.f32.mrb[68].mxu1 }
 0x1d5   : > { %v8598_v10 = vadd.f32 %v6616_v41, %v8486_v37  ;;  %v6560_v62 = vpop.f32.mrb[69].mxu1 }
 0x1d6   : > { %v6561_v59 = vadd.f32 %v6560_v62, %v6559_v58  ;;  %v6562_v30 = vpop.f32.mrb[70].mxu1 }
 0x1d7   : > { %v6617_v61 = vpop.f32.mrb[64].mxu0  ;;  %v6563_v19 = vpop.f32.mrb[71].mxu1 }
 0x1d8   : > { %v6618_v27 = vpop.f32.mrb[65].mxu0  ;;  %v8601_v6 = vadd.f32 %v6561_v59, %v8844_v40  ;;  %v6564_v14 = vadd.f32 %v6563_v19, %v6562_v30 }
 0x1d9   : > { %v6619_v52 = vadd.f32 %v6618_v27, %v6617_v61  ;;  %v6620_v49 = vpop.f32.mrb[66].mxu0 }
 0x1da   : > { %v6621_v45 = vpop.f32.mrb[67].mxu0  ;;  %v8604_v54 = vadd.f32 %v6564_v14, %v8845_v35 }
 0x1db   : > { %v8607_v56 = vadd.f32 %v6619_v52, %v8846_v53  ;;  %v6622_v37 = vadd.f32 %v6621_v45, %v6620_v49 }
 0x1dc   : > { %v6565_v34 = vpop.f32.mrb[72].mxu1 }
 0x1dd   : > { %v8610_v9 = vadd.f32 %v6622_v37, %v8514_v43  ;;  %v6566_v13 = vpop.f32.mrb[73].mxu1 }
 0x1de   : > { %v6567_v20 = vadd.f32 %v6566_v13, %v6565_v34  ;;  %v6568_v11 = vpop.f32.mrb[74].mxu1 }
 0x1df   : > { %v6623_v55 = vpop.f32.mrb[68].mxu0  ;;  %v6569_v7 = vpop.f32.mrb[75].mxu1 }
 0x1e0   : > { %v6624_v23 = vpop.f32.mrb[69].mxu0  ;;  %v8613_v12 = vadd.f32 %v6567_v20, %v8847_v26  ;;  %v6570_v48 = vadd.f32 %v6569_v7, %v6568_v11  ;;  %v8850_v20 = vld [vmem:[#allocation12_spill] sm:$0xff] }
 0x1e1   : > { %v6625_v24 = vadd.f32 %v6624_v23, %v6623_v55  ;;  %v6626_v29 = vpop.f32.mrb[70].mxu0 }
 0x1e2   : > { %v6627_v33 = vpop.f32.mrb[71].mxu0  ;;  %v8616_v3 = vadd.f32 %v6570_v48, %v8848_v50 }
 0x1e3   : > { %v8619_v38 = vadd.f32 %v6625_v24, %v8527_v18  ;;  %v6628_v43 = vadd.f32 %v6627_v33, %v6626_v29 }
 0x1e5   : > { %v8622_v57 = vadd.f32 %v6628_v43, %v8530_v36 }
 0x1e7   : > { %v6629_v17 = vpop.f32.mrb[72].mxu0 }
 0x1e8   : > { %v6630_v42 = vpop.f32.mrb[73].mxu0 }
 0x1e9   : > { %v6631_v41 = vadd.f32 %v6630_v42, %v6629_v17  ;;  %v6632_v58 = vpop.f32.mrb[74].mxu0 }
 0x1ea   : > { %v6633_v62 = vpop.f32.mrb[75].mxu0 }
 0x1eb   : > { %v8625_v59 = vadd.f32 %v6631_v41, %v8537_v16  ;;  %v6634_v30 = vadd.f32 %v6633_v62, %v6632_v58  ;;  %v8849_v16 = vld [vmem:[#allocation11_spill] sm:$0xff] }
 0x1ed   : > { %v8628_v61 = vadd.f32 %v6634_v30, %v8540_v28 }
 0x1ef   : > { %v6635_v19 = vpop.f32.mrb[76].mxu0  ;;  %v6571_v18 = vpop.f32.mrb[76].mxu1 }
 0x1f0   : > { %v6636_v27 = vpop.f32.mrb[77].mxu0  ;;  %v6572_v52 = vpop.f32.mrb[77].mxu1 }
 0x1f1   : > { %v6637_v40 = vadd.f32 %v6636_v27, %v6635_v19  ;;  %v6638_v14 = vpop.f32.mrb[78].mxu0  ;;  %v6573_v49 = vadd.f32 %v6572_v52, %v6571_v18  ;;  %v6574_v45 = vpop.f32.mrb[78].mxu1 }
 0x1f2   : > { %v6639_v36 = vpop.f32.mrb[79].mxu0  ;;  %v6575_v37 = vpop.f32.mrb[79].mxu1 }
 0x1f3   : > { %v8631_v35 = vadd.f32 %v6637_v40, %v8545_v15  ;;  %v6640_v53 = vadd.f32 %v6639_v36, %v6638_v14  ;;  %v8634_v34 = vadd.f32 %v6573_v49, %v8849_v16  ;;  %v6576_v13 = vadd.f32 %v6575_v37, %v6574_v45 }
 0x1f5   : > { %v8637_v28 = vadd.f32 %v6640_v53, %v8548_v21  ;;  %v8640_v11 = vadd.f32 %v6576_v13, %v8850_v20 }
 0x1f7   : > { %v6641_v55 = vpop.f32.mrb[80].mxu0  ;;  %v6705_v23 = vpop.f32.mrb[80].mxu1 }
 0x1f8   : > { %v6642_v7 = vpop.f32.mrb[81].mxu0  ;;  %v6706_v24 = vpop.f32.mrb[81].mxu1 }
 0x1f9   : > { %v6643_v26 = vadd.f32 %v6642_v7, %v6641_v55  ;;  %v6644_v48 = vpop.f32.mrb[82].mxu0  ;;  %v6707_v29 = vadd.f32 %v6706_v24, %v6705_v23  ;;  %v6708_v33 = vpop.f32.mrb[82].mxu1 }
 0x1fa   : > { %v6645_v15 = vpop.f32.mrb[83].mxu0  ;;  %v6709_v17 = vpop.f32.mrb[83].mxu1 }
 0x1fb   : > { %v8643_v50 = vadd.f32 %v6643_v26, %v8551_v63  ;;  %v6646_v43 = vadd.f32 %v6645_v15, %v6644_v48  ;;  %v6710_v42 = vadd.f32 %v6709_v17, %v6708_v33  ;;  %v8646_v21 = vadd.f32 %v6707_v29, %v8563_v22 }
 0x1fd   : > { %v8649_v41 = vadd.f32 %v6646_v43, %v8556_v1  ;;  %v8652_v58 = vadd.f32 %v6710_v42, %v8566_v51 }
 0x1ff   : > { %v6647_v62 = vpop.f32.mrb[84].mxu0  ;;  %v6711_v19 = vpop.f32.mrb[84].mxu1 }
 0x200   : > { %v6648_v30 = vpop.f32.mrb[85].mxu0  ;;  %v6712_v40 = vpop.f32.mrb[85].mxu1 }
 0x201   : > { %v6649_v27 = vadd.f32 %v6648_v30, %v6647_v62  ;;  %v6650_v18 = vpop.f32.mrb[86].mxu0  ;;  %v6713_v14 = vadd.f32 %v6712_v40, %v6711_v19  ;;  %v6714_v52 = vpop.f32.mrb[86].mxu1 }
 0x202   : > { %v6651_v63 = vpop.f32.mrb[87].mxu0  ;;  %v6715_v49 = vpop.f32.mrb[87].mxu1 }
 0x203   : > { %v8655_v36 = vadd.f32 %v6649_v27, %v8558_v32  ;;  %v6652_v22 = vadd.f32 %v6651_v63, %v6650_v18  ;;  %v6716_v45 = vadd.f32 %v6715_v49, %v6714_v52  ;;  %v8658_v1 = vadd.f32 %v6713_v14, %v8573_v47 }
 0x205   : > { %v8661_v51 = vadd.f32 %v6652_v22, %v8560_v44  ;;  %v8664_v53 = vadd.f32 %v6716_v45, %v8576_v46 }
 0x207   : > { %v6653_v37 = vpop.f32.mrb[88].mxu0 }
 0x208   : > { %v6654_v16 = vpop.f32.mrb[89].mxu0 }
 0x209   : > { %v6655_v13 = vadd.f32 %v6654_v16, %v6653_v37  ;;  %v6656_v20 = vpop.f32.mrb[90].mxu0  ;;  %v6717_v55 = vpop.f32.mrb[88].mxu1 }
 0x20a   : > { %v6657_v7 = vpop.f32.mrb[91].mxu0  ;;  %v6718_v32 = vpop.f32.mrb[89].mxu1 }
 0x20b   : > { %v8667_v23 = vadd.f32 %v6655_v13, %v8568_v0  ;;  %v6658_v26 = vadd.f32 %v6657_v7, %v6656_v20  ;;  %v6719_v48 = vadd.f32 %v6718_v32, %v6717_v55  ;;  %v6720_v47 = vpop.f32.mrb[90].mxu1 }
 0x20c   : > { %v6721_v24 = vpop.f32.mrb[91].mxu1 }
 0x20d   : > { %v8670_v44 = vadd.f32 %v6658_v26, %v8570_v4  ;;  %v6722_v15 = vadd.f32 %v6721_v24, %v6720_v47  ;;  %v8673_v46 = vadd.f32 %v6719_v48, %v8583_v31 }
 0x20f   : > { %v6659_v29 = vpop.f32.mrb[92].mxu0  ;;  %v8676_v33 = vadd.f32 %v6722_v15, %v8586_v25 }
 0x210   : > { %v6660_v43 = vpop.f32.mrb[93].mxu0 }
 0x211   : > { %v6661_v17 = vadd.f32 %v6660_v43, %v6659_v29  ;;  %v6662_v42 = vpop.f32.mrb[94].mxu0 }
 0x212   : > { %v6663_v0 = vpop.f32.mrb[95].mxu0 }
 0x213   : > { %v8679_v62 = vadd.f32 %v6661_v17, %v8578_v60  ;;  %v6664_v30 = vadd.f32 %v6663_v0, %v6662_v42 }
 0x214   : > { %v6723_v19 = vpop.f32.mrb[92].mxu1 }
 0x215   : > { %v8682_v4 = vadd.f32 %v6664_v30, %v8580_v8  ;;  %v6724_v27 = vpop.f32.mrb[93].mxu1 }
 0x216   : > { %v6725_v18 = vadd.f32 %v6724_v27, %v6723_v19  ;;  %v6726_v31 = vpop.f32.mrb[94].mxu1 }
 0x217   : > { %v6665_v40 = vpop.f32.mrb[96].mxu0  ;;  %v6727_v63 = vpop.f32.mrb[95].mxu1 }
 0x218   : > { %v6666_v14 = vpop.f32.mrb[97].mxu0  ;;  %v6728_v25 = vadd.f32 %v6727_v63, %v6726_v31  ;;  %v8685_v52 = vadd.f32 %v6725_v18, %v8595_v39 }
 0x219   : > { %v6667_v22 = vadd.f32 %v6666_v14, %v6665_v40  ;;  %v6668_v49 = vpop.f32.mrb[98].mxu0 }
 0x21a   : > { %v6669_v45 = vpop.f32.mrb[99].mxu0  ;;  %v8688_v60 = vadd.f32 %v6728_v25, %v8598_v10 }
 0x21b   : > { %v8691_v37 = vadd.f32 %v6667_v22, %v8589_v5  ;;  %v6670_v8 = vadd.f32 %v6669_v45, %v6668_v49 }
 0x21d   : > { %v8694_v16 = vadd.f32 %v6670_v8, %v8592_v2 }
 0x21f   : > { %v6729_v13 = vpop.f32.mrb[96].mxu1 }
 0x220   : > { %v6671_v20 = vpop.f32.mrb[100].mxu0  ;;  %v6730_v55 = vpop.f32.mrb[97].mxu1 }
 0x221   : > { %v6672_v7 = vpop.f32.mrb[101].mxu0  ;;  %v6731_v32 = vadd.f32 %v6730_v55, %v6729_v13  ;;  %v6732_v39 = vpop.f32.mrb[98].mxu1 }
 0x222   : > { %v6673_v26 = vadd.f32 %v6672_v7, %v6671_v20  ;;  %v6674_v48 = vpop.f32.mrb[102].mxu0  ;;  %v6733_v47 = vpop.f32.mrb[99].mxu1 }
 0x223   : > { %v6675_v24 = vpop.f32.mrb[103].mxu0  ;;  %v6734_v15 = vadd.f32 %v6733_v47, %v6732_v39  ;;  %v8697_v10 = vadd.f32 %v6731_v32, %v8607_v56 }
 0x224   : > { %v8700_v5 = vadd.f32 %v6673_v26, %v8601_v6  ;;  %v6676_v29 = vadd.f32 %v6675_v24, %v6674_v48 }
 0x225   : > { %v8703_v2 = vadd.f32 %v6734_v15, %v8610_v9 }
 0x226   : > { %v8706_v43 = vadd.f32 %v6676_v29, %v8604_v54 }
 0x227   : > { %v6735_v17 = vpop.f32.mrb[100].mxu1 }
 0x228   : > { %v6736_v42 = vpop.f32.mrb[101].mxu1 }
 0x229   : > { %v6737_v0 = vadd.f32 %v6736_v42, %v6735_v17  ;;  %v6738_v30 = vpop.f32.mrb[102].mxu1 }
 0x22a   : > { %v6677_v19 = vpop.f32.mrb[104].mxu0  ;;  %v6739_v27 = vpop.f32.mrb[103].mxu1 }
 0x22b   : > { %v6678_v18 = vpop.f32.mrb[105].mxu0  ;;  %v6740_v31 = vadd.f32 %v6739_v27, %v6738_v30  ;;  %v8709_v56 = vadd.f32 %v6737_v0, %v8619_v38 }
 0x22c   : > { %v6679_v6 = vadd.f32 %v6678_v18, %v6677_v19  ;;  %v6680_v40 = vpop.f32.mrb[106].mxu0 }
 0x22d   : > { %v6681_v63 = vpop.f32.mrb[107].mxu0  ;;  %v8712_v9 = vadd.f32 %v6740_v31, %v8622_v57 }
 0x22e   : > { %v8715_v54 = vadd.f32 %v6679_v6, %v8613_v12  ;;  %v6682_v14 = vadd.f32 %v6681_v63, %v6680_v40 }
 0x230   : > { %v8718_v25 = vadd.f32 %v6682_v14, %v8616_v3 }
 0x232   : > { %v6741_v22 = vpop.f32.mrb[104].mxu1 }
 0x233   : > { %v6742_v49 = vpop.f32.mrb[105].mxu1 }
 0x234   : > { %v6683_v45 = vpop.f32.mrb[108].mxu0  ;;  %v6743_v8 = vadd.f32 %v6742_v49, %v6741_v22  ;;  %v6744_v13 = vpop.f32.mrb[106].mxu1 }
 0x235   : > { %v6684_v38 = vpop.f32.mrb[109].mxu0  ;;  %v6745_v20 = vpop.f32.mrb[107].mxu1 }
 0x236   : > { %v6685_v55 = vadd.f32 %v6684_v38, %v6683_v45  ;;  %v6686_v7 = vpop.f32.mrb[110].mxu0  ;;  %v6746_v32 = vadd.f32 %v6745_v20, %v6744_v13  ;;  %v8721_v57 = vadd.f32 %v6743_v8, %v8625_v59 }
 0x237   : > { %v6687_v39 = vpop.f32.mrb[111].mxu0 }
 0x238   : > { %v8724_v12 = vadd.f32 %v6685_v55, %v8634_v34  ;;  %v6688_v3 = vadd.f32 %v6687_v39, %v6686_v7  ;;  %v8727_v26 = vadd.f32 %v6746_v32, %v8628_v61 }
 0x23a   : > { %v8730_v48 = vadd.f32 %v6688_v3, %v8640_v11 }
 0x23c   : > { %v6747_v47 = vpop.f32.mrb[108].mxu1  ;;  %v6843_v24 = vpop.f32.mrb[112].mxu0 }
 0x23d   : > { %v5281_v15 = vadd.f32 %v6843_v24, %v8658_v1  ;;  %v6748_v29 = vpop.f32.mrb[109].mxu1  ;;  %v5272_v17 = vpop.f32.mrb[113].mxu0 }
 0x23e   : > { %v6749_v59 = vadd.f32 %v6748_v29, %v6747_v47  ;;  %v5273_v42 = vadd.f32 %v5272_v17, %v8646_v21  ;;  %v6750_v0 = vpop.f32.mrb[110].mxu1  ;;  %v6844_v34 = vpop.f32.mrb[114].mxu0 }
 0x23f   : > { %v5284_v30 = vadd.f32 %v6844_v34, %v8664_v53  ;;  %v6751_v19 = vpop.f32.mrb[111].mxu1  ;;  %v5275_v27 = vpop.f32.mrb[115].mxu0  ;;  %v5599_v63 = vmul.f32 %v5281_v15, %v5281_v15 }
 0x240   : > { %v6752_v61 = vadd.f32 %v6751_v19, %v6750_v0  ;;  %v5276_v11 = vadd.f32 %v5275_v27, %v8652_v58  ;;  %v8744_v1 = vadd.f32 %v6749_v59, %v8631_v35  ;;  %v5597_v21 = vmul.f32 %v5273_v42, %v5273_v42 }
 0x241   : > { %v6251_v18 = vpack.c.bf16 %v5284_v30, %v5281_v15  ;;  %v5600_v35 = vmul.f32 %v5284_v30, %v5284_v30 }
 0x242   : > { %v6246_v31 = vpack.c.bf16 %v5276_v11, %v5273_v42  ;;  %v5559_v53 = vadd.f32 %v5276_v11, %v5273_v42  ;;  %v5598_v6 = vmul.f32 %v5276_v11, %v5276_v11  ;;  %v8747_v40 = vadd.f32 %v6752_v61, %v8637_v28 }
 0x243   : > { %6338 = vst [vmem:[%s8740_s23 + $0x8] sm:$0xff] %v6251_v18  }
 0x244   : > { %6247 = vst [vmem:[%s8740_s23] sm:$0xff] %v6246_v31   ;;  %v5560_v14 = vadd.f32 %v5559_v53, %v5281_v15  ;;  %v5629_v22 = vadd.f32 %v5598_v6, %v5597_v21  ;;  %v6847_v49 = vpop.f32.mrb[116].mxu0 }
 0x245   : > { %v6753_v45 = vpop.f32.mrb[112].mxu1  ;;  %v5297_v58 = vadd.f32 %v6847_v49, %v8685_v52  ;;  %v5288_v8 = vpop.f32.mrb[117].mxu0 }
 0x246   : > { %v5630_v13 = vadd.f32 %v5629_v22, %v5599_v63  ;;  %v6754_v38 = vpop.f32.mrb[113].mxu1  ;;  %v5289_v20 = vadd.f32 %v5288_v8, %v8673_v46  ;;  %v5561_v55 = vadd.f32 %v5560_v14, %v5284_v30  ;;  %v6848_v7 = vpop.f32.mrb[118].mxu0 }
 0x247   : > { %v6755_v32 = vadd.f32 %v6754_v38, %v6753_v45  ;;  %v6756_v28 = vpop.f32.mrb[114].mxu1  ;;  %v5300_v39 = vadd.f32 %v6848_v7, %v8688_v60  ;;  %v5291_v3 = vpop.f32.mrb[119].mxu0  ;;  %v5603_v19 = vmul.f32 %v5297_v58, %v5297_v58 }
 0x248   : > { %v5562_v47 = vadd.f32 %v5561_v55, %v5289_v20  ;;  %v5601_v24 = vmul.f32 %v5289_v20, %v5289_v20  ;;  %v5631_v15 = vadd.f32 %v5630_v13, %v5600_v35  ;;  %v6757_v29 = vpop.f32.mrb[115].mxu1  ;;  %v5292_v52 = vadd.f32 %v5291_v3, %v8676_v33 }
 0x249   : > { %v6261_v17 = vpack.c.bf16 %v5300_v39, %v5297_v58  ;;  %v6758_v59 = vadd.f32 %v6757_v29, %v6756_v28  ;;  %v8756_v42 = vadd.f32 %v6755_v32, %v8643_v50  ;;  %v5604_v31 = vmul.f32 %v5300_v39, %v5300_v39 }
 0x24a   : > { %v5632_v46 = vadd.f32 %v5631_v15, %v5601_v24  ;;  %v6256_v0 = vpack.c.bf16 %v5292_v52, %v5289_v20  ;;  %v5563_v34 = vadd.f32 %v5562_v47, %v5292_v52  ;;  %v5602_v30 = vmul.f32 %v5292_v52, %v5292_v52 }
 0x24b   : > { %6340 = vst [vmem:[%s8740_s23 + $0x18] sm:$0xff] %v6261_v17   ;;  %v8760_v60 = vadd.f32 %v6758_v59, %v8649_v41 }
 0x24c   : > { %6339 = vst [vmem:[%s8740_s23 + $0x10] sm:$0xff] %v6256_v0   ;;  %v5564_v27 = vadd.f32 %v5563_v34, %v5297_v58  ;;  %v5633_v61 = vadd.f32 %v5632_v46, %v5602_v30  ;;  %v6851_v11 = vpop.f32.mrb[120].mxu0 }
 0x24d   : > { %v6759_v21 = vpop.f32.mrb[116].mxu1  ;;  %v5313_v33 = vadd.f32 %v6851_v11, %v8709_v56  ;;  %v5304_v18 = vpop.f32.mrb[121].mxu0 }
 0x24e   : > { %v5634_v50 = vadd.f32 %v5633_v61, %v5603_v19  ;;  %v6760_v53 = vpop.f32.mrb[117].mxu1  ;;  %v5305_v6 = vadd.f32 %v5304_v18, %v8697_v10  ;;  %v5565_v63 = vadd.f32 %v5564_v27, %v5300_v39  ;;  %v6852_v14 = vpop.f32.mrb[122].mxu0 }
 0x24f   : > { %v6761_v22 = vadd.f32 %v6760_v53, %v6759_v21  ;;  %v6762_v41 = vpop.f32.mrb[118].mxu1  ;;  %v5316_v49 = vadd.f32 %v6852_v14, %v8712_v9  ;;  %v5307_v45 = vpop.f32.mrb[123].mxu0  ;;  %v5607_v9 = vmul.f32 %v5313_v33, %v5313_v33 }
 0x250   : > { %v5566_v58 = vadd.f32 %v5565_v63, %v5305_v6  ;;  %v5605_v8 = vmul.f32 %v5305_v6, %v5305_v6  ;;  %v5635_v35 = vadd.f32 %v5634_v50, %v5604_v31  ;;  %v6763_v13 = vpop.f32.mrb[119].mxu1  ;;  %v5308_v56 = vadd.f32 %v5307_v45, %v8703_v2 }
 0x251   : > { %v6271_v38 = vpack.c.bf16 %v5316_v49, %v5313_v33  ;;  %v6764_v20 = vadd.f32 %v6763_v13, %v6762_v41  ;;  %v5184_v55 = vadd.f32 %v6761_v22, %v8655_v36  ;;  %v5608_v2 = vmul.f32 %v5316_v49, %v5316_v49 }
 0x252   : > { %v5636_v10 = vadd.f32 %v5635_v35, %v5605_v8  ;;  %v6266_v7 = vpack.c.bf16 %v5308_v56, %v5305_v6  ;;  %v5567_v32 = vadd.f32 %v5566_v58, %v5308_v56  ;;  %v5606_v28 = vmul.f32 %v5308_v56, %v5308_v56 }
 0x253   : > { %6342 = vst [vmem:[%s8740_s23 + $0x28] sm:$0xff] %v6271_v38   ;;  %v5187_v39 = vadd.f32 %v6764_v20, %v8661_v51 }
 0x254   : > { %6341 = vst [vmem:[%s8740_s23 + $0x20] sm:$0xff] %v6266_v7   ;;  %v5568_v3 = vadd.f32 %v5567_v32, %v5313_v33  ;;  %v5637_v47 = vadd.f32 %v5636_v10, %v5606_v28  ;;  %v6855_v24 = vpop.f32.mrb[124].mxu0 }
 0x255   : > { %v5329_v15 = vadd.f32 %v6855_v24, %v8744_v1  ;;  %v5320_v29 = vpop.f32.mrb[125].mxu0 }
 0x256   : > { %v5638_v52 = vadd.f32 %v5637_v47, %v5607_v9  ;;  %v5321_v17 = vadd.f32 %v5320_v29, %v8721_v57  ;;  %v5569_v36 = vadd.f32 %v5568_v3, %v5316_v49  ;;  %v6856_v59 = vpop.f32.mrb[126].mxu0 }
 0x257   : > { %v6765_v46 = vpop.f32.mrb[120].mxu1  ;;  %v5332_v0 = vadd.f32 %v6856_v59, %v8747_v40  ;;  %v5323_v34 = vpop.f32.mrb[127].mxu0  ;;  %v5611_v6 = vmul.f32 %v5329_v15, %v5329_v15 }
 0x258   : > { %v6766_v51 = vpop.f32.mrb[121].mxu1  ;;  %v5570_v30 = vadd.f32 %v5569_v36, %v5321_v17  ;;  %v5609_v19 = vmul.f32 %v5321_v17, %v5321_v17  ;;  %v5639_v27 = vadd.f32 %v5638_v52, %v5608_v2  ;;  %v5324_v61 = vadd.f32 %v5323_v34, %v8727_v26 }
 0x259   : > { %v6767_v1 = vadd.f32 %v6766_v51, %v6765_v46  ;;  %v6768_v11 = vpop.f32.mrb[122].mxu1  ;;  %v6281_v21 = vpack.c.bf16 %v5332_v0, %v5329_v15  ;;  %v5612_v41 = vmul.f32 %v5332_v0, %v5332_v0 }
 0x25a   : > { %v5640_v33 = vadd.f32 %v5639_v27, %v5609_v19  ;;  %v6769_v18 = vpop.f32.mrb[123].mxu1  ;;  %v6276_v57 = vpack.c.bf16 %v5324_v61, %v5321_v17  ;;  %v5571_v31 = vadd.f32 %v5570_v30, %v5324_v61  ;;  %v5610_v50 = vmul.f32 %v5324_v61, %v5324_v61 }
 0x25b   : > { %6344 = vst [vmem:[%s8740_s23 + $0x38] sm:$0xff] %v6281_v21   ;;  %v6770_v53 = vadd.f32 %v6769_v18, %v6768_v11  ;;  %v5192_v40 = vadd.f32 %v6767_v1, %v8667_v23 }
 0x25c   : > { %6343 = vst [vmem:[%s8740_s23 + $0x30] sm:$0xff] %v6276_v57   ;;  %v5572_v63 = vadd.f32 %v5571_v31, %v5329_v15  ;;  %v5641_v14 = vadd.f32 %v5640_v33, %v5610_v50 }
 0x25d   : > { %v5195_v22 = vadd.f32 %v6770_v53, %v8670_v44 }
 0x25e   : > { %v5642_v26 = vadd.f32 %v5641_v14, %v5611_v6  ;;  %v6859_v49 = vpop.f32.mrb[128].mxu0  ;;  %v5573_v45 = vadd.f32 %v5572_v63, %v5332_v0 }
 0x25f   : > { %v5345_v58 = vadd.f32 %v6859_v49, %v5184_v55  ;;  %v5336_v8 = vpop.f32.mrb[129].mxu0 }
 0x260   : > { %v6771_v35 = vpop.f32.mrb[124].mxu1  ;;  %v5337_v13 = vadd.f32 %v5336_v8, %v8756_v42  ;;  %v5643_v56 = vadd.f32 %v5642_v26, %v5612_v41  ;;  %v6860_v38 = vpop.f32.mrb[130].mxu0 }
 0x261   : > { %v6772_v20 = vpop.f32.mrb[125].mxu1  ;;  %v5348_v23 = vadd.f32 %v6860_v38, %v5187_v39  ;;  %v5339_v10 = vpop.f32.mrb[131].mxu0  ;;  %v5615_v17 = vmul.f32 %v5345_v58, %v5345_v58 }
 0x262   : > { %v6773_v7 = vadd.f32 %v6772_v20, %v6771_v35  ;;  %v5574_v32 = vadd.f32 %v5573_v45, %v5337_v13  ;;  %v5613_v28 = vmul.f32 %v5337_v13, %v5337_v13  ;;  %v6774_v44 = vpop.f32.mrb[126].mxu1  ;;  %v5340_v9 = vadd.f32 %v5339_v10, %v8760_v60 }
 0x263   : > { %v6291_v3 = vpack.c.bf16 %v5348_v23, %v5345_v58  ;;  %v6775_v47 = vpop.f32.mrb[127].mxu1  ;;  %v5616_v0 = vmul.f32 %v5348_v23, %v5348_v23 }
 0x264   : > { %v5644_v55 = vadd.f32 %v5643_v56, %v5613_v28  ;;  %v6776_v24 = vadd.f32 %v6775_v47, %v6774_v44  ;;  %v6286_v15 = vpack.c.bf16 %v5340_v9, %v5337_v13  ;;  %v5575_v29 = vadd.f32 %v5574_v32, %v5340_v9 }
 0x265   : > { %6346 = vst [vmem:[%s8740_s23 + $0x48] sm:$0xff] %v6291_v3   ;;  %v5614_v42 = vmul.f32 %v5340_v9, %v5340_v9  ;;  %v5200_v2 = vadd.f32 %v6773_v7, %v8679_v62 }
 0x266   : > { %6345 = vst [vmem:[%s8740_s23 + $0x40] sm:$0xff] %v6286_v15   ;;  %v5576_v39 = vadd.f32 %v5575_v29, %v5345_v58  ;;  %v5203_v52 = vadd.f32 %v6776_v24, %v8682_v4 }
 0x267   : > { %v5645_v36 = vadd.f32 %v5644_v55, %v5614_v42 }
 0x268   : > { %v6863_v59 = vpop.f32.mrb[132].mxu0  ;;  %v5577_v46 = vadd.f32 %v5576_v39, %v5348_v23 }
 0x269   : > { %v5646_v60 = vadd.f32 %v5645_v36, %v5615_v17  ;;  %v5361_v34 = vadd.f32 %v6863_v59, %v5200_v2  ;;  %v5352_v51 = vpop.f32.mrb[133].mxu0 }
 0x26a   : > { %v6777_v30 = vpop.f32.mrb[128].mxu1  ;;  %v5353_v19 = vadd.f32 %v5352_v51, %v5192_v40  ;;  %v6864_v27 = vpop.f32.mrb[134].mxu0 }
 0x26b   : > { %v6778_v61 = vpop.f32.mrb[129].mxu1  ;;  %v5647_v1 = vadd.f32 %v5646_v60, %v5616_v0  ;;  %v5364_v11 = vadd.f32 %v6864_v27, %v5203_v52  ;;  %v5355_v62 = vpop.f32.mrb[135].mxu0  ;;  %v5619_v58 = vmul.f32 %v5361_v34, %v5361_v34 }
 0x26c   : > { %v6779_v21 = vadd.f32 %v6778_v61, %v6777_v30  ;;  %v5578_v33 = vadd.f32 %v5577_v46, %v5353_v19  ;;  %v5617_v4 = vmul.f32 %v5353_v19, %v5353_v19  ;;  %v6780_v18 = vpop.f32.mrb[130].mxu1  ;;  %v5356_v57 = vadd.f32 %v5355_v62, %v5195_v22 }
 0x26d   : > { %v6301_v31 = vpack.c.bf16 %v5364_v11, %v5361_v34  ;;  %v6781_v50 = vpop.f32.mrb[131].mxu1  ;;  %v5620_v20 = vmul.f32 %v5364_v11, %v5364_v11 }
 0x26e   : > { %v5648_v53 = vadd.f32 %v5647_v1, %v5617_v4  ;;  %v6782_v6 = vadd.f32 %v6781_v50, %v6780_v18  ;;  %v6296_v63 = vpack.c.bf16 %v5356_v57, %v5353_v19  ;;  %v5579_v14 = vadd.f32 %v5578_v33, %v5356_v57 }
 0x26f   : > { %6348 = vst [vmem:[%s8740_s23 + $0x58] sm:$0xff] %v6301_v31   ;;  %v5618_v40 = vmul.f32 %v5356_v57, %v5356_v57  ;;  %v5208_v41 = vadd.f32 %v6779_v21, %v8691_v37 }
 0x270   : > { %6347 = vst [vmem:[%s8740_s23 + $0x50] sm:$0xff] %v6296_v63   ;;  %v5580_v26 = vadd.f32 %v5579_v14, %v5361_v34  ;;  %v5211_v45 = vadd.f32 %v6782_v6, %v8694_v16 }
 0x271   : > { %v6867_v49 = vpop.f32.mrb[136].mxu0  ;;  %v5649_v8 = vadd.f32 %v5648_v53, %v5618_v40 }
 0x272   : > { %v5368_v35 = vpop.f32.mrb[137].mxu0  ;;  %v6783_v13 = vpop.f32.mrb[132].mxu1  ;;  %v5581_v56 = vadd.f32 %v5580_v26, %v5364_v11 }
 0x273   : > { %v5369_v22 = vadd.f32 %v5368_v35, %v5208_v41  ;;  %v6868_v38 = vpop.f32.mrb[138].mxu0  ;;  %v5650_v23 = vadd.f32 %v5649_v8, %v5619_v58  ;;  %v6784_v10 = vpop.f32.mrb[133].mxu1 }
 0x274   : > { %v5371_v7 = vpop.f32.mrb[139].mxu0  ;;  %v6785_v32 = vadd.f32 %v6784_v10, %v6783_v13  ;;  %v6786_v44 = vpop.f32.mrb[134].mxu1 }
 0x275   : > { %v5582_v28 = vadd.f32 %v5581_v56, %v5369_v22  ;;  %v5621_v37 = vmul.f32 %v5369_v22, %v5369_v22  ;;  %v5372_v9 = vadd.f32 %v5371_v7, %v5211_v45  ;;  %v5651_v3 = vadd.f32 %v5650_v23, %v5620_v20  ;;  %v6787_v47 = vpop.f32.mrb[135].mxu1 }
 0x276   : > { %v5216_v16 = vadd.f32 %v6785_v32, %v8700_v5  ;;  %v6788_v55 = vadd.f32 %v6787_v47, %v6786_v44 }
 0x277   : > { %v6306_v24 = vpack.c.bf16 %v5372_v9, %v5369_v22  ;;  %v5583_v15 = vadd.f32 %v5582_v28, %v5372_v9  ;;  %v5652_v29 = vadd.f32 %v5651_v3, %v5621_v37  ;;  %v5622_v42 = vmul.f32 %v5372_v9, %v5372_v9 }
 0x278   : > { %v5377_v2 = vadd.f32 %v6867_v49, %v5216_v16  ;;  %v5219_v39 = vadd.f32 %v6788_v55, %v8706_v43 }
 0x279   : > { %6349 = vst [vmem:[%s8740_s23 + $0x60] sm:$0xff] %v6306_v24   ;;  %v5653_v52 = vadd.f32 %v5652_v29, %v5622_v42 }
 0x27a   : > { %v5623_v17 = vmul.f32 %v5377_v2, %v5377_v2  ;;  %v5380_v36 = vadd.f32 %v6868_v38, %v5219_v39  ;;  %v5584_v59 = vadd.f32 %v5583_v15, %v5377_v2 }
 0x27b   : > { %v6871_v0 = vpop.f32.mrb[140].mxu0 }
 0x27c   : > { %v6789_v46 = vpop.f32.mrb[136].mxu1  ;;  %v6311_v60 = vpack.c.bf16 %v5380_v36, %v5377_v2  ;;  %v5624_v34 = vmul.f32 %v5380_v36, %v5380_v36  ;;  %v5654_v51 = vadd.f32 %v5653_v52, %v5623_v17  ;;  %v5384_v30 = vpop.f32.mrb[141].mxu0  ;;  %v5585_v19 = vadd.f32 %v5584_v59, %v5380_v36 }
 0x27d   : > { %v6790_v5 = vpop.f32.mrb[137].mxu1  ;;  %v6872_v1 = vpop.f32.mrb[142].mxu0 }
 0x27e   : > { %v6791_v27 = vadd.f32 %v6790_v5, %v6789_v46  ;;  %v6792_v61 = vpop.f32.mrb[138].mxu1  ;;  %6350 = vst [vmem:[%s8740_s23 + $0x68] sm:$0xff] %v6311_v60   ;;  %v5655_v43 = vadd.f32 %v5654_v51, %v5624_v34  ;;  %v5387_v62 = vpop.f32.mrb[143].mxu0 }
 0x27f   : > { %v6793_v11 = vpop.f32.mrb[139].mxu1 }
 0x280   : > { %v6794_v21 = vadd.f32 %v6793_v11, %v6792_v61  ;;  %v5224_v33 = vadd.f32 %v6791_v27, %v8715_v54 }
 0x282   : > { %v5385_v4 = vadd.f32 %v5384_v30, %v5224_v33  ;;  %v5227_v18 = vadd.f32 %v6794_v21, %v8718_v25 }
 0x284   : > { %v5586_v57 = vadd.f32 %v5585_v19, %v5385_v4  ;;  %v5625_v31 = vmul.f32 %v5385_v4, %v5385_v4  ;;  %v5388_v50 = vadd.f32 %v5387_v62, %v5227_v18 }
 0x285   : > { %v6795_v40 = vpop.f32.mrb[140].mxu1 }
 0x286   : > { %v5656_v53 = vadd.f32 %v5655_v43, %v5625_v31  ;;  %v6316_v6 = vpack.c.bf16 %v5388_v50, %v5385_v4  ;;  %v5587_v63 = vadd.f32 %v5586_v57, %v5388_v50  ;;  %v5626_v14 = vmul.f32 %v5388_v50, %v5388_v50  ;;  %v6796_v41 = vpop.f32.mrb[141].mxu1 }
 0x287   : > { %v6797_v49 = vadd.f32 %v6796_v41, %v6795_v40  ;;  %v6798_v45 = vpop.f32.mrb[142].mxu1 }
 0x288   : > { %6351 = vst [vmem:[%s8740_s23 + $0x70] sm:$0xff] %v6316_v6   ;;  %v5657_v26 = vadd.f32 %v5656_v53, %v5626_v14  ;;  %v6799_v58 = vpop.f32.mrb[143].mxu1 }
 0x289   : > { %v5232_v54 = vadd.f32 %v6797_v49, %v8724_v12  ;;  %v6800_v8 = vadd.f32 %v6799_v58, %v6798_v45 }
 0x28b   : > { %v5393_v35 = vadd.f32 %v6871_v0, %v5232_v54  ;;  %v5235_v25 = vadd.f32 %v6800_v8, %v8730_v48 }
 0x28d   : > { %v5588_v13 = vadd.f32 %v5587_v63, %v5393_v35  ;;  %v5627_v22 = vmul.f32 %v5393_v35, %v5393_v35  ;;  %v5396_v56 = vadd.f32 %v6872_v1, %v5235_v25 }
 0x28f   : > { %v5658_v38 = vadd.f32 %v5657_v26, %v5627_v22  ;;  %v6321_v20 = vpack.c.bf16 %v5396_v56, %v5393_v35  ;;  %v5589_v23 = vadd.f32 %v5588_v13, %v5396_v56  ;;  %v5628_v10 = vmul.f32 %v5396_v56, %v5396_v56 }
 0x291   : > { %6352 = vst [vmem:[%s8740_s23 + $0x78] sm:$0xff] %v6321_v20   ;;  %v5590_v7 = vrot.slane %v5589_v23, 4  ;;  %v5659_v32 = vadd.f32 %v5658_v38, %v5628_v10 }
 0x293   : > { %v5591_v28 = vadd.f32 %v5590_v7, %v5589_v23  ;;  %v5660_v37 = vrot.slane %v5659_v32, 4 }
 0x295   : > { %v5592_v44 = vrot.slane %v5591_v28, 2  ;;  %v5661_v12 = vadd.f32 %v5660_v37, %v5659_v32 }
 0x297   : > { %v5593_v9 = vadd.f32 %v5592_v44, %v5591_v28  ;;  %v5662_v3 = vrot.slane %v5661_v12, 2 }
 0x299   : > { %v5594_v47 = vrot.slane %v5593_v9, 1  ;;  %v5663_v48 = vadd.f32 %v5662_v3, %v5661_v12 }
 0x29b   : > { %v5595_v16 = vadd.f32 %v5594_v47, %v5593_v9  ;;  %v5664_v55 = vrot.slane %v5663_v48, 1 }
 0x29d   : > { %5596 = vst [vmem:[%s265_s24] sm:$0x1] %v5595_v16  ;;  %v5665_v24 = vadd.f32 %v5664_v55, %v5663_v48 }
 0x29f   : > { %5666 = vst [vmem:[%s268_s28] sm:$0x1] %v5665_v24 }
 0x2a0 PF: > { %s17_s21 = sadd.s32 1, %s7029_s21  }
 0x2a1   : > { %p14_p4 = scmp.ge.s32.totalorder %s17_s21, 4  }
 0x2a3   :  { %16 = sbr.rel (!%p14_p4) target bundleno = 1 (0x1), region = 92 }

// kernel: resblock2_forward.3
= control target key start
LH: loop header
LB: loop body
LE: loop exit
PB: predicated region body
PF: predicated region fallthrough
CT: control target
= control target key end

     0   :  { %s6616_s15 = smov 0   ;;  %s8083_s0 = inlined_call_operand.vmem [shape: bf16[2,16,16,128], index: 0, kind: input, shape index: {}]   ;;  %s8084_s1 = inlined_call_operand.vmem [shape: bf16[1152,128], index: 1, kind: input, shape index: {}]   ;;  %s8085_s2 = inlined_call_operand.vmem [shape: bf16[2,16,16,128], index: 2, kind: output, shape index: {0}]   ;;  %s8086_s3 = inlined_call_operand.vmem [shape: f32[2,1,128], index: 3, kind: output, shape index: {1}]   ;;  %s8087_s4 = inlined_call_operand.vmem [shape: f32[2,1,128], index: 4, kind: output, shape index: {2}]  }
   0x1 LB: > { %s5480_s16 = sadd.s32 4294967295, %s6588_s15   ;;  %p5484_p0 = scmp.ge.s32.totalorder %s6588_s15, 1  ;;  %s6588_s15 = sphi %s6616_s15, %s15_s15  }
   0x2   : > { %p167_p1 = scmp.lt.s32.totalorder %s6588_s15, 3 }
   0x4   : > { %p168_p2 = pnand %p5484_p0, %p167_p1 }
   0x6   : > { %171 = sbr.rel (%p168_p2) target bundleno = 640 (0x280), region = 28 }
   0xd   : > { %v6461_v0 = vld [vmem:[%s8084_s1 + $0x40] sm:$0xff]   ;;  %v6590_v2 = vmov 0   ;;  %v6463_v3 = vld [vmem:[%s8084_s1 + $0x48] sm:$0xff]   ;;  %v6465_v5 = vld [vmem:[%s8084_s1 + $0x50] sm:$0xff]   ;;  %p199_p3 = scmp.lt.s32.totalorder %s5480_s16, 1  ;;  %vm626_vm0 = vcmask 1043456  }
   0xe   : > { %v6462_v1 = vld [vmem:[%s8084_s1] sm:$0xff]   ;;  %216 = vst [vmem:[#allocation2] sm:$0xf] %v6590_v2  ;;  %217 = vst [vmem:[#allocation2 + $0x4] sm:$0xf] %v6590_v2  ;;  %5916 = vmatprep.subr.bf16.mxu0 %v6461_v0  ;;  %6436 = vmatprep.subr.bf16.mxu1 %v6461_v0  ;;  %v6464_v4 = vld [vmem:[%s8084_s1 + $0x8] sm:$0xff]  }
   0xf   : > { %218 = vst [vmem:[#allocation2 + $0x8] sm:$0x1] %v6590_v2  ;;  %219 = vst [vmem:[#allocation2 + $0xc] sm:$0xf] %v6590_v2  ;;  %5917 = vmatpush3.bf16.msra.mxu0 %v6462_v1  ;;  %6444 = vmatpush3.bf16.msra.mxu1 %v6462_v1  ;;  %v6466_v6 = vld [vmem:[%s8084_s1 + $0x10] sm:$0xff]   ;;  %v6467_v7 = vld [vmem:[%s8084_s1 + $0x58] sm:$0xff]  }
  0x10   : > { %220 = vst [vmem:[#allocation2 + $0x10] sm:$0xf] %v6590_v2  ;;  %221 = vst [vmem:[#allocation2 + $0x14] sm:$0x1] %v6590_v2  ;;  %5918 = vmatprep.subr.bf16.mxu0 %v6463_v3  ;;  %6437 = vmatprep.subr.bf16.mxu1 %v6463_v3  ;;  %s8131_s16 = smov (!%p199_p3, %s5480_s16), 1  ;;  %v6468_v8 = vld [vmem:[%s8084_s1 + $0x18] sm:$0xff]  }
  0x11   : > { %222 = vst [vmem:[#allocation2 + $0x18] sm:$0xf] %v6590_v2  ;;  %223 = vst [vmem:[#allocation2 + $0x1c] sm:$0xf] %v6590_v2  ;;  %v6469_v9 = vld [vmem:[%s8084_s1 + $0x60] sm:$0xff]   ;;  %s5787_s9 = sshll.u32 %s8131_s16, 7  ;;  %s211_s11 = scalar_lea.vmem %s8086_s3, %s8131_s16 }
  0x12   : > { %224 = vst [vmem:[#allocation2 + $0x20] sm:$0x1] %v6590_v2  ;;  %225 = vst [vmem:[#allocation2 + $0x24] sm:$0xf] %v6590_v2  ;;  %v6470_v10 = vld [vmem:[%s8084_s1 + $0x20] sm:$0xff]   ;;  %v6471_v11 = vld [vmem:[%s8084_s1 + $0x68] sm:$0xff]   ;;  %s6669_s18 = scalar_lea.vmem %s8083_s0, %s5787_s9  ;;  %s8007_s8 = scalar_lea.vmem %s8085_s2, %s5787_s9 }
  0x13   : > { %226 = vst [vmem:[#allocation2 + $0x28] sm:$0xf] %v6590_v2  ;;  %227 = vst [vmem:[#allocation2 + $0x2c] sm:$0x1] %v6590_v2  ;;  %5919 = vmatpush3.bf16.msra.mxu0 %v6464_v4  ;;  %6445 = vmatpush3.bf16.msra.mxu1 %v6464_v4  ;;  %v6472_v15 = vld [vmem:[%s8084_s1 + $0x28] sm:$0xff]   ;;  %vm633_vm2 = vcmask 1040384   ;;  %s214_s14 = scalar_lea.vmem %s8087_s4, %s8131_s16 }
  0x14   : > { %228 = vst [vmem:[#allocation2 + $0x30] sm:$0xf] %v6590_v2  ;;  %229 = vst [vmem:[#allocation2 + $0x34] sm:$0xf] %v6590_v2  ;;  %5920 = vmatprep.subr.bf16.mxu0 %v6465_v5  ;;  %6438 = vmatprep.subr.bf16.mxu1 %v6465_v5  ;;  %vm935_vm1 = vsmask.f32 3328 }
  0x15   : > { %230 = vst [vmem:[#allocation2 + $0x38] sm:$0x1] %v6590_v2  ;;  %231 = vst [vmem:[#allocation2 + $0x3c] sm:$0xf] %v6590_v2  ;;  %v887_v12 = vld [vmem:[#allocation2] sm:$0xf] }
  0x16   : > { %232 = vst [vmem:[#allocation2 + $0x40] sm:$0xf] %v6590_v2  ;;  %233 = vst [vmem:[#allocation2 + $0x44] sm:$0x1] %v6590_v2  ;;  %v888_v13 = vld [vmem:[#allocation2 + $0x4] sm:$0xf] }
  0x17   : > { %234 = vst [vmem:[#allocation2 + $0x48] sm:$0xf] %v6590_v2  ;;  %235 = vst [vmem:[#allocation2 + $0x4c] sm:$0xf] %v6590_v2  ;;  %5921 = vmatpush3.bf16.msra.mxu0 %v6466_v6  ;;  %6446 = vmatpush3.bf16.msra.mxu1 %v6466_v6  ;;  %v889_v14 = vld [vmem:[#allocation2 + $0x8] sm:$0x1] }
  0x18   : > { %236 = vst [vmem:[#allocation2 + $0x50] sm:$0x1] %v6590_v2  ;;  %237 = vst [vmem:[#allocation2 + $0x54] sm:$0xf] %v6590_v2  ;;  %5922 = vmatprep.subr.bf16.mxu0 %v6467_v7  ;;  %6439 = vmatprep.subr.bf16.mxu1 %v6467_v7  ;;  %v939_v16 = vshrl.u32 %v887_v12, 16  ;;  %v942_v17 = vshll.u32 %v887_v12, 16 }
  0x19   : > { %238 = vst [vmem:[#allocation2 + $0x58] sm:$0xf] %v6590_v2  ;;  %239 = vst [vmem:[#allocation2 + $0x5c] sm:$0x1] %v6590_v2  ;;  %v6473_v18 = vld [vmem:[%s8084_s1 + $0x70] sm:$0xff]   ;;  %v948_v19 = vshll.u32 %v888_v13, 16 }
  0x1a   : > { %240 = vst [vmem:[#allocation2 + $0x60] sm:$0xf] %v6590_v2  ;;  %241 = vst [vmem:[#allocation2 + $0x64] sm:$0xf] %v6590_v2  ;;  %v952_v20 = vshrl.u32 %v888_v13, 16  ;;  %v958_v21 = vshll.u32 %v889_v14, 16 }
  0x1b   : > { %242 = vst [vmem:[#allocation2 + $0x68] sm:$0x1] %v6590_v2  ;;  %243 = vst [vmem:[#allocation2 + $0x6c] sm:$0xf] %v6590_v2  ;;  %5923 = vmatpush3.bf16.msra.mxu0 %v6468_v8  ;;  %6447 = vmatpush3.bf16.msra.mxu1 %v6468_v8  ;;  %v292_v22 = vld [vmem:[%s6669_s18 + $0x58] sm:$0xf] }
  0x1c   : > { %244 = vst [vmem:[#allocation2 + $0x70] sm:$0xf] %v6590_v2  ;;  %245 = vst [vmem:[#allocation2 + $0x74] sm:$0x1] %v6590_v2  ;;  %5924 = vmatprep.subr.bf16.mxu0 %v6469_v9  ;;  %6440 = vmatprep.subr.bf16.mxu1 %v6469_v9  ;;  %vm936_vm3 = vsmask.f32 7440 }
  0x1d   : > { %246 = vst [vmem:[#allocation2 + $0x78] sm:$0xf] %v6590_v2  ;;  %247 = vst [vmem:[#allocation2 + $0x7c] sm:$0xf] %v6590_v2  ;;  %v941_v23 = vrot.slane %v939_v16, 4  ;;  %v944_v24 = vrot.slane %v942_v17, 5 }
  0x1e   : > { %248 = vst [vmem:[#allocation2 + $0x80] sm:$0x1] %v6590_v2  ;;  %249 = vst [vmem:[#allocation2 + $0x84] sm:$0xf] %v6590_v2  ;;  %v293_v25 = vld [vmem:[%s6669_s18 + $0x5c] sm:$0xf] }
  0x1f   : > { %250 = vst [vmem:[#allocation2 + $0x88] sm:$0xf] %v6590_v2  ;;  %251 = vst [vmem:[#allocation2 + $0x8c] sm:$0x1] %v6590_v2  ;;  %5925 = vmatpush3.bf16.msra.mxu0 %v6470_v10  ;;  %6448 = vmatpush3.bf16.msra.mxu1 %v6470_v10  ;;  %v950_v26 = vrot.slane %v948_v19, 5  ;;  %v954_v27 = vrot.slane %v952_v20, 4  ;;  %v945_v29 = vor.u32 %v944_v24, %v941_v23 }
  0x20   : > { %252 = vst [vmem:[#allocation2 + $0x90] sm:$0xf] %v6590_v2  ;;  %253 = vst [vmem:[#allocation2 + $0x94] sm:$0xf] %v6590_v2  ;;  %5926 = vmatprep.subr.bf16.mxu0 %v6471_v11  ;;  %6441 = vmatprep.subr.bf16.mxu1 %v6471_v11  ;;  %vm302_vm4 = vsmask.f32 256 }
  0x21   : > { %254 = vst [vmem:[#allocation2 + $0x98] sm:$0x1] %v6590_v2  ;;  %255 = vst [vmem:[#allocation2 + $0x9c] sm:$0xf] %v6590_v2  ;;  %vm303_vm5 = vsmask.f32 4368  ;;  %v955_v34 = vor.u32 %v954_v27, %v950_v26 }
  0x22   : > { %256 = vst [vmem:[#allocation2 + $0xa0] sm:$0xf] %v6590_v2  ;;  %257 = vst [vmem:[#allocation2 + $0xa4] sm:$0x1] %v6590_v2  ;;  %v6474_v28 = vld [vmem:[%s8084_s1 + $0x30] sm:$0xff]   ;;  %v493_v30 = vshrl.u32 %v292_v22, 16 }
  0x23   : > { %258 = vst [vmem:[#allocation2 + $0xa8] sm:$0xf] %v6590_v2  ;;  %259 = vst [vmem:[#allocation2 + $0xac] sm:$0xf] %v6590_v2  ;;  %v496_v31 = vshll.u32 %v292_v22, 16  ;;  %v501_v32 = vshrl.u32 %v293_v25, 16  ;;  %5927 = vmatpush3.bf16.msra.mxu0 %v6472_v15  ;;  %6449 = vmatpush3.bf16.msra.mxu1 %v6472_v15 }
  0x24   : > { %260 = vst [vmem:[#allocation2 + $0xb0] sm:$0x1] %v6590_v2  ;;  %261 = vst [vmem:[#allocation2 + $0xb4] sm:$0xf] %v6590_v2  ;;  %v960_v35 = vrot.slane %v958_v21, 5  ;;  %v504_v36 = vshll.u32 %v293_v25, 16  ;;  %5928 = vmatprep.subr.bf16.mxu0 %v6473_v18  ;;  %6442 = vmatprep.subr.bf16.mxu1 %v6473_v18 }
  0x25   : > { %262 = vst [vmem:[#allocation2 + $0xb8] sm:$0xf] %v6590_v2  ;;  %263 = vst [vmem:[#allocation2 + $0xbc] sm:$0x1] %v6590_v2  ;;  %vm627_vm7 = vsmask.f32 7938 }
  0x26   : > { %264 = vst [vmem:[#allocation2 + $0xc0] sm:$0xf] %v6590_v2  ;;  %265 = vst [vmem:[#allocation2 + $0xc4] sm:$0xf] %v6590_v2  ;;  %v6475_v38 = vld [vmem:[%s8084_s1 + $0x78] sm:$0xff]   ;;  %v946_v39 = vrot.slane %v945_v29, 4 }
  0x27   : > { %266 = vst [vmem:[#allocation2 + $0xc8] sm:$0x1] %v6590_v2  ;;  %267 = vst [vmem:[#allocation2 + $0xcc] sm:$0xf] %v6590_v2  ;;  %v708_v37 = vld [vmem:[#allocation2 + $0x90] sm:$0xf]  ;;  %5929 = vmatpush3.bf16.msra.mxu0 %v6474_v28  ;;  %6450 = vmatpush3.bf16.msra.mxu1 %v6474_v28 }
  0x28   : > { %268 = vst [vmem:[#allocation2 + $0xd0] sm:$0xf] %v6590_v2  ;;  %269 = vst [vmem:[#allocation2 + $0xd4] sm:$0x1] %v6590_v2  ;;  %v495_v41 = vrot.slane %v493_v30, 7  ;;  %v503_v42 = vrot.slane %v501_v32, 7  ;;  %5930 = vmatprep.subr.bf16.mxu0 %v6475_v38  ;;  %6443 = vmatprep.subr.bf16.mxu1 %v6475_v38 }
  0x29   : > { %vm6684_vm6 = vmor %vm935_vm1, %vm936_vm3  ;;  %v712_v43 = vld [vmem:[#allocation2 + $0x98] sm:$0x1]  ;;  %v956_v44 = vrot.slane %v955_v34, 4  ;;  %v6479_v54 = vld [vmem:[%s8084_s1 + $0xc0] sm:$0xff]   ;;  %vm1498_vm11 = vcmask 1042432   ;;  %vm1499_vm12 = vcmask 1046532  }
  0x2a   : > { %vm6693_vm8 = vmor %vm302_vm4, %vm303_vm5  ;;  %v6476_v46 = vld [vmem:[%s8084_s1 + $0x38] sm:$0xff]   ;;  %v951_v47 = vsel %vm6684_vm6, %v946_v39, %v950_v26  ;;  %v498_v48 = vor.u32 %v496_v31, %v495_v41  ;;  %v499_v49 = vrot.slane %v495_v41, 4  ;;  %v506_v50 = vor.u32 %v504_v36, %v503_v42  ;;  %v6480_v55 = vld [vmem:[%s8084_s1 + $0x140] sm:$0xff]  }
  0x2b   : > { %vm6698_vm9 = vmand %vm626_vm0, %vm627_vm7  ;;  %v961_v52 = vsel %vm6684_vm6, %v956_v44, %v960_v35  ;;  %v508_v53 = vrot.slane %v503_v42, 4  ;;  %v270_v60 = vld [vmem:[%s6669_s18] sm:$0xf]  ;;  %v271_v61 = vld [vmem:[%s6669_s18 + $0x4] sm:$0xf]  ;;  %5931 = vmatpush3.bf16.msra.mxu0 %v6476_v46  ;;  %6451 = vmatpush3.bf16.msra.mxu1 %v6476_v46 }
  0x2c   : > { %vm6709_vm10 = vmand %vm633_vm2, %vm302_vm4  ;;  %v5505_v56 = vcombine.low %v951_v47, %v961_v52  ;;  %v507_v57 = vsel %vm6693_vm8, %v499_v49, %v506_v50  ;;  %v709_v58 = vsel %vm6698_vm9, %v498_v48, %v708_v37  ;;  %v6477_v62 = vld [vmem:[#allocation2] sm:$0xff]   ;;  %v306_v63 = vshrl.u32 %v270_v60, 16  ;;  %6028 = vmatprep.subr.bf16.mxu1 %v6479_v54  ;;  %6140 = vmatprep.subr.bf16.mxu0 %v6480_v55  ;;  %v629_v8 = vld [vmem:[#allocation2 + $0xc] sm:$0xf] }
  0x2d   : > { %710 = vst [vmem:[#allocation2 + $0x90] sm:$0xf] %v709_v58  ;;  %711 = vst [vmem:[#allocation2 + $0x94] sm:$0xf] %v507_v57  ;;  %v713_v59 = vsel %vm6709_vm10, %v508_v53, %v712_v43  ;;  %v309_v0 = vshll.u32 %v270_v60, 16  ;;  %v314_v1 = vshrl.u32 %v271_v61, 16 }
  0x2e   : > { %4334 = vmatprep.mubr.bf16.mxu0 %v5505_v56  ;;  %714 = vst [vmem:[#allocation2 + $0x98] sm:$0x1] %v713_v59  ;;  %v317_v2 = vshll.u32 %v271_v61, 16  ;;  %v6482_v3 = vld [vmem:[%s8084_s1 + $0x100] sm:$0xff]   ;;  %v308_v6 = vrot.slane %v306_v63, 7  ;;  %v6490_v39 = vld [vmem:[%s8084_s1 + $0x148] sm:$0xff]   ;;  %vm6888_vm13 = vmor %vm1498_vm11, %vm1499_vm12 }
  0x2f   : > { %v294_v4 = vld [vmem:[%s6669_s18 + $0x60] sm:$0xf]  ;;  %v295_v5 = vld [vmem:[%s6669_s18 + $0x64] sm:$0xf]  ;;  %v316_v7 = vrot.slane %v314_v1, 7  ;;  %4335 = vmatmul.mubr.bf16.vlgmr.msra.gmra.mrb[0].mxu0 %v6477_v62  ;;  %v6492_v50 = vld [vmem:[%s8084_s1 + $0x108] sm:$0xff]  }
  0x30   : > { %v635_v9 = vld [vmem:[#allocation2 + $0x14] sm:$0x1]  ;;  %v510_v10 = vshrl.u32 %v294_v4, 16  ;;  %v513_v11 = vshll.u32 %v294_v4, 16  ;;  %v518_v12 = vshrl.u32 %v295_v5, 16  ;;  %v521_v13 = vshll.u32 %v295_v5, 16  ;;  %6141 = vmatpush3.bf16.msra.mxu0 %v6482_v3 }
  0x31   : > { %v311_v14 = vor.u32 %v309_v0, %v308_v6  ;;  %v312_v15 = vrot.slane %v308_v6, 4  ;;  %v319_v16 = vor.u32 %v317_v2, %v316_v7  ;;  %v321_v17 = vrot.slane %v316_v7, 4  ;;  %v715_v34 = vld [vmem:[#allocation2 + $0x9c] sm:$0xf]  ;;  %v719_v35 = vld [vmem:[#allocation2 + $0xa4] sm:$0x1]  ;;  %6142 = vmatprep.subr.bf16.mxu0 %v6490_v39 }
  0x32   : > { %v512_v37 = vrot.slane %v510_v10, 7  ;;  %v520_v38 = vrot.slane %v518_v12, 7  ;;  %v6481_v52 = vld [vmem:[%s8084_s1 + $0x80] sm:$0xff]   ;;  %v272_v56 = vld [vmem:[%s6669_s18 + $0x8] sm:$0xf] }
  0x33   : > { %v320_v26 = vsel %vm6693_vm8, %v312_v15, %v319_v16  ;;  %v630_v27 = vsel %vm6698_vm9, %v311_v14, %v629_v8  ;;  %v636_v28 = vsel %vm6709_vm10, %v321_v17, %v635_v9  ;;  %v6483_v60 = vld [vmem:[%s8084_s1 + $0xc8] sm:$0xff]   ;;  %v323_v62 = vshrl.u32 %v272_v56, 16  ;;  %v638_v8 = vld [vmem:[#allocation2 + $0x18] sm:$0xf] }
  0x34   : > { %v923_v18 = vld [vmem:[#allocation2 + $0x90] sm:$0xf]  ;;  %v924_v19 = vld [vmem:[#allocation2 + $0x94] sm:$0xf]  ;;  %631 = vst [vmem:[#allocation2 + $0xc] sm:$0xf] %v630_v27  ;;  %v515_v43 = vor.u32 %v513_v11, %v512_v37  ;;  %v523_v46 = vor.u32 %v521_v13, %v520_v38  ;;  %6143 = vmatpush3.bf16.msra.mxu0 %v6492_v50 }
  0x35   : > { %v925_v20 = vld [vmem:[#allocation2 + $0x98] sm:$0x1]  ;;  %v1227_v21 = vshrl.u32 %v923_v18, 16  ;;  %v1230_v22 = vshll.u32 %v923_v18, 16  ;;  %v1236_v23 = vshll.u32 %v924_v19, 16  ;;  %v1240_v24 = vshrl.u32 %v924_v19, 16 }
  0x36   : > { %v1246_v25 = vshll.u32 %v925_v20, 16  ;;  %632 = vst [vmem:[#allocation2 + $0x10] sm:$0xf] %v320_v26  ;;  %637 = vst [vmem:[#allocation2 + $0x14] sm:$0x1] %v636_v28  ;;  %v516_v44 = vrot.slane %v512_v37, 4  ;;  %v716_v54 = vsel %vm6698_vm9, %v515_v43, %v715_v34 }
  0x37   : > { %v1229_v29 = vrot.slane %v1227_v21, 4  ;;  %v1232_v30 = vrot.slane %v1230_v22, 5  ;;  %v1238_v31 = vrot.slane %v1236_v23, 5  ;;  %v1242_v32 = vrot.slane %v1240_v24, 4  ;;  %v6478_v59 = vld [vmem:[#allocation2 + $0x90] sm:$0xff]   ;;  %v6484_v17 = vld [vmem:[%s8084_s1 + $0x88] sm:$0xff]  }
  0x38   : > { %v1248_v36 = vrot.slane %v1246_v25, 5  ;;  %v525_v47 = vrot.slane %v520_v38, 4  ;;  %v524_v53 = vsel %vm6693_vm8, %v516_v44, %v523_v46  ;;  %717 = vst [vmem:[#allocation2 + $0x9c] sm:$0xf] %v716_v54  ;;  %v273_v61 = vld [vmem:[%s6669_s18 + $0xc] sm:$0xf] }
  0x39   : > { %v1233_v41 = vor.u32 %v1232_v30, %v1229_v29  ;;  %v1243_v42 = vor.u32 %v1242_v32, %v1238_v31  ;;  %718 = vst [vmem:[#allocation2 + $0xa0] sm:$0xf] %v524_v53  ;;  %v326_v63 = vshll.u32 %v272_v56, 16  ;;  %v325_v10 = vrot.slane %v323_v62, 7  ;;  %v6765_v16 = vld [vmem:[%s6669_s18 + $0x68] sm:$0xf] }
  0x3a   : > { %v720_v55 = vsel %vm6709_vm10, %v525_v47, %v719_v35  ;;  %v331_v11 = vshrl.u32 %v273_v61, 16  ;;  %v6487_v24 = vld [vmem:[%s8084_s1 + $0xd0] sm:$0xff]   ;;  %v334_v25 = vshll.u32 %v273_v61, 16  ;;  %v527_v26 = vshrl.u32 %v6765_v16, 16  ;;  %v6489_v37 = vld [vmem:[%s8084_s1 + $0xd8] sm:$0xff]  }
  0x3b   : > { %v1234_v48 = vrot.slane %v1233_v41, 4  ;;  %v1244_v49 = vrot.slane %v1243_v42, 4  ;;  %721 = vst [vmem:[#allocation2 + $0xa4] sm:$0x1] %v720_v55  ;;  %v890_v1 = vld [vmem:[#allocation2 + $0xc] sm:$0xf]  ;;  %v328_v19 = vor.u32 %v326_v63, %v325_v10 }
  0x3c   : > { %v963_v4 = vshrl.u32 %v890_v1, 16  ;;  %v966_v5 = vshll.u32 %v890_v1, 16  ;;  %v329_v20 = vrot.slane %v325_v10, 4  ;;  %v333_v21 = vrot.slane %v331_v11, 7  ;;  %v6488_v30 = vld [vmem:[%s8084_s1 + $0x90] sm:$0xff]   ;;  %v6491_v56 = vld [vmem:[%s8084_s1 + $0x98] sm:$0xff]  }
  0x3d   : > { %v1239_v57 = vsel %vm6684_vm6, %v1234_v48, %v1238_v31  ;;  %v1249_v58 = vsel %vm6684_vm6, %v1244_v49, %v1248_v36  ;;  %v891_v2 = vld [vmem:[#allocation2 + $0x10] sm:$0xf]  ;;  %v892_v3 = vld [vmem:[#allocation2 + $0x14] sm:$0x1]  ;;  %v639_v31 = vsel %vm6698_vm9, %v328_v19, %v638_v8  ;;  %v297_v38 = vld [vmem:[%s6669_s18 + $0x6c] sm:$0xf] }
  0x3e   : > { %v5517_v0 = vcombine.low %v1239_v57, %v1249_v58  ;;  %v972_v6 = vshll.u32 %v891_v2, 16  ;;  %v976_v7 = vshrl.u32 %v891_v2, 16  ;;  %v982_v9 = vshll.u32 %v892_v3, 16  ;;  %640 = vst [vmem:[#allocation2 + $0x18] sm:$0xf] %v639_v31  ;;  %v6485_v43 = vld [vmem:[#allocation2 + $0xc] sm:$0xff]  }
  0x3f   : > { %v965_v12 = vrot.slane %v963_v4, 4  ;;  %v968_v13 = vrot.slane %v966_v5, 5  ;;  %v926_v27 = vld [vmem:[#allocation2 + $0x9c] sm:$0xf]  ;;  %v336_v44 = vor.u32 %v334_v25, %v333_v21  ;;  %v642_v46 = vld [vmem:[#allocation2 + $0x20] sm:$0x1] }
  0x40   : > { %4430 = vmatprep.mubr.bf16.mxu1 %v5517_v0  ;;  %v974_v14 = vrot.slane %v972_v6, 5  ;;  %v978_v15 = vrot.slane %v976_v7, 4  ;;  %v984_v18 = vrot.slane %v982_v9, 5  ;;  %v927_v28 = vld [vmem:[#allocation2 + $0xa0] sm:$0xf]  ;;  %v1251_v35 = vshrl.u32 %v926_v27, 16 }
  0x41   : > { %4431 = vmatmul.mubr.bf16.vlgmr.msra.gmra.mrb[0].mxu1 %v6478_v59  ;;  %v969_v22 = vor.u32 %v968_v13, %v965_v12  ;;  %v1254_v36 = vshll.u32 %v926_v27, 16  ;;  %v1260_v39 = vshll.u32 %v927_v28, 16  ;;  %v1264_v41 = vshrl.u32 %v927_v28, 16  ;;  %v722_v61 = vld [vmem:[#allocation2 + $0xa8] sm:$0xf]  ;;  %v6495_v2 = vld [vmem:[%s8084_s1 + $0xe0] sm:$0xff]  }
  0x42   : > { %6029 = vmatpush3.bf16.msra.mxu1 %v6481_v52  ;;  %v979_v23 = vor.u32 %v978_v15, %v974_v14  ;;  %v928_v29 = vld [vmem:[#allocation2 + $0xa4] sm:$0x1]  ;;  %v1253_v49 = vrot.slane %v1251_v35, 4  ;;  %v337_v58 = vsel %vm6693_vm8, %v329_v20, %v336_v44  ;;  %v338_v59 = vrot.slane %v333_v21, 4  ;;  %v726_v13 = vld [vmem:[#allocation2 + $0xb0] sm:$0x1] }
  0x43   : > { %6030 = vmatprep.subr.bf16.mxu1 %v6483_v60  ;;  %v970_v32 = vrot.slane %v969_v22, 4  ;;  %v1270_v42 = vshll.u32 %v928_v29, 16  ;;  %v1256_v50 = vrot.slane %v1254_v36, 5  ;;  %v1262_v53 = vrot.slane %v1260_v39, 5  ;;  %641 = vst [vmem:[#allocation2 + $0x1c] sm:$0xf] %v337_v58 }
  0x44   : > { %v980_v34 = vrot.slane %v979_v23, 4  ;;  %v1266_v54 = vrot.slane %v1264_v41, 4  ;;  %v529_v60 = vrot.slane %v527_v26, 7  ;;  %v530_v63 = vshll.u32 %v6765_v16, 16  ;;  %v6486_v16 = vld [vmem:[#allocation2 + $0x9c] sm:$0xff]   ;;  %v6502_v21 = vld [vmem:[%s8084_s1 + $0x150] sm:$0xff]  }
  0x45   : > { %v975_v47 = vsel %vm6684_vm6, %v970_v32, %v974_v14  ;;  %v1272_v55 = vrot.slane %v1270_v42, 5  ;;  %v1257_v57 = vor.u32 %v1256_v50, %v1253_v49  ;;  %v535_v0 = vshrl.u32 %v297_v38, 16  ;;  %v893_v7 = vld [vmem:[#allocation2 + $0x18] sm:$0xf]  ;;  %v274_v14 = vld [vmem:[%s6669_s18 + $0x10] sm:$0xf]  ;;  %6144 = vmatprep.subr.bf16.mxu0 %v6502_v21 }
  0x46   : > { %6031 = vmatpush3.bf16.msra.mxu1 %v6484_v17  ;;  %v985_v48 = vsel %vm6684_vm6, %v980_v34, %v984_v18  ;;  %v1267_v62 = vor.u32 %v1266_v54, %v1262_v53  ;;  %v538_v1 = vshll.u32 %v297_v38, 16  ;;  %v643_v4 = vsel %vm6709_vm10, %v338_v59, %v642_v46  ;;  %v275_v20 = vld [vmem:[%s6669_s18 + $0x14] sm:$0xf]  ;;  %v6496_v25 = vld [vmem:[%s8084_s1 + $0xa0] sm:$0xff]   ;;  %v6497_v29 = vld [vmem:[%s8084_s1 + $0xe8] sm:$0xff]  }
  0x47   : > { %6032 = vmatprep.subr.bf16.mxu1 %v6487_v24  ;;  %v5506_v52 = vcombine.low %v975_v47, %v985_v48  ;;  %v1258_v3 = vrot.slane %v1257_v57, 4  ;;  %v533_v5 = vrot.slane %v529_v60, 4  ;;  %644 = vst [vmem:[#allocation2 + $0x20] sm:$0x1] %v643_v4  ;;  %v532_v8 = vor.u32 %v530_v63, %v529_v60  ;;  %v298_v32 = vld [vmem:[%s6669_s18 + $0x70] sm:$0xf] }
  0x48   : > { %v1268_v6 = vrot.slane %v1267_v62, 4  ;;  %v537_v9 = vrot.slane %v535_v0, 7  ;;  %v987_v11 = vshrl.u32 %v893_v7, 16  ;;  %v990_v12 = vshll.u32 %v893_v7, 16  ;;  %v6498_v36 = vld [vmem:[%s8084_s1 + $0xa8] sm:$0xff]   ;;  %v6504_v50 = vld [vmem:[%s8084_s1 + $0x110] sm:$0xff]  }
  0x49   : > { %4342 = vmatprep.mubr.bf16.mxu0 %v5506_v52  ;;  %v1263_v10 = vsel %vm6684_vm6, %v1258_v3, %v1262_v53  ;;  %v723_v19 = vsel %vm6698_vm9, %v532_v8, %v722_v61  ;;  %v340_v26 = vshrl.u32 %v274_v14, 16  ;;  %v348_v31 = vshrl.u32 %v275_v20, 16  ;;  %v6501_v57 = vld [vmem:[%s8084_s1 + $0xf0] sm:$0xff]   ;;  %6145 = vmatpush3.bf16.msra.mxu0 %v6504_v50 }
  0x4a   : > { %6033 = vmatpush3.bf16.msra.mxu1 %v6488_v30  ;;  %4343 = vmatmul.mubr.bf16.gmra.mrb[4].mxu0 %v6485_v43  ;;  %v1273_v15 = vsel %vm6684_vm6, %v1268_v6, %v1272_v55  ;;  %v540_v17 = vor.u32 %v538_v1, %v537_v9  ;;  %v542_v18 = vrot.slane %v537_v9, 4  ;;  %v989_v23 = vrot.slane %v987_v11, 4  ;;  %724 = vst [vmem:[#allocation2 + $0xa8] sm:$0xf] %v723_v19  ;;  %v894_v34 = vld [vmem:[#allocation2 + $0x1c] sm:$0xf] }
  0x4b   : > { %6034 = vmatprep.subr.bf16.mxu1 %v6489_v37  ;;  %v5518_v22 = vcombine.low %v1263_v10, %v1273_v15  ;;  %v992_v24 = vrot.slane %v990_v12, 5  ;;  %v343_v30 = vshll.u32 %v274_v14, 16  ;;  %v342_v37 = vrot.slane %v340_v26, 7  ;;  %v645_v43 = vld [vmem:[#allocation2 + $0x24] sm:$0xf]  ;;  %v6503_v3 = vld [vmem:[%s8084_s1 + $0xb0] sm:$0xff]  }
  0x4c   : > { %v541_v27 = vsel %vm6693_vm8, %v533_v5, %v540_v17  ;;  %v727_v28 = vsel %vm6709_vm10, %v542_v18, %v726_v13  ;;  %v996_v38 = vshll.u32 %v894_v34, 16  ;;  %v1000_v39 = vshrl.u32 %v894_v34, 16  ;;  %v299_v60 = vld [vmem:[%s6669_s18 + $0x74] sm:$0xf]  ;;  %v6493_v12 = vld [vmem:[#allocation2 + $0x18] sm:$0xff]   ;;  %v6509_v34 = vld [vmem:[%s8084_s1 + $0x1c0] sm:$0xff]  }
  0x4d   : > { %4438 = vmatprep.mubr.bf16.mxu1 %v5518_v22  ;;  %v993_v35 = vor.u32 %v992_v24, %v989_v23  ;;  %725 = vst [vmem:[#allocation2 + $0xac] sm:$0xf] %v541_v27  ;;  %728 = vst [vmem:[#allocation2 + $0xb0] sm:$0x1] %v727_v28  ;;  %v350_v41 = vrot.slane %v348_v31, 7  ;;  %v351_v42 = vshll.u32 %v275_v20, 16  ;;  %v345_v47 = vor.u32 %v343_v30, %v342_v37 }
  0x4e   : > { %6035 = vmatpush3.bf16.msra.mxu1 %v6491_v56  ;;  %v895_v44 = vld [vmem:[#allocation2 + $0x20] sm:$0x1]  ;;  %v346_v48 = vrot.slane %v342_v37, 4  ;;  %v544_v49 = vshrl.u32 %v298_v32, 16  ;;  %v998_v52 = vrot.slane %v996_v38, 5  ;;  %v1002_v53 = vrot.slane %v1000_v39, 4 }
  0x4f   : > { %6036 = vmatprep.subr.bf16.mxu1 %v6495_v2  ;;  %4439 = vmatmul.mubr.bf16.gmra.mrb[4].mxu1 %v6486_v16  ;;  %v994_v46 = vrot.slane %v993_v35, 4  ;;  %v1006_v54 = vshll.u32 %v895_v44, 16  ;;  %v353_v55 = vor.u32 %v351_v42, %v350_v41  ;;  %v649_v56 = vld [vmem:[#allocation2 + $0x2c] sm:$0x1]  ;;  %v355_v58 = vrot.slane %v350_v41, 4  ;;  %v6505_v14 = vld [vmem:[%s8084_s1 + $0xf8] sm:$0xff]  }
  0x50   : > { %v646_v59 = vsel %vm6698_vm9, %v345_v47, %v645_v43  ;;  %v6832_v61 = vrot.slane %v544_v49, 7  ;;  %v547_v62 = vshll.u32 %v298_v32, 16  ;;  %v1003_v63 = vor.u32 %v1002_v53, %v998_v52  ;;  %v729_v7 = vld [vmem:[#allocation2 + $0xb4] sm:$0xf]  ;;  %v6506_v23 = vld [vmem:[%s8084_s1 + $0xb8] sm:$0xff]  }
  0x51   : > { %v1008_v0 = vrot.slane %v1006_v54, 5  ;;  %v929_v1 = vld [vmem:[#allocation2 + $0xa8] sm:$0xf]  ;;  %v354_v2 = vsel %vm6693_vm8, %v346_v48, %v353_v55  ;;  %647 = vst [vmem:[#allocation2 + $0x24] sm:$0xf] %v646_v59  ;;  %v650_v6 = vsel %vm6709_vm10, %v355_v58, %v649_v56  ;;  %v999_v8 = vsel %vm6684_vm6, %v994_v46, %v998_v52  ;;  %v6511_v38 = vld [vmem:[%s8084_s1 + $0x158] sm:$0xff]  }
  0x52   : > { %6037 = vmatpush3.bf16.msra.mxu1 %v6496_v25  ;;  %v1275_v4 = vshrl.u32 %v929_v1, 16  ;;  %v1278_v5 = vshll.u32 %v929_v1, 16  ;;  %648 = vst [vmem:[#allocation2 + $0x28] sm:$0xf] %v354_v2  ;;  %v1004_v9 = vrot.slane %v1003_v63, 4  ;;  %v549_v13 = vor.u32 %v547_v62, %v6832_v61  ;;  %6146 = vmatprep.subr.bf16.mxu0 %v6511_v38  ;;  %v6512_v52 = vld [vmem:[%s8084_s1 + $0x118] sm:$0xff]  }
  0x53   : > { %6038 = vmatprep.subr.bf16.mxu1 %v6497_v29  ;;  %651 = vst [vmem:[#allocation2 + $0x2c] sm:$0x1] %v650_v6  ;;  %v550_v21 = vrot.slane %v6832_v61, 4  ;;  %v552_v22 = vshrl.u32 %v299_v60, 16  ;;  %v555_v30 = vshll.u32 %v299_v60, 16  ;;  %6147 = vmatpush3.bf16.msra.mxu0 %v6512_v52 }
  0x54   : > { %v930_v10 = vld [vmem:[#allocation2 + $0xac] sm:$0xf]  ;;  %v931_v11 = vld [vmem:[#allocation2 + $0xb0] sm:$0x1]  ;;  %v1277_v15 = vrot.slane %v1275_v4, 4  ;;  %v1280_v16 = vrot.slane %v1278_v5, 5  ;;  %v1009_v19 = vsel %vm6684_vm6, %v1004_v9, %v1008_v0  ;;  %v730_v31 = vsel %vm6698_vm9, %v549_v13, %v729_v7 }
  0x55   : > { %v1284_v17 = vshll.u32 %v930_v10, 16  ;;  %v1288_v18 = vshrl.u32 %v930_v10, 16  ;;  %v1294_v20 = vshll.u32 %v931_v11, 16  ;;  %v5507_v24 = vcombine.low %v999_v8, %v1009_v19  ;;  %v733_v32 = vld [vmem:[#allocation2 + $0xbc] sm:$0x1]  ;;  %v6494_v53 = vld [vmem:[#allocation2 + $0xa8] sm:$0xff]  }
  0x56   : > { %6039 = vmatpush3.bf16.msra.mxu1 %v6498_v36  ;;  %v1281_v25 = vor.u32 %v1280_v16, %v1277_v15  ;;  %v554_v29 = vrot.slane %v552_v22, 7  ;;  %731 = vst [vmem:[#allocation2 + $0xb4] sm:$0xf] %v730_v31  ;;  %v276_v2 = vld [vmem:[%s6669_s18 + $0x18] sm:$0xf] }
  0x57   : > { %6040 = vmatprep.subr.bf16.mxu1 %v6501_v57  ;;  %v1286_v26 = vrot.slane %v1284_v17, 5  ;;  %v1290_v27 = vrot.slane %v1288_v18, 4  ;;  %v1296_v28 = vrot.slane %v1294_v20, 5  ;;  %4350 = vmatprep.mubr.bf16.mxu0 %v5507_v24  ;;  %v357_v6 = vshrl.u32 %v276_v2, 16  ;;  %v652_v16 = vld [vmem:[#allocation2 + $0x30] sm:$0xf] }
  0x58   : > { %v1282_v35 = vrot.slane %v1281_v25, 4  ;;  %v896_v37 = vld [vmem:[#allocation2 + $0x24] sm:$0xf]  ;;  %4351 = vmatmul.mubr.bf16.gmra.mrb[8].mxu0 %v6493_v12  ;;  %v557_v43 = vor.u32 %v555_v30, %v554_v29  ;;  %v559_v44 = vrot.slane %v554_v29, 4  ;;  %v360_v11 = vshll.u32 %v276_v2, 16 }
  0x59   : > { %v1291_v36 = vor.u32 %v1290_v27, %v1286_v26  ;;  %v897_v39 = vld [vmem:[#allocation2 + $0x28] sm:$0xf]  ;;  %v1011_v41 = vshrl.u32 %v896_v37, 16  ;;  %v1014_v42 = vshll.u32 %v896_v37, 16  ;;  %v359_v13 = vrot.slane %v357_v6, 7  ;;  %v6517_v17 = vld [vmem:[%s8084_s1 + $0x160] sm:$0xff]  }
  0x5a   : > { %6041 = vmatpush3.bf16.msra.mxu1 %v6503_v3  ;;  %v1287_v46 = vsel %vm6684_vm6, %v1282_v35, %v1286_v26  ;;  %v898_v48 = vld [vmem:[#allocation2 + $0x2c] sm:$0x1]  ;;  %v1020_v49 = vshll.u32 %v897_v39, 16  ;;  %v1024_v50 = vshrl.u32 %v897_v39, 16  ;;  %v558_v57 = vsel %vm6693_vm8, %v550_v21, %v557_v43  ;;  %v277_v3 = vld [vmem:[%s6669_s18 + $0x1c] sm:$0xf]  ;;  %6148 = vmatprep.subr.bf16.mxu0 %v6517_v17 }
  0x5b   : > { %6042 = vmatprep.subr.bf16.mxu1 %v6505_v14  ;;  %v1292_v47 = vrot.slane %v1291_v36, 4  ;;  %v1013_v54 = vrot.slane %v1011_v41, 4  ;;  %v1016_v55 = vrot.slane %v1014_v42, 5  ;;  %v1030_v56 = vshll.u32 %v898_v48, 16  ;;  %732 = vst [vmem:[#allocation2 + $0xb8] sm:$0xf] %v558_v57 }
  0x5c   : > { %v1022_v59 = vrot.slane %v1020_v49, 5  ;;  %v1026_v60 = vrot.slane %v1024_v50, 4  ;;  %v734_v61 = vsel %vm6709_vm10, %v559_v44, %v733_v32  ;;  %v6499_v10 = vld [vmem:[#allocation2 + $0x24] sm:$0xff]   ;;  %v365_v14 = vshrl.u32 %v277_v3, 16  ;;  %v656_v30 = vld [vmem:[#allocation2 + $0x38] sm:$0x1] }
  0x5d   : > { %v1297_v58 = vsel %vm6684_vm6, %v1292_v47, %v1296_v28  ;;  %v1017_v63 = vor.u32 %v1016_v55, %v1013_v54  ;;  %v1032_v0 = vrot.slane %v1030_v56, 5  ;;  %735 = vst [vmem:[#allocation2 + $0xbc] sm:$0x1] %v734_v61  ;;  %v932_v5 = vld [vmem:[#allocation2 + $0xb4] sm:$0xf]  ;;  %v368_v15 = vshll.u32 %v277_v3, 16 }
  0x5e   : > { %6043 = vmatpush3.bf16.msra.mxu1 %v6506_v23  ;;  %v5519_v62 = vcombine.low %v1287_v46, %v1297_v58  ;;  %v1027_v1 = vor.u32 %v1026_v60, %v1022_v59  ;;  %v1299_v8 = vshrl.u32 %v932_v5, 16  ;;  %v1302_v9 = vshll.u32 %v932_v5, 16  ;;  %v1403_v35 = vld [vmem:[#allocation2 + $0x4] sm:$0xf]  ;;  %v1404_v42 = vld [vmem:[#allocation2 + $0x8] sm:$0x1] }
  0x5f   : > { %6252 = vmatprep.subr.bf16.mxu1 %v6509_v34  ;;  %v1018_v4 = vrot.slane %v1017_v63, 4  ;;  %v362_v23 = vor.u32 %v360_v11, %v359_v13  ;;  %v363_v24 = vrot.slane %v359_v13, 4  ;;  %v367_v29 = vrot.slane %v365_v14, 7  ;;  %v1402_v34 = vld [vmem:[#allocation2] sm:$0xe]  ;;  %v6524_v56 = vld [vmem:[%s8084_s1 + $0x128] sm:$0xff]  }
  0x60   : > { %4446 = vmatprep.mubr.bf16.mxu1 %v5519_v62  ;;  %v1028_v7 = vrot.slane %v1027_v1, 4  ;;  %v1301_v19 = vrot.slane %v1299_v8, 4  ;;  %v1304_v20 = vrot.slane %v1302_v9, 5  ;;  %v6519_v36 = vld [vmem:[%s8084_s1 + $0x120] sm:$0xff]   ;;  %v5521_v47 = vrot.slane %v1402_v34, 9  ;;  %v6507_v63 = vld [vmem:[#allocation2 + $0xc] sm:$0xff]  }
  0x61   : > { %4447 = vmatmul.mubr.bf16.gmra.mrb[8].mxu1 %v6494_v53  ;;  %v1023_v12 = vsel %vm6684_vm6, %v1018_v4, %v1022_v59  ;;  %v653_v32 = vsel %vm6698_vm9, %v362_v23, %v652_v16  ;;  %v370_v41 = vor.u32 %v368_v15, %v367_v29  ;;  %v372_v44 = vrot.slane %v367_v29, 4  ;;  %6149 = vmatpush3.bf16.msra.mxu0 %v6519_v36  ;;  %v6523_v53 = vld [vmem:[%s8084_s1 + $0x168] sm:$0xff]   ;;  %v278_v59 = vld [vmem:[%s6669_s18 + $0x20] sm:$0xf]  ;;  %v279_v60 = vld [vmem:[%s6669_s18 + $0x24] sm:$0xf] }
  0x62   : > { %v1033_v18 = vsel %vm6684_vm6, %v1028_v7, %v1032_v0  ;;  %v933_v22 = vld [vmem:[#allocation2 + $0xb8] sm:$0xf]  ;;  %v1305_v26 = vor.u32 %v1304_v20, %v1301_v19  ;;  %654 = vst [vmem:[#allocation2 + $0x30] sm:$0xf] %v653_v32  ;;  %v1503_v48 = vrot.slane %v1403_v35, 5  ;;  %v1506_v52 = vrot.slane %v1404_v42, 5  ;;  %6150 = vmatprep.subr.bf16.mxu0 %v6523_v53 }
  0x63   : > { %v5508_v21 = vcombine.low %v1023_v12, %v1033_v18  ;;  %v1308_v27 = vshll.u32 %v933_v22, 16  ;;  %v1312_v28 = vshrl.u32 %v933_v22, 16  ;;  %v371_v50 = vsel %vm6693_vm8, %v363_v24, %v370_v41  ;;  %v6500_v62 = vld [vmem:[#allocation2 + $0xb4] sm:$0xff]   ;;  %v659_v8 = vld [vmem:[#allocation2 + $0x3c] sm:$0xf] }
  0x64   : > { %v934_v25 = vld [vmem:[#allocation2 + $0xbc] sm:$0x1]  ;;  %v1306_v37 = vrot.slane %v1305_v26, 4  ;;  %655 = vst [vmem:[#allocation2 + $0x34] sm:$0xf] %v371_v50  ;;  %v657_v54 = vsel %vm6709_vm10, %v372_v44, %v656_v30  ;;  %v1505_v55 = vrot.slane %v1503_v48, 4  ;;  %v6910_v0 = vsel %vm6888_vm13, %v5521_v47, %v1503_v48 }
  0x65   : > { %4358 = vmatprep.mubr.bf16.mxu0 %v5508_v21  ;;  %v1318_v31 = vshll.u32 %v934_v25, 16  ;;  %v1310_v38 = vrot.slane %v1308_v27, 5  ;;  %v1314_v39 = vrot.slane %v1312_v28, 4  ;;  %658 = vst [vmem:[#allocation2 + $0x38] sm:$0x1] %v657_v54  ;;  %6151 = vmatpush3.bf16.msra.mxu0 %v6524_v56  ;;  %v374_v1 = vshrl.u32 %v278_v59, 16 }
  0x66   : > { %4359 = vmatmul.mubr.bf16.gmra.mrb[12].mxu0 %v6499_v10  ;;  %v377_v2 = vshll.u32 %v278_v59, 16  ;;  %v6914_v5 = vsel %vm6888_vm13, %v1505_v55, %v1506_v52  ;;  %v382_v6 = vshrl.u32 %v279_v60, 16  ;;  %v385_v7 = vshll.u32 %v279_v60, 16  ;;  %v663_v13 = vld [vmem:[#allocation2 + $0x44] sm:$0x1]  ;;  %v6531_v15 = vld [vmem:[%s8084_s1 + $0x170] sm:$0xff]  }
  0x67   : > { %v1320_v43 = vrot.slane %v1318_v31, 5  ;;  %v1315_v49 = vor.u32 %v1314_v39, %v1310_v38  ;;  %v1311_v57 = vsel %vm6684_vm6, %v1306_v37, %v1310_v38  ;;  %v376_v11 = vrot.slane %v374_v1, 7  ;;  %v1405_v14 = vld [vmem:[#allocation2 + $0xc] sm:$0xe]  ;;  %6152 = vmatprep.subr.bf16.mxu0 %v6531_v15  ;;  %v1406_v30 = vld [vmem:[#allocation2 + $0x10] sm:$0xf] }
  0x68   : > { %v384_v12 = vrot.slane %v382_v6, 7  ;;  %v5537_v19 = vcombine.low %v6910_v0, %v6914_v5  ;;  %v1407_v31 = vld [vmem:[#allocation2 + $0x14] sm:$0x1]  ;;  %v5522_v36 = vrot.slane %v1405_v14, 9  ;;  %v280_v37 = vld [vmem:[%s6669_s18 + $0x28] sm:$0xf] }
  0x69   : > { %v1316_v58 = vrot.slane %v1315_v49, 4  ;;  %v899_v4 = vld [vmem:[#allocation2 + $0x30] sm:$0xf]  ;;  %v379_v20 = vor.u32 %v377_v2, %v376_v11  ;;  %v380_v24 = vrot.slane %v376_v11, 4  ;;  %v1510_v42 = vrot.slane %v1406_v30, 5  ;;  %v6510_v48 = vld [vmem:[%s8084_s1 + $0x180] sm:$0xff]  }
  0x6a   : > { %v1035_v9 = vshrl.u32 %v899_v4, 16  ;;  %v1038_v10 = vshll.u32 %v899_v4, 16  ;;  %v387_v25 = vor.u32 %v385_v7, %v384_v12  ;;  %v389_v28 = vrot.slane %v384_v12, 4  ;;  %v6532_v44 = vld [vmem:[%s8084_s1 + $0x130] sm:$0xff]   ;;  %v6513_v49 = vld [vmem:[#allocation2 + $0x18] sm:$0xff]   ;;  %v6518_v54 = vld [vmem:[%s8084_s1 + $0x1c8] sm:$0xff]  }
  0x6b   : > { %v1321_v61 = vsel %vm6684_vm6, %v1316_v58, %v1320_v43  ;;  %v900_v16 = vld [vmem:[#allocation2 + $0x34] sm:$0xf]  ;;  %v660_v29 = vsel %vm6698_vm9, %v379_v20, %v659_v8  ;;  %v281_v43 = vld [vmem:[%s6669_s18 + $0x2c] sm:$0xf]  ;;  %v1513_v50 = vrot.slane %v1407_v31, 5  ;;  %v391_v52 = vshrl.u32 %v280_v37, 16  ;;  %6153 = vmatpush3.bf16.msra.mxu0 %v6532_v44 }
  0x6c   : > { %v5520_v3 = vcombine.low %v1311_v57, %v1321_v61  ;;  %v1037_v17 = vrot.slane %v1035_v9, 4  ;;  %v1040_v18 = vrot.slane %v1038_v10, 5  ;;  %v901_v21 = vld [vmem:[#allocation2 + $0x38] sm:$0x1]  ;;  %v1044_v22 = vshll.u32 %v900_v16, 16  ;;  %v6508_v60 = vld [vmem:[#allocation2 + $0x30] sm:$0xff]  }
  0x6d   : > { %v1048_v23 = vshrl.u32 %v900_v16, 16  ;;  %v1054_v27 = vshll.u32 %v901_v21, 16  ;;  %v388_v35 = vsel %vm6693_vm8, %v380_v24, %v387_v25  ;;  %661 = vst [vmem:[#allocation2 + $0x3c] sm:$0xf] %v660_v29  ;;  %v664_v41 = vsel %vm6709_vm10, %v389_v28, %v663_v13  ;;  %v666_v57 = vld [vmem:[#allocation2 + $0x48] sm:$0xf] }
  0x6e   : > { %4454 = vmatprep.mubr.bf16.mxu1 %v5520_v3  ;;  %v1041_v26 = vor.u32 %v1040_v18, %v1037_v17  ;;  %v1046_v32 = vrot.slane %v1044_v22, 5  ;;  %662 = vst [vmem:[#allocation2 + $0x40] sm:$0xf] %v388_v35  ;;  %665 = vst [vmem:[#allocation2 + $0x44] sm:$0x1] %v664_v41  ;;  %v394_v53 = vshll.u32 %v280_v37, 16  ;;  %v1511_v1 = vsel %vm6888_vm13, %v5522_v36, %v1510_v42 }
  0x6f   : > { %4455 = vmatmul.mubr.bf16.gmra.mrb[12].mxu1 %v6500_v62  ;;  %v1050_v34 = vrot.slane %v1048_v23, 4  ;;  %v1056_v39 = vrot.slane %v1054_v27, 5  ;;  %v1512_v55 = vrot.slane %v1510_v42, 4  ;;  %v399_v56 = vshrl.u32 %v281_v43, 16  ;;  %v6520_v0 = vld [vmem:[%s8084_s1 + $0x188] sm:$0xff]   ;;  %v6527_v6 = vld [vmem:[%s8084_s1 + $0x1d0] sm:$0xff]  }
  0x70   : > { %4495 = vmatprep.mubr.bf16.mxu1 %v6507_v63  ;;  %v1042_v38 = vrot.slane %v1041_v26, 4  ;;  %v393_v61 = vrot.slane %v391_v52, 7  ;;  %v402_v62 = vshll.u32 %v281_v43, 16  ;;  %v670_v63 = vld [vmem:[#allocation2 + $0x50] sm:$0x1]  ;;  %v6537_v7 = vld [vmem:[%s8084_s1 + $0x178] sm:$0xff]  }
  0x71   : > { %v1051_v47 = vor.u32 %v1050_v34, %v1046_v32  ;;  %v1514_v2 = vsel %vm6888_vm13, %v1512_v55, %v1513_v50  ;;  %v401_v3 = vrot.slane %v399_v56, 7  ;;  %v1408_v4 = vld [vmem:[#allocation2 + $0x18] sm:$0xe]  ;;  %v1409_v5 = vld [vmem:[#allocation2 + $0x1c] sm:$0xf]  ;;  %6154 = vmatprep.subr.bf16.mxu0 %v6537_v7  ;;  %v6515_v28 = vld [vmem:[#allocation2 + $0x24] sm:$0xff]  }
  0x72   : > { %v1047_v58 = vsel %vm6684_vm6, %v1042_v38, %v1046_v32  ;;  %v396_v9 = vor.u32 %v394_v53, %v393_v61  ;;  %v397_v10 = vrot.slane %v393_v61, 4  ;;  %v1410_v11 = vld [vmem:[#allocation2 + $0x20] sm:$0x1]  ;;  %v6538_v12 = vld [vmem:[%s8084_s1 + $0x138] sm:$0xff]   ;;  %v5523_v17 = vrot.slane %v1408_v4, 9  ;;  %v6528_v29 = vld [vmem:[%s8084_s1 + $0x190] sm:$0xff]  }
  0x73   : > { %v1052_v59 = vrot.slane %v1051_v47, 4  ;;  %v404_v15 = vor.u32 %v402_v62, %v401_v3  ;;  %v406_v16 = vrot.slane %v401_v3, 4  ;;  %v5538_v21 = vcombine.low %v1511_v1, %v1514_v2  ;;  %6155 = vmatpush3.bf16.msra.mxu0 %v6538_v12  ;;  %v6535_v38 = vld [vmem:[%s8084_s1 + $0x1d8] sm:$0xff]   ;;  %v282_v50 = vld [vmem:[%s6669_s18 + $0x30] sm:$0xf]  ;;  %v6543_v53 = vld [vmem:[%s8084_s1 + $0x200] sm:$0xff]  }
  0x74   : > { %v902_v14 = vld [vmem:[#allocation2 + $0x3c] sm:$0xf]  ;;  %v667_v22 = vsel %vm6698_vm9, %v396_v9, %v666_v57  ;;  %v1517_v34 = vrot.slane %v1409_v5, 5  ;;  %v1520_v37 = vrot.slane %v1410_v11, 5  ;;  %v283_v52 = vld [vmem:[%s6669_s18 + $0x34] sm:$0xf]  ;;  %6388 = vmatprep.subr.bf16.mxu0 %v6543_v53 }
  0x75   : > { %v1057_v8 = vsel %vm6684_vm6, %v1052_v59, %v1056_v39  ;;  %v903_v18 = vld [vmem:[#allocation2 + $0x40] sm:$0xf]  ;;  %v1062_v20 = vshll.u32 %v902_v14, 16  ;;  %v904_v23 = vld [vmem:[#allocation2 + $0x44] sm:$0x1]  ;;  %v405_v26 = vsel %vm6693_vm8, %v397_v10, %v404_v15  ;;  %v671_v27 = vsel %vm6709_vm10, %v406_v16, %v670_v63  ;;  %v6536_v43 = vld [vmem:[%s8084_s1 + $0x198] sm:$0xff]  }
  0x76   : > { %v5509_v13 = vcombine.low %v1047_v58, %v1057_v8  ;;  %v1068_v24 = vshll.u32 %v903_v18, 16  ;;  %v1072_v25 = vshrl.u32 %v903_v18, 16  ;;  %668 = vst [vmem:[#allocation2 + $0x48] sm:$0xf] %v667_v22  ;;  %v1078_v32 = vshll.u32 %v904_v23, 16  ;;  %v6514_v55 = vld [vmem:[#allocation2 + $0x3c] sm:$0xff]  }
  0x77   : > { %4496 = vmatmul.mubr.bf16.vlgmr.msra.gmra.mrb[16].mxu1 %v5537_v19  ;;  %v1059_v19 = vshrl.u32 %v902_v14, 16  ;;  %v1064_v31 = vrot.slane %v1062_v20, 5  ;;  %669 = vst [vmem:[#allocation2 + $0x4c] sm:$0xf] %v405_v26  ;;  %672 = vst [vmem:[#allocation2 + $0x50] sm:$0x1] %v671_v27 }
  0x78   : > { %6253 = vmatpush3.bf16.msra.mxu1 %v6510_v48  ;;  %4503 = vmatprep.mubr.bf16.mxu1 %v6513_v49  ;;  %v1070_v35 = vrot.slane %v1068_v24, 5  ;;  %v1074_v36 = vrot.slane %v1072_v25, 4  ;;  %v1080_v41 = vrot.slane %v1078_v32, 5  ;;  %v1519_v42 = vrot.slane %v1517_v34, 4  ;;  %v6542_v58 = vld [vmem:[%s8084_s1 + $0x1e0] sm:$0xff]   ;;  %v6521_v63 = vld [vmem:[#allocation2 + $0x30] sm:$0xff]  }
  0x79   : > { %6254 = vmatprep.subr.bf16.mxu1 %v6518_v54  ;;  %4366 = vmatprep.mubr.bf16.mxu0 %v5509_v13  ;;  %v1061_v30 = vrot.slane %v1059_v19, 4  ;;  %v1518_v48 = vsel %vm6888_vm13, %v5523_v17, %v1517_v34  ;;  %v408_v56 = vshrl.u32 %v282_v50, 16  ;;  %v411_v57 = vshll.u32 %v282_v50, 16  ;;  %v673_v10 = vld [vmem:[#allocation2 + $0x54] sm:$0xf]  ;;  %v6544_v11 = vld [vmem:[%s8084_s1 + $0x1a0] sm:$0xff]  }
  0x7a   : > { %4367 = vmatmul.mubr.bf16.gmra.mrb[16].mxu0 %v6508_v60  ;;  %v1075_v44 = vor.u32 %v1074_v36, %v1070_v35  ;;  %v1521_v49 = vsel %vm6888_vm13, %v1519_v42, %v1520_v37  ;;  %v416_v61 = vshrl.u32 %v283_v52, 16  ;;  %v419_v62 = vshll.u32 %v283_v52, 16  ;;  %v677_v16 = vld [vmem:[#allocation2 + $0x5c] sm:$0x1]  ;;  %v1411_v24 = vld [vmem:[#allocation2 + $0x24] sm:$0xe] }
  0x7b   : > { %v1065_v39 = vor.u32 %v1064_v31, %v1061_v30  ;;  %v5539_v5 = vcombine.low %v1518_v48, %v1521_v49  ;;  %v410_v14 = vrot.slane %v408_v56, 7  ;;  %v6547_v25 = vld [vmem:[%s8084_s1 + $0x1e8] sm:$0xff]   ;;  %v5524_v30 = vrot.slane %v1411_v24, 9 }
  0x7c   : > { %6255 = vmatpush3.bf16.msra.mxu1 %v6520_v0  ;;  %v1076_v54 = vrot.slane %v1075_v44, 4  ;;  %v418_v15 = vrot.slane %v416_v61, 7  ;;  %v285_v44 = vld [vmem:[%s6669_s18 + $0x3c] sm:$0xf]  ;;  %v6549_v53 = vld [vmem:[%s8084_s1 + $0x1a8] sm:$0xff]  }
  0x7d   : > { %6256 = vmatprep.subr.bf16.mxu1 %v6527_v6  ;;  %v1066_v47 = vrot.slane %v1065_v39, 4  ;;  %v905_v60 = vld [vmem:[#allocation2 + $0x48] sm:$0xf]  ;;  %v414_v22 = vrot.slane %v410_v14, 4  ;;  %v433_v52 = vshrl.u32 %v285_v44, 16  ;;  %v436_v56 = vshll.u32 %v285_v44, 16 }
  0x7e   : > { %v1081_v0 = vsel %vm6684_vm6, %v1076_v54, %v1080_v41  ;;  %v906_v1 = vld [vmem:[#allocation2 + $0x4c] sm:$0xf]  ;;  %v907_v2 = vld [vmem:[#allocation2 + $0x50] sm:$0x1]  ;;  %v1083_v3 = vshrl.u32 %v905_v60, 16  ;;  %v1086_v4 = vshll.u32 %v905_v60, 16  ;;  %v421_v23 = vor.u32 %v419_v62, %v418_v15 }
  0x7f   : > { %4504 = vmatmul.mubr.bf16.gmra.mrb[20].mxu1 %v5538_v21  ;;  %v1071_v59 = vsel %vm6684_vm6, %v1066_v47, %v1070_v35  ;;  %v1092_v7 = vshll.u32 %v906_v1, 16  ;;  %v1096_v8 = vshrl.u32 %v906_v1, 16  ;;  %v1102_v9 = vshll.u32 %v907_v2, 16  ;;  %v6516_v48 = vld [vmem:[#allocation2 + $0x48] sm:$0xff]   ;;  %v1414_v61 = vld [vmem:[#allocation2 + $0x30] sm:$0xe] }
  0x80   : > { %4511 = vmatprep.mubr.bf16.mxu1 %v6515_v28  ;;  %6257 = vmatpush3.bf16.msra.mxu1 %v6528_v29  ;;  %v5510_v6 = vcombine.low %v1071_v59, %v1081_v0  ;;  %v1085_v12 = vrot.slane %v1083_v3, 4  ;;  %v1088_v13 = vrot.slane %v1086_v4, 5  ;;  %v413_v21 = vor.u32 %v411_v57, %v410_v14  ;;  %v1412_v28 = vld [vmem:[#allocation2 + $0x28] sm:$0xf]  ;;  %v1413_v29 = vld [vmem:[#allocation2 + $0x2c] sm:$0x1] }
  0x81   : > { %6258 = vmatprep.subr.bf16.mxu1 %v6535_v38  ;;  %v1094_v17 = vrot.slane %v1092_v7, 5  ;;  %v1098_v18 = vrot.slane %v1096_v8, 4  ;;  %v1104_v19 = vrot.slane %v1102_v9, 5  ;;  %v423_v27 = vrot.slane %v418_v15, 4  ;;  %v6525_v57 = vld [vmem:[#allocation2 + $0x3c] sm:$0xff]  }
  0x82   : > { %4374 = vmatprep.mubr.bf16.mxu0 %v5510_v6  ;;  %v1089_v20 = vor.u32 %v1088_v13, %v1085_v12  ;;  %v422_v32 = vsel %vm6693_vm8, %v414_v22, %v421_v23  ;;  %v674_v34 = vsel %vm6698_vm9, %v413_v21, %v673_v10  ;;  %v1524_v35 = vrot.slane %v1412_v28, 5  ;;  %v680_v62 = vld [vmem:[#allocation2 + $0x60] sm:$0xf]  ;;  %v1416_v6 = vld [vmem:[#allocation2 + $0x38] sm:$0x1] }
  0x83   : > { %4375 = vmatmul.mubr.bf16.gmra.mrb[20].mxu0 %v6514_v55  ;;  %v1099_v26 = vor.u32 %v1098_v18, %v1094_v17  ;;  %675 = vst [vmem:[#allocation2 + $0x54] sm:$0xf] %v674_v34  ;;  %676 = vst [vmem:[#allocation2 + $0x58] sm:$0xf] %v422_v32  ;;  %v678_v37 = vsel %vm6709_vm10, %v423_v27, %v677_v16  ;;  %v1527_v38 = vrot.slane %v1413_v29, 5  ;;  %v435_v60 = vrot.slane %v433_v52, 7 }
  0x84   : > { %6259 = vmatpush3.bf16.msra.mxu1 %v6536_v43  ;;  %v1090_v31 = vrot.slane %v1089_v20, 4  ;;  %679 = vst [vmem:[#allocation2 + $0x5c] sm:$0x1] %v678_v37  ;;  %v1525_v41 = vsel %vm6888_vm13, %v5524_v30, %v1524_v35  ;;  %v1526_v42 = vrot.slane %v1524_v35, 4  ;;  %v284_v43 = vld [vmem:[%s6669_s18 + $0x38] sm:$0xf] }
  0x85   : > { %6260 = vmatprep.subr.bf16.mxu1 %v6542_v58  ;;  %v1100_v36 = vrot.slane %v1099_v26, 4  ;;  %v425_v49 = vshrl.u32 %v284_v43, 16  ;;  %v428_v50 = vshll.u32 %v284_v43, 16  ;;  %v5525_v0 = vrot.slane %v1414_v61, 9  ;;  %v287_v28 = vld [vmem:[%s6669_s18 + $0x44] sm:$0xf] }
  0x86   : > { %v1095_v39 = vsel %vm6684_vm6, %v1090_v31, %v1094_v17  ;;  %v1528_v55 = vsel %vm6888_vm13, %v1526_v42, %v1527_v38  ;;  %v438_v3 = vor.u32 %v436_v56, %v435_v60  ;;  %v440_v4 = vrot.slane %v435_v60, 4  ;;  %v6552_v37 = vld [vmem:[%s8084_s1 + $0x1f0] sm:$0xff]   ;;  %v1418_v61 = vld [vmem:[#allocation2 + $0x40] sm:$0xf] }
  0x87   : > { %4512 = vmatmul.mubr.bf16.gmra.mrb[24].mxu1 %v5539_v5  ;;  %v1105_v47 = vsel %vm6684_vm6, %v1100_v36, %v1104_v19  ;;  %v5540_v58 = vcombine.low %v1525_v41, %v1528_v55  ;;  %v427_v59 = vrot.slane %v425_v49, 7  ;;  %v1415_v5 = vld [vmem:[#allocation2 + $0x34] sm:$0xf]  ;;  %v1534_v24 = vrot.slane %v1416_v6, 5  ;;  %v6529_v36 = vld [vmem:[#allocation2 + $0x48] sm:$0xff]  }
  0x88   : > { %4519 = vmatprep.mubr.bf16.mxu1 %v6521_v63  ;;  %6261 = vmatpush3.bf16.msra.mxu1 %v6544_v11  ;;  %v5511_v54 = vcombine.low %v1095_v39, %v1105_v47  ;;  %v684_v63 = vld [vmem:[#allocation2 + $0x68] sm:$0x1]  ;;  %v1531_v23 = vrot.slane %v1415_v5, 5  ;;  %v450_v34 = vshrl.u32 %v287_v28, 16  ;;  %v453_v35 = vshll.u32 %v287_v28, 16 }
  0x89   : > { %6262 = vmatprep.subr.bf16.mxu1 %v6547_v25  ;;  %v430_v1 = vor.u32 %v428_v50, %v427_v59  ;;  %v431_v2 = vrot.slane %v427_v59, 4  ;;  %v685_v17 = vsel %vm6709_vm10, %v440_v4, %v684_v63  ;;  %v286_v25 = vld [vmem:[%s6669_s18 + $0x40] sm:$0xf]  ;;  %v687_v47 = vld [vmem:[#allocation2 + $0x6c] sm:$0xf] }
  0x8a   : > { %4382 = vmatprep.mubr.bf16.mxu0 %v5511_v54  ;;  %v908_v7 = vld [vmem:[#allocation2 + $0x54] sm:$0xf]  ;;  %v909_v8 = vld [vmem:[#allocation2 + $0x58] sm:$0xf]  ;;  %686 = vst [vmem:[#allocation2 + $0x68] sm:$0x1] %v685_v17  ;;  %v1532_v31 = vsel %vm6888_vm13, %v5525_v0, %v1531_v23 }
  0x8b   : > { %4383 = vmatmul.mubr.bf16.gmra.mrb[24].mxu0 %v6516_v48  ;;  %v910_v9 = vld [vmem:[#allocation2 + $0x5c] sm:$0x1]  ;;  %v1107_v10 = vshrl.u32 %v908_v7, 16  ;;  %v1110_v11 = vshll.u32 %v908_v7, 16  ;;  %v1116_v12 = vshll.u32 %v909_v8, 16  ;;  %v1120_v13 = vshrl.u32 %v909_v8, 16 }
  0x8c   : > { %6263 = vmatpush3.bf16.msra.mxu1 %v6549_v53  ;;  %v1126_v14 = vshll.u32 %v910_v9, 16  ;;  %v439_v15 = vsel %vm6693_vm8, %v431_v2, %v438_v3  ;;  %v681_v16 = vsel %vm6698_vm9, %v430_v1, %v680_v62  ;;  %v442_v29 = vshrl.u32 %v286_v25, 16  ;;  %v6522_v41 = vld [vmem:[#allocation2 + $0x54] sm:$0xff]   ;;  %v1417_v55 = vld [vmem:[#allocation2 + $0x3c] sm:$0xe] }
  0x8d   : > { %v1109_v18 = vrot.slane %v1107_v10, 4  ;;  %v1112_v19 = vrot.slane %v1110_v11, 5  ;;  %v1118_v20 = vrot.slane %v1116_v12, 5  ;;  %v1122_v21 = vrot.slane %v1120_v13, 4  ;;  %682 = vst [vmem:[#allocation2 + $0x60] sm:$0xf] %v681_v16  ;;  %6264 = vmatprep.subr.bf16.mxu1 %v6552_v37 }
  0x8e   : > { %683 = vst [vmem:[#allocation2 + $0x64] sm:$0xf] %v439_v15  ;;  %v1128_v22 = vrot.slane %v1126_v14, 5  ;;  %v445_v30 = vshll.u32 %v286_v25, 16  ;;  %v1533_v32 = vrot.slane %v1531_v23, 4  ;;  %v444_v42 = vrot.slane %v442_v29, 7 }
  0x8f   : > { %4520 = vmatmul.mubr.bf16.gmra.mrb[28].mxu1 %v5540_v58  ;;  %v1113_v26 = vor.u32 %v1112_v19, %v1109_v18  ;;  %v1123_v27 = vor.u32 %v1122_v21, %v1118_v20  ;;  %v452_v44 = vrot.slane %v450_v34, 7  ;;  %v6554_v48 = vld [vmem:[%s8084_s1 + $0x1b0] sm:$0xff]   ;;  %v1419_v62 = vld [vmem:[#allocation2 + $0x44] sm:$0x1]  ;;  %v5526_v14 = vrot.slane %v1417_v55, 9 }
  0x90   : > { %4527 = vmatprep.mubr.bf16.mxu1 %v6525_v57  ;;  %v1535_v43 = vsel %vm6888_vm13, %v1533_v32, %v1534_v24  ;;  %v447_v53 = vor.u32 %v445_v30, %v444_v42  ;;  %v691_v54 = vld [vmem:[#allocation2 + $0x74] sm:$0x1]  ;;  %6265 = vmatpush3.bf16.msra.mxu1 %v6554_v48  ;;  %v448_v4 = vrot.slane %v444_v42, 4  ;;  %v1538_v17 = vrot.slane %v1418_v61, 5  ;;  %v288_v19 = vld [vmem:[%s6669_s18 + $0x48] sm:$0xf] }
  0x91   : > { %v1114_v38 = vrot.slane %v1113_v26, 4  ;;  %v1124_v39 = vrot.slane %v1123_v27, 4  ;;  %v5541_v52 = vcombine.low %v1532_v31, %v1535_v43  ;;  %v913_v59 = vld [vmem:[#allocation2 + $0x68] sm:$0x1]  ;;  %v455_v60 = vor.u32 %v453_v35, %v452_v44  ;;  %v6533_v30 = vld [vmem:[#allocation2 + $0x54] sm:$0xff]  }
  0x92   : > { %v1150_v3 = vshll.u32 %v913_v59, 16  ;;  %v457_v5 = vrot.slane %v452_v44, 4  ;;  %v688_v6 = vsel %vm6698_vm9, %v447_v53, %v687_v47  ;;  %v1541_v18 = vrot.slane %v1419_v62, 5  ;;  %v694_v37 = vld [vmem:[#allocation2 + $0x78] sm:$0xf] }
  0x93   : > { %v1119_v49 = vsel %vm6684_vm6, %v1114_v38, %v1118_v20  ;;  %v1129_v50 = vsel %vm6684_vm6, %v1124_v39, %v1128_v22  ;;  %689 = vst [vmem:[#allocation2 + $0x6c] sm:$0xf] %v688_v6  ;;  %v456_v12 = vsel %vm6693_vm8, %v448_v4, %v455_v60  ;;  %v289_v20 = vld [vmem:[%s6669_s18 + $0x4c] sm:$0xf]  ;;  %v459_v21 = vshrl.u32 %v288_v19, 16  ;;  %v6557_v6 = vld [vmem:[%s8084_s1 + $0x1f8] sm:$0xff]  }
  0x94   : > { %v5512_v56 = vcombine.low %v1119_v49, %v1129_v50  ;;  %v911_v57 = vld [vmem:[#allocation2 + $0x60] sm:$0xf]  ;;  %v1152_v11 = vrot.slane %v1150_v3, 5  ;;  %v692_v13 = vsel %vm6709_vm10, %v457_v5, %v691_v54  ;;  %690 = vst [vmem:[#allocation2 + $0x70] sm:$0xf] %v456_v12  ;;  %v462_v22 = vshll.u32 %v288_v19, 16  ;;  %6266 = vmatprep.subr.bf16.mxu1 %v6557_v6 }
  0x95   : > { %v912_v58 = vld [vmem:[#allocation2 + $0x64] sm:$0xf]  ;;  %v1131_v63 = vshrl.u32 %v911_v57, 16  ;;  %v1134_v0 = vshll.u32 %v911_v57, 16  ;;  %693 = vst [vmem:[#allocation2 + $0x74] sm:$0x1] %v692_v13  ;;  %v1539_v28 = vsel %vm6888_vm13, %v5526_v14, %v1538_v17 }
  0x96   : > { %v1140_v1 = vshll.u32 %v912_v58, 16  ;;  %v1144_v2 = vshrl.u32 %v912_v58, 16  ;;  %4390 = vmatprep.mubr.bf16.mxu0 %v5512_v56  ;;  %v467_v23 = vshrl.u32 %v289_v20, 16  ;;  %v470_v24 = vshll.u32 %v289_v20, 16  ;;  %v6526_v27 = vld [vmem:[#allocation2 + $0x60] sm:$0xff]  }
  0x97   : > { %4528 = vmatmul.mubr.bf16.gmra.mrb[32].mxu1 %v5541_v52  ;;  %4391 = vmatmul.mubr.bf16.gmra.mrb[28].mxu0 %v6522_v41  ;;  %v1133_v7 = vrot.slane %v1131_v63, 4  ;;  %v1136_v8 = vrot.slane %v1134_v0, 5  ;;  %v1540_v29 = vrot.slane %v1538_v17, 4  ;;  %v461_v31 = vrot.slane %v459_v21, 7  ;;  %v698_v38 = vld [vmem:[#allocation2 + $0x80] sm:$0x1] }
  0x98   : > { %4535 = vmatprep.mubr.bf16.mxu1 %v6529_v36  ;;  %v1142_v9 = vrot.slane %v1140_v1, 5  ;;  %v1146_v10 = vrot.slane %v1144_v2, 4  ;;  %v469_v32 = vrot.slane %v467_v23, 7  ;;  %v1420_v39 = vld [vmem:[#allocation2 + $0x48] sm:$0xe]  ;;  %v6539_v19 = vld [vmem:[#allocation2 + $0x60] sm:$0xff]  }
  0x99   : > { %v1137_v15 = vor.u32 %v1136_v8, %v1133_v7  ;;  %v1542_v36 = vsel %vm6888_vm13, %v1540_v29, %v1541_v18  ;;  %v464_v44 = vor.u32 %v462_v22, %v461_v31  ;;  %v465_v47 = vrot.slane %v461_v31, 4  ;;  %v1421_v48 = vld [vmem:[#allocation2 + $0x4c] sm:$0xf]  ;;  %v1422_v61 = vld [vmem:[#allocation2 + $0x50] sm:$0x1] }
  0x9a   : > { %v1147_v16 = vor.u32 %v1146_v10, %v1142_v9  ;;  %v914_v42 = vld [vmem:[#allocation2 + $0x6c] sm:$0xf]  ;;  %v5542_v43 = vcombine.low %v1539_v28, %v1542_v36  ;;  %v472_v52 = vor.u32 %v470_v24, %v469_v32  ;;  %v474_v53 = vrot.slane %v469_v32, 4  ;;  %v290_v13 = vld [vmem:[%s6669_s18 + $0x50] sm:$0xf] }
  0x9b   : > { %v1138_v25 = vrot.slane %v1137_v15, 4  ;;  %v1155_v49 = vshrl.u32 %v914_v42, 16  ;;  %v1158_v50 = vshll.u32 %v914_v42, 16  ;;  %v915_v54 = vld [vmem:[#allocation2 + $0x70] sm:$0xf]  ;;  %v695_v56 = vsel %vm6698_vm9, %v464_v44, %v694_v37 }
  0x9c   : > { %v1148_v26 = vrot.slane %v1147_v16, 4  ;;  %v916_v55 = vld [vmem:[#allocation2 + $0x74] sm:$0x1]  ;;  %v1164_v59 = vshll.u32 %v915_v54, 16  ;;  %v1168_v60 = vshrl.u32 %v915_v54, 16  ;;  %v473_v63 = vsel %vm6693_vm8, %v465_v47, %v472_v52  ;;  %v6559_v47 = vld [vmem:[%s8084_s1 + $0x1b8] sm:$0xff]  }
  0x9d   : > { %v1143_v34 = vsel %vm6684_vm6, %v1138_v25, %v1142_v9  ;;  %v1157_v57 = vrot.slane %v1155_v49, 4  ;;  %v1160_v58 = vrot.slane %v1158_v50, 5  ;;  %696 = vst [vmem:[#allocation2 + $0x78] sm:$0xf] %v695_v56  ;;  %v1174_v62 = vshll.u32 %v916_v55, 16  ;;  %v6530_v25 = vld [vmem:[#allocation2 + $0x6c] sm:$0xff]   ;;  %6267 = vmatpush3.bf16.msra.mxu1 %v6559_v47 }
  0x9e   : > { %v1153_v35 = vsel %vm6684_vm6, %v1148_v26, %v1152_v11  ;;  %v699_v0 = vsel %vm6709_vm10, %v474_v53, %v698_v38  ;;  %v5527_v1 = vrot.slane %v1420_v39, 9  ;;  %v1166_v3 = vrot.slane %v1164_v59, 5  ;;  %697 = vst [vmem:[#allocation2 + $0x7c] sm:$0xf] %v473_v63  ;;  %v291_v14 = vld [vmem:[%s6669_s18 + $0x54] sm:$0xf] }
  0x9f   : > { %v5513_v41 = vcombine.low %v1143_v34, %v1153_v35  ;;  %4536 = vmatmul.mubr.bf16.gmra.mrb[36].mxu1 %v5542_v43  ;;  %v1161_v2 = vor.u32 %v1160_v58, %v1157_v57  ;;  %v1170_v4 = vrot.slane %v1168_v60, 4  ;;  %700 = vst [vmem:[#allocation2 + $0x80] sm:$0x1] %v699_v0  ;;  %v1545_v5 = vrot.slane %v1421_v48, 5  ;;  %v701_v29 = vld [vmem:[#allocation2 + $0x84] sm:$0xf] }
  0xa0   : > { %4543 = vmatprep.mubr.bf16.mxu1 %v6533_v30  ;;  %v1176_v7 = vrot.slane %v1174_v62, 5  ;;  %v1548_v8 = vrot.slane %v1422_v61, 5  ;;  %v476_v18 = vshrl.u32 %v290_v13, 16  ;;  %v479_v22 = vshll.u32 %v290_v13, 16  ;;  %v705_v38 = vld [vmem:[#allocation2 + $0x8c] sm:$0x1] }
  0xa1   : > { %4398 = vmatprep.mubr.bf16.mxu0 %v5513_v41  ;;  %v1162_v9 = vrot.slane %v1161_v2, 4  ;;  %v1171_v10 = vor.u32 %v1170_v4, %v1166_v3  ;;  %v1546_v11 = vsel %vm6888_vm13, %v5527_v1, %v1545_v5  ;;  %v1547_v12 = vrot.slane %v1545_v5, 4  ;;  %v1423_v44 = vld [vmem:[#allocation2 + $0x54] sm:$0xe]  ;;  %v1424_v53 = vld [vmem:[#allocation2 + $0x58] sm:$0xf] }
  0xa2   : > { %4399 = vmatmul.mubr.bf16.gmra.mrb[32].mxu0 %v6526_v27  ;;  %v484_v23 = vshrl.u32 %v291_v14, 16  ;;  %v478_v28 = vrot.slane %v476_v18, 7  ;;  %v487_v52 = vshll.u32 %v291_v14, 16  ;;  %v1425_v57 = vld [vmem:[#allocation2 + $0x5c] sm:$0x1]  ;;  %v5528_v58 = vrot.slane %v1423_v44, 9 }
  0xa3   : > { %v1167_v15 = vsel %vm6684_vm6, %v1162_v9, %v1166_v3  ;;  %v1172_v16 = vrot.slane %v1171_v10, 4  ;;  %v1549_v17 = vsel %vm6888_vm13, %v1547_v12, %v1548_v8  ;;  %v1552_v62 = vrot.slane %v1424_v53, 5  ;;  %v1426_v4 = vld [vmem:[#allocation2 + $0x60] sm:$0xe]  ;;  %v6541_v8 = vld [vmem:[#allocation2 + $0x6c] sm:$0xff]  }
  0xa4   : > { %v917_v20 = vld [vmem:[#allocation2 + $0x78] sm:$0xf]  ;;  %v5543_v21 = vcombine.low %v1546_v11, %v1549_v17  ;;  %v481_v41 = vor.u32 %v479_v22, %v478_v28  ;;  %v482_v42 = vrot.slane %v478_v28, 4  ;;  %v486_v43 = vrot.slane %v484_v23, 7  ;;  %v1427_v9 = vld [vmem:[#allocation2 + $0x64] sm:$0xf] }
  0xa5   : > { %v1177_v24 = vsel %vm6684_vm6, %v1172_v16, %v1176_v7  ;;  %v1179_v26 = vshrl.u32 %v917_v20, 16  ;;  %v1182_v27 = vshll.u32 %v917_v20, 16  ;;  %v918_v31 = vld [vmem:[#allocation2 + $0x7c] sm:$0xf]  ;;  %v1555_v0 = vrot.slane %v1425_v57, 5 }
  0xa6   : > { %v5514_v30 = vcombine.low %v1167_v15, %v1177_v24  ;;  %v919_v32 = vld [vmem:[#allocation2 + $0x80] sm:$0x1]  ;;  %v1188_v36 = vshll.u32 %v918_v31, 16  ;;  %v1192_v37 = vshrl.u32 %v918_v31, 16  ;;  %v491_v55 = vrot.slane %v486_v43, 4  ;;  %v6534_v5 = vld [vmem:[#allocation2 + $0x78] sm:$0xff]  }
  0xa7   : > { %4544 = vmatmul.mubr.bf16.gmra.mrb[40].mxu1 %v5543_v21  ;;  %v1181_v34 = vrot.slane %v1179_v26, 4  ;;  %v1184_v35 = vrot.slane %v1182_v27, 5  ;;  %v1198_v39 = vshll.u32 %v919_v32, 16  ;;  %v702_v56 = vsel %vm6698_vm9, %v481_v41, %v701_v29  ;;  %v1428_v11 = vld [vmem:[#allocation2 + $0x68] sm:$0x1] }
  0xa8   : > { %4551 = vmatprep.mubr.bf16.mxu1 %v6539_v19  ;;  %4406 = vmatprep.mubr.bf16.mxu0 %v5514_v30  ;;  %v1190_v49 = vrot.slane %v1188_v36, 5  ;;  %v1194_v50 = vrot.slane %v1192_v37, 4  ;;  %v489_v61 = vor.u32 %v487_v52, %v486_v43  ;;  %703 = vst [vmem:[#allocation2 + $0x84] sm:$0xf] %v702_v56  ;;  %v706_v63 = vsel %vm6709_vm10, %v491_v55, %v705_v38  ;;  %v1837_v14 = vld [vmem:[#allocation2 + $0xc] sm:$0xf] }
  0xa9   : > { %v1185_v48 = vor.u32 %v1184_v35, %v1181_v34  ;;  %v1200_v54 = vrot.slane %v1198_v39, 5  ;;  %707 = vst [vmem:[#allocation2 + $0x8c] sm:$0x1] %v706_v63  ;;  %v1553_v6 = vsel %vm6888_vm13, %v5528_v58, %v1552_v62  ;;  %v1554_v7 = vrot.slane %v1552_v62, 4  ;;  %v2349_v17 = vld [vmem:[#allocation2 + $0xc] sm:$0xe] }
  0xaa   : > { %4407 = vmatmul.mubr.bf16.gmra.mrb[36].mxu0 %v6530_v25  ;;  %v1195_v60 = vor.u32 %v1194_v50, %v1190_v49  ;;  %v490_v3 = vsel %vm6693_vm8, %v482_v42, %v489_v61  ;;  %v5529_v12 = vrot.slane %v1426_v4, 9  ;;  %v1559_v13 = vrot.slane %v1427_v9, 5  ;;  %v2350_v18 = vld [vmem:[#allocation2 + $0x10] sm:$0xf]  ;;  %v1839_v24 = vld [vmem:[#allocation2 + $0x14] sm:$0x1] }
  0xab   : > { %v1186_v59 = vrot.slane %v1185_v48, 4  ;;  %704 = vst [vmem:[#allocation2 + $0x88] sm:$0xf] %v490_v3  ;;  %v1556_v16 = vsel %vm6888_vm13, %v1554_v7, %v1555_v0  ;;  %v1838_v19 = vld [vmem:[#allocation2 + $0x10] sm:$0xf]  ;;  %v1562_v22 = vrot.slane %v1428_v11, 5 }
  0xac   : > { %v1196_v2 = vrot.slane %v1195_v60, 4  ;;  %v5544_v20 = vcombine.low %v1553_v6, %v1556_v16  ;;  %v1561_v21 = vrot.slane %v1559_v13, 4  ;;  %v1886_v25 = vshrl.u32 %v1837_v14, 16  ;;  %v2351_v29 = vld [vmem:[#allocation2 + $0x14] sm:$0x1]  ;;  %v6545_v55 = vld [vmem:[#allocation2 + $0x78] sm:$0xff]  }
  0xad   : > { %v1191_v1 = vsel %vm6684_vm6, %v1186_v59, %v1190_v49  ;;  %v1889_v26 = vshll.u32 %v1837_v14, 16  ;;  %v1560_v30 = vsel %vm6888_vm13, %v5529_v12, %v1559_v13  ;;  %v2447_v34 = vrot.slane %v2350_v18, 5  ;;  %v2354_v6 = vld [vmem:[#allocation2 + $0x20] sm:$0x1]  ;;  %v1430_v14 = vld [vmem:[#allocation2 + $0x70] sm:$0xf] }
  0xae   : > { %v1201_v10 = vsel %vm6684_vm6, %v1196_v2, %v1200_v54  ;;  %v1563_v31 = vsel %vm6888_vm13, %v1561_v21, %v1562_v22  ;;  %v1888_v35 = vrot.slane %v1886_v25, 4  ;;  %v1895_v37 = vshll.u32 %v1838_v19, 16  ;;  %v2353_v2 = vld [vmem:[#allocation2 + $0x1c] sm:$0xf]  ;;  %v1842_v25 = vld [vmem:[#allocation2 + $0x20] sm:$0x1] }
  0xaf   : > { %v5515_v15 = vcombine.low %v1191_v1, %v1201_v10  ;;  %v920_v23 = vld [vmem:[#allocation2 + $0x84] sm:$0xf]  ;;  %4552 = vmatmul.mubr.bf16.gmra.mrb[44].mxu1 %v5544_v20  ;;  %v1891_v36 = vrot.slane %v1889_v26, 5  ;;  %v5585_v43 = vrot.slane %v2349_v17, 9  ;;  %v5545_v48 = vcombine.low %v1560_v30, %v1563_v31  ;;  %v2352_v1 = vld [vmem:[#allocation2 + $0x18] sm:$0xe] }
  0xb0   : > { %v1203_v27 = vshrl.u32 %v920_v23, 16  ;;  %v1206_v28 = vshll.u32 %v920_v23, 16  ;;  %v922_v32 = vld [vmem:[#allocation2 + $0x8c] sm:$0x1]  ;;  %4559 = vmatprep.mubr.bf16.mxu1 %v6541_v8  ;;  %v7092_v52 = vrot.slane %v1895_v37, 5  ;;  %v1899_v53 = vshrl.u32 %v1838_v19, 16 }
  0xb1   : > { %4414 = vmatprep.mubr.bf16.mxu0 %v5515_v15  ;;  %v1222_v42 = vshll.u32 %v922_v32, 16  ;;  %v1892_v49 = vor.u32 %v1891_v36, %v1888_v35  ;;  %v1905_v54 = vshll.u32 %v1839_v24, 16  ;;  %v2449_v58 = vrot.slane %v2447_v34, 4  ;;  %v1429_v8 = vld [vmem:[#allocation2 + $0x6c] sm:$0xe] }
  0xb2   : > { %4415 = vmatmul.mubr.bf16.gmra.mrb[40].mxu0 %v6534_v5  ;;  %v921_v38 = vld [vmem:[#allocation2 + $0x88] sm:$0xf]  ;;  %v1205_v39 = vrot.slane %v1203_v27, 4  ;;  %v1208_v41 = vrot.slane %v1206_v28, 5  ;;  %v2450_v59 = vrot.slane %v2351_v29, 5  ;;  %v1901_v63 = vrot.slane %v1899_v53, 4 }
  0xb3   : > { %v1212_v44 = vshll.u32 %v921_v38, 16  ;;  %v1216_v47 = vshrl.u32 %v921_v38, 16  ;;  %v1224_v61 = vrot.slane %v1222_v42, 5  ;;  %v1893_v62 = vrot.slane %v1892_v49, 4  ;;  %v6540_v11 = vld [vmem:[#allocation2 + $0x84] sm:$0xff]  }
  0xb4   : > { %v1209_v50 = vor.u32 %v1208_v41, %v1205_v39  ;;  %v2448_v3 = vsel %vm6888_vm13, %v5585_v43, %v2447_v34  ;;  %v1902_v4 = vor.u32 %v1901_v63, %v7092_v52  ;;  %v1907_v5 = vrot.slane %v1905_v54, 5  ;;  %v1431_v15 = vld [vmem:[#allocation2 + $0x74] sm:$0x1]  ;;  %v1840_v20 = vld [vmem:[#allocation2 + $0x18] sm:$0xf] }
  0xb5   : > { %v1214_v56 = vrot.slane %v1212_v44, 5  ;;  %v1218_v57 = vrot.slane %v1216_v47, 4  ;;  %v2454_v7 = vrot.slane %v2353_v2, 5  ;;  %v2451_v12 = vsel %vm6888_vm13, %v2449_v58, %v2450_v59  ;;  %v1841_v24 = vld [vmem:[#allocation2 + $0x1c] sm:$0xf] }
  0xb6   : > { %v1210_v60 = vrot.slane %v1209_v50, 4  ;;  %v5586_v13 = vrot.slane %v2352_v1, 9  ;;  %v1903_v16 = vrot.slane %v1902_v4, 4  ;;  %v2457_v18 = vrot.slane %v2354_v6, 5  ;;  %v2355_v35 = vld [vmem:[#allocation2 + $0x24] sm:$0xe] }
  0xb7   : > { %v1219_v0 = vor.u32 %v1218_v57, %v1214_v56  ;;  %4560 = vmatmul.mubr.bf16.gmra.mrb[48].mxu1 %v5545_v48  ;;  %v2456_v17 = vrot.slane %v2454_v7, 4  ;;  %v5530_v19 = vrot.slane %v1429_v8, 9  ;;  %v1566_v22 = vrot.slane %v1430_v14, 5  ;;  %v2356_v36 = vld [vmem:[#allocation2 + $0x28] sm:$0xf] }
  0xb8   : > { %v1215_v9 = vsel %vm6684_vm6, %v1210_v60, %v1214_v56  ;;  %4567 = vmatprep.mubr.bf16.mxu1 %v6545_v55  ;;  %v1569_v23 = vrot.slane %v1431_v15, 5  ;;  %v5601_v27 = vcombine.low %v2448_v3, %v2451_v12  ;;  %v1898_v28 = vsel %vm6684_vm6, %v1893_v62, %v7092_v52  ;;  %v2357_v42 = vld [vmem:[#allocation2 + $0x2c] sm:$0x1]  ;;  %v6546_v48 = vld [vmem:[#allocation2 + $0x84] sm:$0xff]   ;;  %v1432_v50 = vld [vmem:[#allocation2 + $0x78] sm:$0xe] }
  0xb9   : > { %v1220_v10 = vrot.slane %v1219_v0, 4  ;;  %v1910_v29 = vshrl.u32 %v1840_v20, 16  ;;  %v1908_v30 = vsel %vm6684_vm6, %v1903_v16, %v1907_v5  ;;  %v7110_v31 = vsel %vm6888_vm13, %v5586_v13, %v2454_v7  ;;  %v1433_v56 = vld [vmem:[#allocation2 + $0x7c] sm:$0xf]  ;;  %v1843_v2 = vld [vmem:[#allocation2 + $0x24] sm:$0xf] }
  0xba   : > { %v1567_v32 = vsel %vm6888_vm13, %v5530_v19, %v1566_v22  ;;  %v1568_v34 = vrot.slane %v1566_v22, 4  ;;  %v1913_v38 = vshll.u32 %v1840_v20, 16  ;;  %v1919_v39 = vshll.u32 %v1841_v24, 16  ;;  %v1844_v3 = vld [vmem:[#allocation2 + $0x28] sm:$0xf] }
  0xbb   : > { %v1225_v21 = vsel %vm6684_vm6, %v1220_v10, %v1224_v61  ;;  %v1912_v37 = vrot.slane %v1910_v29, 4  ;;  %v1923_v41 = vshrl.u32 %v1841_v24, 16  ;;  %v2458_v43 = vsel %vm6888_vm13, %v2456_v17, %v2457_v18  ;;  %v1434_v61 = vld [vmem:[#allocation2 + $0x80] sm:$0x1]  ;;  %v1845_v6 = vld [vmem:[#allocation2 + $0x2c] sm:$0x1] }
  0xbc   : > { %v5516_v26 = vcombine.low %v1215_v9, %v1225_v21  ;;  %v1570_v44 = vsel %vm6888_vm13, %v1568_v34, %v1569_v23  ;;  %v1929_v47 = vshll.u32 %v1842_v25, 16  ;;  %v2461_v49 = vrot.slane %v2356_v36, 5  ;;  %v6548_v9 = vld [vmem:[%s8084_s1 + $0x208] sm:$0xff]   ;;  %v6550_v18 = vld [vmem:[#allocation2 + $0x90] sm:$0xff]  }
  0xbd   : > { %v5546_v52 = vcombine.low %v1567_v32, %v1570_v44  ;;  %v1915_v53 = vrot.slane %v1913_v38, 5  ;;  %v1921_v54 = vrot.slane %v1919_v39, 5  ;;  %v1925_v55 = vrot.slane %v1923_v41, 4  ;;  %v2358_v34 = vld [vmem:[#allocation2 + $0x30] sm:$0xe] }
  0xbe   : > { %4422 = vmatprep.mubr.bf16.mxu0 %v5516_v26  ;;  %v5569_v57 = vcombine.low %v1898_v28, %v1908_v30  ;;  %v5587_v58 = vrot.slane %v2355_v35, 9  ;;  %v2463_v59 = vrot.slane %v2461_v49, 4  ;;  %v2464_v60 = vrot.slane %v2357_v42, 5  ;;  %v6581_v28 = vld [vmem:[%s8084_s1 + $0x200] sm:$0xff]   ;;  %v2359_v36 = vld [vmem:[#allocation2 + $0x34] sm:$0xf] }
  0xbf   : > { %4423 = vmatmul.mubr.bf16.gmra.mrb[44].mxu0 %v6540_v11  ;;  %4568 = vmatmul.mubr.bf16.gmra.mrb[52].mxu1 %v5546_v52  ;;  %v1916_v62 = vor.u32 %v1915_v53, %v1912_v37  ;;  %v1926_v63 = vor.u32 %v1925_v55, %v1921_v54  ;;  %v5531_v0 = vrot.slane %v1432_v50, 9  ;;  %v1573_v1 = vrot.slane %v1433_v56, 5  ;;  %v2360_v37 = vld [vmem:[#allocation2 + $0x38] sm:$0x1]  ;;  %v1435_v44 = vld [vmem:[#allocation2 + $0x84] sm:$0xe] }
  0xc0   : > { %4656 = vmatprep.mubr.bf16.mxu0 %v5601_v27  ;;  %v1931_v4 = vrot.slane %v1929_v47, 5  ;;  %4575 = vmatprep.mubr.bf16.mxu1 %v6546_v48  ;;  %v1576_v5 = vrot.slane %v1434_v61, 5  ;;  %v1934_v7 = vshrl.u32 %v1843_v2, 16  ;;  %v1937_v8 = vshll.u32 %v1843_v2, 16  ;;  %v6553_v27 = vld [vmem:[%s8084_s1 + $0x210] sm:$0xff]  }
  0xc1   : > { %v5602_v10 = vcombine.low %v7110_v31, %v2458_v43  ;;  %v1917_v11 = vrot.slane %v1916_v62, 4  ;;  %v1927_v12 = vrot.slane %v1926_v63, 4  ;;  %v1574_v13 = vsel %vm6888_vm13, %v5531_v0, %v1573_v1  ;;  %v1436_v47 = vld [vmem:[#allocation2 + $0x88] sm:$0xf]  ;;  %v1437_v50 = vld [vmem:[#allocation2 + $0x8c] sm:$0x1] }
  0xc2   : > { %v1575_v14 = vrot.slane %v1573_v1, 4  ;;  %v1936_v15 = vrot.slane %v1934_v7, 4  ;;  %v1939_v16 = vrot.slane %v1937_v8, 5  ;;  %v1943_v17 = vshll.u32 %v1844_v3, 16  ;;  %v1848_v62 = vld [vmem:[#allocation2 + $0x38] sm:$0x1] }
  0xc3   : > { %v2462_v19 = vsel %vm6888_vm13, %v5587_v58, %v2461_v49  ;;  %v2465_v20 = vsel %vm6888_vm13, %v2463_v59, %v2464_v60  ;;  %v1947_v21 = vshrl.u32 %v1844_v3, 16  ;;  %v1953_v22 = vshll.u32 %v1845_v6, 16  ;;  %v1847_v59 = vld [vmem:[#allocation2 + $0x34] sm:$0xf]  ;;  %v6558_v1 = vld [vmem:[%s8084_s1 + $0x218] sm:$0xff]  }
  0xc4   : > { %v1922_v23 = vsel %vm6684_vm6, %v1917_v11, %v1921_v54  ;;  %v1577_v24 = vsel %vm6888_vm13, %v1575_v14, %v1576_v5  ;;  %v1940_v25 = vor.u32 %v1939_v16, %v1936_v15  ;;  %v1945_v26 = vrot.slane %v1943_v17, 5  ;;  %v1846_v54 = vld [vmem:[#allocation2 + $0x30] sm:$0xf]  ;;  %v6551_v8 = vld [vmem:[#allocation2 + $0x9c] sm:$0xff]   ;;  %v2363_v15 = vld [vmem:[#allocation2 + $0x44] sm:$0x1] }
  0xc5   : > { %v1932_v29 = vsel %vm6684_vm6, %v1927_v12, %v1931_v4  ;;  %v5547_v30 = vcombine.low %v1574_v13, %v1577_v24  ;;  %v1949_v31 = vrot.slane %v1947_v21, 4  ;;  %v1955_v32 = vrot.slane %v1953_v22, 5  ;;  %v6562_v21 = vld [vmem:[%s8084_s1 + $0x220] sm:$0xff]  }
  0xc6   : > { %v1941_v35 = vrot.slane %v1940_v25, 4  ;;  %v5588_v38 = vrot.slane %v2358_v34, 9  ;;  %v5603_v39 = vcombine.low %v2462_v19, %v2465_v20  ;;  %v2468_v42 = vrot.slane %v2359_v36, 5  ;;  %v1438_v20 = vld [vmem:[#allocation2 + $0x90] sm:$0xe]  ;;  %v6565_v34 = vld [vmem:[%s8084_s1 + $0x228] sm:$0xff]  }
  0xc7   : > { %4657 = vmatmul.mubr.bf16.vlgmr.msra.gmra.mrb[48].mxu0 %v5569_v57  ;;  %4576 = vmatmul.mubr.bf16.gmra.mrb[56].mxu1 %v5547_v30  ;;  %v1950_v41 = vor.u32 %v1949_v31, %v1945_v26  ;;  %v2471_v43 = vrot.slane %v2360_v37, 5  ;;  %v5570_v48 = vcombine.low %v1922_v23, %v1932_v29  ;;  %v5532_v52 = vrot.slane %v1435_v44, 9  ;;  %v1439_v25 = vld [vmem:[#allocation2 + $0x94] sm:$0xf] }
  0xc8   : > { %6389 = vmatpush3.bf16.msra.mxu0 %v6581_v28  ;;  %4664 = vmatprep.mubr.bf16.mxu0 %v5602_v10  ;;  %v1946_v49 = vsel %vm6684_vm6, %v1941_v35, %v1945_v26  ;;  %v1580_v53 = vrot.slane %v1436_v47, 5  ;;  %v7144_v56 = vsel %vm6888_vm13, %v5588_v38, %v2468_v42  ;;  %v2470_v57 = vrot.slane %v2468_v42, 4  ;;  %v2362_v10 = vld [vmem:[#allocation2 + $0x40] sm:$0xf]  ;;  %v1440_v26 = vld [vmem:[#allocation2 + $0x98] sm:$0x1] }
  0xc9   : > { %6390 = vmatprep.subr.bf16.mxu0 %v6548_v9  ;;  %4583 = vmatprep.mubr.bf16.mxu1 %v6550_v18  ;;  %v1951_v55 = vrot.slane %v1950_v41, 4  ;;  %v1583_v58 = vrot.slane %v1437_v50, 5  ;;  %v1958_v63 = vshrl.u32 %v1846_v54, 16  ;;  %v1961_v0 = vshll.u32 %v1846_v54, 16  ;;  %v1850_v38 = vld [vmem:[#allocation2 + $0x40] sm:$0xf] }
  0xca   : > { %v1581_v60 = vsel %vm6888_vm13, %v5532_v52, %v1580_v53  ;;  %v1582_v61 = vrot.slane %v1580_v53, 4  ;;  %v2472_v3 = vsel %vm6888_vm13, %v2470_v57, %v2471_v43  ;;  %v1967_v4 = vshll.u32 %v1847_v59, 16  ;;  %v1851_v43 = vld [vmem:[#allocation2 + $0x44] sm:$0x1] }
  0xcb   : > { %v1956_v2 = vsel %vm6684_vm6, %v1951_v55, %v1955_v32  ;;  %v1971_v5 = vshrl.u32 %v1847_v59, 16  ;;  %v1960_v7 = vrot.slane %v1958_v63, 4  ;;  %v1963_v12 = vrot.slane %v1961_v0, 5  ;;  %v1849_v32 = vld [vmem:[#allocation2 + $0x3c] sm:$0xf]  ;;  %v6568_v63 = vld [vmem:[%s8084_s1 + $0x230] sm:$0xff]  }
  0xcc   : > { %6391 = vmatpush3.bf16.msra.mxu0 %v6548_v9  ;;  %v1584_v6 = vsel %vm6888_vm13, %v1582_v61, %v1583_v58  ;;  %v2361_v9 = vld [vmem:[#allocation2 + $0x3c] sm:$0xe]  ;;  %v1969_v13 = vrot.slane %v1967_v4, 5  ;;  %v5571_v16 = vcombine.low %v1946_v49, %v1956_v2  ;;  %v5604_v17 = vcombine.low %v7144_v56, %v2472_v3  ;;  %v6555_v49 = vld [vmem:[#allocation2 + $0xa8] sm:$0xff]   ;;  %v2366_v3 = vld [vmem:[#allocation2 + $0x50] sm:$0x1] }
  0xcd   : > { %6392 = vmatprep.subr.bf16.mxu0 %v6553_v27  ;;  %v5548_v11 = vcombine.low %v1581_v60, %v1584_v6  ;;  %v1973_v14 = vrot.slane %v1971_v5, 4  ;;  %v1977_v18 = vshll.u32 %v1848_v62, 16  ;;  %v2475_v19 = vrot.slane %v2362_v10, 5  ;;  %v2364_v62 = vld [vmem:[#allocation2 + $0x48] sm:$0xe] }
  0xce   : > { %v1964_v22 = vor.u32 %v1963_v12, %v1960_v7  ;;  %v5589_v24 = vrot.slane %v2361_v9, 9  ;;  %v5533_v28 = vrot.slane %v1438_v20, 9  ;;  %v2478_v30 = vrot.slane %v2363_v15, 5  ;;  %v2365_v2 = vld [vmem:[#allocation2 + $0x4c] sm:$0xf]  ;;  %v6571_v9 = vld [vmem:[%s8084_s1 + $0x238] sm:$0xff]  }
  0xcf   : > { %4665 = vmatmul.mubr.bf16.gmra.mrb[52].mxu0 %v5570_v48  ;;  %4584 = vmatmul.mubr.bf16.gmra.mrb[60].mxu1 %v5548_v11  ;;  %v1974_v23 = vor.u32 %v1973_v14, %v1969_v13  ;;  %v1979_v29 = vrot.slane %v1977_v18, 5  ;;  %v1587_v31 = vrot.slane %v1439_v25, 5  ;;  %v1590_v37 = vrot.slane %v1440_v26, 5  ;;  %v1443_v14 = vld [vmem:[#allocation2 + $0xa4] sm:$0x1] }
  0xd0   : > { %4672 = vmatprep.mubr.bf16.mxu0 %v5603_v39  ;;  %6393 = vmatpush3.bf16.msra.mxu0 %v6553_v27  ;;  %v2477_v27 = vrot.slane %v2475_v19, 4  ;;  %v1965_v35 = vrot.slane %v1964_v22, 4  ;;  %v1982_v39 = vshrl.u32 %v1849_v32, 16  ;;  %v1985_v44 = vshll.u32 %v1849_v32, 16  ;;  %v1852_v20 = vld [vmem:[#allocation2 + $0x48] sm:$0xf] }
  0xd1   : > { %6394 = vmatprep.subr.bf16.mxu0 %v6558_v1  ;;  %4591 = vmatprep.mubr.bf16.mxu1 %v6551_v8  ;;  %v1975_v36 = vrot.slane %v1974_v23, 4  ;;  %v1588_v41 = vsel %vm6888_vm13, %v5533_v28, %v1587_v31  ;;  %v1589_v42 = vrot.slane %v1587_v31, 4  ;;  %v1991_v54 = vshll.u32 %v1850_v38, 16  ;;  %v1441_v8 = vld [vmem:[#allocation2 + $0x9c] sm:$0xe]  ;;  %v6556_v31 = vld [vmem:[#allocation2 + $0xb4] sm:$0xff]  }
  0xd2   : > { %v1970_v47 = vsel %vm6684_vm6, %v1965_v35, %v1969_v13  ;;  %v1984_v48 = vrot.slane %v1982_v39, 4  ;;  %v1987_v53 = vrot.slane %v1985_v44, 5  ;;  %v1995_v56 = vshrl.u32 %v1850_v38, 16  ;;  %v1442_v13 = vld [vmem:[#allocation2 + $0xa0] sm:$0xf] }
  0xd3   : > { %v1980_v50 = vsel %vm6684_vm6, %v1975_v36, %v1979_v29  ;;  %v1591_v52 = vsel %vm6888_vm13, %v1589_v42, %v1590_v37  ;;  %v2001_v57 = vshll.u32 %v1851_v43, 16  ;;  %v2476_v58 = vsel %vm6888_vm13, %v5589_v24, %v2475_v19  ;;  %v1854_v24 = vld [vmem:[#allocation2 + $0x50] sm:$0x1]  ;;  %v2367_v37 = vld [vmem:[#allocation2 + $0x54] sm:$0xe] }
  0xd4   : > { %6395 = vmatpush3.bf16.msra.mxu0 %v6558_v1  ;;  %v5549_v55 = vcombine.low %v1588_v41, %v1591_v52  ;;  %v2479_v59 = vsel %vm6888_vm13, %v2477_v27, %v2478_v30  ;;  %v1988_v60 = vor.u32 %v1987_v53, %v1984_v48  ;;  %v1993_v61 = vrot.slane %v1991_v54, 5  ;;  %v2368_v38 = vld [vmem:[#allocation2 + $0x58] sm:$0xf]  ;;  %v2369_v44 = vld [vmem:[#allocation2 + $0x5c] sm:$0x1] }
  0xd5   : > { %6396 = vmatprep.subr.bf16.mxu0 %v6562_v21  ;;  %v5572_v0 = vcombine.low %v1970_v47, %v1980_v50  ;;  %v1997_v1 = vrot.slane %v1995_v56, 4  ;;  %v5590_v5 = vrot.slane %v2364_v62, 9  ;;  %v2482_v6 = vrot.slane %v2365_v2, 5  ;;  %v1444_v47 = vld [vmem:[#allocation2 + $0xa8] sm:$0xe] }
  0xd6   : > { %v1989_v4 = vrot.slane %v1988_v60, 4  ;;  %v2485_v7 = vrot.slane %v2366_v3, 5  ;;  %v5605_v10 = vcombine.low %v2476_v58, %v2479_v59  ;;  %v2003_v12 = vrot.slane %v2001_v57, 5  ;;  %v1445_v53 = vld [vmem:[#allocation2 + $0xac] sm:$0xf] }
  0xd7   : > { %4673 = vmatmul.mubr.bf16.gmra.mrb[56].mxu0 %v5571_v16  ;;  %4592 = vmatmul.mubr.bf16.gmra.mrb[64].mxu1 %v5549_v55  ;;  %v1998_v11 = vor.u32 %v1997_v1, %v1993_v61  ;;  %v5534_v15 = vrot.slane %v1441_v8, 9  ;;  %v2484_v18 = vrot.slane %v2482_v6, 4  ;;  %v1594_v19 = vrot.slane %v1442_v13, 5  ;;  %v1446_v54 = vld [vmem:[#allocation2 + $0xb0] sm:$0x1] }
  0xd8   : > { %4680 = vmatprep.mubr.bf16.mxu0 %v5604_v17  ;;  %6397 = vmatpush3.bf16.msra.mxu0 %v6562_v21  ;;  %v1994_v16 = vsel %vm6684_vm6, %v1989_v4, %v1993_v61  ;;  %v7186_v17 = vsel %vm6888_vm13, %v5590_v5, %v2482_v6  ;;  %v1853_v21 = vld [vmem:[#allocation2 + $0x4c] sm:$0xf]  ;;  %v1597_v23 = vrot.slane %v1443_v14, 5  ;;  %v2006_v25 = vshrl.u32 %v1852_v20, 16  ;;  %v1855_v59 = vld [vmem:[#allocation2 + $0x54] sm:$0xf] }
  0xd9   : > { %6398 = vmatprep.subr.bf16.mxu0 %v6565_v34  ;;  %4599 = vmatprep.mubr.bf16.mxu1 %v6555_v49  ;;  %v1999_v22 = vrot.slane %v1998_v11, 4  ;;  %v2009_v26 = vshll.u32 %v1852_v20, 16  ;;  %v2486_v28 = vsel %vm6888_vm13, %v2484_v18, %v2485_v7  ;;  %v1595_v29 = vsel %vm6888_vm13, %v5534_v15, %v1594_v19  ;;  %v1857_v4 = vld [vmem:[#allocation2 + $0x5c] sm:$0x1] }
  0xda   : > { %v1596_v27 = vrot.slane %v1594_v19, 4  ;;  %v2015_v30 = vshll.u32 %v1853_v21, 16  ;;  %v2008_v35 = vrot.slane %v2006_v25, 4  ;;  %v2019_v43 = vshrl.u32 %v1853_v21, 16 }
  0xdb   : > { %v2004_v32 = vsel %vm6684_vm6, %v1999_v22, %v2003_v12  ;;  %v2011_v36 = vrot.slane %v2009_v26, 5  ;;  %v2025_v50 = vshll.u32 %v1854_v24, 16  ;;  %v5591_v52 = vrot.slane %v2367_v37, 9  ;;  %v300_v22 = vld [vmem:[%s6669_s18 + $0x78] sm:$0xf] }
  0xdc   : > { %6399 = vmatpush3.bf16.msra.mxu0 %v6565_v34  ;;  %v5606_v34 = vcombine.low %v7186_v17, %v2486_v28  ;;  %v5573_v39 = vcombine.low %v1994_v16, %v2004_v32  ;;  %v1598_v41 = vsel %vm6888_vm13, %v1596_v27, %v1597_v23  ;;  %v2017_v42 = vrot.slane %v2015_v30, 5  ;;  %v301_v23 = vld [vmem:[%s6669_s18 + $0x7c] sm:$0xf] }
  0xdd   : > { %6400 = vmatprep.subr.bf16.mxu0 %v6568_v63  ;;  %v5550_v48 = vcombine.low %v1595_v29, %v1598_v41  ;;  %v2012_v49 = vor.u32 %v2011_v36, %v2008_v35  ;;  %v2021_v55 = vrot.slane %v2019_v43, 4  ;;  %v2489_v56 = vrot.slane %v2368_v38, 5  ;;  %v2370_v29 = vld [vmem:[#allocation2 + $0x60] sm:$0xe]  ;;  %v2371_v35 = vld [vmem:[#allocation2 + $0x64] sm:$0xf] }
  0xde   : > { %v2492_v57 = vrot.slane %v2369_v44, 5  ;;  %v5535_v58 = vrot.slane %v1444_v47, 9  ;;  %v2027_v61 = vrot.slane %v2025_v50, 5  ;;  %v1601_v62 = vrot.slane %v1445_v53, 5  ;;  %v1447_v47 = vld [vmem:[#allocation2 + $0xb4] sm:$0xe] }
  0xdf   : > { %4681 = vmatmul.mubr.bf16.gmra.mrb[60].mxu0 %v5572_v0  ;;  %4600 = vmatmul.mubr.bf16.gmra.mrb[68].mxu1 %v5550_v48  ;;  %v2013_v60 = vrot.slane %v2012_v49, 4  ;;  %v1856_v0 = vld [vmem:[#allocation2 + $0x58] sm:$0xf]  ;;  %v2022_v1 = vor.u32 %v2021_v55, %v2017_v42  ;;  %v2490_v2 = vsel %vm6888_vm13, %v5591_v52, %v2489_v56  ;;  %v2491_v3 = vrot.slane %v2489_v56, 4 }
  0xe0   : > { %4688 = vmatprep.mubr.bf16.mxu0 %v5605_v10  ;;  %6401 = vmatpush3.bf16.msra.mxu0 %v6568_v63  ;;  %v1604_v63 = vrot.slane %v1446_v54, 5  ;;  %v2030_v5 = vshrl.u32 %v1855_v59, 16  ;;  %v1602_v7 = vsel %vm6888_vm13, %v5535_v58, %v1601_v62  ;;  %v1603_v8 = vrot.slane %v1601_v62, 4  ;;  %v1448_v53 = vld [vmem:[#allocation2 + $0xb8] sm:$0xf] }
  0xe1   : > { %6402 = vmatprep.subr.bf16.mxu0 %v6571_v9  ;;  %4607 = vmatprep.mubr.bf16.mxu1 %v6556_v31  ;;  %v2018_v6 = vsel %vm6684_vm6, %v2013_v60, %v2017_v42  ;;  %v2033_v10 = vshll.u32 %v1855_v59, 16  ;;  %v2493_v11 = vsel %vm6888_vm13, %v2491_v3, %v2492_v57  ;;  %v2039_v13 = vshll.u32 %v1856_v0, 16  ;;  %v1449_v54 = vld [vmem:[#allocation2 + $0xbc] sm:$0x1]  ;;  %v1858_v59 = vld [vmem:[#allocation2 + $0x60] sm:$0xf] }
  0xe2   : > { %v2032_v12 = vrot.slane %v2030_v5, 4  ;;  %v5607_v14 = vcombine.low %v2490_v2, %v2493_v11  ;;  %v1605_v15 = vsel %vm6888_vm13, %v1603_v8, %v1604_v63  ;;  %v2043_v17 = vshrl.u32 %v1856_v0, 16  ;;  %v1859_v0 = vld [vmem:[#allocation2 + $0x64] sm:$0xf]  ;;  %v2375_v11 = vld [vmem:[#allocation2 + $0x74] sm:$0x1] }
  0xe3   : > { %v2035_v16 = vrot.slane %v2033_v10, 5  ;;  %v5551_v19 = vcombine.low %v1602_v7, %v1605_v15  ;;  %v2041_v20 = vrot.slane %v2039_v13, 5  ;;  %v2049_v21 = vshll.u32 %v1857_v4, 16  ;;  %v2374_v7 = vld [vmem:[#allocation2 + $0x70] sm:$0xf] }
  0xe4   : > { %6403 = vmatpush3.bf16.msra.mxu0 %v6571_v9  ;;  %v2023_v9 = vrot.slane %v2022_v1, 4  ;;  %v2045_v26 = vrot.slane %v2043_v17, 4  ;;  %v561_v28 = vshrl.u32 %v300_v22, 16  ;;  %v564_v30 = vshll.u32 %v300_v22, 16  ;;  %v1860_v1 = vld [vmem:[#allocation2 + $0x68] sm:$0x1] }
  0xe5   : > { %v2036_v25 = vor.u32 %v2035_v16, %v2032_v12  ;;  %v2051_v27 = vrot.slane %v2049_v21, 5  ;;  %v569_v31 = vshrl.u32 %v301_v23, 16  ;;  %v572_v32 = vshll.u32 %v301_v23, 16  ;;  %v2782_v15 = vld [vmem:[#allocation2 + $0x18] sm:$0xf] }
  0xe6   : > { %v2028_v18 = vsel %vm6684_vm6, %v2023_v9, %v2027_v61  ;;  %v2046_v37 = vor.u32 %v2045_v26, %v2041_v20  ;;  %v563_v38 = vrot.slane %v561_v28, 7  ;;  %v5592_v41 = vrot.slane %v2370_v29, 9  ;;  %v2784_v26 = vld [vmem:[#allocation2 + $0x20] sm:$0x1] }
  0xe7   : > { %4689 = vmatmul.mubr.bf16.gmra.mrb[64].mxu0 %v5573_v39  ;;  %v5574_v24 = vcombine.low %v2018_v6, %v2028_v18  ;;  %4608 = vmatmul.mubr.bf16.gmra.mrb[72].mxu1 %v5551_v19  ;;  %v2037_v36 = vrot.slane %v2036_v25, 4  ;;  %v2372_v39 = vld [vmem:[#allocation2 + $0x68] sm:$0x1]  ;;  %v7211_v42 = vrot.slane %v569_v31, 7  ;;  %v2496_v43 = vrot.slane %v2371_v35, 5 }
  0xe8   : > { %4696 = vmatprep.mubr.bf16.mxu0 %v5606_v34  ;;  %v736_v34 = vld [vmem:[#allocation2 + $0xc0] sm:$0xf]  ;;  %v2499_v44 = vrot.slane %v2372_v39, 5  ;;  %v2047_v49 = vrot.slane %v2046_v37, 4  ;;  %v566_v50 = vor.u32 %v564_v30, %v563_v38  ;;  %v567_v52 = vrot.slane %v563_v38, 4 }
  0xe9   : > { %v2042_v48 = vsel %vm6684_vm6, %v2037_v36, %v2041_v20  ;;  %v574_v55 = vor.u32 %v572_v32, %v7211_v42  ;;  %v576_v56 = vrot.slane %v7211_v42, 4  ;;  %v2497_v57 = vsel %vm6888_vm13, %v5592_v41, %v2496_v43  ;;  %v2373_v6 = vld [vmem:[#allocation2 + $0x6c] sm:$0xe]  ;;  %v2783_v20 = vld [vmem:[#allocation2 + $0x1c] sm:$0xf] }
  0xea   : > { %v2498_v58 = vrot.slane %v2496_v43, 4  ;;  %v2052_v60 = vsel %vm6684_vm6, %v2047_v49, %v2051_v27  ;;  %v737_v61 = vsel %vm6698_vm9, %v566_v50, %v736_v34  ;;  %v5536_v62 = vrot.slane %v1447_v47, 9  ;;  %v1861_v32 = vld [vmem:[#allocation2 + $0x6c] sm:$0xf]  ;;  %v1862_v39 = vld [vmem:[#allocation2 + $0x70] sm:$0xf] }
  0xeb   : > { %v1608_v63 = vrot.slane %v1448_v53, 5  ;;  %v5575_v2 = vcombine.low %v2042_v48, %v2052_v60  ;;  %v575_v3 = vsel %vm6693_vm8, %v567_v52, %v574_v55  ;;  %738 = vst [vmem:[#allocation2 + $0xc0] sm:$0xf] %v737_v61  ;;  %v1611_v5 = vrot.slane %v1449_v54, 5  ;;  %v1863_v48 = vld [vmem:[#allocation2 + $0x74] sm:$0x1] }
  0xec   : > { %v2500_v4 = vsel %vm6888_vm13, %v2498_v58, %v2499_v44  ;;  %739 = vst [vmem:[#allocation2 + $0xc4] sm:$0xf] %v575_v3  ;;  %v2054_v9 = vshrl.u32 %v1858_v59, 16  ;;  %v2057_v12 = vshll.u32 %v1858_v59, 16  ;;  %v2063_v13 = vshll.u32 %v1859_v0, 16 }
  0xed   : > { %v5608_v8 = vcombine.low %v2497_v57, %v2500_v4  ;;  %v1609_v45 = vsel %vm6888_vm13, %v5536_v62, %v1608_v63  ;;  %v1610_v10 = vrot.slane %v1608_v63, 4  ;;  %v2073_v40 = vshll.u32 %v1860_v1, 16  ;;  %v2376_v1 = vld [vmem:[#allocation2 + $0x78] sm:$0xe] }
  0xee   : > { %v2056_v17 = vrot.slane %v2054_v9, 4  ;;  %v5593_v18 = vrot.slane %v2373_v6, 9  ;;  %v2503_v19 = vrot.slane %v2374_v7, 5  ;;  %v2059_v23 = vrot.slane %v2057_v12, 5  ;;  %v2377_v6 = vld [vmem:[#allocation2 + $0x7c] sm:$0xf] }
  0xef   : > { %4697 = vmatmul.mubr.bf16.gmra.mrb[68].mxu0 %v5574_v24  ;;  %v1612_v16 = vsel %vm6888_vm13, %v1610_v10, %v1611_v5  ;;  %v2065_v24 = vrot.slane %v2063_v13, 5  ;;  %v2075_v29 = vrot.slane %v2073_v40, 5  ;;  %v2506_v31 = vrot.slane %v2375_v11, 5  ;;  %v2378_v7 = vld [vmem:[#allocation2 + $0x80] sm:$0x1] }
  0xf0   : > { %4704 = vmatprep.mubr.bf16.mxu0 %v5607_v14  ;;  %v2067_v14 = vshrl.u32 %v1859_v0, 16  ;;  %v5552_v22 = vcombine.low %v1609_v45, %v1612_v16  ;;  %v2504_v27 = vsel %vm6888_vm13, %v5593_v18, %v2503_v19  ;;  %v2505_v30 = vrot.slane %v2503_v19, 4  ;;  %v2785_v11 = vld [vmem:[#allocation2 + $0x24] sm:$0xf]  ;;  %v2786_v19 = vld [vmem:[#allocation2 + $0x28] sm:$0xf] }
  0xf1   : > { %v2060_v35 = vor.u32 %v2059_v23, %v2056_v17  ;;  %v2831_v37 = vshrl.u32 %v2782_v15, 16  ;;  %v2834_v38 = vshll.u32 %v2782_v15, 16  ;;  %v2840_v43 = vshll.u32 %v2783_v20, 16  ;;  %v6561_v23 = vld [vmem:[#allocation2 + $0x18] sm:$0xff]  }
  0xf2   : > { %v2069_v25 = vrot.slane %v2067_v14, 4  ;;  %v2507_v41 = vsel %vm6888_vm13, %v2505_v30, %v2506_v31  ;;  %v2844_v44 = vshrl.u32 %v2783_v20, 16  ;;  %v2850_v47 = vshll.u32 %v2784_v26, 16 }
  0xf3   : > { %v6560_v50 = vld [vmem:[#allocation2 + $0xc0] sm:$0xff]   ;;  %v2061_v52 = vrot.slane %v2060_v35, 4  ;;  %v5609_v54 = vcombine.low %v2504_v27, %v2507_v41  ;;  %v2833_v55 = vrot.slane %v2831_v37, 4  ;;  %v2836_v57 = vrot.slane %v2834_v38, 5 }
  0xf4   : > { %v2070_v36 = vor.u32 %v2069_v25, %v2065_v24  ;;  %v2842_v58 = vrot.slane %v2840_v43, 5  ;;  %v2846_v59 = vrot.slane %v2844_v44, 4  ;;  %v2852_v60 = vrot.slane %v2850_v47, 5  ;;  %4615 = vmatprep.mubr.bf16.mxu1 %v6560_v50  ;;  %v2787_v25 = vld [vmem:[#allocation2 + $0x2c] sm:$0x1] }
  0xf5   : > { %v2066_v61 = vsel %vm6684_vm6, %v2061_v52, %v2065_v24  ;;  %v2078_v63 = vshrl.u32 %v1861_v32, 16  ;;  %v2081_v0 = vshll.u32 %v1861_v32, 16  ;;  %4616 = vmatmul.mubr.bf16.gmra.mrb[76].mxu1 %v5552_v22  ;;  %v2837_v3 = vor.u32 %v2836_v57, %v2833_v55  ;;  %v1864_v32 = vld [vmem:[#allocation2 + $0x78] sm:$0xf]  ;;  %v1866_v55 = vld [vmem:[#allocation2 + $0x80] sm:$0x1] }
  0xf6   : > { %v2071_v53 = vrot.slane %v2070_v36, 4  ;;  %v2847_v4 = vor.u32 %v2846_v59, %v2842_v58  ;;  %v2087_v5 = vshll.u32 %v1862_v39, 16  ;;  %v2091_v10 = vshrl.u32 %v1862_v39, 16 }
  0xf7   : > { %4705 = vmatmul.mubr.bf16.gmra.mrb[72].mxu0 %v5575_v2  ;;  %v2083_v45 = vrot.slane %v2081_v0, 5  ;;  %v2097_v9 = vshll.u32 %v1863_v48, 16  ;;  %v2838_v12 = vrot.slane %v2837_v3, 4  ;;  %v5594_v40 = vrot.slane %v2376_v1, 9  ;;  %v1865_v48 = vld [vmem:[#allocation2 + $0x7c] sm:$0xf] }
  0xf8   : > { %4712 = vmatprep.mubr.bf16.mxu0 %v5608_v8  ;;  %v2076_v62 = vsel %vm6684_vm6, %v2071_v53, %v2075_v29  ;;  %v2080_v8 = vrot.slane %v2078_v63, 4  ;;  %v2848_v13 = vrot.slane %v2847_v4, 4  ;;  %v2089_v14 = vrot.slane %v2087_v5, 5  ;;  %v2379_v63 = vld [vmem:[#allocation2 + $0x84] sm:$0xe] }
  0xf9   : > { %v5576_v2 = vcombine.low %v2066_v61, %v2076_v62  ;;  %v2093_v16 = vrot.slane %v2091_v10, 4  ;;  %v2099_v17 = vrot.slane %v2097_v9, 5  ;;  %v2510_v18 = vrot.slane %v2377_v6, 5  ;;  %v2380_v0 = vld [vmem:[#allocation2 + $0x88] sm:$0xf] }
  0xfa   : > { %v2084_v15 = vor.u32 %v2083_v45, %v2080_v8  ;;  %v2843_v20 = vsel %vm6684_vm6, %v2838_v12, %v2842_v58  ;;  %v2853_v22 = vsel %vm6684_vm6, %v2848_v13, %v2852_v60  ;;  %v2513_v24 = vrot.slane %v2378_v7, 5  ;;  %v2381_v45 = vld [vmem:[#allocation2 + $0x8c] sm:$0x1] }
  0xfb   : > { %v2855_v26 = vshrl.u32 %v2785_v11, 16  ;;  %v5633_v29 = vcombine.low %v2843_v20, %v2853_v22  ;;  %v2094_v30 = vor.u32 %v2093_v16, %v2089_v14  ;;  %v2511_v31 = vsel %vm6888_vm13, %v5594_v40, %v2510_v18 }
  0xfc   : > { %v2085_v27 = vrot.slane %v2084_v15, 4  ;;  %v2512_v36 = vrot.slane %v2510_v18, 4  ;;  %v2858_v38 = vshll.u32 %v2785_v11, 16  ;;  %v2864_v39 = vshll.u32 %v2786_v19, 16  ;;  %v6563_v18 = vld [vmem:[#allocation2 + $0x24] sm:$0xff]  }
  0xfd   : > { %v2857_v37 = vrot.slane %v2855_v26, 4  ;;  %4817 = vmatprep.mubr.bf16.mxu1 %v5633_v29  ;;  %v2095_v43 = vrot.slane %v2094_v30, 4  ;;  %v2868_v44 = vshrl.u32 %v2786_v19, 16  ;;  %v2874_v47 = vshll.u32 %v2787_v25, 16  ;;  %v2789_v19 = vld [vmem:[#allocation2 + $0x34] sm:$0xf] }
  0xfe   : > { %v2090_v41 = vsel %vm6684_vm6, %v2085_v27, %v2089_v14  ;;  %4818 = vmatmul.mubr.bf16.vlgmr.msra.gmra.mrb[80].mxu1 %v6561_v23  ;;  %v2514_v52 = vsel %vm6888_vm13, %v2512_v36, %v2513_v24  ;;  %v2860_v53 = vrot.slane %v2858_v38, 5  ;;  %v2102_v57 = vshrl.u32 %v1864_v32, 16  ;;  %v2788_v14 = vld [vmem:[#allocation2 + $0x30] sm:$0xf]  ;;  %v2790_v25 = vld [vmem:[#allocation2 + $0x38] sm:$0x1] }
  0xff   : > { %4713 = vmatmul.mubr.bf16.gmra.mrb[76].mxu0 %v5576_v2  ;;  %v2100_v59 = vsel %vm6684_vm6, %v2095_v43, %v2099_v17  ;;  %v5610_v60 = vcombine.low %v2511_v31, %v2514_v52  ;;  %v2870_v61 = vrot.slane %v2868_v44, 4  ;;  %v2876_v62 = vrot.slane %v2874_v47, 5  ;;  %v1868_v52 = vld [vmem:[#allocation2 + $0x88] sm:$0xf] }
 0x100   : > { %4720 = vmatprep.mubr.bf16.mxu0 %v5609_v54  ;;  %v2866_v54 = vrot.slane %v2864_v39, 5  ;;  %v5577_v1 = vcombine.low %v2090_v41, %v2100_v59  ;;  %v2861_v2 = vor.u32 %v2860_v53, %v2857_v37  ;;  %v2104_v3 = vrot.slane %v2102_v57, 4  ;;  %v1867_v39 = vld [vmem:[#allocation2 + $0x84] sm:$0xf] }
 0x101   : > { %v2105_v4 = vshll.u32 %v1864_v32, 16  ;;  %v2111_v6 = vshll.u32 %v1865_v48, 16  ;;  %v2115_v7 = vshrl.u32 %v1865_v48, 16  ;;  %v2121_v8 = vshll.u32 %v1866_v55, 16 }
 0x102   : > { %v7231_v21 = vpop.f32.mrb[0].mxu0  ;;  %v2871_v5 = vor.u32 %v2870_v61, %v2866_v54  ;;  %v2862_v9 = vrot.slane %v2861_v2, 4  ;;  %v5595_v12 = vrot.slane %v2379_v63, 9  ;;  %v2517_v13 = vrot.slane %v2380_v0, 5  ;;  %v1869_v63 = vld [vmem:[#allocation2 + $0x8c] sm:$0x1] }
 0x103   : > { %v7233_v28 = vpop.f32.mrb[1].mxu0  ;;  %v2107_v11 = vrot.slane %v2105_v4, 5  ;;  %v2113_v15 = vrot.slane %v2111_v6, 5  ;;  %v2117_v16 = vrot.slane %v2115_v7, 4  ;;  %v2123_v17 = vrot.slane %v2121_v8, 5 }
 0x104   : > { %v7237_v34 = vpop.f32.mrb[2].mxu0  ;;  %v2872_v40 = vrot.slane %v2871_v5, 4  ;;  %v2867_v20 = vsel %vm6684_vm6, %v2862_v9, %v2866_v54  ;;  %v2518_v23 = vsel %vm6888_vm13, %v5595_v12, %v2517_v13  ;;  %v2519_v24 = vrot.slane %v2517_v13, 4  ;;  %v2382_v6 = vld [vmem:[#allocation2 + $0x90] sm:$0xe] }
 0x105   : > { %v7241_v49 = vpop.f32.mrb[3].mxu0  ;;  %v2108_v22 = vor.u32 %v2107_v11, %v2104_v3  ;;  %v2118_v27 = vor.u32 %v2117_v16, %v2113_v15  ;;  %v2520_v30 = vrot.slane %v2381_v45, 5  ;;  %v2879_v31 = vshrl.u32 %v2788_v14, 16  ;;  %v2383_v7 = vld [vmem:[#allocation2 + $0x94] sm:$0xf] }
 0x106   : > { %v2877_v29 = vsel %vm6684_vm6, %v2872_v40, %v2876_v62  ;;  %v2882_v37 = vshll.u32 %v2788_v14, 16  ;;  %v2888_v38 = vshll.u32 %v2789_v19, 16  ;;  %v2892_v48 = vshrl.u32 %v2789_v19, 16  ;;  %v2384_v12 = vld [vmem:[#allocation2 + $0x98] sm:$0x1] }
 0x107   : > { %4721 = vmatmul.mubr.bf16.gmra.mrb[80].mxu0 %v5577_v1  ;;  %v5634_v32 = vcombine.low %v2867_v20, %v2877_v29  ;;  %v2109_v36 = vrot.slane %v2108_v22, 4  ;;  %v2119_v43 = vrot.slane %v2118_v27, 4  ;;  %v2521_v44 = vsel %vm6888_vm13, %v2519_v24, %v2520_v30  ;;  %v2792_v27 = vld [vmem:[#allocation2 + $0x40] sm:$0xf] }
 0x108   : > { %4728 = vmatprep.mubr.bf16.mxu0 %v5610_v60  ;;  %v2881_v47 = vrot.slane %v2879_v31, 4  ;;  %v5611_v55 = vcombine.low %v2518_v23, %v2521_v44  ;;  %v2884_v57 = vrot.slane %v2882_v37, 5  ;;  %v2890_v59 = vrot.slane %v2888_v38, 5  ;;  %v2793_v38 = vld [vmem:[#allocation2 + $0x44] sm:$0x1] }
 0x109   : > { %4825 = vmatprep.mubr.bf16.mxu1 %v5634_v32  ;;  %v2114_v54 = vsel %vm6684_vm6, %v2109_v36, %v2113_v15  ;;  %v2124_v60 = vsel %vm6684_vm6, %v2119_v43, %v2123_v17  ;;  %v2894_v61 = vrot.slane %v2892_v48, 4  ;;  %v2898_v62 = vshll.u32 %v2790_v25, 16  ;;  %v2791_v17 = vld [vmem:[#allocation2 + $0x3c] sm:$0xf]  ;;  %v6564_v32 = vld [vmem:[#allocation2 + $0x30] sm:$0xff]  }
 0x10a   : > { %4826 = vmatmul.mubr.bf16.gmra.mrb[84].mxu1 %v6563_v18  ;;  %v2126_v0 = vshrl.u32 %v1867_v39, 16  ;;  %v5578_v2 = vcombine.low %v2114_v54, %v2124_v60  ;;  %v2885_v3 = vor.u32 %v2884_v57, %v2881_v47  ;;  %v2129_v4 = vshll.u32 %v1867_v39, 16 }
 0x10b   : > { %v2135_v5 = vshll.u32 %v1868_v52, 16  ;;  %v2895_v8 = vor.u32 %v2894_v61, %v2890_v59  ;;  %v2900_v45 = vrot.slane %v2898_v62, 5  ;;  %v2139_v11 = vshrl.u32 %v1868_v52, 16  ;;  %v1870_v52 = vld [vmem:[#allocation2 + $0x90] sm:$0xf] }
 0x10c   : > { %v2128_v9 = vrot.slane %v2126_v0, 4  ;;  %v2886_v14 = vrot.slane %v2885_v3, 4  ;;  %v2131_v40 = vrot.slane %v2129_v4, 5  ;;  %v2145_v16 = vshll.u32 %v1869_v63, 16  ;;  %v1871_v61 = vld [vmem:[#allocation2 + $0x94] sm:$0xf] }
 0x10d   : > { %v2137_v15 = vrot.slane %v2135_v5, 5  ;;  %v2896_v18 = vrot.slane %v2895_v8, 4  ;;  %v2141_v19 = vrot.slane %v2139_v11, 4  ;;  %v5596_v20 = vrot.slane %v2382_v6, 9  ;;  %v1872_v4 = vld [vmem:[#allocation2 + $0x98] sm:$0x1] }
 0x10e   : > { %v2524_v22 = vrot.slane %v2383_v7, 5  ;;  %v2891_v23 = vsel %vm6684_vm6, %v2886_v14, %v2890_v59  ;;  %v2132_v24 = vor.u32 %v2131_v40, %v2128_v9  ;;  %v2147_v25 = vrot.slane %v2145_v16, 5  ;;  %v2385_v5 = vld [vmem:[#allocation2 + $0x9c] sm:$0xe]  ;;  %v2386_v9 = vld [vmem:[#allocation2 + $0xa0] sm:$0xf] }
 0x10f   : > { %4729 = vmatmul.mubr.bf16.gmra.mrb[84].mxu0 %v5578_v2  ;;  %v2527_v29 = vrot.slane %v2384_v12, 5  ;;  %v2901_v30 = vsel %vm6684_vm6, %v2896_v18, %v2900_v45  ;;  %v2142_v31 = vor.u32 %v2141_v19, %v2137_v15  ;;  %v2903_v47 = vshrl.u32 %v2791_v17, 16  ;;  %v2387_v16 = vld [vmem:[#allocation2 + $0xa4] sm:$0x1] }
 0x110   : > { %4736 = vmatprep.mubr.bf16.mxu0 %v5611_v55  ;;  %v2525_v36 = vsel %vm6888_vm13, %v5596_v20, %v2524_v22  ;;  %v2526_v37 = vrot.slane %v2524_v22, 4  ;;  %v5635_v43 = vcombine.low %v2891_v23, %v2901_v30  ;;  %v2133_v44 = vrot.slane %v2132_v24, 4 }
 0x111   : > { %v2906_v48 = vshll.u32 %v2791_v17, 16  ;;  %v2143_v55 = vrot.slane %v2142_v31, 4  ;;  %v2912_v59 = vshll.u32 %v2792_v27, 16  ;;  %v2916_v60 = vshrl.u32 %v2792_v27, 16  ;;  %v2794_v17 = vld [vmem:[#allocation2 + $0x48] sm:$0xf] }
 0x112   : > { %v2528_v57 = vsel %vm6888_vm13, %v2526_v37, %v2527_v29  ;;  %4833 = vmatprep.mubr.bf16.mxu1 %v5635_v43  ;;  %v2138_v63 = vsel %vm6684_vm6, %v2133_v44, %v2137_v15  ;;  %v2905_v2 = vrot.slane %v2903_v47, 4  ;;  %v2922_v45 = vshll.u32 %v2793_v38, 16  ;;  %v2795_v43 = vld [vmem:[#allocation2 + $0x4c] sm:$0xf] }
 0x113   : > { %v5612_v0 = vcombine.low %v2525_v36, %v2528_v57  ;;  %v2908_v3 = vrot.slane %v2906_v48, 5  ;;  %v2148_v6 = vsel %vm6684_vm6, %v2143_v55, %v2147_v25  ;;  %4834 = vmatmul.mubr.bf16.gmra.mrb[88].mxu1 %v6564_v32  ;;  %v2914_v7 = vrot.slane %v2912_v59, 5  ;;  %v6566_v48 = vld [vmem:[#allocation2 + $0x3c] sm:$0xff]   ;;  %v2796_v55 = vld [vmem:[#allocation2 + $0x50] sm:$0x1] }
 0x114   : > { %v7253_v35 = vpop.f32.mrb[0].mxu1  ;;  %v2918_v8 = vrot.slane %v2916_v60, 4  ;;  %v5579_v11 = vcombine.low %v2138_v63, %v2148_v6  ;;  %v2150_v14 = vshrl.u32 %v1870_v52, 16  ;;  %v2153_v40 = vshll.u32 %v1870_v52, 16  ;;  %v1874_v6 = vld [vmem:[#allocation2 + $0xa0] sm:$0xf] }
 0x115   : > { %v7257_v50 = vpop.f32.mrb[1].mxu1  ;;  %v2909_v12 = vor.u32 %v2908_v3, %v2905_v2  ;;  %v2924_v18 = vrot.slane %v2922_v45, 5  ;;  %v2159_v19 = vshll.u32 %v1871_v61, 16  ;;  %v2163_v20 = vshrl.u32 %v1871_v61, 16 }
 0x116   : > { %v7261_v58 = vpop.f32.mrb[2].mxu1  ;;  %v2919_v15 = vor.u32 %v2918_v8, %v2914_v7  ;;  %v2152_v23 = vrot.slane %v2150_v14, 4  ;;  %v2155_v24 = vrot.slane %v2153_v40, 5  ;;  %v2169_v25 = vshll.u32 %v1872_v4, 16 }
 0x117   : > { %v7265_v10 = vpop.f32.mrb[3].mxu1  ;;  %4737 = vmatmul.mubr.bf16.gmra.mrb[88].mxu0 %v5579_v11  ;;  %v2910_v22 = vrot.slane %v2909_v12, 4  ;;  %v2161_v27 = vrot.slane %v2159_v19, 5  ;;  %v2165_v30 = vrot.slane %v2163_v20, 4  ;;  %v5597_v31 = vrot.slane %v2385_v5, 9 }
 0x118   : > { %4744 = vmatprep.mubr.bf16.mxu0 %v5612_v0  ;;  %v2920_v29 = vrot.slane %v2919_v15, 4  ;;  %v2156_v36 = vor.u32 %v2155_v24, %v2152_v23  ;;  %v2171_v37 = vrot.slane %v2169_v25, 5  ;;  %v2531_v38 = vrot.slane %v2386_v9, 5  ;;  %v1873_v0 = vld [vmem:[#allocation2 + $0x9c] sm:$0xf] }
 0x119   : > { %v2915_v32 = vsel %vm6684_vm6, %v2910_v22, %v2914_v7  ;;  %v2166_v47 = vor.u32 %v2165_v30, %v2161_v27  ;;  %v2534_v52 = vrot.slane %v2387_v16, 5  ;;  %v2927_v57 = vshrl.u32 %v2794_v17, 16  ;;  %v1875_v11 = vld [vmem:[#allocation2 + $0xa4] sm:$0x1]  ;;  %v2388_v12 = vld [vmem:[#allocation2 + $0xa8] sm:$0xe] }
 0x11a   : > { %v2925_v44 = vsel %vm6684_vm6, %v2920_v29, %v2924_v18  ;;  %v2157_v60 = vrot.slane %v2156_v36, 4  ;;  %v2532_v61 = vsel %vm6888_vm13, %v5597_v31, %v2531_v38  ;;  %v2533_v63 = vrot.slane %v2531_v38, 4  ;;  %v2389_v22 = vld [vmem:[#allocation2 + $0xac] sm:$0xf]  ;;  %v2390_v30 = vld [vmem:[#allocation2 + $0xb0] sm:$0x1] }
 0x11b   : > { %v5636_v59 = vcombine.low %v2915_v32, %v2925_v44  ;;  %v2167_v2 = vrot.slane %v2166_v47, 4  ;;  %v2929_v3 = vrot.slane %v2927_v57, 4  ;;  %v2930_v4 = vshll.u32 %v2794_v17, 16 }
 0x11c   : > { %v2936_v5 = vshll.u32 %v2795_v43, 16  ;;  %v2162_v7 = vsel %vm6684_vm6, %v2157_v60, %v2161_v27  ;;  %v2535_v8 = vsel %vm6888_vm13, %v2533_v63, %v2534_v52  ;;  %v2940_v45 = vshrl.u32 %v2795_v43, 16  ;;  %v2797_v43 = vld [vmem:[#allocation2 + $0x54] sm:$0xf]  ;;  %v6567_v60 = vld [vmem:[#allocation2 + $0x48] sm:$0xff]  }
 0x11d   : > { %v7271_v26 = vpop.f32.mrb[4].mxu0  ;;  %4841 = vmatprep.mubr.bf16.mxu1 %v5636_v59  ;;  %v2946_v9 = vshll.u32 %v2796_v55, 16  ;;  %v2172_v14 = vsel %vm6684_vm6, %v2167_v2, %v2171_v37  ;;  %v5613_v40 = vcombine.low %v2532_v61, %v2535_v8  ;;  %v2932_v16 = vrot.slane %v2930_v4, 5  ;;  %v2798_v4 = vld [vmem:[#allocation2 + $0x58] sm:$0xf] }
 0x11e   : > { %v7275_v41 = vpop.f32.mrb[5].mxu0  ;;  %4842 = vmatmul.mubr.bf16.gmra.mrb[92].mxu1 %v6566_v48  ;;  %v2938_v17 = vrot.slane %v2936_v5, 5  ;;  %v5580_v15 = vcombine.low %v2162_v7, %v2172_v14  ;;  %v2942_v18 = vrot.slane %v2940_v45, 4  ;;  %v2174_v20 = vshrl.u32 %v1873_v0, 16  ;;  %v2799_v5 = vld [vmem:[#allocation2 + $0x5c] sm:$0x1] }
 0x11f   : > { %v7279_v53 = vpop.f32.mrb[6].mxu0  ;;  %v2948_v19 = vrot.slane %v2946_v9, 5  ;;  %v2933_v24 = vor.u32 %v2932_v16, %v2929_v3  ;;  %v2177_v25 = vshll.u32 %v1873_v0, 16  ;;  %v2183_v29 = vshll.u32 %v1874_v6, 16  ;;  %v1877_v14 = vld [vmem:[#allocation2 + $0xac] sm:$0xf] }
 0x120   : > { %v7285_v1 = vpop.f32.mrb[7].mxu0  ;;  %v2187_v27 = vshrl.u32 %v1874_v6, 16  ;;  %4745 = vmatmul.mubr.bf16.gmra.mrb[92].mxu0 %v5580_v15  ;;  %v2943_v32 = vor.u32 %v2942_v18, %v2938_v17  ;;  %v2176_v36 = vrot.slane %v2174_v20, 4  ;;  %v2193_v37 = vshll.u32 %v1875_v11, 16  ;;  %v1878_v18 = vld [vmem:[#allocation2 + $0xb0] sm:$0x1] }
 0x121   : > { %v5598_v38 = vrot.slane %v2388_v12, 9  ;;  %4752 = vmatprep.mubr.bf16.mxu0 %v5613_v40  ;;  %v2934_v47 = vrot.slane %v2933_v24, 4  ;;  %v2179_v48 = vrot.slane %v2177_v25, 5  ;;  %v2185_v52 = vrot.slane %v2183_v29, 5  ;;  %v1876_v12 = vld [vmem:[#allocation2 + $0xa8] sm:$0xf] }
 0x122   : > { %v7287_v13 = vpop.f32.mrb[4].mxu1  ;;  %v2189_v55 = vrot.slane %v2187_v27, 4  ;;  %v2944_v57 = vrot.slane %v2943_v32, 4  ;;  %v2195_v59 = vrot.slane %v2193_v37, 5  ;;  %v2538_v61 = vrot.slane %v2389_v22, 5 }
 0x123   : > { %v7295_v39 = vpop.f32.mrb[5].mxu1  ;;  %v2541_v63 = vrot.slane %v2390_v30, 5  ;;  %v2939_v0 = vsel %vm6684_vm6, %v2934_v47, %v2938_v17  ;;  %v2180_v2 = vor.u32 %v2179_v48, %v2176_v36  ;;  %v2951_v6 = vshrl.u32 %v2797_v43, 16 }
 0x124   : > { %v7297_v54 = vpop.f32.mrb[6].mxu1  ;;  %v2190_v3 = vor.u32 %v2189_v55, %v2185_v52  ;;  %v2949_v8 = vsel %vm6684_vm6, %v2944_v57, %v2948_v19  ;;  %v2539_v45 = vsel %vm6888_vm13, %v5598_v38, %v2538_v61  ;;  %v2540_v9 = vrot.slane %v2538_v61, 4  ;;  %v2391_v55 = vld [vmem:[#allocation2 + $0xb4] sm:$0xe]  ;;  %v2392_v57 = vld [vmem:[#allocation2 + $0xb8] sm:$0xf] }
 0x125   : > { %v7301_v62 = vpop.f32.mrb[7].mxu1  ;;  %v2954_v11 = vshll.u32 %v2797_v43, 16  ;;  %v5637_v40 = vcombine.low %v2939_v0, %v2949_v8  ;;  %v2181_v16 = vrot.slane %v2180_v2, 4  ;;  %v2953_v15 = vrot.slane %v2951_v6, 4 }
 0x126   : > { %v2191_v17 = vrot.slane %v2190_v3, 4  ;;  %v2542_v22 = vsel %vm6888_vm13, %v2540_v9, %v2541_v63  ;;  %v2960_v25 = vshll.u32 %v2798_v4, 16  ;;  %v2964_v19 = vshrl.u32 %v2798_v4, 16  ;;  %v2393_v3 = vld [vmem:[#allocation2 + $0xbc] sm:$0x1] }
 0x127   : > { %v2956_v24 = vrot.slane %v2954_v11, 5  ;;  %4849 = vmatprep.mubr.bf16.mxu1 %v5637_v40  ;;  %v2186_v27 = vsel %vm6684_vm6, %v2181_v16, %v2185_v52  ;;  %v5614_v32 = vcombine.low %v2539_v45, %v2542_v22  ;;  %v2970_v36 = vshll.u32 %v2799_v5, 16  ;;  %v2800_v5 = vld [vmem:[#allocation2 + $0x60] sm:$0xf]  ;;  %v2801_v40 = vld [vmem:[#allocation2 + $0x64] sm:$0xf] }
 0x128   : > { %v2196_v30 = vsel %vm6684_vm6, %v2191_v17, %v2195_v59  ;;  %4850 = vmatmul.mubr.bf16.gmra.mrb[96].mxu1 %v6567_v60  ;;  %v2962_v47 = vrot.slane %v2960_v25, 5  ;;  %v2966_v48 = vrot.slane %v2964_v19, 4  ;;  %v2198_v63 = vshrl.u32 %v1876_v12, 16 }
 0x129   : > { %v5581_v38 = vcombine.low %v2186_v27, %v2196_v30  ;;  %v2957_v43 = vor.u32 %v2956_v24, %v2953_v15  ;;  %v2972_v61 = vrot.slane %v2970_v36, 5  ;;  %v2201_v0 = vshll.u32 %v1876_v12, 16  ;;  %v2802_v36 = vld [vmem:[#allocation2 + $0x68] sm:$0x1] }
 0x12a   : > { %v2207_v2 = vshll.u32 %v1877_v14, 16  ;;  %v2967_v4 = vor.u32 %v2966_v48, %v2962_v47  ;;  %v2211_v59 = vshrl.u32 %v1877_v14, 16  ;;  %v2217_v6 = vshll.u32 %v1878_v18, 16  ;;  %v6569_v14 = vld [vmem:[#allocation2 + $0x54] sm:$0xff]  }
 0x12b   : > { %v7319_v23 = vpop.f32.mrb[8].mxu0  ;;  %4753 = vmatmul.mubr.bf16.gmra.mrb[96].mxu0 %v5581_v38  ;;  %v2958_v52 = vrot.slane %v2957_v43, 4  ;;  %v2200_v60 = vrot.slane %v2198_v63, 4  ;;  %v2203_v45 = vrot.slane %v2201_v0, 5  ;;  %v5599_v11 = vrot.slane %v2391_v55, 9 }
 0x12c   : > { %v7323_v44 = vpop.f32.mrb[9].mxu0  ;;  %4760 = vmatprep.mubr.bf16.mxu0 %v5614_v32  ;;  %v2209_v9 = vrot.slane %v2207_v2, 5  ;;  %v2968_v12 = vrot.slane %v2967_v4, 4  ;;  %v2213_v17 = vrot.slane %v2211_v59, 4  ;;  %v2219_v15 = vrot.slane %v2217_v6, 5 }
 0x12d   : > { %v7333_v20 = vpop.f32.mrb[10].mxu0  ;;  %v2963_v16 = vsel %vm6684_vm6, %v2958_v52, %v2962_v47  ;;  %v2204_v24 = vor.u32 %v2203_v45, %v2200_v60  ;;  %v2545_v18 = vrot.slane %v2392_v57, 5  ;;  %v2548_v25 = vrot.slane %v2393_v3, 5  ;;  %v1879_v0 = vld [vmem:[#allocation2 + $0xb4] sm:$0xf] }
 0x12e   : > { %v7343_v37 = vpop.f32.mrb[11].mxu0  ;;  %v2975_v19 = vshrl.u32 %v2800_v5, 16  ;;  %v2973_v30 = vsel %vm6684_vm6, %v2968_v12, %v2972_v61  ;;  %v2214_v32 = vor.u32 %v2213_v17, %v2209_v9  ;;  %v2978_v38 = vshll.u32 %v2800_v5, 16  ;;  %v1880_v5 = vld [vmem:[#allocation2 + $0xb8] sm:$0xf] }
 0x12f   : > { %v2984_v43 = vshll.u32 %v2801_v40, 16  ;;  %v5638_v47 = vcombine.low %v2963_v16, %v2973_v30  ;;  %v2205_v48 = vrot.slane %v2204_v24, 4  ;;  %v2546_v55 = vsel %vm6888_vm13, %v5599_v11, %v2545_v18  ;;  %v1881_v16 = vld [vmem:[#allocation2 + $0xbc] sm:$0x1] }
 0x130   : > { %v2547_v63 = vrot.slane %v2545_v18, 4  ;;  %v2215_v2 = vrot.slane %v2214_v32, 4  ;;  %v2977_v57 = vrot.slane %v2975_v19, 4  ;;  %v2980_v3 = vrot.slane %v2978_v38, 5 }
 0x131   : > { %v2986_v52 = vrot.slane %v2984_v43, 5  ;;  %4857 = vmatprep.mubr.bf16.mxu1 %v5638_v47  ;;  %v2210_v4 = vsel %vm6684_vm6, %v2205_v48, %v2209_v9  ;;  %v2988_v59 = vshrl.u32 %v2801_v40, 16  ;;  %v2994_v6 = vshll.u32 %v2802_v36, 16  ;;  %v740_v47 = vld [vmem:[#allocation2 + $0xc8] sm:$0x1] }
 0x132   : > { %v2549_v61 = vsel %vm6888_vm13, %v2547_v63, %v2548_v25  ;;  %v2220_v60 = vsel %vm6684_vm6, %v2215_v2, %v2219_v15  ;;  %4858 = vmatmul.mubr.bf16.gmra.mrb[100].mxu1 %v6569_v14  ;;  %v2981_v11 = vor.u32 %v2980_v3, %v2977_v57  ;;  %v2222_v12 = vshrl.u32 %v1879_v0, 16  ;;  %v2394_v48 = vld [vmem:[#allocation2 + $0xc0] sm:$0xe]  ;;  %v2395_v57 = vld [vmem:[#allocation2 + $0xc4] sm:$0xf] }
 0x133   : > { %v5615_v45 = vcombine.low %v2546_v55, %v2549_v61  ;;  %v5582_v24 = vcombine.low %v2210_v4, %v2220_v60  ;;  %v2990_v18 = vrot.slane %v2988_v59, 4  ;;  %v2996_v19 = vrot.slane %v2994_v6, 5  ;;  %v2803_v3 = vld [vmem:[#allocation2 + $0x6c] sm:$0xf]  ;;  %v2805_v60 = vld [vmem:[#allocation2 + $0x74] sm:$0x1] }
 0x134   : > { %v7321_v31 = vpop.f32.mrb[8].mxu1  ;;  %v2225_v9 = vshll.u32 %v1879_v0, 16  ;;  %v2982_v25 = vrot.slane %v2981_v11, 4  ;;  %v2224_v40 = vrot.slane %v2222_v12, 4  ;;  %v2231_v32 = vshll.u32 %v1880_v5, 16 }
 0x135   : > { %v7327_v7 = vpop.f32.mrb[9].mxu1  ;;  %v2235_v36 = vshrl.u32 %v1880_v5, 16  ;;  %4761 = vmatmul.mubr.bf16.gmra.mrb[100].mxu0 %v5582_v24  ;;  %v2991_v38 = vor.u32 %v2990_v18, %v2986_v52  ;;  %v2241_v14 = vshll.u32 %v1881_v16, 16  ;;  %v7369_v43 = vadd.f32 %v7233_v28, %v7231_v21  ;;  %v2804_v28 = vld [vmem:[#allocation2 + $0x70] sm:$0xf]  ;;  %v6570_v5 = vld [vmem:[#allocation2 + $0x60] sm:$0xff]  }
 0x136   : > { %v7337_v29 = vpop.f32.mrb[10].mxu1  ;;  %v2227_v15 = vrot.slane %v2225_v9, 5  ;;  %4768 = vmatprep.mubr.bf16.mxu0 %v5615_v45  ;;  %v2987_v55 = vsel %vm6684_vm6, %v2982_v25, %v2986_v52  ;;  %v2233_v63 = vrot.slane %v2231_v32, 5  ;;  %v7375_v2 = vadd.f32 %v7257_v50, %v7253_v35  ;;  %v1882_v12 = vld [vmem:[#allocation2 + $0xc0] sm:$0xf] }
 0x137   : > { %v7345_v8 = vpop.f32.mrb[11].mxu1  ;;  %v2237_v0 = vrot.slane %v2235_v36, 4  ;;  %v2992_v4 = vrot.slane %v2991_v38, 4  ;;  %v2243_v59 = vrot.slane %v2241_v14, 5  ;;  %v7379_v21 = vadd.f32 %v7241_v49, %v7237_v34 }
 0x138   : > { %8098 = vst [vmem:[#allocation4_spill] sm:$0xff] %v7375_v2  ;;  %v2228_v61 = vor.u32 %v2227_v15, %v2224_v40  ;;  %v7383_v52 = vadd.f32 %v7265_v10, %v7261_v58  ;;  %v741_v35 = vsel %vm6709_vm10, %v576_v56, %v740_v47  ;;  %v5600_v50 = vrot.slane %v2394_v48, 9  ;;  %v1883_v40 = vld [vmem:[#allocation2 + $0xc4] sm:$0xf] }
 0x139   : > { %v7349_v22 = vpop.f32.mrb[12].mxu0  ;;  %v2238_v6 = vor.u32 %v2237_v0, %v2233_v63  ;;  %v2997_v34 = vsel %vm6684_vm6, %v2992_v4, %v2996_v19  ;;  %742 = vst [vmem:[#allocation2 + $0xc8] sm:$0x1] %v741_v35  ;;  %v2552_v11 = vrot.slane %v2395_v57, 5  ;;  %v2999_v16 = vshrl.u32 %v2803_v3, 16 }
 0x13a   : > { %v7351_v27 = vpop.f32.mrb[13].mxu0  ;;  %8099 = vst [vmem:[#allocation5_spill] sm:$0xff] %v7383_v52  ;;  %v2229_v49 = vrot.slane %v2228_v61, 4  ;;  %v5639_v58 = vcombine.low %v2987_v55, %v2997_v34  ;;  %v3002_v42 = vshll.u32 %v2803_v3, 16  ;;  %v3008_v18 = vshll.u32 %v2804_v28, 16 }
 0x13b   : > { %v7389_v45 = vpop.f32.mrb[14].mxu0  ;;  %v2239_v10 = vrot.slane %v2238_v6, 4  ;;  %v7401_v9 = vsel %vm6888_vm13, %v5600_v50, %v2552_v11  ;;  %v2554_v19 = vrot.slane %v2552_v11, 4  ;;  %v3001_v25 = vrot.slane %v2999_v16, 4 }
 0x13c   : > { %v7395_v51 = vpop.f32.mrb[15].mxu0  ;;  %v2234_v56 = vsel %vm6684_vm6, %v2229_v49, %v2233_v63  ;;  %4865 = vmatprep.mubr.bf16.mxu1 %v5639_v58  ;;  %v3004_v36 = vrot.slane %v3002_v42, 5  ;;  %v3010_v38 = vrot.slane %v3008_v18, 5  ;;  %v3012_v15 = vshrl.u32 %v2804_v28, 16 }
 0x13d   : > { %v2244_v32 = vsel %vm6684_vm6, %v2239_v10, %v2243_v59  ;;  %4866 = vmatmul.mubr.bf16.gmra.mrb[104].mxu1 %v6570_v5  ;;  %v3018_v48 = vshll.u32 %v2805_v60, 16  ;;  %v2246_v55 = vshrl.u32 %v1882_v12, 16  ;;  %v2249_v63 = vshll.u32 %v1882_v12, 16  ;;  %v2806_v5 = vld [vmem:[#allocation2 + $0x78] sm:$0xf] }
 0x13e   : > { %v5583_v47 = vcombine.low %v2234_v56, %v2244_v32  ;;  %v3005_v57 = vor.u32 %v3004_v36, %v3001_v25  ;;  %v3014_v3 = vrot.slane %v3012_v15, 4  ;;  %v2255_v4 = vshll.u32 %v1883_v40, 16  ;;  %v2807_v25 = vld [vmem:[#allocation2 + $0x7c] sm:$0xf]  ;;  %v6572_v32 = vld [vmem:[#allocation2 + $0x6c] sm:$0xff]  }
 0x13f   : > { %v2259_v61 = vshrl.u32 %v1883_v40, 16  ;;  %v3020_v59 = vrot.slane %v3018_v48, 5  ;;  %v2248_v35 = vrot.slane %v2246_v55, 4  ;;  %v2251_v50 = vrot.slane %v2249_v63, 5  ;;  %v3294_v15 = vld [vmem:[#allocation2 + $0x18] sm:$0xe] }
 0x140   : > { %4769 = vmatmul.mubr.bf16.gmra.mrb[104].mxu0 %v5583_v47  ;;  %v7413_v28 = vadd.f32 %v7275_v41, %v7271_v26  ;;  %v2396_v34 = vld [vmem:[#allocation2 + $0xc8] sm:$0x1]  ;;  %v3006_v49 = vrot.slane %v3005_v57, 4  ;;  %v3015_v11 = vor.u32 %v3014_v3, %v3010_v38  ;;  %v2257_v12 = vrot.slane %v2255_v4, 5  ;;  %v3295_v57 = vld [vmem:[#allocation2 + $0x1c] sm:$0xf] }
 0x141   : > { %v1884_v16 = vld [vmem:[#allocation2 + $0xc8] sm:$0x1]  ;;  %v7419_v58 = vadd.f32 %v7295_v39, %v7287_v13  ;;  %v2555_v10 = vrot.slane %v2396_v34, 5  ;;  %v2252_v42 = vor.u32 %v2251_v50, %v2248_v35  ;;  %v2261_v18 = vrot.slane %v2259_v61, 4  ;;  %v2808_v39 = vld [vmem:[#allocation2 + $0x80] sm:$0x1] }
 0x142   : > { %v7363_v17 = vpop.f32.mrb[12].mxu1  ;;  %v2265_v56 = vshll.u32 %v1884_v16, 16  ;;  %v3011_v26 = vsel %vm6684_vm6, %v3006_v49, %v3010_v38  ;;  %v3016_v41 = vrot.slane %v3015_v11, 4  ;;  %v7427_v36 = vadd.f32 %v7285_v1, %v7279_v53  ;;  %v3297_v34 = vld [vmem:[#allocation2 + $0x24] sm:$0xe] }
 0x143   : > { %v7365_v30 = vpop.f32.mrb[13].mxu1  ;;  %8100 = vst [vmem:[#allocation6_spill] sm:$0xff] %v7419_v58  ;;  %v7431_v13 = vadd.f32 %v7301_v62, %v7297_v54  ;;  %v2556_v48 = vsel %vm6888_vm13, %v2554_v19, %v2555_v10  ;;  %v2253_v55 = vrot.slane %v2252_v42, 4  ;;  %v2262_v63 = vor.u32 %v2261_v18, %v2257_v12  ;;  %v3296_v54 = vld [vmem:[#allocation2 + $0x20] sm:$0x1] }
 0x144   : > { %v7393_v24 = vpop.f32.mrb[14].mxu1  ;;  %v2267_v38 = vrot.slane %v2265_v56, 5  ;;  %v5616_v3 = vcombine.low %v7401_v9, %v2556_v48  ;;  %v3021_v53 = vsel %vm6684_vm6, %v3016_v41, %v3020_v59  ;;  %v3023_v1 = vshrl.u32 %v2806_v5, 16  ;;  %v3298_v19 = vld [vmem:[#allocation2 + $0x28] sm:$0xf] }
 0x145   : > { %v7405_v14 = vpop.f32.mrb[15].mxu1  ;;  %8101 = vst [vmem:[#allocation7_spill] sm:$0xff] %v7431_v13  ;;  %v3026_v4 = vshll.u32 %v2806_v5, 16  ;;  %v5640_v62 = vcombine.low %v3011_v26, %v3021_v53  ;;  %v2258_v61 = vsel %vm6684_vm6, %v2253_v55, %v2257_v12  ;;  %v2263_v35 = vrot.slane %v2262_v63, 4  ;;  %v3299_v56 = vld [vmem:[#allocation2 + $0x2c] sm:$0x1] }
 0x146   : > { %v3032_v50 = vshll.u32 %v2807_v25, 16  ;;  %4776 = vmatprep.mubr.bf16.mxu0 %v5616_v3  ;;  %v3025_v49 = vrot.slane %v3023_v1, 4  ;;  %v3036_v16 = vshrl.u32 %v2807_v25, 16  ;;  %v3042_v10 = vshll.u32 %v2808_v39, 16  ;;  %v2809_v1 = vld [vmem:[#allocation2 + $0x84] sm:$0xf] }
 0x147   : > { %v3028_v11 = vrot.slane %v3026_v4, 5  ;;  %4873 = vmatprep.mubr.bf16.mxu1 %v5640_v62  ;;  %v2268_v59 = vsel %vm6684_vm6, %v2263_v35, %v2267_v38  ;;  %v5649_v18 = vrot.slane %v3294_v15, 9  ;;  %v3392_v12 = vrot.slane %v3295_v57, 5  ;;  %v2810_v35 = vld [vmem:[#allocation2 + $0x88] sm:$0xf] }
 0x148   : > { %v3034_v5 = vrot.slane %v3032_v50, 5  ;;  %v5584_v41 = vcombine.low %v2258_v61, %v2268_v59  ;;  %4874 = vmatmul.mubr.bf16.gmra.mrb[108].mxu1 %v6572_v32  ;;  %v3038_v55 = vrot.slane %v3036_v16, 4  ;;  %v3044_v25 = vrot.slane %v3042_v10, 5  ;;  %v3300_v59 = vld [vmem:[#allocation2 + $0x30] sm:$0xe] }
 0x149   : > { %v3029_v48 = vor.u32 %v3028_v11, %v3025_v49  ;;  %v3393_v39 = vsel %vm6888_vm13, %v5649_v18, %v3392_v12  ;;  %v3394_v63 = vrot.slane %v3392_v12, 4  ;;  %v3395_v3 = vrot.slane %v3296_v54, 5  ;;  %v3303_v12 = vld [vmem:[#allocation2 + $0x3c] sm:$0xe]  ;;  %v2812_v13 = vld [vmem:[#allocation2 + $0x90] sm:$0xf] }
 0x14a   : > { %v7409_v6 = vpop.f32.mrb[16].mxu1  ;;  %v5650_v53 = vrot.slane %v3297_v34, 9  ;;  %4777 = vmatmul.mubr.bf16.gmra.mrb[108].mxu0 %v5584_v41  ;;  %v3039_v38 = vor.u32 %v3038_v55, %v3034_v5  ;;  %v3399_v57 = vrot.slane %v3298_v19, 5  ;;  %v3402_v62 = vrot.slane %v3299_v56, 5  ;;  %v2811_v19 = vld [vmem:[#allocation2 + $0x8c] sm:$0x1] }
 0x14b   : > { %v7421_v40 = vpop.f32.mrb[17].mxu1  ;;  %v3030_v15 = vrot.slane %v3029_v48, 4  ;;  %v3396_v32 = vsel %vm6888_vm13, %v3394_v63, %v3395_v3  ;;  %v7460_v50 = vadd.f32 %v7323_v44, %v7319_v23  ;;  %v7464_v54 = vadd.f32 %v7327_v7, %v7321_v31  ;;  %v3301_v23 = vld [vmem:[#allocation2 + $0x34] sm:$0xf]  ;;  %v3302_v44 = vld [vmem:[#allocation2 + $0x38] sm:$0x1] }
 0x14c   : > { %v7442_v9 = vpop.f32.mrb[18].mxu1  ;;  %v7468_v34 = vadd.f32 %v7343_v37, %v7333_v20  ;;  %v3040_v11 = vrot.slane %v3039_v38, 4  ;;  %v5665_v16 = vcombine.low %v3393_v39, %v3396_v32  ;;  %v3400_v10 = vsel %vm6888_vm13, %v5650_v53, %v3399_v57  ;;  %v3304_v56 = vld [vmem:[#allocation2 + $0x40] sm:$0xf]  ;;  %v6573_v48 = vld [vmem:[#allocation2 + $0x78] sm:$0xff]  }
 0x14d   : > { %v7407_v0 = vpop.f32.mrb[16].mxu0  ;;  %v7448_v26 = vpop.f32.mrb[19].mxu1  ;;  %8102 = vst [vmem:[#allocation8_spill] sm:$0xff] %v7464_v54  ;;  %v3035_v49 = vsel %vm6684_vm6, %v3030_v15, %v3034_v5  ;;  %v3401_v31 = vrot.slane %v3399_v57, 4  ;;  %v7478_v7 = vadd.f32 %v7345_v8, %v7337_v29  ;;  %v3047_v20 = vshrl.u32 %v2809_v1, 16 }
 0x14e   : > { %v7415_v60 = vpop.f32.mrb[17].mxu0  ;;  %v3050_v37 = vshll.u32 %v2809_v1, 16  ;;  %v3045_v41 = vsel %vm6684_vm6, %v3040_v11, %v3044_v25  ;;  %6404 = vmatprep.mubr.bf16.mxu0 %v5665_v16  ;;  %v3056_v55 = vshll.u32 %v2810_v35, 16  ;;  %v3060_v39 = vshrl.u32 %v2810_v35, 16  ;;  %v3305_v38 = vld [vmem:[#allocation2 + $0x44] sm:$0x1] }
 0x14f   : > { %v7433_v47 = vpop.f32.mrb[18].mxu0  ;;  %8103 = vst [vmem:[#allocation9_spill] sm:$0xff] %v7478_v7  ;;  %v3066_v63 = vshll.u32 %v2811_v19, 16  ;;  %v5641_v29 = vcombine.low %v3035_v49, %v3045_v41  ;;  %v3403_v8 = vsel %vm6888_vm13, %v3401_v31, %v3402_v62  ;;  %v3049_v1 = vrot.slane %v3047_v20, 4 }
 0x150   : > { %v7444_v42 = vpop.f32.mrb[19].mxu0  ;;  %v3052_v15 = vrot.slane %v3050_v37, 5  ;;  %v5666_v25 = vcombine.low %v3400_v10, %v3403_v8  ;;  %v3058_v11 = vrot.slane %v3056_v55, 5  ;;  %v3062_v16 = vrot.slane %v3060_v39, 4  ;;  %v2813_v10 = vld [vmem:[#allocation2 + $0x94] sm:$0xf] }
 0x151   : > { %v3068_v35 = vrot.slane %v3066_v63, 5  ;;  %4881 = vmatprep.mubr.bf16.mxu1 %v5641_v29  ;;  %v5651_v54 = vrot.slane %v3300_v59, 9  ;;  %v3406_v49 = vrot.slane %v3301_v23, 5  ;;  %v3409_v41 = vrot.slane %v3302_v44, 5  ;;  %v2814_v23 = vld [vmem:[#allocation2 + $0x98] sm:$0x1] }
 0x152   : > { %v7454_v61 = vpop.f32.mrb[20].mxu1  ;;  %v3053_v7 = vor.u32 %v3052_v15, %v3049_v1  ;;  %4882 = vmatmul.mubr.bf16.gmra.mrb[112].mxu1 %v6573_v48  ;;  %6405 = vmatmul.mubr.bf16.vlgmr.msra.gmra.mrb[112].mxu0 %v5666_v25  ;;  %v3063_v31 = vor.u32 %v3062_v16, %v3058_v11  ;;  %v5652_v20 = vrot.slane %v3303_v12, 9  ;;  %v3413_v37 = vrot.slane %v3304_v56, 5  ;;  %v3306_v44 = vld [vmem:[#allocation2 + $0x48] sm:$0xe] }
 0x153   : > { %v7480_v5 = vpop.f32.mrb[21].mxu1  ;;  %v3416_v58 = vrot.slane %v3305_v38, 5  ;;  %v3407_v63 = vsel %vm6888_vm13, %v5651_v54, %v3406_v49  ;;  %v3408_v29 = vrot.slane %v3406_v49, 4  ;;  %v7504_v59 = vadd.f32 %v7351_v27, %v7349_v22  ;;  %v3307_v1 = vld [vmem:[#allocation2 + $0x4c] sm:$0xf]  ;;  %v6574_v25 = vld [vmem:[#allocation2 + $0x84] sm:$0xff]  }
 0x154   : > { %v7486_v53 = vpop.f32.mrb[22].mxu1  ;;  %v3054_v39 = vrot.slane %v3053_v7, 4  ;;  %v3064_v48 = vrot.slane %v3063_v31, 4  ;;  %v3414_v12 = vsel %vm6888_vm13, %v5652_v20, %v3413_v37  ;;  %v3415_v56 = vrot.slane %v3413_v37, 4  ;;  %v3308_v15 = vld [vmem:[#allocation2 + $0x50] sm:$0x1] }
 0x155   : > { %v7492_v32 = vpop.f32.mrb[23].mxu1  ;;  %v7510_v8 = vadd.f32 %v7365_v30, %v7363_v17  ;;  %v3410_v54 = vsel %vm6888_vm13, %v3408_v29, %v3409_v41  ;;  %v7518_v22 = vadd.f32 %v7395_v51, %v7389_v45  ;;  %v7522_v27 = vadd.f32 %v7405_v14, %v7393_v24  ;;  %v3309_v38 = vld [vmem:[#allocation2 + $0x54] sm:$0xe]  ;;  %v3310_v49 = vld [vmem:[#allocation2 + $0x58] sm:$0xf] }
 0x156   : > { %v7452_v4 = vpop.f32.mrb[20].mxu0  ;;  %v3059_v7 = vsel %vm6684_vm6, %v3054_v39, %v3058_v11  ;;  %v3069_v17 = vsel %vm6684_vm6, %v3064_v48, %v3068_v35  ;;  %v5667_v30 = vcombine.low %v3407_v63, %v3410_v54  ;;  %v3417_v11 = vsel %vm6888_vm13, %v3415_v56, %v3416_v58  ;;  %v3311_v20 = vld [vmem:[#allocation2 + $0x5c] sm:$0x1] }
 0x157   : > { %v7474_v18 = vpop.f32.mrb[21].mxu0  ;;  %8104 = vst [vmem:[#allocation10_spill] sm:$0xff] %v7510_v8  ;;  %8105 = vst [vmem:[#allocation11_spill] sm:$0xff] %v7522_v27  ;;  %v3071_v16 = vshrl.u32 %v2812_v13, 16  ;;  %v5642_v51 = vcombine.low %v3059_v7, %v3069_v17  ;;  %v5668_v24 = vcombine.low %v3414_v12, %v3417_v11  ;;  %v3074_v14 = vshll.u32 %v2812_v13, 16 }
 0x158   : > { %v7484_v3 = vpop.f32.mrb[22].mxu0  ;;  %v3080_v31 = vshll.u32 %v2813_v10, 16  ;;  %6408 = vmatprep.mubr.bf16.mxu0 %v5667_v30  ;;  %v3084_v63 = vshrl.u32 %v2813_v10, 16  ;;  %v3090_v29 = vshll.u32 %v2814_v23, 16  ;;  %v5653_v58 = vrot.slane %v3306_v44, 9 }
 0x159   : > { %v7490_v57 = vpop.f32.mrb[23].mxu0  ;;  %v3073_v35 = vrot.slane %v3071_v16, 4  ;;  %4889 = vmatprep.mubr.bf16.mxu1 %v5642_v51  ;;  %v3076_v56 = vrot.slane %v3074_v14, 5  ;;  %v3420_v27 = vrot.slane %v3307_v1, 5  ;;  %v3423_v7 = vrot.slane %v3308_v15, 5 }
 0x15a   : > { %v7496_v62 = vpop.f32.mrb[24].mxu1  ;;  %v3082_v54 = vrot.slane %v3080_v31, 5  ;;  %4890 = vmatmul.mubr.bf16.gmra.mrb[116].mxu1 %v6574_v25  ;;  %6409 = vmatmul.mubr.bf16.gmra.mrb[116].mxu0 %v5668_v24  ;;  %v3086_v13 = vrot.slane %v3084_v63, 4  ;;  %v3092_v12 = vrot.slane %v3090_v29, 5  ;;  %v5654_v17 = vrot.slane %v3309_v38, 9 }
 0x15b   : > { %v7528_v41 = vpop.f32.mrb[25].mxu1  ;;  %v3427_v11 = vrot.slane %v3310_v49, 5  ;;  %v3077_v8 = vor.u32 %v3076_v56, %v3073_v35  ;;  %v3421_v30 = vsel %vm6888_vm13, %v5653_v58, %v3420_v27  ;;  %v3422_v10 = vrot.slane %v3420_v27, 4  ;;  %v2815_v44 = vld [vmem:[#allocation2 + $0x9c] sm:$0xf] }
 0x15c   : > { %v7532_v37 = vpop.f32.mrb[26].mxu1  ;;  %v3430_v23 = vrot.slane %v3311_v20, 5  ;;  %v2816_v16 = vld [vmem:[#allocation2 + $0xa0] sm:$0xf]  ;;  %v3087_v52 = vor.u32 %v3086_v13, %v3082_v54  ;;  %v7544_v15 = vadd.f32 %v7415_v60, %v7407_v0  ;;  %v6046_v27 = vadd.f32 %v7421_v40, %v7409_v6  ;;  %v2817_v14 = vld [vmem:[#allocation2 + $0xa4] sm:$0x1] }
 0x15d   : > { %v7536_v48 = vpop.f32.mrb[27].mxu1  ;;  %v3428_v51 = vsel %vm6888_vm13, %v5654_v17, %v3427_v11  ;;  %v3429_v1 = vrot.slane %v3427_v11, 4  ;;  %v3078_v38 = vrot.slane %v3077_v8, 4  ;;  %v3424_v49 = vsel %vm6888_vm13, %v3422_v10, %v3423_v7  ;;  %v3312_v31 = vld [vmem:[#allocation2 + $0x60] sm:$0xe] }
 0x15e   : > { %v7494_v19 = vpop.f32.mrb[24].mxu0  ;;  %v7554_v24 = vadd.f32 %v7444_v42, %v7433_v47  ;;  %v3088_v35 = vrot.slane %v3087_v52, 4  ;;  %v5669_v0 = vcombine.low %v3421_v30, %v3424_v49  ;;  %v6049_v8 = vadd.f32 %v7448_v26, %v7442_v9  ;;  %v3313_v63 = vld [vmem:[#allocation2 + $0x64] sm:$0xf]  ;;  %v6575_v47 = vld [vmem:[#allocation2 + $0x90] sm:$0xff]  }
 0x15f   : > { %v7498_v55 = vpop.f32.mrb[25].mxu0  ;;  %v3431_v60 = vsel %vm6888_vm13, %v3429_v1, %v3430_v23  ;;  %v3083_v40 = vsel %vm6684_vm6, %v3078_v38, %v3082_v54  ;;  %v7569_v58 = vadd.f32 %v6046_v27, %v7369_v43  ;;  %v3095_v52 = vshrl.u32 %v2815_v44, 16  ;;  %v3314_v56 = vld [vmem:[#allocation2 + $0x68] sm:$0x1]  ;;  %v3315_v11 = vld [vmem:[#allocation2 + $0x6c] sm:$0xe] }
 0x160   : > { %v7530_v45 = vpop.f32.mrb[26].mxu0  ;;  %v5670_v42 = vcombine.low %v3428_v51, %v3431_v60  ;;  %v3093_v9 = vsel %vm6684_vm6, %v3088_v35, %v3092_v12  ;;  %6412 = vmatprep.mubr.bf16.mxu0 %v5669_v0  ;;  %v7578_v26 = vadd.f32 %v6049_v8, %v7379_v21  ;;  %v3098_v17 = vshll.u32 %v2815_v44, 16  ;;  %v3316_v38 = vld [vmem:[#allocation2 + $0x70] sm:$0xf]  ;;  %v3317_v0 = vld [vmem:[#allocation2 + $0x74] sm:$0x1] }
 0x161   : > { %v7534_v39 = vpop.f32.mrb[27].mxu0  ;;  %8106 = vst [vmem:[#allocation12_spill] sm:$0xff] %v7569_v58  ;;  %v3104_v54 = vshll.u32 %v2816_v16, 16  ;;  %v5643_v10 = vcombine.low %v3083_v40, %v3093_v9  ;;  %v3097_v23 = vrot.slane %v3095_v52, 4  ;;  %v3108_v51 = vshrl.u32 %v2816_v16, 16 }
 0x162   : > { %v7546_v25 = vpop.f32.mrb[28].mxu1  ;;  %8107 = vst [vmem:[#allocation13_spill] sm:$0xff] %v7578_v26  ;;  %v3114_v1 = vshll.u32 %v2817_v14, 16  ;;  %6413 = vmatmul.mubr.bf16.gmra.mrb[120].mxu0 %v5670_v42  ;;  %v3100_v12 = vrot.slane %v3098_v17, 5  ;;  %v5655_v35 = vrot.slane %v3312_v31, 9  ;;  %v3434_v21 = vrot.slane %v3313_v63, 5 }
 0x163   : > { %v7564_v6 = vpop.f32.mrb[29].mxu1  ;;  %v3106_v27 = vrot.slane %v3104_v54, 5  ;;  %4897 = vmatprep.mubr.bf16.mxu1 %v5643_v10  ;;  %v3110_v44 = vrot.slane %v3108_v51, 4  ;;  %v3437_v8 = vrot.slane %v3314_v56, 5  ;;  %v5656_v2 = vrot.slane %v3315_v11, 9 }
 0x164   : > { %v7573_v13 = vpop.f32.mrb[30].mxu1  ;;  %v3116_v60 = vrot.slane %v3114_v1, 5  ;;  %4898 = vmatmul.mubr.bf16.gmra.mrb[120].mxu1 %v6575_v47  ;;  %v3101_v26 = vor.u32 %v3100_v12, %v3097_v23  ;;  %v3435_v16 = vsel %vm6888_vm13, %v5655_v35, %v3434_v21  ;;  %v3436_v14 = vrot.slane %v3434_v21, 4  ;;  %v2818_v52 = vld [vmem:[#allocation2 + $0xa8] sm:$0xf]  ;;  %v6576_v35 = vld [vmem:[#allocation2 + $0x9c] sm:$0xff]  }
 0x165   : > { %v7582_v43 = vpop.f32.mrb[31].mxu1  ;;  %v3441_v40 = vrot.slane %v3316_v38, 5  ;;  %v3111_v9 = vor.u32 %v3110_v44, %v3106_v27  ;;  %v3444_v42 = vrot.slane %v3317_v0, 5  ;;  %v7590_v31 = vadd.f32 %v7474_v18, %v7452_v4  ;;  %v2819_v17 = vld [vmem:[#allocation2 + $0xac] sm:$0xf] }
 0x166   : > { %v6052_v63 = vadd.f32 %v7480_v5, %v7454_v61  ;;  %v3102_v47 = vrot.slane %v3101_v26, 4  ;;  %v3438_v54 = vsel %vm6888_vm13, %v3436_v14, %v3437_v8  ;;  %v2820_v23 = vld [vmem:[#allocation2 + $0xb0] sm:$0x1]  ;;  %v3318_v51 = vld [vmem:[#allocation2 + $0x78] sm:$0xe]  ;;  %v7605_v61 = vadd.f32 %v7490_v57, %v7484_v3 }
 0x167   : > { %v3442_v11 = vsel %vm6888_vm13, %v5656_v2, %v3441_v40  ;;  %v3443_v10 = vrot.slane %v3441_v40, 4  ;;  %v3112_v1 = vrot.slane %v3111_v9, 4  ;;  %v5671_v38 = vcombine.low %v3435_v16, %v3438_v54  ;;  %v3319_v18 = vld [vmem:[#allocation2 + $0x7c] sm:$0xf]  ;;  %v3320_v5 = vld [vmem:[#allocation2 + $0x80] sm:$0x1] }
 0x168   : > { %v7601_v4 = vadd.f32 %v6052_v63, %v7413_v28  ;;  %v3107_v2 = vsel %vm6684_vm6, %v3102_v47, %v3106_v27  ;;  %v6055_v28 = vadd.f32 %v7492_v32, %v7486_v53  ;;  %v3119_v0 = vshrl.u32 %v2818_v52, 16  ;;  %v3321_v44 = vld [vmem:[#allocation2 + $0x84] sm:$0xe]  ;;  %v3322_v40 = vld [vmem:[#allocation2 + $0x88] sm:$0xf] }
 0x169   : > { %v3445_v21 = vsel %vm6888_vm13, %v3443_v10, %v3444_v42  ;;  %v3117_v8 = vsel %vm6684_vm6, %v3112_v1, %v3116_v60  ;;  %6416 = vmatprep.mubr.bf16.mxu0 %v5671_v38  ;;  %v3122_v14 = vshll.u32 %v2818_v52, 16  ;;  %v3128_v27 = vshll.u32 %v2819_v17, 16  ;;  %v3323_v54 = vld [vmem:[#allocation2 + $0x8c] sm:$0x1] }
 0x16a   : > { %v7556_v20 = vpop.f32.mrb[28].mxu0  ;;  %v7584_v49 = vpop.f32.mrb[32].mxu1  ;;  %8108 = vst [vmem:[#allocation14_spill] sm:$0xff] %v7601_v4  ;;  %v5672_v16 = vcombine.low %v3442_v11, %v3445_v21  ;;  %v5644_v63 = vcombine.low %v3107_v2, %v3117_v8  ;;  %v7628_v53 = vadd.f32 %v6055_v28, %v7427_v36  ;;  %v3121_v32 = vrot.slane %v3119_v0, 4 }
 0x16b   : > { %v7562_v29 = vpop.f32.mrb[29].mxu0  ;;  %v7594_v56 = vpop.f32.mrb[33].mxu1  ;;  %v3132_v47 = vshrl.u32 %v2819_v17, 16  ;;  %v3124_v60 = vrot.slane %v3122_v14, 5  ;;  %v3130_v52 = vrot.slane %v3128_v27, 5  ;;  %v3138_v11 = vshll.u32 %v2820_v23, 16 }
 0x16c   : > { %v7571_v7 = vpop.f32.mrb[30].mxu0  ;;  %v7609_v12 = vpop.f32.mrb[34].mxu1  ;;  %8109 = vst [vmem:[#allocation15_spill] sm:$0xff] %v7628_v53  ;;  %6417 = vmatmul.mubr.bf16.gmra.mrb[124].mxu0 %v5672_v16  ;;  %v5657_v1 = vrot.slane %v3318_v51, 9  ;;  %4905 = vmatprep.mubr.bf16.mxu1 %v5644_v63  ;;  %v3448_v21 = vrot.slane %v3319_v18, 5  ;;  %v3451_v58 = vrot.slane %v3320_v5, 5  ;;  %v7640_v23 = vadd.f32 %v7498_v55, %v7494_v19 }
 0x16d   : > { %v7580_v30 = vpop.f32.mrb[31].mxu0  ;;  %v7619_v57 = vpop.f32.mrb[35].mxu1  ;;  %v3134_v38 = vrot.slane %v3132_v47, 4  ;;  %v5658_v2 = vrot.slane %v3321_v44, 9  ;;  %4906 = vmatmul.mubr.bf16.gmra.mrb[124].mxu1 %v6576_v35  ;;  %v3125_v36 = vor.u32 %v3124_v60, %v3121_v32  ;;  %v3140_v28 = vrot.slane %v3138_v11, 5 }
 0x16e   : > { %v3455_v0 = vrot.slane %v3322_v40, 5  ;;  %v3458_v17 = vrot.slane %v3323_v54, 5  ;;  %v3449_v16 = vsel %vm6888_vm13, %v5657_v1, %v3448_v21  ;;  %v3450_v14 = vrot.slane %v3448_v21, 4  ;;  %v2821_v51 = vld [vmem:[#allocation2 + $0xb4] sm:$0xf]  ;;  %v6577_v1 = vld [vmem:[#allocation2 + $0xa8] sm:$0xff]  }
 0x16f   : > { %v3135_v53 = vor.u32 %v3134_v38, %v3130_v52  ;;  %v3126_v5 = vrot.slane %v3125_v36, 4  ;;  %v6058_v27 = vadd.f32 %v7528_v41, %v7496_v62  ;;  %v2822_v40 = vld [vmem:[#allocation2 + $0xb8] sm:$0xf]  ;;  %v2823_v63 = vld [vmem:[#allocation2 + $0xbc] sm:$0x1]  ;;  %v7652_v19 = vadd.f32 %v7534_v39, %v7530_v45 }
 0x170   : > { %v3456_v35 = vsel %vm6888_vm13, %v5658_v2, %v3455_v0  ;;  %v3457_v44 = vrot.slane %v3455_v0, 4  ;;  %v3452_v47 = vsel %vm6888_vm13, %v3450_v14, %v3451_v58  ;;  %v6061_v55 = vadd.f32 %v7536_v48, %v7532_v37  ;;  %v3324_v54 = vld [vmem:[#allocation2 + $0x90] sm:$0xe]  ;;  %v3325_v60 = vld [vmem:[#allocation2 + $0x94] sm:$0xf] }
 0x171   : > { %v3136_v32 = vrot.slane %v3135_v53, 4  ;;  %v3131_v62 = vsel %vm6684_vm6, %v3126_v5, %v3130_v52  ;;  %v5673_v41 = vcombine.low %v3449_v16, %v3452_v47  ;;  %v7663_v58 = vadd.f32 %v6058_v27, %v7460_v50  ;;  %v3326_v45 = vld [vmem:[#allocation2 + $0x98] sm:$0x1]  ;;  %v3327_v39 = vld [vmem:[#allocation2 + $0x9c] sm:$0xe] }
 0x172   : > { %v7625_v42 = vpop.f32.mrb[36].mxu1  ;;  %v3459_v53 = vsel %vm6888_vm13, %v3457_v44, %v3458_v17  ;;  %v7670_v21 = vadd.f32 %v6061_v55, %v7468_v34  ;;  %v3143_v52 = vshrl.u32 %v2821_v51, 16  ;;  %v3328_v2 = vld [vmem:[#allocation2 + $0xa0] sm:$0xf]  ;;  %v3329_v36 = vld [vmem:[#allocation2 + $0xa4] sm:$0x1] }
 0x173   : > { %v7632_v4 = vpop.f32.mrb[37].mxu1  ;;  %v3141_v37 = vsel %vm6684_vm6, %v3136_v32, %v3140_v28  ;;  %v5674_v48 = vcombine.low %v3456_v35, %v3459_v53  ;;  %6420 = vmatprep.mubr.bf16.mxu0 %v5673_v41  ;;  %v3146_v50 = vshll.u32 %v2821_v51, 16  ;;  %v3152_v16 = vshll.u32 %v2822_v40, 16 }
 0x174   : > { %v7634_v8 = vpop.f32.mrb[38].mxu1  ;;  %8110 = vst [vmem:[#allocation16_spill] sm:$0xff] %v7670_v21  ;;  %v5645_v17 = vcombine.low %v3131_v62, %v3141_v37  ;;  %v3156_v14 = vshrl.u32 %v2822_v40, 16  ;;  %v3145_v28 = vrot.slane %v3143_v52, 4  ;;  %v3162_v35 = vshll.u32 %v2823_v63, 16 }
 0x175   : > { %v7607_v26 = vpop.f32.mrb[32].mxu0  ;;  %v7642_v18 = vpop.f32.mrb[39].mxu1  ;;  %6421 = vmatmul.mubr.bf16.gmra.mrb[128].mxu0 %v5674_v48  ;;  %v5659_v27 = vrot.slane %v3324_v54, 9  ;;  %v3462_v34 = vrot.slane %v3325_v60, 5  ;;  %v3148_v47 = vrot.slane %v3146_v50, 5  ;;  %v3154_v55 = vrot.slane %v3152_v16, 5 }
 0x176   : > { %v7617_v3 = vpop.f32.mrb[33].mxu0  ;;  %4913 = vmatprep.mubr.bf16.mxu1 %v5645_v17  ;;  %v3158_v53 = vrot.slane %v3156_v14, 4  ;;  %v3465_v62 = vrot.slane %v3326_v45, 5  ;;  %v3164_v51 = vrot.slane %v3162_v35, 5  ;;  %v5660_v48 = vrot.slane %v3327_v39, 9 }
 0x177   : > { %v7623_v9 = vpop.f32.mrb[34].mxu0  ;;  %4914 = vmatmul.mubr.bf16.gmra.mrb[128].mxu1 %v6577_v1  ;;  %v3463_v40 = vsel %vm6888_vm13, %v5659_v27, %v3462_v34  ;;  %v3464_v37 = vrot.slane %v3462_v34, 4  ;;  %v3149_v63 = vor.u32 %v3148_v47, %v3145_v28  ;;  %v3469_v60 = vrot.slane %v3328_v2, 5  ;;  %v2824_v17 = vld [vmem:[#allocation2 + $0xc0] sm:$0xf] }
 0x178   : > { %v7630_v10 = vpop.f32.mrb[35].mxu0  ;;  %v3159_v54 = vor.u32 %v3158_v53, %v3154_v55  ;;  %v3472_v21 = vrot.slane %v3329_v36, 5  ;;  %v7690_v45 = vadd.f32 %v7562_v29, %v7556_v20  ;;  %v6064_v1 = vadd.f32 %v7564_v6, %v7546_v25  ;;  %v2825_v16 = vld [vmem:[#allocation2 + $0xc4] sm:$0xf]  ;;  %v6578_v36 = vld [vmem:[#allocation2 + $0xb4] sm:$0xff]  }
 0x179   : > { %v3466_v50 = vsel %vm6888_vm13, %v3464_v37, %v3465_v62  ;;  %v7696_v39 = vadd.f32 %v7580_v30, %v7571_v7  ;;  %v3150_v14 = vrot.slane %v3149_v63, 4  ;;  %v3470_v35 = vsel %vm6888_vm13, %v5660_v48, %v3469_v60  ;;  %v2826_v27 = vld [vmem:[#allocation2 + $0xc8] sm:$0x1]  ;;  %v3330_v6 = vld [vmem:[#allocation2 + $0xa8] sm:$0xe] }
 0x17a   : > { %v7656_v11 = vpop.f32.mrb[40].mxu1  ;;  %v3160_v28 = vrot.slane %v3159_v54, 4  ;;  %v5675_v2 = vcombine.low %v3463_v40, %v3466_v50  ;;  %v3471_v34 = vrot.slane %v3469_v60, 4  ;;  %v7701_v20 = vadd.f32 %v6064_v1, %v7504_v59  ;;  %v3331_v7 = vld [vmem:[#allocation2 + $0xac] sm:$0xf] }
 0x17b   : > { %v7665_v38 = vpop.f32.mrb[41].mxu1  ;;  %v6067_v25 = vadd.f32 %v7582_v43, %v7573_v13  ;;  %v3167_v29 = vshrl.u32 %v2824_v17, 16  ;;  %v3155_v30 = vsel %vm6684_vm6, %v3150_v14, %v3154_v55  ;;  %v3170_v53 = vshll.u32 %v2824_v17, 16  ;;  %v3332_v40 = vld [vmem:[#allocation2 + $0xb0] sm:$0x1] }
 0x17c   : > { %v7672_v0 = vpop.f32.mrb[42].mxu1  ;;  %8111 = vst [vmem:[#allocation17_spill] sm:$0xff] %v7701_v20  ;;  %v3165_v47 = vsel %vm6684_vm6, %v3160_v28, %v3164_v51  ;;  %6424 = vmatprep.mubr.bf16.mxu0 %v5675_v2  ;;  %v3176_v62 = vshll.u32 %v2825_v16, 16  ;;  %v3333_v37 = vld [vmem:[#allocation2 + $0xb4] sm:$0xe]  ;;  %v3473_v59 = vsel %vm6888_vm13, %v3471_v34, %v3472_v21  ;;  %v3180_v1 = vshrl.u32 %v2825_v16, 16 }
 0x17d   : > { %v7674_v5 = vpop.f32.mrb[36].mxu0  ;;  %v7676_v44 = vpop.f32.mrb[43].mxu1  ;;  %v5646_v48 = vcombine.low %v3155_v30, %v3165_v47  ;;  %v7712_v13 = vadd.f32 %v6067_v25, %v7518_v22  ;;  %v3169_v43 = vrot.slane %v3167_v29, 4  ;;  %v3334_v63 = vld [vmem:[#allocation2 + $0xb8] sm:$0xf]  ;;  %v5676_v60 = vcombine.low %v3470_v35, %v3473_v59 }
 0x17e   : > { %v7678_v32 = vpop.f32.mrb[37].mxu0  ;;  %v3335_v54 = vld [vmem:[#allocation2 + $0xbc] sm:$0x1]  ;;  %v3172_v55 = vrot.slane %v3170_v53, 5  ;;  %v3178_v50 = vrot.slane %v3176_v62, 5  ;;  %v3186_v14 = vshll.u32 %v2826_v27, 16  ;;  %v6082_v33 = vadd.f32 %v7665_v38, %v7656_v11 }
 0x17f   : > { %v7680_v41 = vpop.f32.mrb[38].mxu0  ;;  %8112 = vst [vmem:[#allocation18_spill] sm:$0xff] %v7712_v13  ;;  %4921 = vmatprep.mubr.bf16.mxu1 %v5646_v48  ;;  %v5661_v28 = vrot.slane %v3330_v6, 9  ;;  %v3476_v2 = vrot.slane %v3331_v7, 5  ;;  %v3479_v30 = vrot.slane %v3332_v40, 5  ;;  %6425 = vmatmul.mubr.bf16.gmra.mrb[132].mxu0 %v5676_v60  ;;  %v3182_v35 = vrot.slane %v3180_v1, 4 }
 0x180   : > { %v7684_v52 = vpop.f32.mrb[39].mxu0  ;;  %4922 = vmatmul.mubr.bf16.gmra.mrb[132].mxu1 %v6578_v36  ;;  %v3173_v34 = vor.u32 %v3172_v55, %v3169_v43  ;;  %v5662_v25 = vrot.slane %v3333_v37, 9  ;;  %v3483_v29 = vrot.slane %v3334_v63, 5  ;;  %v3188_v53 = vrot.slane %v3186_v14, 5  ;;  %v2827_v43 = vld [vmem:[#allocation2 + $0xcc] sm:$0xf] }
 0x181   : > { %v3477_v27 = vsel %vm6888_vm13, %v5661_v28, %v3476_v2  ;;  %v3478_v6 = vrot.slane %v3476_v2, 4  ;;  %v3486_v7 = vrot.slane %v3335_v54, 5  ;;  %v3183_v48 = vor.u32 %v3182_v35, %v3178_v50  ;;  %v2828_v1 = vld [vmem:[#allocation2 + $0xd0] sm:$0xf]  ;;  %v2829_v14 = vld [vmem:[#allocation2 + $0xd4] sm:$0x1] }
 0x182   : > { %v7716_v17 = vpop.f32.mrb[44].mxu1  ;;  %v3174_v36 = vrot.slane %v3173_v34, 4  ;;  %v3484_v37 = vsel %vm6888_vm13, %v5662_v25, %v3483_v29  ;;  %v3485_v59 = vrot.slane %v3483_v29, 4  ;;  %v7738_v60 = vadd.f32 %v7617_v3, %v7607_v26  ;;  %v3336_v35 = vld [vmem:[#allocation2 + $0xc0] sm:$0xe] }
 0x183   : > { %v7720_v22 = vpop.f32.mrb[45].mxu1  ;;  %v3480_v63 = vsel %vm6888_vm13, %v3478_v6, %v3479_v30  ;;  %v6070_v54 = vadd.f32 %v7594_v56, %v7584_v49  ;;  %v7744_v55 = vadd.f32 %v7630_v10, %v7623_v9  ;;  %v3184_v2 = vrot.slane %v3183_v48, 4  ;;  %v3337_v26 = vld [vmem:[#allocation2 + $0xc4] sm:$0xf]  ;;  %v3338_v10 = vld [vmem:[#allocation2 + $0xc8] sm:$0x1] }
 0x184   : > { %v7724_v47 = vpop.f32.mrb[46].mxu1  ;;  %v3179_v28 = vsel %vm6684_vm6, %v3174_v36, %v3178_v50  ;;  %v5677_v34 = vcombine.low %v3477_v27, %v3480_v63  ;;  %v3487_v30 = vsel %vm6888_vm13, %v3485_v59, %v3486_v7  ;;  %v6579_v3 = vld [vmem:[#allocation2 + $0xc0] sm:$0xff]   ;;  %v6073_v56 = vadd.f32 %v7619_v57, %v7609_v12  ;;  %v3339_v29 = vld [vmem:[#allocation2 + $0xcc] sm:$0xe]  ;;  %v3340_v36 = vld [vmem:[#allocation2 + $0xd0] sm:$0xf] }
 0x185   : > { %v7714_v51 = vpop.f32.mrb[40].mxu0  ;;  %v7730_v40 = vpop.f32.mrb[47].mxu1  ;;  %v5678_v25 = vcombine.low %v3484_v37, %v3487_v30  ;;  %v7751_v49 = vadd.f32 %v6070_v54, %v7544_v15  ;;  %v3191_v9 = vshrl.u32 %v2827_v43, 16  ;;  %v3189_v50 = vsel %vm6684_vm6, %v3184_v2, %v3188_v53  ;;  %v3341_v12 = vld [vmem:[#allocation2 + $0xd4] sm:$0x1] }
 0x186   : > { %v7718_v21 = vpop.f32.mrb[41].mxu0  ;;  %6428 = vmatprep.mubr.bf16.mxu0 %v5677_v34  ;;  %v3194_v27 = vshll.u32 %v2827_v43, 16  ;;  %v3200_v6 = vshll.u32 %v2828_v1, 16  ;;  %v3204_v7 = vshrl.u32 %v2828_v1, 16  ;;  %v5647_v37 = vcombine.low %v3179_v28, %v3189_v50 }
 0x187   : > { %v7722_v16 = vpop.f32.mrb[42].mxu0  ;;  %8113 = vst [vmem:[#allocation19_spill] sm:$0xff] %v7751_v49  ;;  %v7760_v15 = vadd.f32 %v6073_v56, %v7554_v24  ;;  %v3193_v59 = vrot.slane %v3191_v9, 4  ;;  %v3210_v63 = vshll.u32 %v2829_v14, 16  ;;  %6429 = vmatmul.mubr.bf16.gmra.mrb[136].mxu0 %v5678_v25  ;;  %v5663_v53 = vrot.slane %v3336_v35, 9 }
 0x188   : > { %v7728_v62 = vpop.f32.mrb[43].mxu0  ;;  %v3196_v54 = vrot.slane %v3194_v27, 5  ;;  %v3202_v30 = vrot.slane %v3200_v6, 5  ;;  %v3206_v49 = vrot.slane %v3204_v7, 4  ;;  %4929 = vmatprep.mubr.bf16.mxu1 %v5647_v37  ;;  %v3490_v1 = vrot.slane %v3337_v26, 5  ;;  %v6580_v7 = vld [vmem:[#allocation2 + $0xcc] sm:$0xff]  }
 0x189   : > { %v3212_v43 = vrot.slane %v3210_v63, 5  ;;  %v3493_v34 = vrot.slane %v3338_v10, 5  ;;  %v5664_v13 = vrot.slane %v3339_v29, 9  ;;  %4930 = vmatmul.mubr.bf16.gmra.mrb[136].mxu1 %v6579_v3  ;;  %v3497_v56 = vrot.slane %v3340_v36, 5 }
 0x18a   : > { %v7757_v48 = vpop.f32.mrb[48].mxu1  ;;  %v3197_v28 = vor.u32 %v3196_v54, %v3193_v59  ;;  %v3207_v24 = vor.u32 %v3206_v49, %v3202_v30  ;;  %v3500_v9 = vrot.slane %v3341_v12, 5  ;;  %v3491_v14 = vsel %vm6888_vm13, %v5663_v53, %v3490_v1 }
 0x18b   : > { %v6093_v57 = vpop.f32.mrb[49].mxu1  ;;  %v3492_v25 = vrot.slane %v3490_v1, 4  ;;  %v5988_v50 = vadd.f32 %v7678_v32, %v7674_v5  ;;  %v6076_v35 = vadd.f32 %v7632_v4, %v7625_v42  ;;  %v3498_v10 = vsel %vm6888_vm13, %v5664_v13, %v3497_v56  ;;  %v8114_v1 = vld [vmem:[#allocation12_spill] sm:$0xff] }
 0x18c   : > { %v6095_v2 = vpop.f32.mrb[50].mxu1  ;;  %v3198_v27 = vrot.slane %v3197_v28, 4  ;;  %v3208_v26 = vrot.slane %v3207_v24, 4  ;;  %v3499_v3 = vrot.slane %v3497_v56, 4  ;;  %v5991_v6 = vadd.f32 %v7684_v52, %v7680_v41 }
 0x18d   : > { %v6096_v20 = vpop.f32.mrb[51].mxu1  ;;  %v3494_v49 = vsel %vm6888_vm13, %v3492_v25, %v3493_v34  ;;  %v7773_v29 = vadd.f32 %v6076_v35, %v7590_v31  ;;  %v6079_v5 = vadd.f32 %v7642_v18, %v7634_v8  ;;  %v5994_v8 = vadd.f32 %v7718_v21, %v7714_v51 }
 0x18e   : > { %v3203_v4 = vsel %vm6684_vm6, %v3198_v27, %v3202_v30  ;;  %v3213_v42 = vsel %vm6684_vm6, %v3208_v26, %v3212_v43  ;;  %v5679_v13 = vcombine.low %v3491_v14, %v3494_v49  ;;  %v3501_v36 = vsel %vm6888_vm13, %v3499_v3, %v3500_v9 }
 0x18f   : > { %v5648_v37 = vcombine.low %v3203_v4, %v3213_v42  ;;  %v5680_v59 = vcombine.low %v3498_v10, %v3501_v36  ;;  %v7786_v41 = vadd.f32 %v6079_v5, %v7605_v61  ;;  %v5997_v52 = vadd.f32 %v7728_v62, %v7722_v16  ;;  %v8116_v5 = vld [vmem:[#allocation14_spill] sm:$0xff]  ;;  %v8117_v36 = vld [vmem:[#allocation15_spill] sm:$0xff] }
 0x190   : > { %6432 = vmatprep.mubr.bf16.mxu0 %v5679_v13  ;;  %v6085_v46 = vadd.f32 %v7676_v44, %v7672_v0  ;;  %v6088_v61 = vadd.f32 %v7720_v22, %v7716_v17  ;;  %v6091_v21 = vadd.f32 %v7730_v40, %v7724_v47  ;;  %v7801_v11 = vadd.f32 %v6082_v33, %v7640_v23 }
 0x191   : > { %4937 = vmatprep.mubr.bf16.mxu1 %v5648_v37  ;;  %6433 = vmatmul.mubr.bf16.gmra.mrb[140].mxu0 %v5680_v59  ;;  %v6094_v0 = vadd.f32 %v6093_v57, %v7757_v48  ;;  %v6097_v44 = vadd.f32 %v6096_v20, %v6095_v2 }
 0x192   : > { %v5998_v32 = vpop.f32.mrb[44].mxu0  ;;  %v6098_v54 = vpop.f32.mrb[52].mxu1  ;;  %4938 = vmatmul.mubr.bf16.gmra.mrb[140].mxu1 %v6580_v7  ;;  %v7804_v38 = vadd.f32 %v6085_v46, %v7652_v19  ;;  %v7808_v62 = vadd.f32 %v6088_v61, %v7690_v45  ;;  %v7811_v17 = vadd.f32 %v6091_v21, %v7696_v39 }
 0x193   : > { %v5999_v31 = vpop.f32.mrb[45].mxu0  ;;  %v6099_v30 = vpop.f32.mrb[53].mxu1  ;;  %v7814_v40 = vadd.f32 %v6094_v0, %v7738_v60  ;;  %v7817_v23 = vadd.f32 %v6097_v44, %v7744_v55  ;;  %v8115_v55 = vld [vmem:[#allocation13_spill] sm:$0xff] }
 0x194   : > { %v6001_v18 = vpop.f32.mrb[46].mxu0  ;;  %v6000_v63 = vadd.f32 %v5999_v31, %v5998_v32  ;;  %v6101_v16 = vpop.f32.mrb[54].mxu1  ;;  %v6100_v22 = vadd.f32 %v6099_v30, %v6098_v54 }
 0x195   : > { %v6002_v12 = vpop.f32.mrb[47].mxu0  ;;  %v6102_v47 = vpop.f32.mrb[55].mxu1 }
 0x196   : > { %v6003_v51 = vadd.f32 %v6002_v12, %v6001_v18  ;;  %v6103_v19 = vadd.f32 %v6102_v47, %v6101_v16  ;;  %v7819_v43 = vadd.f32 %v6100_v22, %v5988_v50  ;;  %v8118_v22 = vld [vmem:[#allocation16_spill] sm:$0xff] }
 0x198   : > { %v7821_v48 = vadd.f32 %v6103_v19, %v5991_v6  ;;  %v8119_v19 = vld [vmem:[#allocation4_spill] sm:$0xff] }
 0x19a   : > { %v6156_v53 = vpop.f32.mrb[48].mxu0  ;;  %v6104_v39 = vpop.f32.mrb[56].mxu1 }
 0x19b   : > { %v6157_v20 = vpop.f32.mrb[49].mxu0  ;;  %v6105_v60 = vpop.f32.mrb[57].mxu1 }
 0x19c   : > { %v6158_v45 = vadd.f32 %v6157_v20, %v6156_v53  ;;  %v6159_v57 = vpop.f32.mrb[50].mxu0  ;;  %v6106_v24 = vadd.f32 %v6105_v60, %v6104_v39  ;;  %v6107_v56 = vpop.f32.mrb[58].mxu1 }
 0x19d   : > { %v6160_v2 = vpop.f32.mrb[51].mxu0  ;;  %v6108_v14 = vpop.f32.mrb[59].mxu1 }
 0x19e   : > { %v7824_v34 = vadd.f32 %v6158_v45, %v8114_v1  ;;  %v6161_v28 = vadd.f32 %v6160_v2, %v6159_v57  ;;  %v7829_v25 = vadd.f32 %v6106_v24, %v5994_v8  ;;  %v6109_v50 = vadd.f32 %v6108_v14, %v6107_v56  ;;  %v8120_v57 = vld [vmem:[#allocation5_spill] sm:$0xff] }
 0x1a0   : > { %v7827_v9 = vadd.f32 %v6161_v28, %v8115_v55  ;;  %v7831_v26 = vadd.f32 %v6109_v50, %v5997_v52  ;;  %v8121_v28 = vld [vmem:[#allocation17_spill] sm:$0xff]  ;;  %v8122_v55 = vld [vmem:[#allocation18_spill] sm:$0xff] }
 0x1a2   : > { %v6162_v35 = vpop.f32.mrb[52].mxu0  ;;  %v6110_v6 = vpop.f32.mrb[60].mxu1 }
 0x1a3   : > { %v6163_v27 = vpop.f32.mrb[53].mxu0  ;;  %v6111_v42 = vpop.f32.mrb[61].mxu1 }
 0x1a4   : > { %v6164_v10 = vadd.f32 %v6163_v27, %v6162_v35  ;;  %v6165_v3 = vpop.f32.mrb[54].mxu0  ;;  %v6112_v13 = vadd.f32 %v6111_v42, %v6110_v6  ;;  %v6113_v7 = vpop.f32.mrb[62].mxu1  ;;  %v8123_v6 = vld [vmem:[#allocation6_spill] sm:$0xff] }
 0x1a5   : > { %v6166_v49 = vpop.f32.mrb[55].mxu0  ;;  %v6114_v37 = vpop.f32.mrb[63].mxu1 }
 0x1a6   : > { %v7834_v32 = vadd.f32 %v6164_v10, %v8116_v5  ;;  %v6167_v4 = vadd.f32 %v6166_v49, %v6165_v3  ;;  %v7839_v59 = vadd.f32 %v6112_v13, %v6000_v63  ;;  %v6115_v8 = vadd.f32 %v6114_v37, %v6113_v7 }
 0x1a8   : > { %v7837_v31 = vadd.f32 %v6167_v4, %v8117_v36  ;;  %v7841_v52 = vadd.f32 %v6115_v8, %v6003_v51  ;;  %v8124_v36 = vld [vmem:[#allocation7_spill] sm:$0xff] }
 0x1a9   : > { %v8125_v8 = vld [vmem:[#allocation19_spill] sm:$0xff] }
 0x1aa   : > { %v6168_v18 = vpop.f32.mrb[56].mxu0  ;;  %v6116_v61 = vpop.f32.mrb[64].mxu1 }
 0x1ab   : > { %v6169_v33 = vpop.f32.mrb[57].mxu0  ;;  %v6117_v0 = vpop.f32.mrb[65].mxu1 }
 0x1ac   : > { %v6170_v46 = vadd.f32 %v6169_v33, %v6168_v18  ;;  %v6171_v12 = vpop.f32.mrb[58].mxu0  ;;  %v6118_v44 = vadd.f32 %v6117_v0, %v6116_v61  ;;  %v6119_v16 = vpop.f32.mrb[66].mxu1 }
 0x1ad   : > { %v6172_v54 = vpop.f32.mrb[59].mxu0  ;;  %v6120_v63 = vpop.f32.mrb[67].mxu1 }
 0x1ae   : > { %v7844_v21 = vadd.f32 %v6170_v46, %v7663_v58  ;;  %v6173_v30 = vadd.f32 %v6172_v54, %v6171_v12  ;;  %v7850_v53 = vadd.f32 %v6118_v44, %v8119_v19  ;;  %v6121_v51 = vadd.f32 %v6120_v63, %v6119_v16 }
 0x1b0   : > { %v7847_v47 = vadd.f32 %v6173_v30, %v8118_v22  ;;  %v7853_v2 = vadd.f32 %v6121_v51, %v8120_v57  ;;  %v8126_v22 = vld [vmem:[#allocation8_spill] sm:$0xff]  ;;  %v8127_v57 = vld [vmem:[#allocation9_spill] sm:$0xff] }
 0x1b2   : > { %v6174_v20 = vpop.f32.mrb[60].mxu0  ;;  %v6122_v56 = vpop.f32.mrb[68].mxu1 }
 0x1b3   : > { %v6175_v45 = vpop.f32.mrb[61].mxu0  ;;  %v6123_v50 = vpop.f32.mrb[69].mxu1 }
 0x1b4   : > { %v6176_v39 = vadd.f32 %v6175_v45, %v6174_v20  ;;  %v6177_v58 = vpop.f32.mrb[62].mxu0  ;;  %v6124_v35 = vadd.f32 %v6123_v50, %v6122_v56  ;;  %v6125_v27 = vpop.f32.mrb[70].mxu1 }
 0x1b5   : > { %v6178_v1 = vpop.f32.mrb[63].mxu0  ;;  %v6126_v3 = vpop.f32.mrb[71].mxu1 }
 0x1b6   : > { %v7856_v60 = vadd.f32 %v6176_v39, %v8121_v28  ;;  %v6179_v24 = vadd.f32 %v6178_v1, %v6177_v58  ;;  %v7862_v5 = vadd.f32 %v6124_v35, %v8123_v6  ;;  %v6127_v4 = vadd.f32 %v6126_v3, %v6125_v27 }
 0x1b8   : > { %v7859_v14 = vadd.f32 %v6179_v24, %v8122_v55  ;;  %v7865_v37 = vadd.f32 %v6127_v4, %v8124_v36 }
 0x1ba   : > { %v6180_v10 = vpop.f32.mrb[64].mxu0  ;;  %v6128_v46 = vpop.f32.mrb[72].mxu1 }
 0x1bb   : > { %v6181_v49 = vpop.f32.mrb[65].mxu0  ;;  %v6129_v54 = vpop.f32.mrb[73].mxu1 }
 0x1bc   : > { %v6182_v42 = vadd.f32 %v6181_v49, %v6180_v10  ;;  %v6183_v13 = vpop.f32.mrb[66].mxu0  ;;  %v6130_v61 = vadd.f32 %v6129_v54, %v6128_v46  ;;  %v6131_v30 = vpop.f32.mrb[74].mxu1  ;;  %v8129_v46 = vld [vmem:[#allocation11_spill] sm:$0xff] }
 0x1bd   : > { %v6184_v7 = vpop.f32.mrb[67].mxu0  ;;  %v6132_v44 = vpop.f32.mrb[75].mxu1 }
 0x1be   : > { %v7868_v18 = vadd.f32 %v6182_v42, %v8125_v8  ;;  %v6185_v33 = vadd.f32 %v6184_v7, %v6183_v13  ;;  %v7874_v63 = vadd.f32 %v6130_v61, %v8126_v22  ;;  %v6133_v19 = vadd.f32 %v6132_v44, %v6131_v30 }
 0x1c0   : > { %v7871_v12 = vadd.f32 %v6185_v33, %v7760_v15  ;;  %v7877_v39 = vadd.f32 %v6133_v19, %v8127_v57 }
 0x1c2   : > { %v6186_v0 = vpop.f32.mrb[68].mxu0 }
 0x1c3   : > { %v6187_v16 = vpop.f32.mrb[69].mxu0 }
 0x1c4   : > { %v6188_v51 = vadd.f32 %v6187_v16, %v6186_v0  ;;  %v6189_v20 = vpop.f32.mrb[70].mxu0 }
 0x1c5   : > { %v6190_v45 = vpop.f32.mrb[71].mxu0 }
 0x1c6   : > { %v7880_v58 = vadd.f32 %v6188_v51, %v7773_v29  ;;  %v6191_v15 = vadd.f32 %v6190_v45, %v6189_v20 }
 0x1c8   : > { %v7883_v1 = vadd.f32 %v6191_v15, %v7786_v41  ;;  %v6134_v10 = vpop.f32.mrb[76].mxu1  ;;  %v8128_v41 = vld [vmem:[#allocation10_spill] sm:$0xff] }
 0x1c9   : > { %v6135_v49 = vpop.f32.mrb[77].mxu1 }
 0x1ca   : > { %v6192_v28 = vpop.f32.mrb[72].mxu0  ;;  %v6136_v29 = vadd.f32 %v6135_v49, %v6134_v10  ;;  %v6137_v6 = vpop.f32.mrb[78].mxu1 }
 0x1cb   : > { %v6193_v24 = vpop.f32.mrb[73].mxu0  ;;  %v6138_v42 = vpop.f32.mrb[79].mxu1 }
 0x1cc   : > { %v6194_v56 = vadd.f32 %v6193_v24, %v6192_v28  ;;  %v6195_v55 = vpop.f32.mrb[74].mxu0  ;;  %v7892_v13 = vadd.f32 %v6136_v29, %v8128_v41  ;;  %v6139_v36 = vadd.f32 %v6138_v42, %v6137_v6 }
 0x1cd   : > { %v6196_v50 = vpop.f32.mrb[75].mxu0 }
 0x1ce   : > { %v7886_v35 = vadd.f32 %v6194_v56, %v7801_v11  ;;  %v6197_v27 = vadd.f32 %v6196_v50, %v6195_v55  ;;  %v7895_v11 = vadd.f32 %v6139_v36, %v8129_v46 }
 0x1d0   : > { %v7889_v3 = vadd.f32 %v6197_v27, %v7804_v38 }
 0x1d1   : > { %v6268_v30 = vpop.f32.mrb[80].mxu1 }
 0x1d2   : > { %v6198_v4 = vpop.f32.mrb[76].mxu0  ;;  %v6269_v44 = vpop.f32.mrb[81].mxu1 }
 0x1d3   : > { %v6199_v7 = vpop.f32.mrb[77].mxu0  ;;  %v6270_v16 = vadd.f32 %v6269_v44, %v6268_v30  ;;  %v6271_v22 = vpop.f32.mrb[82].mxu1 }
 0x1d4   : > { %v6200_v8 = vadd.f32 %v6199_v7, %v6198_v4  ;;  %v6201_v33 = vpop.f32.mrb[78].mxu0  ;;  %v6272_v19 = vpop.f32.mrb[83].mxu1 }
 0x1d5   : > { %v6202_v54 = vpop.f32.mrb[79].mxu0  ;;  %v6273_v20 = vadd.f32 %v6272_v19, %v6271_v22  ;;  %v7904_v45 = vadd.f32 %v6270_v16, %v7824_v34 }
 0x1d6   : > { %v7898_v61 = vadd.f32 %v6200_v8, %v7808_v62  ;;  %v6203_v38 = vadd.f32 %v6202_v54, %v6201_v33 }
 0x1d7   : > { %v7907_v62 = vadd.f32 %v6273_v20, %v7827_v9 }
 0x1d8   : > { %v7901_v0 = vadd.f32 %v6203_v38, %v7811_v17 }
 0x1da   : > { %v6204_v51 = vpop.f32.mrb[80].mxu0 }
 0x1db   : > { %v6205_v57 = vpop.f32.mrb[81].mxu0 }
 0x1dc   : > { %v6206_v15 = vadd.f32 %v6205_v57, %v6204_v51  ;;  %v6207_v28 = vpop.f32.mrb[82].mxu0 }
 0x1dd   : > { %v6208_v24 = vpop.f32.mrb[83].mxu0  ;;  %v6274_v50 = vpop.f32.mrb[84].mxu1 }
 0x1de   : > { %v7910_v56 = vadd.f32 %v6206_v15, %v7814_v40  ;;  %v6209_v17 = vadd.f32 %v6208_v24, %v6207_v28  ;;  %v6275_v27 = vpop.f32.mrb[85].mxu1 }
 0x1df   : > { %v6276_v10 = vadd.f32 %v6275_v27, %v6274_v50  ;;  %v6277_v49 = vpop.f32.mrb[86].mxu1 }
 0x1e0   : > { %v7913_v55 = vadd.f32 %v6209_v17, %v7817_v23  ;;  %v6278_v29 = vpop.f32.mrb[87].mxu1 }
 0x1e1   : > { %v6279_v4 = vadd.f32 %v6278_v29, %v6277_v49  ;;  %v7916_v42 = vadd.f32 %v6276_v10, %v7834_v32 }
 0x1e2   : > { %v6210_v34 = vpop.f32.mrb[84].mxu0 }
 0x1e3   : > { %v6211_v6 = vpop.f32.mrb[85].mxu0  ;;  %v7919_v40 = vadd.f32 %v6279_v4, %v7837_v31 }
 0x1e4   : > { %v6212_v9 = vadd.f32 %v6211_v6, %v6210_v34  ;;  %v6213_v41 = vpop.f32.mrb[86].mxu0 }
 0x1e5   : > { %v6214_v7 = vpop.f32.mrb[87].mxu0 }
 0x1e6   : > { %v7922_v23 = vadd.f32 %v6212_v9, %v7819_v43  ;;  %v6215_v36 = vadd.f32 %v6214_v7, %v6213_v41  ;;  %v6280_v33 = vpop.f32.mrb[88].mxu1 }
 0x1e7   : > { %v6281_v46 = vpop.f32.mrb[89].mxu1 }
 0x1e8   : > { %v7925_v8 = vadd.f32 %v6215_v36, %v7821_v48  ;;  %v6282_v54 = vadd.f32 %v6281_v46, %v6280_v33  ;;  %v6283_v38 = vpop.f32.mrb[90].mxu1 }
 0x1e9   : > { %v6284_v32 = vpop.f32.mrb[91].mxu1 }
 0x1ea   : > { %v6216_v30 = vpop.f32.mrb[88].mxu0  ;;  %v6285_v16 = vadd.f32 %v6284_v32, %v6283_v38  ;;  %v7928_v22 = vadd.f32 %v6282_v54, %v7844_v21 }
 0x1eb   : > { %v6217_v44 = vpop.f32.mrb[89].mxu0 }
 0x1ec   : > { %v6218_v31 = vadd.f32 %v6217_v44, %v6216_v30  ;;  %v6219_v19 = vpop.f32.mrb[90].mxu0  ;;  %v7931_v43 = vadd.f32 %v6285_v16, %v7847_v47 }
 0x1ed   : > { %v6220_v51 = vpop.f32.mrb[91].mxu0 }
 0x1ee   : > { %v7934_v48 = vadd.f32 %v6218_v31, %v7829_v25  ;;  %v6221_v20 = vadd.f32 %v6220_v51, %v6219_v19 }
 0x1f0   : > { %v7937_v57 = vadd.f32 %v6221_v20, %v7831_v26 }
 0x1f1   : > { %v6286_v15 = vpop.f32.mrb[92].mxu1 }
 0x1f2   : > { %v6287_v28 = vpop.f32.mrb[93].mxu1 }
 0x1f3   : > { %v6288_v24 = vadd.f32 %v6287_v28, %v6286_v15  ;;  %v6289_v17 = vpop.f32.mrb[94].mxu1  ;;  %v6222_v50 = vpop.f32.mrb[92].mxu0 }
 0x1f4   : > { %v6290_v21 = vpop.f32.mrb[95].mxu1  ;;  %v6223_v27 = vpop.f32.mrb[93].mxu0 }
 0x1f5   : > { %v6291_v10 = vadd.f32 %v6290_v21, %v6289_v17  ;;  %v7940_v49 = vadd.f32 %v6288_v24, %v7856_v60  ;;  %v6224_v47 = vadd.f32 %v6223_v27, %v6222_v50  ;;  %v6225_v34 = vpop.f32.mrb[94].mxu0 }
 0x1f6   : > { %v6226_v29 = vpop.f32.mrb[95].mxu0 }
 0x1f7   : > { %v7943_v25 = vadd.f32 %v6291_v10, %v7859_v14  ;;  %v7946_v26 = vadd.f32 %v6224_v47, %v7839_v59  ;;  %v6227_v6 = vadd.f32 %v6226_v29, %v6225_v34 }
 0x1f9   : > { %v7949_v4 = vadd.f32 %v6227_v6, %v7841_v52 }
 0x1fb   : > { %v6292_v9 = vpop.f32.mrb[96].mxu1 }
 0x1fc   : > { %v6293_v41 = vpop.f32.mrb[97].mxu1 }
 0x1fd   : > { %v6294_v36 = vadd.f32 %v6293_v41, %v6292_v9  ;;  %v6295_v33 = vpop.f32.mrb[98].mxu1 }
 0x1fe   : > { %v6228_v7 = vpop.f32.mrb[96].mxu0  ;;  %v6296_v46 = vpop.f32.mrb[99].mxu1 }
 0x1ff   : > { %v6229_v60 = vpop.f32.mrb[97].mxu0  ;;  %v6297_v30 = vadd.f32 %v6296_v46, %v6295_v33  ;;  %v7952_v14 = vadd.f32 %v6294_v36, %v7868_v18 }
 0x200   : > { %v6230_v54 = vadd.f32 %v6229_v60, %v6228_v7  ;;  %v6231_v38 = vpop.f32.mrb[98].mxu0 }
 0x201   : > { %v6232_v32 = vpop.f32.mrb[99].mxu0  ;;  %v7958_v52 = vadd.f32 %v6297_v30, %v7871_v12 }
 0x202   : > { %v7955_v59 = vadd.f32 %v6230_v54, %v7850_v53  ;;  %v6233_v44 = vadd.f32 %v6232_v32, %v6231_v38 }
 0x204   : > { %v7961_v16 = vadd.f32 %v6233_v44, %v7853_v2 }
 0x205   : > { %v6298_v31 = vpop.f32.mrb[100].mxu1 }
 0x206   : > { %v6299_v19 = vpop.f32.mrb[101].mxu1 }
 0x207   : > { %v6300_v51 = vadd.f32 %v6299_v19, %v6298_v31  ;;  %v6301_v20 = vpop.f32.mrb[102].mxu1 }
 0x208   : > { %v6234_v15 = vpop.f32.mrb[100].mxu0  ;;  %v6302_v28 = vpop.f32.mrb[103].mxu1 }
 0x209   : > { %v6235_v24 = vpop.f32.mrb[101].mxu0  ;;  %v6303_v18 = vadd.f32 %v6302_v28, %v6301_v20  ;;  %v7964_v17 = vadd.f32 %v6300_v51, %v7880_v58 }
 0x20a   : > { %v6236_v53 = vadd.f32 %v6235_v24, %v6234_v15  ;;  %v6237_v50 = vpop.f32.mrb[102].mxu0 }
 0x20b   : > { %v6238_v21 = vpop.f32.mrb[103].mxu0  ;;  %v7967_v12 = vadd.f32 %v6303_v18, %v7883_v1 }
 0x20c   : > { %v7970_v2 = vadd.f32 %v6236_v53, %v7862_v5  ;;  %v6239_v27 = vadd.f32 %v6238_v21, %v6237_v50 }
 0x20e   : > { %v7973_v10 = vadd.f32 %v6239_v27, %v7865_v37 }
 0x210   : > { %v6304_v47 = vpop.f32.mrb[104].mxu1 }
 0x211   : > { %v6305_v34 = vpop.f32.mrb[105].mxu1 }
 0x212   : > { %v6306_v6 = vadd.f32 %v6305_v34, %v6304_v47  ;;  %v6307_v9 = vpop.f32.mrb[106].mxu1 }
 0x213   : > { %v6240_v29 = vpop.f32.mrb[104].mxu0  ;;  %v6308_v41 = vpop.f32.mrb[107].mxu1 }
 0x214   : > { %v6241_v58 = vpop.f32.mrb[105].mxu0  ;;  %v6309_v33 = vadd.f32 %v6308_v41, %v6307_v9  ;;  %v7976_v1 = vadd.f32 %v6306_v6, %v7886_v35 }
 0x215   : > { %v6242_v7 = vadd.f32 %v6241_v58, %v6240_v29  ;;  %v6243_v36 = vpop.f32.mrb[106].mxu0 }
 0x216   : > { %v6244_v60 = vpop.f32.mrb[107].mxu0  ;;  %v7982_v37 = vadd.f32 %v6309_v33, %v7889_v3 }
 0x217   : > { %v7979_v5 = vadd.f32 %v6242_v7, %v7874_v63  ;;  %v6245_v46 = vadd.f32 %v6244_v60, %v6243_v36 }
 0x219   : > { %v7985_v54 = vadd.f32 %v6245_v46, %v7877_v39 }
 0x21b   : > { %v6310_v38 = vpop.f32.mrb[108].mxu1 }
 0x21c   : > { %v6311_v30 = vpop.f32.mrb[109].mxu1 }
 0x21d   : > { %v6246_v32 = vpop.f32.mrb[108].mxu0  ;;  %v6312_v44 = vadd.f32 %v6311_v30, %v6310_v38  ;;  %v6313_v31 = vpop.f32.mrb[110].mxu1 }
 0x21e   : > { %v6247_v19 = vpop.f32.mrb[109].mxu0  ;;  %v6314_v51 = vpop.f32.mrb[111].mxu1 }
 0x21f   : > { %v6248_v35 = vadd.f32 %v6247_v19, %v6246_v32  ;;  %v6249_v20 = vpop.f32.mrb[110].mxu0  ;;  %v6315_v15 = vadd.f32 %v6314_v51, %v6313_v31  ;;  %v7988_v63 = vadd.f32 %v6312_v44, %v7898_v61 }
 0x220   : > { %v6250_v28 = vpop.f32.mrb[111].mxu0 }
 0x221   : > { %v7991_v3 = vadd.f32 %v6248_v35, %v7892_v13  ;;  %v6251_v39 = vadd.f32 %v6250_v28, %v6249_v20  ;;  %v7994_v24 = vadd.f32 %v6315_v15, %v7901_v0 }
 0x223   : > { %v7997_v18 = vadd.f32 %v6251_v39, %v7895_v11 }
 0x225   : > { %v6316_v53 = vpop.f32.mrb[112].mxu1  ;;  %v6406_v50 = vpop.f32.mrb[112].mxu0 }
 0x226   : > { %v4989_v21 = vadd.f32 %v6406_v50, %v7916_v42  ;;  %v6317_v27 = vpop.f32.mrb[113].mxu1  ;;  %v4980_v47 = vpop.f32.mrb[113].mxu0 }
 0x227   : > { %v6318_v61 = vadd.f32 %v6317_v27, %v6316_v53  ;;  %v4981_v34 = vadd.f32 %v4980_v47, %v7904_v45  ;;  %v6319_v29 = vpop.f32.mrb[114].mxu1  ;;  %v6407_v13 = vpop.f32.mrb[114].mxu0 }
 0x228   : > { %v4992_v6 = vadd.f32 %v6407_v13, %v7919_v40  ;;  %v6320_v9 = vpop.f32.mrb[115].mxu1  ;;  %v4983_v58 = vpop.f32.mrb[115].mxu0  ;;  %v5307_v60 = vmul.f32 %v4989_v21, %v4989_v21 }
 0x229   : > { %v6321_v11 = vadd.f32 %v6320_v9, %v6319_v29  ;;  %v4984_v0 = vadd.f32 %v4983_v58, %v7907_v62  ;;  %v8011_v42 = vadd.f32 %v6318_v61, %v7910_v56  ;;  %v5305_v45 = vmul.f32 %v4981_v34, %v4981_v34 }
 0x22a   : > { %v5829_v41 = vpack.c.bf16 %v4992_v6, %v4989_v21  ;;  %v5308_v44 = vmul.f32 %v4992_v6, %v4992_v6 }
 0x22b   : > { %v5824_v7 = vpack.c.bf16 %v4984_v0, %v4981_v34  ;;  %v5267_v40 = vadd.f32 %v4984_v0, %v4981_v34  ;;  %v5306_v36 = vmul.f32 %v4984_v0, %v4984_v0  ;;  %v8014_v33 = vadd.f32 %v6321_v11, %v7913_v55 }
 0x22c   : > { %5901 = vst [vmem:[%s8007_s8 + $0x8] sm:$0xff] %v5829_v41  }
 0x22d   : > { %5825 = vst [vmem:[%s8007_s8] sm:$0xff] %v5824_v7   ;;  %v5268_v46 = vadd.f32 %v5267_v40, %v4989_v21  ;;  %v5337_v38 = vadd.f32 %v5306_v36, %v5305_v45  ;;  %v6322_v30 = vpop.f32.mrb[116].mxu1  ;;  %v6410_v32 = vpop.f32.mrb[116].mxu0 }
 0x22e   : > { %v5005_v62 = vadd.f32 %v6410_v32, %v7940_v49  ;;  %v6323_v56 = vpop.f32.mrb[117].mxu1  ;;  %v4996_v31 = vpop.f32.mrb[117].mxu0 }
 0x22f   : > { %v5338_v19 = vadd.f32 %v5337_v38, %v5307_v60  ;;  %v6324_v51 = vadd.f32 %v6323_v56, %v6322_v30  ;;  %v4997_v35 = vadd.f32 %v4996_v31, %v7928_v22  ;;  %v5269_v20 = vadd.f32 %v5268_v46, %v4992_v6  ;;  %v6325_v55 = vpop.f32.mrb[118].mxu1  ;;  %v6411_v15 = vpop.f32.mrb[118].mxu0 }
 0x230   : > { %v5008_v28 = vadd.f32 %v6411_v15, %v7943_v25  ;;  %v6326_v39 = vpop.f32.mrb[119].mxu1  ;;  %v4999_v53 = vpop.f32.mrb[119].mxu0  ;;  %v5311_v58 = vmul.f32 %v5005_v62, %v5005_v62 }
 0x231   : > { %v5270_v50 = vadd.f32 %v5269_v20, %v4997_v35  ;;  %v5309_v21 = vmul.f32 %v4997_v35, %v4997_v35  ;;  %v5339_v27 = vadd.f32 %v5338_v19, %v5308_v44  ;;  %v6327_v47 = vadd.f32 %v6326_v39, %v6325_v55 }
 0x232   : > { %v5839_v49 = vpack.c.bf16 %v5008_v28, %v5005_v62  ;;  %v5000_v61 = vadd.f32 %v4999_v53, %v7931_v43  ;;  %v8023_v34 = vadd.f32 %v6324_v51, %v7922_v23  ;;  %v5312_v40 = vmul.f32 %v5008_v28, %v5008_v28 }
 0x233   : > { %v5340_v22 = vadd.f32 %v5339_v27, %v5309_v21  ;;  %v8026_v29 = vadd.f32 %v6327_v47, %v7925_v8 }
 0x234   : > { %5903 = vst [vmem:[%s8007_s8 + $0x18] sm:$0xff] %v5839_v49   ;;  %v5834_v13 = vpack.c.bf16 %v5000_v61, %v4997_v35  ;;  %v5271_v25 = vadd.f32 %v5270_v50, %v5000_v61  ;;  %v5310_v6 = vmul.f32 %v5000_v61, %v5000_v61 }
 0x235   : > { %v6414_v9 = vpop.f32.mrb[120].mxu0 }
 0x236   : > { %5902 = vst [vmem:[%s8007_s8 + $0x10] sm:$0xff] %v5834_v13   ;;  %v5272_v11 = vadd.f32 %v5271_v25, %v5005_v62  ;;  %v5341_v0 = vadd.f32 %v5340_v22, %v5310_v6  ;;  %v5021_v45 = vadd.f32 %v6414_v9, %v7964_v17  ;;  %v5012_v41 = vpop.f32.mrb[121].mxu0 }
 0x237   : > { %v6328_v43 = vpop.f32.mrb[120].mxu1  ;;  %v5013_v23 = vadd.f32 %v5012_v41, %v7952_v14  ;;  %v6415_v7 = vpop.f32.mrb[122].mxu0 }
 0x238   : > { %v5342_v36 = vadd.f32 %v5341_v0, %v5311_v58  ;;  %v6329_v8 = vpop.f32.mrb[121].mxu1  ;;  %v5273_v60 = vadd.f32 %v5272_v11, %v5008_v28  ;;  %v5024_v46 = vadd.f32 %v6415_v7, %v7967_v12  ;;  %v5015_v38 = vpop.f32.mrb[123].mxu0  ;;  %v5315_v28 = vmul.f32 %v5021_v45, %v5021_v45 }
 0x239   : > { %v6330_v30 = vadd.f32 %v6329_v8, %v6328_v43  ;;  %v5313_v32 = vmul.f32 %v5013_v23, %v5013_v23  ;;  %v6331_v44 = vpop.f32.mrb[122].mxu1  ;;  %v5016_v62 = vadd.f32 %v5015_v38, %v7958_v52 }
 0x23a   : > { %v5274_v17 = vadd.f32 %v5273_v60, %v5013_v23  ;;  %v5343_v56 = vadd.f32 %v5342_v36, %v5312_v40  ;;  %v5849_v31 = vpack.c.bf16 %v5024_v46, %v5021_v45  ;;  %v6332_v19 = vpop.f32.mrb[123].mxu1  ;;  %v5316_v27 = vmul.f32 %v5024_v46, %v5024_v46 }
 0x23b   : > { %v6333_v14 = vadd.f32 %v6332_v19, %v6331_v44  ;;  %v5844_v51 = vpack.c.bf16 %v5016_v62, %v5013_v23  ;;  %v5314_v35 = vmul.f32 %v5016_v62, %v5016_v62  ;;  %v8035_v20 = vadd.f32 %v6330_v30, %v7934_v48 }
 0x23c   : > { %v5344_v55 = vadd.f32 %v5343_v56, %v5313_v32  ;;  %5905 = vst [vmem:[%s8007_s8 + $0x28] sm:$0xff] %v5849_v31   ;;  %v5275_v12 = vadd.f32 %v5274_v17, %v5016_v62 }
 0x23d   : > { %5904 = vst [vmem:[%s8007_s8 + $0x20] sm:$0xff] %v5844_v51   ;;  %v8040_v15 = vadd.f32 %v6333_v14, %v7937_v57 }
 0x23e   : > { %v5276_v39 = vadd.f32 %v5275_v12, %v5021_v45  ;;  %v5345_v52 = vadd.f32 %v5344_v55, %v5314_v35 }
 0x23f   : > { %v6418_v53 = vpop.f32.mrb[124].mxu0 }
 0x240   : > { %v5037_v50 = vadd.f32 %v6418_v53, %v7988_v63  ;;  %v5028_v21 = vpop.f32.mrb[125].mxu0  ;;  %v5346_v47 = vadd.f32 %v5345_v52, %v5315_v28  ;;  %v6334_v49 = vpop.f32.mrb[124].mxu1  ;;  %v5277_v61 = vadd.f32 %v5276_v39, %v5024_v46 }
 0x241   : > { %v5029_v48 = vadd.f32 %v5028_v21, %v7976_v1  ;;  %v6419_v22 = vpop.f32.mrb[126].mxu0  ;;  %v6335_v13 = vpop.f32.mrb[125].mxu1 }
 0x242   : > { %v5040_v25 = vadd.f32 %v6419_v22, %v7994_v24  ;;  %v5031_v57 = vpop.f32.mrb[127].mxu0  ;;  %v6336_v6 = vadd.f32 %v6335_v13, %v6334_v49  ;;  %v5347_v11 = vadd.f32 %v5346_v47, %v5316_v27  ;;  %v6337_v0 = vpop.f32.mrb[126].mxu1  ;;  %v5319_v8 = vmul.f32 %v5037_v50, %v5037_v50 }
 0x243   : > { %v5278_v9 = vadd.f32 %v5277_v61, %v5029_v48  ;;  %v5317_v58 = vmul.f32 %v5029_v48, %v5029_v48  ;;  %v6338_v45 = vpop.f32.mrb[127].mxu1  ;;  %v5032_v41 = vadd.f32 %v5031_v57, %v7982_v37 }
 0x244   : > { %v5859_v63 = vpack.c.bf16 %v5040_v25, %v5037_v50  ;;  %v6339_v23 = vadd.f32 %v6338_v45, %v6337_v0  ;;  %v4908_v1 = vadd.f32 %v6336_v6, %v7946_v26  ;;  %v5320_v44 = vmul.f32 %v5040_v25, %v5040_v25 }
 0x245   : > { %v5348_v43 = vadd.f32 %v5347_v11, %v5317_v58  ;;  %v5854_v7 = vpack.c.bf16 %v5032_v41, %v5029_v48  ;;  %v5279_v40 = vadd.f32 %v5278_v9, %v5032_v41  ;;  %v5318_v36 = vmul.f32 %v5032_v41, %v5032_v41 }
 0x246   : > { %5907 = vst [vmem:[%s8007_s8 + $0x38] sm:$0xff] %v5859_v63   ;;  %v4911_v24 = vadd.f32 %v6339_v23, %v7949_v4 }
 0x247   : > { %5906 = vst [vmem:[%s8007_s8 + $0x30] sm:$0xff] %v5854_v7   ;;  %v5280_v60 = vadd.f32 %v5279_v40, %v5037_v50  ;;  %v5349_v46 = vadd.f32 %v5348_v43, %v5318_v36 }
 0x248   : > { %v6422_v38 = vpop.f32.mrb[128].mxu0 }
 0x249   : > { %v5053_v30 = vadd.f32 %v6422_v38, %v8023_v34  ;;  %v5044_v32 = vpop.f32.mrb[129].mxu0  ;;  %v5350_v37 = vadd.f32 %v5349_v46, %v5319_v8  ;;  %v5281_v26 = vadd.f32 %v5280_v60, %v5040_v25 }
 0x24a   : > { %v6340_v62 = vpop.f32.mrb[128].mxu1  ;;  %v5045_v17 = vadd.f32 %v5044_v32, %v8011_v42  ;;  %v6423_v56 = vpop.f32.mrb[130].mxu0 }
 0x24b   : > { %v6341_v31 = vpop.f32.mrb[129].mxu1  ;;  %v5056_v19 = vadd.f32 %v6423_v56, %v8026_v29  ;;  %v5047_v4 = vpop.f32.mrb[131].mxu0  ;;  %v5351_v55 = vadd.f32 %v5350_v37, %v5320_v44  ;;  %v5323_v47 = vmul.f32 %v5053_v30, %v5053_v30 }
 0x24c   : > { %v6342_v14 = vadd.f32 %v6341_v31, %v6340_v62  ;;  %v5282_v51 = vadd.f32 %v5281_v26, %v5045_v17  ;;  %v5321_v35 = vmul.f32 %v5045_v17, %v5045_v17  ;;  %v6343_v12 = vpop.f32.mrb[130].mxu1  ;;  %v5048_v39 = vadd.f32 %v5047_v4, %v8014_v33 }
 0x24d   : > { %v5869_v34 = vpack.c.bf16 %v5056_v19, %v5053_v30  ;;  %v6344_v28 = vpop.f32.mrb[131].mxu1  ;;  %v5324_v61 = vmul.f32 %v5056_v19, %v5056_v19 }
 0x24e   : > { %v5352_v52 = vadd.f32 %v5351_v55, %v5321_v35  ;;  %v6345_v53 = vadd.f32 %v6344_v28, %v6343_v12  ;;  %v4916_v42 = vadd.f32 %v6342_v14, %v7955_v59  ;;  %v5864_v50 = vpack.c.bf16 %v5048_v39, %v5045_v17 }
 0x24f   : > { %5909 = vst [vmem:[%s8007_s8 + $0x48] sm:$0xff] %v5869_v34   ;;  %v5283_v21 = vadd.f32 %v5282_v51, %v5048_v39  ;;  %v5322_v27 = vmul.f32 %v5048_v39, %v5048_v39 }
 0x250   : > { %v4919_v29 = vadd.f32 %v6345_v53, %v7961_v16  ;;  %5908 = vst [vmem:[%s8007_s8 + $0x40] sm:$0xff] %v5864_v50  }
 0x251   : > { %v5284_v49 = vadd.f32 %v5283_v21, %v5053_v30  ;;  %v5353_v48 = vadd.f32 %v5352_v52, %v5322_v27 }
 0x252   : > { %v6426_v25 = vpop.f32.mrb[132].mxu0 }
 0x253   : > { %v5354_v22 = vadd.f32 %v5353_v48, %v5323_v47  ;;  %v6346_v13 = vpop.f32.mrb[132].mxu1  ;;  %v5285_v57 = vadd.f32 %v5284_v49, %v5056_v19  ;;  %v5069_v33 = vadd.f32 %v6426_v25, %v4908_v1  ;;  %v5060_v9 = vpop.f32.mrb[133].mxu0 }
 0x254   : > { %v6347_v6 = vpop.f32.mrb[133].mxu1  ;;  %v5061_v59 = vadd.f32 %v5060_v9, %v8035_v20  ;;  %v6427_v63 = vpop.f32.mrb[134].mxu0 }
 0x255   : > { %v6348_v58 = vadd.f32 %v6347_v6, %v6346_v13  ;;  %v5355_v11 = vadd.f32 %v5354_v22, %v5324_v61  ;;  %v6349_v0 = vpop.f32.mrb[134].mxu1  ;;  %v5072_v16 = vadd.f32 %v6427_v63, %v4911_v24  ;;  %v5063_v41 = vpop.f32.mrb[135].mxu0  ;;  %v5327_v30 = vmul.f32 %v5069_v33, %v5069_v33 }
 0x256   : > { %v6350_v45 = vpop.f32.mrb[135].mxu1  ;;  %v5286_v43 = vadd.f32 %v5285_v57, %v5061_v59  ;;  %v5325_v23 = vmul.f32 %v5061_v59, %v5061_v59  ;;  %v5064_v40 = vadd.f32 %v5063_v41, %v8040_v15 }
 0x257   : > { %v6351_v7 = vadd.f32 %v6350_v45, %v6349_v0  ;;  %v5879_v36 = vpack.c.bf16 %v5072_v16, %v5069_v33  ;;  %v4924_v1 = vadd.f32 %v6348_v58, %v7970_v2  ;;  %v5328_v17 = vmul.f32 %v5072_v16, %v5072_v16 }
 0x258   : > { %v5356_v8 = vadd.f32 %v5355_v11, %v5325_v23  ;;  %v5874_v60 = vpack.c.bf16 %v5064_v40, %v5061_v59  ;;  %v5287_v46 = vadd.f32 %v5286_v43, %v5064_v40  ;;  %v5326_v20 = vmul.f32 %v5064_v40, %v5064_v40 }
 0x259   : > { %5911 = vst [vmem:[%s8007_s8 + $0x58] sm:$0xff] %v5879_v36   ;;  %v4927_v38 = vadd.f32 %v6351_v7, %v7973_v10 }
 0x25a   : > { %5910 = vst [vmem:[%s8007_s8 + $0x50] sm:$0xff] %v5874_v60   ;;  %v5288_v24 = vadd.f32 %v5287_v46, %v5069_v33  ;;  %v5357_v32 = vadd.f32 %v5356_v8, %v5326_v20  ;;  %v6430_v44 = vpop.f32.mrb[136].mxu0 }
 0x25b   : > { %v5085_v37 = vadd.f32 %v6430_v44, %v4924_v1  ;;  %v5076_v62 = vpop.f32.mrb[137].mxu0 }
 0x25c   : > { %v5358_v26 = vadd.f32 %v5357_v32, %v5327_v30  ;;  %v6352_v15 = vpop.f32.mrb[136].mxu1  ;;  %v5077_v56 = vadd.f32 %v5076_v62, %v4916_v42  ;;  %v5289_v31 = vadd.f32 %v5288_v24, %v5072_v16  ;;  %v6431_v2 = vpop.f32.mrb[138].mxu0 }
 0x25d   : > { %v6353_v19 = vpop.f32.mrb[137].mxu1  ;;  %v5088_v4 = vadd.f32 %v6431_v2, %v4927_v38  ;;  %v5079_v14 = vpop.f32.mrb[139].mxu0  ;;  %v5331_v49 = vmul.f32 %v5085_v37, %v5085_v37 }
 0x25e   : > { %v6354_v51 = vadd.f32 %v6353_v19, %v6352_v15  ;;  %v5290_v35 = vadd.f32 %v5289_v31, %v5077_v56  ;;  %v5329_v10 = vmul.f32 %v5077_v56, %v5077_v56  ;;  %v5359_v55 = vadd.f32 %v5358_v26, %v5328_v17  ;;  %v6355_v12 = vpop.f32.mrb[138].mxu1 }
 0x25f   : > { %v5889_v34 = vpack.c.bf16 %v5088_v4, %v5085_v37  ;;  %v6356_v28 = vpop.f32.mrb[139].mxu1  ;;  %v5080_v39 = vadd.f32 %v5079_v14, %v4919_v29  ;;  %v5332_v57 = vmul.f32 %v5088_v4, %v5088_v4 }
 0x260   : > { %v5360_v52 = vadd.f32 %v5359_v55, %v5329_v10  ;;  %v6357_v53 = vadd.f32 %v6356_v28, %v6355_v12  ;;  %v4932_v50 = vadd.f32 %v6354_v51, %v7979_v5 }
 0x261   : > { %5913 = vst [vmem:[%s8007_s8 + $0x68] sm:$0xff] %v5889_v34   ;;  %v5884_v42 = vpack.c.bf16 %v5080_v39, %v5077_v56  ;;  %v5291_v21 = vadd.f32 %v5290_v35, %v5080_v39  ;;  %v5330_v27 = vmul.f32 %v5080_v39, %v5080_v39 }
 0x262   : > { %v4935_v47 = vadd.f32 %v6357_v53, %v7985_v54 }
 0x263   : > { %5912 = vst [vmem:[%s8007_s8 + $0x60] sm:$0xff] %v5884_v42   ;;  %v5292_v48 = vadd.f32 %v5291_v21, %v5085_v37  ;;  %v5361_v61 = vadd.f32 %v5360_v52, %v5330_v27 }
 0x264   : > { %v6434_v22 = vpop.f32.mrb[140].mxu0 }
 0x265   : > { %v6358_v13 = vpop.f32.mrb[140].mxu1  ;;  %v5092_v25 = vpop.f32.mrb[141].mxu0  ;;  %v5362_v33 = vadd.f32 %v5361_v61, %v5331_v49  ;;  %v5293_v9 = vadd.f32 %v5292_v48, %v5088_v4 }
 0x266   : > { %v6359_v29 = vpop.f32.mrb[141].mxu1  ;;  %v5093_v6 = vadd.f32 %v5092_v25, %v4932_v50  ;;  %v6435_v58 = vpop.f32.mrb[142].mxu0 }
 0x267   : > { %v6360_v5 = vadd.f32 %v6359_v29, %v6358_v13  ;;  %v6361_v59 = vpop.f32.mrb[142].mxu1  ;;  %v5095_v11 = vpop.f32.mrb[143].mxu0  ;;  %v5363_v54 = vadd.f32 %v5362_v33, %v5332_v57 }
 0x268   : > { %v5294_v0 = vadd.f32 %v5293_v9, %v5093_v6  ;;  %v5333_v63 = vmul.f32 %v5093_v6, %v5093_v6  ;;  %v6362_v16 = vpop.f32.mrb[143].mxu1  ;;  %v5096_v45 = vadd.f32 %v5095_v11, %v4935_v47 }
 0x269   : > { %v4940_v41 = vadd.f32 %v6360_v5, %v7991_v3  ;;  %v6363_v43 = vadd.f32 %v6362_v16, %v6361_v59 }
 0x26a   : > { %v5364_v23 = vadd.f32 %v5363_v54, %v5333_v63  ;;  %v5894_v7 = vpack.c.bf16 %v5096_v45, %v5093_v6  ;;  %v5295_v40 = vadd.f32 %v5294_v0, %v5096_v45  ;;  %v5334_v36 = vmul.f32 %v5096_v45, %v5096_v45 }
 0x26b   : > { %v5101_v1 = vadd.f32 %v6434_v22, %v4940_v41  ;;  %v4943_v8 = vadd.f32 %v6363_v43, %v7997_v18 }
 0x26c   : > { %5914 = vst [vmem:[%s8007_s8 + $0x70] sm:$0xff] %v5894_v7   ;;  %v5365_v60 = vadd.f32 %v5364_v23, %v5334_v36 }
 0x26d   : > { %v5335_v46 = vmul.f32 %v5101_v1, %v5101_v1  ;;  %v5104_v20 = vadd.f32 %v6435_v58, %v4943_v8  ;;  %v5296_v38 = vadd.f32 %v5295_v40, %v5101_v1 }
 0x26f   : > { %v5899_v30 = vpack.c.bf16 %v5104_v20, %v5101_v1  ;;  %v5336_v24 = vmul.f32 %v5104_v20, %v5104_v20  ;;  %v5297_v32 = vadd.f32 %v5296_v38, %v5104_v20  ;;  %v5366_v3 = vadd.f32 %v5365_v60, %v5335_v46 }
 0x271   : > { %5915 = vst [vmem:[%s8007_s8 + $0x78] sm:$0xff] %v5899_v30   ;;  %v5298_v44 = vrot.slane %v5297_v32, 4  ;;  %v5367_v37 = vadd.f32 %v5366_v3, %v5336_v24 }
 0x273   : > { %v5299_v62 = vadd.f32 %v5298_v44, %v5297_v32  ;;  %v5368_v17 = vrot.slane %v5367_v37, 4 }
 0x275   : > { %v5300_v26 = vrot.slane %v5299_v62, 2  ;;  %v5369_v15 = vadd.f32 %v5368_v17, %v5367_v37 }
 0x277   : > { %v5301_v56 = vadd.f32 %v5300_v26, %v5299_v62  ;;  %v5370_v18 = vrot.slane %v5369_v15, 2 }
 0x279   : > { %v5302_v31 = vrot.slane %v5301_v56, 1  ;;  %v5371_v2 = vadd.f32 %v5370_v18, %v5369_v15 }
 0x27b   : > { %v5303_v19 = vadd.f32 %v5302_v31, %v5301_v56  ;;  %v5372_v4 = vrot.slane %v5371_v2, 1 }
 0x27d   : > { %5304 = vst [vmem:[%s211_s11] sm:$0x1] %v5303_v19  ;;  %v5373_v14 = vadd.f32 %v5372_v4, %v5371_v2 }
 0x27f   : > { %5374 = vst [vmem:[%s214_s14] sm:$0x1] %v5373_v14 }
 0x280 PF: > { %s15_s15 = sadd.s32 1, %s6588_s15  }
 0x281   : > { %p12_p4 = scmp.ge.s32.totalorder %s15_s15, 4  }
 0x283   :  { %14 = sbr.rel (!%p12_p4) target bundleno = 1 (0x1), region = 84 }

</bundles_post_ra>
